<compile_context>
chip_gen: v7x
topology: tpu7x:2x2x1
jax: 0.10.0
libtpu: 0.0.40
codegen_flags: <defaults>
</compile_context>

<pallas_src>
import jax
import jax.numpy as jnp
from jax.experimental import pallas as pl
from jax.experimental.pallas import tpu as pltpu  # noqa: F401  (TPU backend)

# ---------------- problem sizes ---------------------------------------------
N, C, H, W = 2, 4, 16, 16          # input x: [N, C, H, W]
KH = KW = 3                        # 3x3 conv, padding=1 ('same')
FDIM = 32                          # backbone.out_features
NUM_CLASSES = 5                    # classifier width
MAX_NORM = 0.25                    # LinearWithConstraint max_norm
HW = H * W

# padded / lane-dense sizes
HP, WP = H + 2, W + 2              # spatially padded image
NP = N * HP * WP                   # padded row space, one row per (n, hp, wp) = 648
PAD = 20                           # extra zero rows so every tap slice is in-bounds
ROWS = NP + 2 * PAD                # 688 (multiple of 8)
FP = 128                           # FDIM zero-padded to a full lane tile
CP = 128                           # classes zero-padded to a full lane tile


def simplenet_kernel(x_ref, wtap_ref, bconv_ref, pool_ref, wcls_ref, bcls_ref,
                     y_ref):
    """Fused conv3x3 (+bias, ReLU) -> GAP -> renorm-Linear classifier.

    x_ref    : [ROWS, C]      f32   spatially padded input, rows = (n, hp, wp)
    wtap_ref : [KH*KW, C, FP] bf16  conv weight, one [C, FP] block per tap
    bconv_ref: [1, FP]        f32   conv bias (lane-padded)
    pool_ref : [N, NP]        f32   GAP matrix (1/HW at interior rows of image n)
    wcls_ref : [FP, CP]       f32   classifier weight, pre-transposed + padded
    bcls_ref : [1, CP]        f32   classifier bias (lane-padded)
    y_ref    : [N, CP]        f32   lane-padded logits
    """
    # ---- conv as 9 accumulated shifted matmuls (bf16 MXU in, f32 acc) ------
    acc = jnp.zeros((NP, FP), dtype=jnp.float32)
    for kh in range(KH):
        for kw in range(KW):
            start = PAD + (kh - 1) * WP + (kw - 1)            # static int
            slab = x_ref[start:start + NP, :].astype(jnp.bfloat16)   # [NP, C]
            acc = acc + jnp.dot(slab, wtap_ref[kh * KW + kw],
                                preferred_element_type=jnp.float32)
    conv = jnp.maximum(acc + bconv_ref[...], 0.0)             # bias + ReLU (f32 VPU)

    # ---- global average pool as a pooling-matrix matmul (no reshape) -------
    feat = jnp.dot(pool_ref[...], conv,
                   preferred_element_type=jnp.float32)        # [N, FP]

    # ---- LinearWithConstraint: torch.renorm(w, p=2, dim=0, maxnorm) --------
    # Weight is pre-transposed, so per-class norms are column (sublane) norms.
    wc = wcls_ref[...]                                        # [FP, CP]
    sq = jnp.sum(wc * wc, axis=0, keepdims=True)              # [1, CP]
    # NOTE: torch's renorm divides by (norm + 1e-7); the rsqrt form below
    # differs by <= ~1e-7 relative and keeps the op on the EUP slot.
    scale = jnp.where(sq > MAX_NORM * MAX_NORM,
                      MAX_NORM * jax.lax.rsqrt(sq),
                      jnp.ones_like(sq))

    # ---- classifier: y = f @ W_renormed + b (lane-dense [N, 128] store) ----
    y = jnp.dot(feat, wc * scale, preferred_element_type=jnp.float32)  # [N, CP]
    y_ref[...] = y + bcls_ref[...]


def simplenet_forward(x, w_conv, b_conv, w_cls, b_cls):
    """x: [N,C,H,W], w_conv: [FDIM,C,KH,KW], b_conv: [FDIM],
       w_cls: [NUM_CLASSES,FDIM], b_cls: [NUM_CLASSES] -> logits [N,NUM_CLASSES]."""
    f32 = jnp.float32

    # spatially padded, channels-last, flattened to rows (n, hp, wp) ---------
    x_rows = jnp.pad(jnp.transpose(x.astype(f32), (0, 2, 3, 1)),
                     ((0, 0), (1, 1), (1, 1), (0, 0))).reshape(NP, C)
    x_rows = jnp.pad(x_rows, ((PAD, PAD), (0, 0)))                     # [ROWS, C]

    # conv weight: one [C, FP] block per tap; bf16 for the MXU ---------------
    w_taps = jnp.transpose(w_conv.astype(f32), (2, 3, 1, 0)).reshape(KH * KW, C, FDIM)
    w_taps = jnp.pad(w_taps, ((0, 0), (0, 0), (0, FP - FDIM))).astype(jnp.bfloat16)
    b_conv_p = jnp.pad(b_conv.astype(f32), (0, FP - FDIM)).reshape(1, FP)

    # GAP pooling matrix: 1/HW at interior (non-halo) rows of image n --------
    rp = jnp.arange(NP)
    hp = (rp // WP) % HP
    wp = rp % WP
    interior = (hp >= 1) & (hp <= H) & (wp >= 1) & (wp <= W)
    owner = rp // (HP * WP)
    pool = jnp.where((owner[None, :] == jnp.arange(N)[:, None]) & interior[None, :],
                     1.0 / HW, 0.0).astype(f32)                        # [N, NP]

    # classifier weight pre-transposed ([FDIM, classes]) and lane-padded -----
    w_cls_t = jnp.pad(w_cls.astype(f32).T,
                      ((0, FP - FDIM), (0, CP - NUM_CLASSES)))         # [FP, CP]
    b_cls_p = jnp.pad(b_cls.astype(f32), (0, CP - NUM_CLASSES)).reshape(1, CP)

    flops = 2 * NP * C * FP * KH * KW + 2 * N * NP * FP + 2 * N * FP * CP
    bytes_accessed = (ROWS * C * 4 + KH * KW * C * FP * 2 + FP * 4
                      + N * NP * 4 + FP * CP * 4 + CP * 4 + N * CP * 4)

    y_pad = pl.pallas_call(
        simplenet_kernel,
        out_shape=jax.ShapeDtypeStruct((N, CP), jnp.float32),
        in_specs=[
            pl.BlockSpec((ROWS, C), lambda: (0, 0)),
            pl.BlockSpec((KH * KW, C, FP), lambda: (0, 0, 0)),
            pl.BlockSpec((1, FP), lambda: (0, 0)),
            pl.BlockSpec((N, NP), lambda: (0, 0)),
            pl.BlockSpec((FP, CP), lambda: (0, 0)),
            pl.BlockSpec((1, CP), lambda: (0, 0)),
        ],
        out_specs=pl.BlockSpec((N, CP), lambda: (0, 0)),
        cost_estimate=pl.CostEstimate(flops=flops, transcendentals=CP,
                                      bytes_accessed=bytes_accessed),
    )(x_rows, w_taps, b_conv_p, pool, w_cls_t, b_cls_p)

    return y_pad[:, :NUM_CLASSES]


def simplenet_reference(x, w_conv, b_conv, w_cls, b_cls):
    """Pure-JAX f32 reference of the same forward pass."""
    conv = jax.lax.conv_general_dilated(
        x, w_conv, window_strides=(1, 1), padding="SAME",
        dimension_numbers=("NCHW", "OIHW", "NCHW"))
    conv = jnp.maximum(conv + b_conv[None, :, None, None], 0.0)
    feat = conv.mean(axis=(2, 3))                                      # [N, FDIM]
    norm = jnp.sqrt(jnp.sum(w_cls * w_cls, axis=1, keepdims=True))
    w = jnp.where(norm > MAX_NORM, w_cls * (MAX_NORM / norm), w_cls)
    return feat @ w.T + b_cls


if __name__ == "__main__":
    key = jax.random.PRNGKey(0)
    kx, kwc, kbc, kwl, kbl = jax.random.split(key, 5)

    x = jax.random.normal(kx, (N, C, H, W), dtype=jnp.float32)
    w_conv = jax.random.normal(kwc, (FDIM, C, KH, KW), dtype=jnp.float32) * 0.1
    b_conv = jax.random.normal(kbc, (FDIM,), dtype=jnp.float32) * 0.1
    w_cls = jax.random.normal(kwl, (NUM_CLASSES, FDIM), dtype=jnp.float32) * 0.1
    b_cls = jax.random.normal(kbl, (NUM_CLASSES,), dtype=jnp.float32) * 0.1

    y = simplenet_forward(x, w_conv, b_conv, w_cls, b_cls)
    jax.block_until_ready(y)
    assert y.shape == (N, NUM_CLASSES) and y.dtype == jnp.float32

    # correctness vs pure-JAX f32 reference (tolerance covers the bf16 MXU path)
    y_ref = simplenet_reference(x, w_conv, b_conv, w_cls, b_cls)
    assert jnp.allclose(y, y_ref, atol=3e-2, rtol=3e-2), (y, y_ref)

    print("KERNEL_OK")
</pallas_src>

<mosaic_0001>
module attributes {stable_mosaic.version = 11 : i64} {
  func.func @simplenet_kernel(%arg0: memref<688x4xf32, #tpu.memory_space<vmem>>, %arg1: memref<9x4x128xbf16, #tpu.memory_space<vmem>>, %arg2: memref<1x128xf32, #tpu.memory_space<vmem>>, %arg3: memref<2x648xf32, #tpu.memory_space<vmem>>, %arg4: memref<128x128xf32, #tpu.memory_space<vmem>>, %arg5: memref<1x128xf32, #tpu.memory_space<vmem>>, %arg6: memref<2x128xf32, #tpu.memory_space<vmem>>) attributes {dimension_semantics = [], scalar_prefetch = 0 : i64, scratch_operands = 0 : i64, tpu.core_type = #tpu.core_type<tc>} {
    %cst = arith.constant 0.000000e+00 : f32
    %0 = vector.broadcast %cst : f32 to vector<648x128xf32>
    %c1 = arith.constant 1 : index
    %c0 = arith.constant 0 : index
    %1 = vector.load %arg0[%c1, %c0] : memref<688x4xf32, #tpu.memory_space<vmem>>, vector<648x4xf32>
    %2 = arith.truncf %1 : vector<648x4xf32> to vector<648x4xbf16>
    %c0_0 = arith.constant 0 : index
    %c0_1 = arith.constant 0 : index
    %c0_2 = arith.constant 0 : index
    %3 = vector.load %arg1[%c0_0, %c0_1, %c0_2] : memref<9x4x128xbf16, #tpu.memory_space<vmem>>, vector<1x4x128xbf16>
    %4 = vector.shape_cast %3 : vector<1x4x128xbf16> to vector<4x128xbf16>
    %cst_3 = arith.constant dense<0.000000e+00> : vector<648x128xf32>
    %5 = tpu.matmul %2, %4, %cst_3 {dimension_numbers = #tpu.dot_dimension_numbers<[1], [0], [0], [1], [0, 0, 1, 1], [], []>} : vector<648x4xbf16>, vector<4x128xbf16>, vector<648x128xf32> -> vector<648x128xf32>
    %6 = arith.addf %0, %5 : vector<648x128xf32>
    %c2 = arith.constant 2 : index
    %c0_4 = arith.constant 0 : index
    %7 = vector.load %arg0[%c2, %c0_4] : memref<688x4xf32, #tpu.memory_space<vmem>>, vector<648x4xf32>
    %8 = arith.truncf %7 : vector<648x4xf32> to vector<648x4xbf16>
    %c1_5 = arith.constant 1 : index
    %c0_6 = arith.constant 0 : index
    %c0_7 = arith.constant 0 : index
    %9 = vector.load %arg1[%c1_5, %c0_6, %c0_7] : memref<9x4x128xbf16, #tpu.memory_space<vmem>>, vector<1x4x128xbf16>
    %10 = vector.shape_cast %9 : vector<1x4x128xbf16> to vector<4x128xbf16>
    %cst_8 = arith.constant dense<0.000000e+00> : vector<648x128xf32>
    %11 = tpu.matmul %8, %10, %cst_8 {dimension_numbers = #tpu.dot_dimension_numbers<[1], [0], [0], [1], [0, 0, 1, 1], [], []>} : vector<648x4xbf16>, vector<4x128xbf16>, vector<648x128xf32> -> vector<648x128xf32>
    %12 = arith.addf %6, %11 : vector<648x128xf32>
    %c3 = arith.constant 3 : index
    %c0_9 = arith.constant 0 : index
    %13 = vector.load %arg0[%c3, %c0_9] : memref<688x4xf32, #tpu.memory_space<vmem>>, vector<648x4xf32>
    %14 = arith.truncf %13 : vector<648x4xf32> to vector<648x4xbf16>
    %c2_10 = arith.constant 2 : index
    %c0_11 = arith.constant 0 : index
    %c0_12 = arith.constant 0 : index
    %15 = vector.load %arg1[%c2_10, %c0_11, %c0_12] : memref<9x4x128xbf16, #tpu.memory_space<vmem>>, vector<1x4x128xbf16>
    %16 = vector.shape_cast %15 : vector<1x4x128xbf16> to vector<4x128xbf16>
    %cst_13 = arith.constant dense<0.000000e+00> : vector<648x128xf32>
    %17 = tpu.matmul %14, %16, %cst_13 {dimension_numbers = #tpu.dot_dimension_numbers<[1], [0], [0], [1], [0, 0, 1, 1], [], []>} : vector<648x4xbf16>, vector<4x128xbf16>, vector<648x128xf32> -> vector<648x128xf32>
    %18 = arith.addf %12, %17 : vector<648x128xf32>
    %c19 = arith.constant 19 : index
    %c0_14 = arith.constant 0 : index
    %19 = vector.load %arg0[%c19, %c0_14] : memref<688x4xf32, #tpu.memory_space<vmem>>, vector<648x4xf32>
    %20 = arith.truncf %19 : vector<648x4xf32> to vector<648x4xbf16>
    %c3_15 = arith.constant 3 : index
    %c0_16 = arith.constant 0 : index
    %c0_17 = arith.constant 0 : index
    %21 = vector.load %arg1[%c3_15, %c0_16, %c0_17] : memref<9x4x128xbf16, #tpu.memory_space<vmem>>, vector<1x4x128xbf16>
    %22 = vector.shape_cast %21 : vector<1x4x128xbf16> to vector<4x128xbf16>
    %cst_18 = arith.constant dense<0.000000e+00> : vector<648x128xf32>
    %23 = tpu.matmul %20, %22, %cst_18 {dimension_numbers = #tpu.dot_dimension_numbers<[1], [0], [0], [1], [0, 0, 1, 1], [], []>} : vector<648x4xbf16>, vector<4x128xbf16>, vector<648x128xf32> -> vector<648x128xf32>
    %24 = arith.addf %18, %23 : vector<648x128xf32>
    %c20 = arith.constant 20 : index
    %c0_19 = arith.constant 0 : index
    %25 = vector.load %arg0[%c20, %c0_19] : memref<688x4xf32, #tpu.memory_space<vmem>>, vector<648x4xf32>
    %26 = arith.truncf %25 : vector<648x4xf32> to vector<648x4xbf16>
    %c4 = arith.constant 4 : index
    %c0_20 = arith.constant 0 : index
    %c0_21 = arith.constant 0 : index
    %27 = vector.load %arg1[%c4, %c0_20, %c0_21] : memref<9x4x128xbf16, #tpu.memory_space<vmem>>, vector<1x4x128xbf16>
    %28 = vector.shape_cast %27 : vector<1x4x128xbf16> to vector<4x128xbf16>
    %cst_22 = arith.constant dense<0.000000e+00> : vector<648x128xf32>
    %29 = tpu.matmul %26, %28, %cst_22 {dimension_numbers = #tpu.dot_dimension_numbers<[1], [0], [0], [1], [0, 0, 1, 1], [], []>} : vector<648x4xbf16>, vector<4x128xbf16>, vector<648x128xf32> -> vector<648x128xf32>
    %30 = arith.addf %24, %29 : vector<648x128xf32>
    %c21 = arith.constant 21 : index
    %c0_23 = arith.constant 0 : index
    %31 = vector.load %arg0[%c21, %c0_23] : memref<688x4xf32, #tpu.memory_space<vmem>>, vector<648x4xf32>
    %32 = arith.truncf %31 : vector<648x4xf32> to vector<648x4xbf16>
    %c5 = arith.constant 5 : index
    %c0_24 = arith.constant 0 : index
    %c0_25 = arith.constant 0 : index
    %33 = vector.load %arg1[%c5, %c0_24, %c0_25] : memref<9x4x128xbf16, #tpu.memory_space<vmem>>, vector<1x4x128xbf16>
    %34 = vector.shape_cast %33 : vector<1x4x128xbf16> to vector<4x128xbf16>
    %cst_26 = arith.constant dense<0.000000e+00> : vector<648x128xf32>
    %35 = tpu.matmul %32, %34, %cst_26 {dimension_numbers = #tpu.dot_dimension_numbers<[1], [0], [0], [1], [0, 0, 1, 1], [], []>} : vector<648x4xbf16>, vector<4x128xbf16>, vector<648x128xf32> -> vector<648x128xf32>
    %36 = arith.addf %30, %35 : vector<648x128xf32>
    %c37 = arith.constant 37 : index
    %c0_27 = arith.constant 0 : index
    %37 = vector.load %arg0[%c37, %c0_27] : memref<688x4xf32, #tpu.memory_space<vmem>>, vector<648x4xf32>
    %38 = arith.truncf %37 : vector<648x4xf32> to vector<648x4xbf16>
    %c6 = arith.constant 6 : index
    %c0_28 = arith.constant 0 : index
    %c0_29 = arith.constant 0 : index
    %39 = vector.load %arg1[%c6, %c0_28, %c0_29] : memref<9x4x128xbf16, #tpu.memory_space<vmem>>, vector<1x4x128xbf16>
    %40 = vector.shape_cast %39 : vector<1x4x128xbf16> to vector<4x128xbf16>
    %cst_30 = arith.constant dense<0.000000e+00> : vector<648x128xf32>
    %41 = tpu.matmul %38, %40, %cst_30 {dimension_numbers = #tpu.dot_dimension_numbers<[1], [0], [0], [1], [0, 0, 1, 1], [], []>} : vector<648x4xbf16>, vector<4x128xbf16>, vector<648x128xf32> -> vector<648x128xf32>
    %42 = arith.addf %36, %41 : vector<648x128xf32>
    %c38 = arith.constant 38 : index
    %c0_31 = arith.constant 0 : index
    %43 = vector.load %arg0[%c38, %c0_31] : memref<688x4xf32, #tpu.memory_space<vmem>>, vector<648x4xf32>
    %44 = arith.truncf %43 : vector<648x4xf32> to vector<648x4xbf16>
    %c7 = arith.constant 7 : index
    %c0_32 = arith.constant 0 : index
    %c0_33 = arith.constant 0 : index
    %45 = vector.load %arg1[%c7, %c0_32, %c0_33] : memref<9x4x128xbf16, #tpu.memory_space<vmem>>, vector<1x4x128xbf16>
    %46 = vector.shape_cast %45 : vector<1x4x128xbf16> to vector<4x128xbf16>
    %cst_34 = arith.constant dense<0.000000e+00> : vector<648x128xf32>
    %47 = tpu.matmul %44, %46, %cst_34 {dimension_numbers = #tpu.dot_dimension_numbers<[1], [0], [0], [1], [0, 0, 1, 1], [], []>} : vector<648x4xbf16>, vector<4x128xbf16>, vector<648x128xf32> -> vector<648x128xf32>
    %48 = arith.addf %42, %47 : vector<648x128xf32>
    %c39 = arith.constant 39 : index
    %c0_35 = arith.constant 0 : index
    %49 = vector.load %arg0[%c39, %c0_35] : memref<688x4xf32, #tpu.memory_space<vmem>>, vector<648x4xf32>
    %50 = arith.truncf %49 : vector<648x4xf32> to vector<648x4xbf16>
    %c8 = arith.constant 8 : index
    %c0_36 = arith.constant 0 : index
    %c0_37 = arith.constant 0 : index
    %51 = vector.load %arg1[%c8, %c0_36, %c0_37] : memref<9x4x128xbf16, #tpu.memory_space<vmem>>, vector<1x4x128xbf16>
    %52 = vector.shape_cast %51 : vector<1x4x128xbf16> to vector<4x128xbf16>
    %cst_38 = arith.constant dense<0.000000e+00> : vector<648x128xf32>
    %53 = tpu.matmul %50, %52, %cst_38 {dimension_numbers = #tpu.dot_dimension_numbers<[1], [0], [0], [1], [0, 0, 1, 1], [], []>} : vector<648x4xbf16>, vector<4x128xbf16>, vector<648x128xf32> -> vector<648x128xf32>
    %54 = arith.addf %48, %53 : vector<648x128xf32>
    %c0_39 = arith.constant 0 : index
    %c0_40 = arith.constant 0 : index
    %55 = vector.load %arg2[%c0_39, %c0_40] : memref<1x128xf32, #tpu.memory_space<vmem>>, vector<1x128xf32>
    %56 = vector.broadcast %55 : vector<1x128xf32> to vector<648x128xf32>
    %57 = arith.addf %54, %56 : vector<648x128xf32>
    %cst_41 = arith.constant 0.000000e+00 : f32
    %58 = vector.broadcast %cst_41 : f32 to vector<648x128xf32>
    %59 = arith.maximumf %57, %58 : vector<648x128xf32>
    %c0_42 = arith.constant 0 : index
    %c0_43 = arith.constant 0 : index
    %60 = vector.load %arg3[%c0_42, %c0_43] : memref<2x648xf32, #tpu.memory_space<vmem>>, vector<2x648xf32>
    %cst_44 = arith.constant dense<0.000000e+00> : vector<2x128xf32>
    %61 = tpu.matmul %60, %59, %cst_44 {dimension_numbers = #tpu.dot_dimension_numbers<[1], [0], [0], [1], [0, 0, 1, 1], [], []>} : vector<2x648xf32>, vector<648x128xf32>, vector<2x128xf32> -> vector<2x128xf32>
    %c0_45 = arith.constant 0 : index
    %c0_46 = arith.constant 0 : index
    %62 = vector.load %arg4[%c0_45, %c0_46] : memref<128x128xf32, #tpu.memory_space<vmem>>, vector<128x128xf32>
    %63 = arith.mulf %62, %62 : vector<128x128xf32>
    %cst_47 = arith.constant dense<0.000000e+00> : vector<128xf32>
    %64 = vector.multi_reduction <add>, %63, %cst_47 [0] : vector<128x128xf32> to vector<128xf32>
    %65 = vector.shape_cast %64 : vector<128xf32> to vector<1x128xf32>
    %cst_48 = arith.constant 6.250000e-02 : f32
    %66 = vector.broadcast %cst_48 : f32 to vector<1x128xf32>
    %67 = arith.cmpf ogt, %65, %66 : vector<1x128xf32>
    %68 = math.rsqrt %65 : vector<1x128xf32>
    %cst_49 = arith.constant 2.500000e-01 : f32
    %69 = vector.broadcast %cst_49 : f32 to vector<1x128xf32>
    %70 = arith.mulf %69, %68 : vector<1x128xf32>
    %cst_50 = arith.constant 1.000000e+00 : f32
    %71 = vector.broadcast %cst_50 : f32 to vector<1x128xf32>
    %72 = arith.select %67, %70, %71 : vector<1x128xi1>, vector<1x128xf32>
    %73 = vector.broadcast %72 : vector<1x128xf32> to vector<128x128xf32>
    %74 = arith.mulf %62, %73 : vector<128x128xf32>
    %cst_51 = arith.constant dense<0.000000e+00> : vector<2x128xf32>
    %75 = tpu.matmul %61, %74, %cst_51 {dimension_numbers = #tpu.dot_dimension_numbers<[1], [0], [0], [1], [0, 0, 1, 1], [], []>} : vector<2x128xf32>, vector<128x128xf32>, vector<2x128xf32> -> vector<2x128xf32>
    %c0_52 = arith.constant 0 : index
    %c0_53 = arith.constant 0 : index
    %76 = vector.load %arg5[%c0_52, %c0_53] : memref<1x128xf32, #tpu.memory_space<vmem>>, vector<1x128xf32>
    %77 = vector.broadcast %76 : vector<1x128xf32> to vector<2x128xf32>
    %78 = arith.addf %75, %77 : vector<2x128xf32>
    %c0_54 = arith.constant 0 : index
    %c0_55 = arith.constant 0 : index
    %79 = vector.load %arg6[%c0_54, %c0_55] : memref<2x128xf32, #tpu.memory_space<vmem>>, vector<2x128xf32>
    tpu.vector_store %arg6[%c0_54, %c0_55], %78 {strides = array<i32>} : memref<2x128xf32, #tpu.memory_space<vmem>>, vector<2x128xf32>,
    return
  }
}

</mosaic_0001>

<bundles_post_ra>
// kernel: tpu_custom_call.1
= control target key start
LH: loop header
LB: loop body
LE: loop exit
PB: predicated region body
PF: predicated region fallthrough
CT: control target
= control target key end

     0   :  { %vm396_vm0 = vcmask 1041408   ;;  %v14772_v2 = vmov 0.0   ;;  %vm272_vm1 = vcmask 31744   ;;  %vm9187_vm2 = vmmov 0   ;;  %s14765_s0 = inlined_call_operand.vmem [shape: f32[688,4], index: 0, kind: input, shape index: {}]   ;;  %s14766_s1 = inlined_call_operand.vmem [shape: bf16[9,4,128], index: 1, kind: input, shape index: {}]   ;;  %s14767_s2 = inlined_call_operand.vmem [shape: f32[1,128], index: 2, kind: input, shape index: {}]   ;;  %s14768_s3 = inlined_call_operand.vmem [shape: f32[2,648], index: 3, kind: input, shape index: {}]   ;;  %s14769_s4 = inlined_call_operand.vmem [shape: f32[128,128], index: 4, kind: input, shape index: {}]   ;;  %s14770_s5 = inlined_call_operand.vmem [shape: f32[1,128], index: 5, kind: input, shape index: {}]   ;;  %s14771_s6 = inlined_call_operand.hbm [shape: f32[2,128], index: 6, kind: output, shape index: {}]  }
   0x1   :  { %v6664_v0 = vld [vmem:[%s14766_s1 + $0x2] sm:$0x3]  ;;  %7510 = vmatprep.subr.bf16.mxu0 %v14772_v2  ;;  %9151 = vmatprep.subr.bf16.mxu1 %v14772_v2  ;;  %v149_v4 = vld [vmem:[%s14765_s0 + $0xa] sm:$0xff]  ;;  %v202_v5 = vld [vmem:[%s14765_s0 + $0x1b2] sm:$0xff] }
   0x2   :  { %v148_v1 = vld [vmem:[%s14765_s0 + $0x2] sm:$0xff]  ;;  %v398_v3 = vsel %vm396_vm0, %v6664_v0, 0  ;;  %v203_v6 = vld [vmem:[%s14765_s0 + $0x1ba] sm:$0xff]  ;;  %7512 = vmatprep.mubr.msk.bf16.mxu0 %vm9187_vm2, %v14772_v2  ;;  %7620 = vmatprep.mubr.msk.bf16.mxu1 %vm9187_vm2, %v14772_v2  ;;  %v150_v9 = vld [vmem:[%s14765_s0 + $0x12] sm:$0xff] }
   0x3   :  { %7511 = vmatpush3.bf16.msra.mxu0 %v398_v3  ;;  %9152 = vmatpush3.bf16.msra.mxu1 %v398_v3  ;;  %v229_v7 = vpack.c.bf16 %v149_v4, %v148_v1  ;;  %v256_v8 = vpack.c.bf16 %v203_v6, %v202_v5  ;;  %v151_v10 = vld [vmem:[%s14765_s0 + $0x1a] sm:$0xff]  ;;  %v204_v11 = vld [vmem:[%s14765_s0 + $0x1c2] sm:$0xff]  ;;  %v205_v12 = vld [vmem:[%s14765_s0 + $0x1ca] sm:$0xff] }
   0x4   :  { %7676 = vmatprep.subr.bf16.mxu1 %v14772_v2  ;;  %7842 = vmatprep.subr.bf16.mxu0 %v14772_v2  ;;  %v230_v13 = vpack.c.bf16 %v151_v10, %v150_v9  ;;  %v257_v14 = vpack.c.bf16 %v205_v12, %v204_v11  ;;  %v152_v15 = vld [vmem:[%s14765_s0 + $0x22] sm:$0xff]  ;;  %v153_v16 = vld [vmem:[%s14765_s0 + $0x2a] sm:$0xff]  ;;  %v206_v17 = vld [vmem:[%s14765_s0 + $0x1d2] sm:$0xff] }
   0x5   :  { %v207_v18 = vld [vmem:[%s14765_s0 + $0x1da] sm:$0xff]  ;;  %v231_v19 = vpack.c.bf16 %v153_v16, %v152_v15  ;;  %v154_v23 = vld [vmem:[%s14765_s0 + $0x32] sm:$0xff]  ;;  %v208_v25 = vld [vmem:[%s14765_s0 + $0x1e2] sm:$0xff] }
   0x6   :  { %7513 = vmatmul.mubr.msk.bf16.vlgmr.msra.gmra.mrb[0].mxu0 %vm272_vm1, %v229_v7  ;;  %7621 = vmatmul.mubr.msk.bf16.vlgmr.msra.gmra.mrb[0].mxu1 %vm272_vm1, %v256_v8  ;;  %v258_v20 = vpack.c.bf16 %v207_v18, %v206_v17  ;;  %v147_v21 = vld [vmem:[%s14766_s1] sm:$0x3]  ;;  %v209_v26 = vld [vmem:[%s14765_s0 + $0x1ea] sm:$0xff]  ;;  %v6747_v27 = vld [vmem:[%s14766_s1 + $0x4] sm:$0x3] }
   0x7   :  { %7516 = vmatprep.mubr.msk.bf16.mxu0 %vm9187_vm2, %v14772_v2  ;;  %7624 = vmatprep.mubr.msk.bf16.mxu1 %vm9187_vm2, %v14772_v2  ;;  %v884_v22 = vsel %vm396_vm0, %v147_v21, 0  ;;  %v155_v24 = vld [vmem:[%s14765_s0 + $0x3a] sm:$0xff]  ;;  %v259_v29 = vpack.c.bf16 %v209_v26, %v208_v25  ;;  %v1494_v30 = vsel %vm396_vm0, %v6747_v27, 0 }
   0x8   :  { %7677 = vmatpush3.bf16.msra.mxu1 %v884_v22  ;;  %v232_v28 = vpack.c.bf16 %v155_v24, %v154_v23  ;;  %7843 = vmatpush3.bf16.msra.mxu0 %v1494_v30 }
   0x9   :  { %8008 = vmatprep.subr.bf16.mxu1 %v14772_v2  ;;  %8174 = vmatprep.subr.bf16.mxu0 %v14772_v2 }
   0xe   :  { %7517 = vmatmul.mubr.msk.bf16.gmra.mrb[4].mxu0 %vm272_vm1, %v230_v13  ;;  %7625 = vmatmul.mubr.msk.bf16.gmra.mrb[4].mxu1 %vm272_vm1, %v257_v14 }
   0xf   :  { %7520 = vmatprep.mubr.msk.bf16.mxu0 %vm9187_vm2, %v14772_v2  ;;  %7628 = vmatprep.mubr.msk.bf16.mxu1 %vm9187_vm2, %v14772_v2 }
  0x16   :  { %7521 = vmatmul.mubr.msk.bf16.gmra.mrb[8].mxu0 %vm272_vm1, %v231_v19  ;;  %7629 = vmatmul.mubr.msk.bf16.gmra.mrb[8].mxu1 %vm272_vm1, %v258_v20 }
  0x17   :  { %7524 = vmatprep.mubr.msk.bf16.mxu0 %vm9187_vm2, %v14772_v2  ;;  %7632 = vmatprep.mubr.msk.bf16.mxu1 %vm9187_vm2, %v14772_v2 }
  0x18   :  { %11 = vsyncpa [#allocation3], 0  ;;  %v156_v31 = vld [vmem:[%s14765_s0 + $0x42] sm:$0xff]  ;;  %v157_v32 = vld [vmem:[%s14765_s0 + $0x4a] sm:$0xff]  ;;  %vm6286_vm3 = vcmask 64512   ;;  %s9190_s12 = smov [#allocation2]  }
  0x19   :  { %v210_v33 = vld [vmem:[%s14765_s0 + $0x1f2] sm:$0xff]  ;;  %v211_v34 = vld [vmem:[%s14765_s0 + $0x1fa] sm:$0xff]  ;;  %v233_v35 = vpack.c.bf16 %v157_v32, %v156_v31  ;;  %v212_v39 = vld [vmem:[%s14765_s0 + $0x202] sm:$0xff]  ;;  %s6656_s13 = sshll.u32 %s9190_s12, 4  ;;  %s6657_s13 = int_to_ptr.vmem [resolvable:$true] %s6656_s13 }
  0x1a   :  { %v260_v36 = vpack.c.bf16 %v211_v34, %v210_v33  ;;  %v158_v37 = vld [vmem:[%s14765_s0 + $0x52] sm:$0xff]  ;;  %v159_v38 = vld [vmem:[%s14765_s0 + $0x5a] sm:$0xff]  ;;  %v213_v40 = vld [vmem:[%s14765_s0 + $0x20a] sm:$0xff]  ;;  %s9162_s14 = scalar_lea.vmem %s6657_s13, 32  ;;  %p9167_p1 = scmp.lt.s32.totalorder %s6657_s13, %s6657_s13 }
  0x1b   :  { %v234_v41 = vpack.c.bf16 %v159_v38, %v158_v37  ;;  %v261_v42 = vpack.c.bf16 %v213_v40, %v212_v39  ;;  %v160_v43 = vld [vmem:[%s14765_s0 + $0x62] sm:$0xff]  ;;  %v161_v44 = vld [vmem:[%s14765_s0 + $0x6a] sm:$0xff]  ;;  %v214_v45 = vld [vmem:[%s14765_s0 + $0x212] sm:$0xff]  ;;  %p9163_p0 = scmp.ne.s32.totalorder %s6657_s13, %s9162_s14  ;;  %p9168_p2 = scmp.lt.s32.totalorder %s9162_s14, %s9162_s14 }
  0x1c   :  { %v215_v46 = vld [vmem:[%s14765_s0 + $0x21a] sm:$0xff]  ;;  %v235_v47 = vpack.c.bf16 %v161_v44, %v160_v43  ;;  %v162_v49 = vld [vmem:[%s14765_s0 + $0x72] sm:$0xff]  ;;  %v216_v51 = vld [vmem:[%s14765_s0 + $0x222] sm:$0xff] }
  0x1d   :  { %v262_v48 = vpack.c.bf16 %v215_v46, %v214_v45  ;;  %v163_v50 = vld [vmem:[%s14765_s0 + $0x7a] sm:$0xff]  ;;  %v217_v52 = vld [vmem:[%s14765_s0 + $0x22a] sm:$0xff]  ;;  %v164_v55 = vld [vmem:[%s14765_s0 + $0x82] sm:$0xff]  ;;  %p9169_p3 = por %p9168_p2, %p9167_p1 }
  0x1e   :  { %7525 = vmatmul.mubr.msk.bf16.gmra.mrb[12].mxu0 %vm272_vm1, %v232_v28  ;;  %7633 = vmatmul.mubr.msk.bf16.gmra.mrb[12].mxu1 %vm272_vm1, %v259_v29  ;;  %v236_v53 = vpack.c.bf16 %v163_v50, %v162_v49  ;;  %v263_v54 = vpack.c.bf16 %v217_v52, %v216_v51  ;;  %v165_v56 = vld [vmem:[%s14765_s0 + $0x8a] sm:$0xff]  ;;  %v218_v57 = vld [vmem:[%s14765_s0 + $0x232] sm:$0xff]  ;;  %v219_v58 = vld [vmem:[%s14765_s0 + $0x23a] sm:$0xff] }
  0x1f   :  { %7528 = vmatprep.mubr.msk.bf16.mxu0 %vm9187_vm2, %v14772_v2  ;;  %7636 = vmatprep.mubr.msk.bf16.mxu1 %vm9187_vm2, %v14772_v2  ;;  %v237_v59 = vpack.c.bf16 %v165_v56, %v164_v55  ;;  %v264_v60 = vpack.c.bf16 %v219_v58, %v218_v57  ;;  %v166_v61 = vld [vmem:[%s14765_s0 + $0x92] sm:$0xff]  ;;  %v167_v62 = vld [vmem:[%s14765_s0 + $0x9a] sm:$0xff]  ;;  %v220_v63 = vld [vmem:[%s14765_s0 + $0x242] sm:$0xff]  ;;  %p9170_p4 = pnand %p9169_p3, %p9163_p0 }
  0x20   :  { %v221_v0 = vld [vmem:[%s14765_s0 + $0x24a] sm:$0xff]  ;;  %v238_v1 = vpack.c.bf16 %v167_v62, %v166_v61  ;;  %v168_v4 = vld [vmem:[%s14765_s0 + $0xa2] sm:$0xff]  ;;  %v222_v6 = vld [vmem:[%s14765_s0 + $0x252] sm:$0xff] }
  0x21   :  { %v265_v3 = vpack.c.bf16 %v221_v0, %v220_v63  ;;  %v169_v5 = vld [vmem:[%s14765_s0 + $0xaa] sm:$0xff]  ;;  %v223_v7 = vld [vmem:[%s14765_s0 + $0x25a] sm:$0xff]  ;;  %v170_v10 = vld [vmem:[%s14765_s0 + $0xb2] sm:$0xff] }
  0x22   :  { %v239_v8 = vpack.c.bf16 %v169_v5, %v168_v4  ;;  %v266_v9 = vpack.c.bf16 %v223_v7, %v222_v6  ;;  %v171_v11 = vld [vmem:[%s14765_s0 + $0xba] sm:$0xff]  ;;  %v224_v12 = vld [vmem:[%s14765_s0 + $0x262] sm:$0xff]  ;;  %v225_v13 = vld [vmem:[%s14765_s0 + $0x26a] sm:$0xff] }
  0x23   :  { %v240_v14 = vpack.c.bf16 %v171_v11, %v170_v10  ;;  %v267_v15 = vpack.c.bf16 %v225_v13, %v224_v12  ;;  %v172_v16 = vld [vmem:[%s14765_s0 + $0xc2] sm:$0xff]  ;;  %v173_v17 = vld [vmem:[%s14765_s0 + $0xca] sm:$0xff]  ;;  %v226_v18 = vld [vmem:[%s14765_s0 + $0x272] sm:$0xff] }
  0x24   :  { %v227_v19 = vld [vmem:[%s14765_s0 + $0x27a] sm:$0xff]  ;;  %v241_v20 = vpack.c.bf16 %v173_v17, %v172_v16  ;;  %v174_v22 = vld [vmem:[%s14765_s0 + $0xd2] sm:$0xff]  ;;  %v228_v24 = vld [vmem:[%s14765_s0 + $0x282] sm:$0xff] }
  0x25   :  { %v268_v21 = vpack.c.bf16 %v227_v19, %v226_v18  ;;  %v175_v23 = vld [vmem:[%s14765_s0 + $0xda] sm:$0xff]  ;;  %v269_v26 = vpack.c.bf16 %v228_v24, %v228_v24  ;;  %v176_v27 = vld [vmem:[%s14765_s0 + $0xe2] sm:$0xff]  ;;  %v177_v28 = vld [vmem:[%s14765_s0 + $0xea] sm:$0xff] }
  0x26   :  { %7529 = vmatmul.mubr.msk.bf16.gmra.mrb[16].mxu0 %vm272_vm1, %v233_v35  ;;  %7637 = vmatmul.mubr.msk.bf16.gmra.mrb[16].mxu1 %vm272_vm1, %v260_v36  ;;  %v242_v25 = vpack.c.bf16 %v175_v23, %v174_v22  ;;  %v25_v29 = vld [vmem:[%s14765_s0 + $0x1] sm:$0xff]  ;;  %v26_v30 = vld [vmem:[%s14765_s0 + $0x9] sm:$0xff]  ;;  %v243_v31 = vpack.c.bf16 %v177_v28, %v176_v27  ;;  %v178_v33 = vld [vmem:[%s14765_s0 + $0xf2] sm:$0xff] }
  0x27   :  { %7532 = vmatprep.mubr.msk.bf16.mxu0 %vm9187_vm2, %v14772_v2  ;;  %7640 = vmatprep.mubr.msk.bf16.mxu1 %vm9187_vm2, %v14772_v2  ;;  %v106_v32 = vpack.c.bf16 %v26_v30, %v25_v29  ;;  %v179_v34 = vld [vmem:[%s14765_s0 + $0xfa] sm:$0xff]  ;;  %v27_v35 = vld [vmem:[%s14765_s0 + $0x11] sm:$0xff]  ;;  %v180_v39 = vld [vmem:[%s14765_s0 + $0x102] sm:$0xff] }
  0x28   :  { %v28_v36 = vld [vmem:[%s14765_s0 + $0x19] sm:$0xff]  ;;  %v244_v37 = vpack.c.bf16 %v179_v34, %v178_v33  ;;  %v181_v40 = vld [vmem:[%s14765_s0 + $0x10a] sm:$0xff]  ;;  %v184_v51 = vld [vmem:[%s14765_s0 + $0x122] sm:$0xff] }
  0x29   :  { %v107_v38 = vpack.c.bf16 %v28_v36, %v27_v35  ;;  %v245_v43 = vpack.c.bf16 %v181_v40, %v180_v39  ;;  %v182_v45 = vld [vmem:[%s14765_s0 + $0x112] sm:$0xff]  ;;  %v183_v46 = vld [vmem:[%s14765_s0 + $0x11a] sm:$0xff]  ;;  %v185_v52 = vld [vmem:[%s14765_s0 + $0x12a] sm:$0xff] }
  0x2a   :  { %v246_v49 = vpack.c.bf16 %v183_v46, %v182_v45  ;;  %v247_v55 = vpack.c.bf16 %v185_v52, %v184_v51  ;;  %v186_v57 = vld [vmem:[%s14765_s0 + $0x132] sm:$0xff]  ;;  %v187_v58 = vld [vmem:[%s14765_s0 + $0x13a] sm:$0xff]  ;;  %v188_v63 = vld [vmem:[%s14765_s0 + $0x142] sm:$0xff] }
  0x2b   :  { %v248_v61 = vpack.c.bf16 %v187_v58, %v186_v57  ;;  %v189_v0 = vld [vmem:[%s14765_s0 + $0x14a] sm:$0xff]  ;;  %v190_v6 = vld [vmem:[%s14765_s0 + $0x152] sm:$0xff]  ;;  %v191_v7 = vld [vmem:[%s14765_s0 + $0x15a] sm:$0xff] }
  0x2c   :  { %v249_v4 = vpack.c.bf16 %v189_v0, %v188_v63  ;;  %v250_v10 = vpack.c.bf16 %v191_v7, %v190_v6  ;;  %v192_v12 = vld [vmem:[%s14765_s0 + $0x162] sm:$0xff]  ;;  %v193_v13 = vld [vmem:[%s14765_s0 + $0x16a] sm:$0xff]  ;;  %v194_v18 = vld [vmem:[%s14765_s0 + $0x172] sm:$0xff] }
  0x2d   :  { %v251_v16 = vpack.c.bf16 %v193_v13, %v192_v12  ;;  %v195_v19 = vld [vmem:[%s14765_s0 + $0x17a] sm:$0xff]  ;;  %v196_v24 = vld [vmem:[%s14765_s0 + $0x182] sm:$0xff]  ;;  %v198_v30 = vld [vmem:[%s14765_s0 + $0x192] sm:$0xff] }
  0x2e   :  { %7533 = vmatmul.mubr.msk.bf16.gmra.mrb[20].mxu0 %vm272_vm1, %v234_v41  ;;  %7641 = vmatmul.mubr.msk.bf16.gmra.mrb[20].mxu1 %vm272_vm1, %v261_v42  ;;  %v29_v41 = vld [vmem:[%s14765_s0 + $0x21] sm:$0xff]  ;;  %v30_v42 = vld [vmem:[%s14765_s0 + $0x29] sm:$0xff]  ;;  %v252_v22 = vpack.c.bf16 %v195_v19, %v194_v18  ;;  %v48_v33 = vld [vmem:[%s14765_s0 + $0xb9] sm:$0xff] }
  0x2f   :  { %7536 = vmatprep.mubr.msk.bf16.mxu0 %vm9187_vm2, %v14772_v2  ;;  %7644 = vmatprep.mubr.msk.bf16.mxu1 %vm9187_vm2, %v14772_v2  ;;  %v108_v44 = vpack.c.bf16 %v30_v42, %v29_v41  ;;  %v46_v27 = vld [vmem:[%s14765_s0 + $0xa9] sm:$0xff]  ;;  %v51_v42 = vld [vmem:[%s14765_s0 + $0xd1] sm:$0xff] }
  0x30   :  { %v200_v36 = vld [vmem:[%s14765_s0 + $0x1a2] sm:$0xff]  ;;  %v1247_v45 = vld [vmem:[%s14765_s0 + $0xb] sm:$0xff]  ;;  %v1248_v58 = vld [vmem:[%s14765_s0 + $0x13] sm:$0xff] }
  0x31   :  { %v50_v39 = vld [vmem:[%s14765_s0 + $0xc9] sm:$0xff]  ;;  %v55_v7 = vld [vmem:[%s14765_s0 + $0xf1] sm:$0xff] }
  0x32   :  { %v54_v57 = vld [vmem:[%s14765_s0 + $0xe9] sm:$0xff] }
  0x36   :  { %7537 = vmatmul.mubr.msk.bf16.gmra.mrb[24].mxu0 %vm272_vm1, %v235_v47  ;;  %7645 = vmatmul.mubr.msk.bf16.gmra.mrb[24].mxu1 %vm272_vm1, %v262_v48  ;;  %v31_v47 = vld [vmem:[%s14765_s0 + $0x31] sm:$0xff]  ;;  %v32_v48 = vld [vmem:[%s14765_s0 + $0x39] sm:$0xff] }
  0x37   :  { %7540 = vmatprep.mubr.msk.bf16.mxu0 %vm9187_vm2, %v14772_v2  ;;  %7648 = vmatprep.mubr.msk.bf16.mxu1 %vm9187_vm2, %v14772_v2  ;;  %v109_v50 = vpack.c.bf16 %v32_v48, %v31_v47 }
  0x3e   :  { %7541 = vmatmul.mubr.msk.bf16.gmra.mrb[28].mxu0 %vm272_vm1, %v236_v53  ;;  %7649 = vmatmul.mubr.msk.bf16.gmra.mrb[28].mxu1 %vm272_vm1, %v263_v54  ;;  %v33_v53 = vld [vmem:[%s14765_s0 + $0x41] sm:$0xff]  ;;  %v34_v54 = vld [vmem:[%s14765_s0 + $0x49] sm:$0xff] }
  0x3f   :  { %7544 = vmatprep.mubr.msk.bf16.mxu0 %vm9187_vm2, %v14772_v2  ;;  %7652 = vmatprep.mubr.msk.bf16.mxu1 %vm9187_vm2, %v14772_v2  ;;  %v110_v56 = vpack.c.bf16 %v34_v54, %v33_v53 }
  0x46   :  { %7545 = vmatmul.mubr.msk.bf16.gmra.mrb[32].mxu0 %vm272_vm1, %v237_v59  ;;  %7653 = vmatmul.mubr.msk.bf16.gmra.mrb[32].mxu1 %vm272_vm1, %v264_v60  ;;  %v35_v59 = vld [vmem:[%s14765_s0 + $0x51] sm:$0xff]  ;;  %v36_v60 = vld [vmem:[%s14765_s0 + $0x59] sm:$0xff] }
  0x47   :  { %7548 = vmatprep.mubr.msk.bf16.mxu0 %vm9187_vm2, %v14772_v2  ;;  %7656 = vmatprep.mubr.msk.bf16.mxu1 %vm9187_vm2, %v14772_v2  ;;  %v111_v62 = vpack.c.bf16 %v36_v60, %v35_v59  ;;  %v1249_v59 = vld [vmem:[%s14765_s0 + $0x1b] sm:$0xff] }
  0x48   :  { %v1328_v0 = vpack.c.bf16 %v1249_v59, %v1248_v58  ;;  %v62_v58 = vld [vmem:[%s14765_s0 + $0x129] sm:$0xff]  ;;  %v1256_v59 = vld [vmem:[%s14765_s0 + $0x53] sm:$0xff] }
  0x4e   :  { %7549 = vmatmul.mubr.msk.bf16.gmra.mrb[36].mxu0 %vm272_vm1, %v238_v1  ;;  %7657 = vmatmul.mubr.msk.bf16.gmra.mrb[36].mxu1 %vm272_vm1, %v265_v3  ;;  %v37_v1 = vld [vmem:[%s14765_s0 + $0x61] sm:$0xff]  ;;  %v38_v3 = vld [vmem:[%s14765_s0 + $0x69] sm:$0xff] }
  0x4f   :  { %7552 = vmatprep.mubr.msk.bf16.mxu0 %vm9187_vm2, %v14772_v2  ;;  %7660 = vmatprep.mubr.msk.bf16.mxu1 %vm9187_vm2, %v14772_v2  ;;  %v112_v5 = vpack.c.bf16 %v38_v3, %v37_v1 }
  0x56   :  { %7553 = vmatmul.mubr.msk.bf16.gmra.mrb[40].mxu0 %vm272_vm1, %v239_v8  ;;  %7661 = vmatmul.mubr.msk.bf16.gmra.mrb[40].mxu1 %vm272_vm1, %v266_v9  ;;  %v39_v8 = vld [vmem:[%s14765_s0 + $0x71] sm:$0xff]  ;;  %v40_v9 = vld [vmem:[%s14765_s0 + $0x79] sm:$0xff] }
  0x57   :  { %7556 = vmatprep.mubr.msk.bf16.mxu0 %vm9187_vm2, %v14772_v2  ;;  %7664 = vmatprep.mubr.msk.bf16.mxu1 %vm9187_vm2, %v14772_v2  ;;  %v113_v11 = vpack.c.bf16 %v40_v9, %v39_v8  ;;  %v56_v8 = vld [vmem:[%s14765_s0 + $0xf9] sm:$0xff]  ;;  %v1250_v9 = vld [vmem:[%s14765_s0 + $0x23] sm:$0xff] }
  0x5e   :  { %7557 = vmatmul.mubr.msk.bf16.gmra.mrb[44].mxu0 %vm272_vm1, %v240_v14  ;;  %7665 = vmatmul.mubr.msk.bf16.gmra.mrb[44].mxu1 %vm272_vm1, %v267_v15  ;;  %v41_v14 = vld [vmem:[%s14765_s0 + $0x81] sm:$0xff]  ;;  %v42_v15 = vld [vmem:[%s14765_s0 + $0x89] sm:$0xff] }
  0x5f   :  { %7560 = vmatprep.mubr.msk.bf16.mxu0 %vm9187_vm2, %v14772_v2  ;;  %7668 = vmatprep.mubr.msk.bf16.mxu1 %vm9187_vm2, %v14772_v2  ;;  %v114_v17 = vpack.c.bf16 %v42_v15, %v41_v14  ;;  %v121_v14 = vpack.c.bf16 %v56_v8, %v55_v7 }
  0x66   :  { %7561 = vmatmul.mubr.msk.bf16.gmra.mrb[48].mxu0 %vm272_vm1, %v241_v20  ;;  %7669 = vmatmul.mubr.msk.bf16.gmra.mrb[48].mxu1 %vm272_vm1, %v268_v21  ;;  %v43_v20 = vld [vmem:[%s14765_s0 + $0x91] sm:$0xff]  ;;  %v44_v21 = vld [vmem:[%s14765_s0 + $0x99] sm:$0xff] }
  0x67   :  { %7564 = vmatprep.mubr.msk.bf16.mxu0 %vm9187_vm2, %v14772_v2  ;;  %7672 = vmatprep.mubr.msk.bf16.mxu1 %vm9187_vm2, %v14772_v2  ;;  %v115_v23 = vpack.c.bf16 %v44_v21, %v43_v20 }
  0x6e   :  { %7565 = vmatmul.mubr.msk.bf16.gmra.mrb[52].mxu0 %vm272_vm1, %v242_v25  ;;  %7673 = vmatmul.mubr.msk.bf16.gmra.mrb[52].mxu1 %vm272_vm1, %v269_v26  ;;  %v197_v25 = vld [vmem:[%s14765_s0 + $0x18a] sm:$0xff]  ;;  %v45_v26 = vld [vmem:[%s14765_s0 + $0xa1] sm:$0xff] }
  0x6f   :  { %7568 = vmatprep.mubr.msk.bf16.mxu0 %vm9187_vm2, %v14772_v2  ;;  %7678 = vmatprep.mubr.msk.bf16.mxu1 %vm9187_vm2, %v14772_v2  ;;  %v253_v28 = vpack.c.bf16 %v197_v25, %v196_v24  ;;  %v116_v29 = vpack.c.bf16 %v46_v27, %v45_v26  ;;  %v57_v25 = vld [vmem:[%s14765_s0 + $0x101] sm:$0xff]  ;;  %v58_v26 = vld [vmem:[%s14765_s0 + $0x109] sm:$0xff]  ;;  %v1252_v27 = vld [vmem:[%s14765_s0 + $0x33] sm:$0xff] }
  0x76   :  { %7569 = vmatmul.mubr.msk.bf16.gmra.mrb[56].mxu0 %vm272_vm1, %v243_v31  ;;  %7679 = vmatmul.mubr.msk.bf16.vlgmr.msra.gmra.mrb[56].mxu1 %vm272_vm1, %v106_v32  ;;  %v199_v31 = vld [vmem:[%s14765_s0 + $0x19a] sm:$0xff]  ;;  %v47_v32 = vld [vmem:[%s14765_s0 + $0xb1] sm:$0xff] }
  0x77   :  { %7572 = vmatprep.mubr.msk.bf16.mxu0 %vm9187_vm2, %v14772_v2  ;;  %7682 = vmatprep.mubr.msk.bf16.mxu1 %vm9187_vm2, %v14772_v2  ;;  %v254_v34 = vpack.c.bf16 %v199_v31, %v198_v30  ;;  %v117_v35 = vpack.c.bf16 %v48_v33, %v47_v32  ;;  %v122_v32 = vpack.c.bf16 %v58_v26, %v57_v25 }
  0x7e   :  { %7573 = vmatmul.mubr.msk.bf16.gmra.mrb[60].mxu0 %vm272_vm1, %v244_v37  ;;  %7683 = vmatmul.mubr.msk.bf16.gmra.mrb[60].mxu1 %vm272_vm1, %v107_v38  ;;  %v201_v37 = vld [vmem:[%s14765_s0 + $0x1aa] sm:$0xff]  ;;  %v49_v38 = vld [vmem:[%s14765_s0 + $0xc1] sm:$0xff] }
  0x7f   :  { %7576 = vmatprep.mubr.msk.bf16.mxu0 %vm9187_vm2, %v14772_v2  ;;  %7686 = vmatprep.mubr.msk.bf16.mxu1 %vm9187_vm2, %v14772_v2  ;;  %v255_v40 = vpack.c.bf16 %v201_v37, %v200_v36  ;;  %v118_v41 = vpack.c.bf16 %v50_v39, %v49_v38  ;;  %v59_v39 = vld [vmem:[%s14765_s0 + $0x111] sm:$0xff] }
  0x86   :  { %7577 = vmatmul.mubr.msk.bf16.gmra.mrb[64].mxu0 %vm272_vm1, %v245_v43  ;;  %7687 = vmatmul.mubr.msk.bf16.gmra.mrb[64].mxu1 %vm272_vm1, %v108_v44  ;;  %v52_v43 = vld [vmem:[%s14765_s0 + $0xd9] sm:$0xff]  ;;  %v1246_v44 = vld [vmem:[%s14765_s0 + $0x3] sm:$0xff] }
  0x87   :  { %7580 = vmatprep.mubr.msk.bf16.mxu0 %vm9187_vm2, %v14772_v2  ;;  %7690 = vmatprep.mubr.msk.bf16.mxu1 %vm9187_vm2, %v14772_v2 }
  0x8e   :  { %7581 = vmatmul.mubr.msk.bf16.gmra.mrb[68].mxu0 %vm272_vm1, %v246_v49  ;;  %7691 = vmatmul.mubr.msk.bf16.gmra.mrb[68].mxu1 %vm272_vm1, %v109_v50  ;;  %v119_v49 = vpack.c.bf16 %v52_v43, %v51_v42  ;;  %v1327_v50 = vpack.c.bf16 %v1247_v45, %v1246_v44  ;;  %v1255_v42 = vld [vmem:[%s14765_s0 + $0x4b] sm:$0xff] }
  0x8f   :  { %7584 = vmatprep.mubr.msk.bf16.mxu0 %vm9187_vm2, %v14772_v2  ;;  %7694 = vmatprep.mubr.msk.bf16.mxu1 %vm9187_vm2, %v14772_v2 }
  0x96   :  { %7585 = vmatmul.mubr.msk.bf16.gmra.mrb[72].mxu0 %vm272_vm1, %v247_v55  ;;  %7695 = vmatmul.mubr.msk.bf16.gmra.mrb[72].mxu1 %vm272_vm1, %v110_v56  ;;  %v53_v56 = vld [vmem:[%s14765_s0 + $0xe1] sm:$0xff] }
  0x97   :  { %7588 = vmatprep.mubr.msk.bf16.mxu0 %vm9187_vm2, %v14772_v2  ;;  %7698 = vmatprep.mubr.msk.bf16.mxu1 %vm9187_vm2, %v14772_v2  ;;  %v120_v63 = vpack.c.bf16 %v54_v57, %v53_v56  ;;  %v61_v57 = vld [vmem:[%s14765_s0 + $0x121] sm:$0xff] }
  0x9e   :  { %7589 = vmatmul.mubr.msk.bf16.gmra.mrb[76].mxu0 %vm272_vm1, %v248_v61  ;;  %7699 = vmatmul.mubr.msk.bf16.gmra.mrb[76].mxu1 %vm272_vm1, %v111_v62 }
  0x9f   :  { %7592 = vmatprep.mubr.msk.bf16.mxu0 %vm9187_vm2, %v14772_v2  ;;  %7702 = vmatprep.mubr.msk.bf16.mxu1 %vm9187_vm2, %v14772_v2 }
  0xa6   :  { %7593 = vmatmul.mubr.msk.bf16.gmra.mrb[80].mxu0 %vm272_vm1, %v249_v4  ;;  %7703 = vmatmul.mubr.msk.bf16.gmra.mrb[80].mxu1 %vm272_vm1, %v112_v5 }
  0xa7   :  { %7596 = vmatprep.mubr.msk.bf16.mxu0 %vm9187_vm2, %v14772_v2  ;;  %7706 = vmatprep.mubr.msk.bf16.mxu1 %vm9187_vm2, %v14772_v2 }
  0xae   :  { %7597 = vmatmul.mubr.msk.bf16.gmra.mrb[84].mxu0 %vm272_vm1, %v250_v10  ;;  %7707 = vmatmul.mubr.msk.bf16.gmra.mrb[84].mxu1 %vm272_vm1, %v113_v11  ;;  %v1251_v10 = vld [vmem:[%s14765_s0 + $0x2b] sm:$0xff] }
  0xaf   :  { %7600 = vmatprep.mubr.msk.bf16.mxu0 %vm9187_vm2, %v14772_v2  ;;  %7710 = vmatprep.mubr.msk.bf16.mxu1 %vm9187_vm2, %v14772_v2  ;;  %v1329_v15 = vpack.c.bf16 %v1251_v10, %v1250_v9 }
  0xb6   :  { %7601 = vmatmul.mubr.msk.bf16.gmra.mrb[88].mxu0 %vm272_vm1, %v251_v16  ;;  %7711 = vmatmul.mubr.msk.bf16.gmra.mrb[88].mxu1 %vm272_vm1, %v114_v17  ;;  %v6789_v17 = vld [vmem:[%s14766_s1 + $0x6] sm:$0x3] }
  0xb7   :  { %7604 = vmatprep.mubr.msk.bf16.mxu0 %vm9187_vm2, %v14772_v2  ;;  %7714 = vmatprep.mubr.msk.bf16.mxu1 %vm9187_vm2, %v14772_v2  ;;  %v2185_v20 = vsel %vm396_vm0, %v6789_v17, 0  ;;  %v1259_v17 = vld [vmem:[%s14765_s0 + $0x6b] sm:$0xff] }
  0xb8   :  { %8009 = vmatpush3.bf16.msra.mxu1 %v2185_v20 }
  0xb9   :  { %8340 = vmatprep.subr.bf16.mxu1 %v14772_v2 }
  0xbe   :  { %7605 = vmatmul.mubr.msk.bf16.gmra.mrb[92].mxu0 %vm272_vm1, %v252_v22  ;;  %7715 = vmatmul.mubr.msk.bf16.gmra.mrb[92].mxu1 %vm272_vm1, %v115_v23  ;;  %v6831_v23 = vld [vmem:[%s14766_s1 + $0x8] sm:$0x3] }
  0xbf   :  { %7608 = vmatprep.mubr.msk.bf16.mxu0 %vm9187_vm2, %v14772_v2  ;;  %7718 = vmatprep.mubr.msk.bf16.mxu1 %vm9187_vm2, %v14772_v2  ;;  %v2876_v24 = vsel %vm396_vm0, %v6831_v23, 0 }
  0xc6   :  { %7609 = vmatmul.mubr.msk.bf16.gmra.mrb[96].mxu0 %vm272_vm1, %v253_v28  ;;  %7719 = vmatmul.mubr.msk.bf16.gmra.mrb[96].mxu1 %vm272_vm1, %v116_v29  ;;  %v1253_v28 = vld [vmem:[%s14765_s0 + $0x3b] sm:$0xff] }
  0xc7   :  { %7612 = vmatprep.mubr.msk.bf16.mxu0 %vm9187_vm2, %v14772_v2  ;;  %7722 = vmatprep.mubr.msk.bf16.mxu1 %vm9187_vm2, %v14772_v2  ;;  %v1330_v33 = vpack.c.bf16 %v1253_v28, %v1252_v27 }
  0xce   :  { %7613 = vmatmul.mubr.msk.bf16.gmra.mrb[100].mxu0 %vm272_vm1, %v254_v34  ;;  %7723 = vmatmul.mubr.msk.bf16.gmra.mrb[100].mxu1 %vm272_vm1, %v117_v35 }
  0xcf   :  { %7616 = vmatprep.mubr.msk.bf16.mxu0 %vm9187_vm2, %v14772_v2  ;;  %7726 = vmatprep.mubr.msk.bf16.mxu1 %vm9187_vm2, %v14772_v2 }
  0xd6   :  { %7617 = vmatmul.mubr.msk.bf16.gmra.mrb[104].mxu0 %vm272_vm1, %v255_v40  ;;  %7727 = vmatmul.mubr.msk.bf16.gmra.mrb[104].mxu1 %vm272_vm1, %v118_v41  ;;  %v60_v40 = vld [vmem:[%s14765_s0 + $0x119] sm:$0xff]  ;;  %v1254_v41 = vld [vmem:[%s14765_s0 + $0x43] sm:$0xff] }
  0xd7   :  { %7730 = vmatprep.mubr.msk.bf16.mxu1 %vm9187_vm2, %v14772_v2  ;;  %7844 = vmatprep.mubr.msk.bf16.mxu0 %vm9187_vm2, %v14772_v2 }
  0xd9   :  { %v9743_v46 = vpop.f32.mrb[0].mxu0  ;;  %v9745_v47 = vpop.f32.mrb[0].mxu1 }
  0xda   :  { %14774 = vst [vmem:[#allocation5_spill] sm:$0xff] %v9745_v47  ;;  %v7514_v48 = vpop.f32.mrb[1].mxu0  ;;  %v7622_v51 = vpop.f32.mrb[1].mxu1 }
  0xdb   :  { %v9747_v52 = vpop.f32.mrb[2].mxu0  ;;  %v9749_v53 = vpop.f32.mrb[2].mxu1  ;;  %v123_v48 = vpack.c.bf16 %v60_v40, %v59_v39 }
  0xdc   :  { %14775 = vst [vmem:[#allocation6_spill] sm:$0xff] %v9749_v53  ;;  %v7515_v54 = vpop.f32.mrb[3].mxu0  ;;  %v7623_v55 = vpop.f32.mrb[3].mxu1 }
  0xde   :  { %7731 = vmatmul.mubr.msk.bf16.gmra.mrb[108].mxu1 %vm272_vm1, %v119_v49  ;;  %7845 = vmatmul.mubr.msk.bf16.vlgmr.msra.gmra.mrb[108].mxu0 %vm272_vm1, %v1327_v50  ;;  %v1331_v49 = vpack.c.bf16 %v1255_v42, %v1254_v41 }
  0xdf   :  { %7734 = vmatprep.mubr.msk.bf16.mxu1 %vm9187_vm2, %v14772_v2  ;;  %7848 = vmatprep.mubr.msk.bf16.mxu0 %vm9187_vm2, %v14772_v2 }
  0xe0   :  { %8175 = vmatpush3.bf16.msra.mxu0 %v2876_v24 }
  0xe1   :  { %v9769_v60 = vpop.f32.mrb[4].mxu0  ;;  %v9771_v61 = vpop.f32.mrb[4].mxu1  ;;  %8506 = vmatprep.subr.bf16.mxu0 %v14772_v2 }
  0xe2   :  { %14776 = vst [vmem:[#allocation7_spill] sm:$0xff] %v9771_v61  ;;  %v7518_v62 = vpop.f32.mrb[5].mxu0  ;;  %v7626_v1 = vpop.f32.mrb[5].mxu1 }
  0xe3   :  { %v9773_v3 = vpop.f32.mrb[6].mxu0  ;;  %v9775_v4 = vpop.f32.mrb[6].mxu1  ;;  %v1257_v62 = vld [vmem:[%s14765_s0 + $0x5b] sm:$0xff] }
  0xe4   :  { %14777 = vst [vmem:[#allocation8_spill] sm:$0xff] %v9775_v4  ;;  %v7519_v5 = vpop.f32.mrb[7].mxu0  ;;  %v7627_v6 = vpop.f32.mrb[7].mxu1 }
  0xe5   :  { %v124_v5 = vpack.c.bf16 %v62_v58, %v61_v57  ;;  %v1332_v6 = vpack.c.bf16 %v1257_v62, %v1256_v59  ;;  %v68_v57 = vld [vmem:[%s14765_s0 + $0x159] sm:$0xff]  ;;  %v1262_v58 = vld [vmem:[%s14765_s0 + $0x83] sm:$0xff]  ;;  %v1263_v59 = vld [vmem:[%s14765_s0 + $0x8b] sm:$0xff] }
  0xe6   :  { %7735 = vmatmul.mubr.msk.bf16.gmra.mrb[112].mxu1 %vm272_vm1, %v120_v63  ;;  %7849 = vmatmul.mubr.msk.bf16.gmra.mrb[112].mxu0 %vm272_vm1, %v1328_v0 }
  0xe7   :  { %7738 = vmatprep.mubr.msk.bf16.mxu1 %vm9187_vm2, %v14772_v2  ;;  %7852 = vmatprep.mubr.msk.bf16.mxu0 %vm9187_vm2, %v14772_v2 }
  0xe9   :  { %v9795_v11 = vpop.f32.mrb[8].mxu0  ;;  %v9797_v12 = vpop.f32.mrb[8].mxu1 }
  0xea   :  { %14778 = vst [vmem:[#allocation9_spill] sm:$0xff] %v9797_v12  ;;  %v7522_v13 = vpop.f32.mrb[9].mxu0  ;;  %v7630_v16 = vpop.f32.mrb[9].mxu1 }
  0xeb   :  { %v9802_v18 = vpop.f32.mrb[10].mxu0  ;;  %v9804_v19 = vpop.f32.mrb[10].mxu1  ;;  %v1258_v16 = vld [vmem:[%s14765_s0 + $0x63] sm:$0xff] }
  0xec   :  { %14779 = vst [vmem:[#allocation10_spill] sm:$0xff] %v9804_v19  ;;  %v7523_v21 = vpop.f32.mrb[11].mxu0  ;;  %v7631_v22 = vpop.f32.mrb[11].mxu1  ;;  %v1333_v24 = vpack.c.bf16 %v1259_v17, %v1258_v16  ;;  %v69_v17 = vld [vmem:[%s14765_s0 + $0x161] sm:$0xff] }
  0xee   :  { %7739 = vmatmul.mubr.msk.bf16.gmra.mrb[116].mxu1 %vm272_vm1, %v121_v14  ;;  %7853 = vmatmul.mubr.msk.bf16.gmra.mrb[116].mxu0 %vm272_vm1, %v1329_v15  ;;  %v63_v14 = vld [vmem:[%s14765_s0 + $0x131] sm:$0xff]  ;;  %v64_v15 = vld [vmem:[%s14765_s0 + $0x139] sm:$0xff] }
  0xef   :  { %7742 = vmatprep.mubr.msk.bf16.mxu1 %vm9187_vm2, %v14772_v2  ;;  %7856 = vmatprep.mubr.msk.bf16.mxu0 %vm9187_vm2, %v14772_v2  ;;  %v125_v23 = vpack.c.bf16 %v64_v15, %v63_v14 }
  0xf1   :  { %v9830_v29 = vpop.f32.mrb[12].mxu0  ;;  %v9832_v30 = vpop.f32.mrb[12].mxu1 }
  0xf2   :  { %14780 = vst [vmem:[#allocation11_spill] sm:$0xff] %v9832_v30  ;;  %v7526_v31 = vpop.f32.mrb[13].mxu0  ;;  %v7634_v34 = vpop.f32.mrb[13].mxu1 }
  0xf3   :  { %v9835_v35 = vpop.f32.mrb[14].mxu0  ;;  %v9837_v36 = vpop.f32.mrb[14].mxu1  ;;  %v1260_v34 = vld [vmem:[%s14765_s0 + $0x73] sm:$0xff] }
  0xf4   :  { %14781 = vst [vmem:[#allocation12_spill] sm:$0xff] %v9837_v36  ;;  %v7527_v37 = vpop.f32.mrb[15].mxu0  ;;  %v7635_v38 = vpop.f32.mrb[15].mxu1 }
  0xf5   :  { %v1261_v37 = vld [vmem:[%s14765_s0 + $0x7b] sm:$0xff] }
  0xf6   :  { %7743 = vmatmul.mubr.msk.bf16.gmra.mrb[120].mxu1 %vm272_vm1, %v122_v32  ;;  %7857 = vmatmul.mubr.msk.bf16.gmra.mrb[120].mxu0 %vm272_vm1, %v1330_v33  ;;  %v65_v32 = vld [vmem:[%s14765_s0 + $0x141] sm:$0xff]  ;;  %v66_v33 = vld [vmem:[%s14765_s0 + $0x149] sm:$0xff]  ;;  %v1334_v42 = vpack.c.bf16 %v1261_v37, %v1260_v34 }
  0xf7   :  { %7746 = vmatprep.mubr.msk.bf16.mxu1 %vm9187_vm2, %v14772_v2  ;;  %7860 = vmatprep.mubr.msk.bf16.mxu0 %vm9187_vm2, %v14772_v2  ;;  %v126_v41 = vpack.c.bf16 %v66_v33, %v65_v32 }
  0xf9   :  { %v9857_v43 = vpop.f32.mrb[16].mxu0  ;;  %v9859_v44 = vpop.f32.mrb[16].mxu1 }
  0xfa   :  { %14782 = vst [vmem:[#allocation13_spill] sm:$0xff] %v9859_v44  ;;  %v7530_v45 = vpop.f32.mrb[17].mxu0  ;;  %v7638_v50 = vpop.f32.mrb[17].mxu1 }
  0xfb   :  { %v9861_v51 = vpop.f32.mrb[18].mxu0  ;;  %v9863_v54 = vpop.f32.mrb[18].mxu1 }
  0xfc   :  { %14783 = vst [vmem:[#allocation14_spill] sm:$0xff] %v9863_v54  ;;  %v7531_v55 = vpop.f32.mrb[19].mxu0  ;;  %v7639_v56 = vpop.f32.mrb[19].mxu1 }
  0xfd   :  { %v67_v56 = vld [vmem:[%s14765_s0 + $0x151] sm:$0xff] }
  0xfe   :  { %7747 = vmatmul.mubr.msk.bf16.gmra.mrb[124].mxu1 %vm272_vm1, %v123_v48  ;;  %7861 = vmatmul.mubr.msk.bf16.gmra.mrb[124].mxu0 %vm272_vm1, %v1331_v49 }
  0xff   :  { %7750 = vmatprep.mubr.msk.bf16.mxu1 %vm9187_vm2, %v14772_v2  ;;  %7864 = vmatprep.mubr.msk.bf16.mxu0 %vm9187_vm2, %v14772_v2 }
 0x101   :  { %v9883_v63 = vpop.f32.mrb[20].mxu0  ;;  %v9885_v0 = vpop.f32.mrb[20].mxu1 }
 0x102   :  { %14784 = vst [vmem:[#allocation15_spill] sm:$0xff] %v9885_v0  ;;  %v7534_v1 = vpop.f32.mrb[21].mxu0  ;;  %v7642_v7 = vpop.f32.mrb[21].mxu1 }
 0x103   :  { %v9887_v8 = vpop.f32.mrb[22].mxu0  ;;  %v9889_v9 = vpop.f32.mrb[22].mxu1  ;;  %v1335_v7 = vpack.c.bf16 %v1263_v59, %v1262_v58 }
 0x104   :  { %14785 = vst [vmem:[#allocation16_spill] sm:$0xff] %v9889_v9  ;;  %v7535_v10 = vpop.f32.mrb[23].mxu0  ;;  %v7643_v13 = vpop.f32.mrb[23].mxu1 }
 0x106   :  { %7751 = vmatmul.mubr.msk.bf16.gmra.mrb[128].mxu1 %vm272_vm1, %v124_v5  ;;  %7865 = vmatmul.mubr.msk.bf16.gmra.mrb[128].mxu0 %vm272_vm1, %v1332_v6  ;;  %v127_v6 = vpack.c.bf16 %v68_v57, %v67_v56  ;;  %v1267_v56 = vld [vmem:[%s14765_s0 + $0xab] sm:$0xff] }
 0x107   :  { %7754 = vmatprep.mubr.msk.bf16.mxu1 %vm9187_vm2, %v14772_v2  ;;  %7868 = vmatprep.mubr.msk.bf16.mxu0 %vm9187_vm2, %v14772_v2 }
 0x109   :  { %v9909_v20 = vpop.f32.mrb[24].mxu0  ;;  %v9911_v21 = vpop.f32.mrb[24].mxu1 }
 0x10a   :  { %14786 = vst [vmem:[#allocation17_spill] sm:$0xff] %v9911_v21  ;;  %v7538_v22 = vpop.f32.mrb[25].mxu0  ;;  %v7646_v25 = vpop.f32.mrb[25].mxu1 }
 0x10b   :  { %v9913_v26 = vpop.f32.mrb[26].mxu0  ;;  %v9915_v27 = vpop.f32.mrb[26].mxu1  ;;  %v70_v22 = vld [vmem:[%s14765_s0 + $0x169] sm:$0xff] }
 0x10c   :  { %14787 = vst [vmem:[#allocation18_spill] sm:$0xff] %v9915_v27  ;;  %v7539_v28 = vpop.f32.mrb[27].mxu0  ;;  %v7647_v31 = vpop.f32.mrb[27].mxu1  ;;  %v128_v32 = vpack.c.bf16 %v70_v22, %v69_v17  ;;  %v73_v22 = vld [vmem:[%s14765_s0 + $0x181] sm:$0xff] }
 0x10e   :  { %7755 = vmatmul.mubr.msk.bf16.gmra.mrb[132].mxu1 %vm272_vm1, %v125_v23  ;;  %7869 = vmatmul.mubr.msk.bf16.gmra.mrb[132].mxu0 %vm272_vm1, %v1333_v24  ;;  %v1264_v23 = vld [vmem:[%s14765_s0 + $0x93] sm:$0xff]  ;;  %v1265_v24 = vld [vmem:[%s14765_s0 + $0x9b] sm:$0xff] }
 0x10f   :  { %7758 = vmatprep.mubr.msk.bf16.mxu1 %vm9187_vm2, %v14772_v2  ;;  %7872 = vmatprep.mubr.msk.bf16.mxu0 %vm9187_vm2, %v14772_v2  ;;  %v1336_v33 = vpack.c.bf16 %v1265_v24, %v1264_v23  ;;  %v74_v23 = vld [vmem:[%s14765_s0 + $0x189] sm:$0xff]  ;;  %v1268_v24 = vld [vmem:[%s14765_s0 + $0xb3] sm:$0xff] }
 0x111   :  { %v9935_v38 = vpop.f32.mrb[28].mxu0  ;;  %v9937_v39 = vpop.f32.mrb[28].mxu1 }
 0x112   :  { %14788 = vst [vmem:[#allocation19_spill] sm:$0xff] %v9937_v39  ;;  %v7542_v40 = vpop.f32.mrb[29].mxu0  ;;  %v7650_v45 = vpop.f32.mrb[29].mxu1 }
 0x113   :  { %v9939_v48 = vpop.f32.mrb[30].mxu0  ;;  %v9941_v49 = vpop.f32.mrb[30].mxu1  ;;  %v71_v45 = vld [vmem:[%s14765_s0 + $0x171] sm:$0xff] }
 0x114   :  { %14789 = vst [vmem:[#allocation20_spill] sm:$0xff] %v9941_v49  ;;  %v7543_v50 = vpop.f32.mrb[31].mxu0  ;;  %v7651_v55 = vpop.f32.mrb[31].mxu1 }
 0x115   :  { %v72_v50 = vld [vmem:[%s14765_s0 + $0x179] sm:$0xff]  ;;  %v1266_v55 = vld [vmem:[%s14765_s0 + $0xa3] sm:$0xff] }
 0x116   :  { %7759 = vmatmul.mubr.msk.bf16.gmra.mrb[136].mxu1 %vm272_vm1, %v126_v41  ;;  %7873 = vmatmul.mubr.msk.bf16.gmra.mrb[136].mxu0 %vm272_vm1, %v1334_v42 }
 0x117   :  { %7762 = vmatprep.mubr.msk.bf16.mxu1 %vm9187_vm2, %v14772_v2  ;;  %7876 = vmatprep.mubr.msk.bf16.mxu0 %vm9187_vm2, %v14772_v2 }
 0x119   :  { %v9961_v62 = vpop.f32.mrb[32].mxu0  ;;  %v9963_v1 = vpop.f32.mrb[32].mxu1 }
 0x11a   :  { %14790 = vst [vmem:[#allocation21_spill] sm:$0xff] %v9963_v1  ;;  %v7546_v5 = vpop.f32.mrb[33].mxu0  ;;  %v7654_v10 = vpop.f32.mrb[33].mxu1 }
 0x11b   :  { %v9965_v13 = vpop.f32.mrb[34].mxu0  ;;  %v9967_v14 = vpop.f32.mrb[34].mxu1  ;;  %v129_v5 = vpack.c.bf16 %v72_v50, %v71_v45 }
 0x11c   :  { %14791 = vst [vmem:[#allocation22_spill] sm:$0xff] %v9967_v14  ;;  %v7547_v15 = vpop.f32.mrb[35].mxu0  ;;  %v7655_v16 = vpop.f32.mrb[35].mxu1 }
 0x11e   :  { %7763 = vmatmul.mubr.msk.bf16.gmra.mrb[140].mxu1 %vm272_vm1, %v127_v6  ;;  %7877 = vmatmul.mubr.msk.bf16.gmra.mrb[140].mxu0 %vm272_vm1, %v1335_v7  ;;  %v1337_v6 = vpack.c.bf16 %v1267_v56, %v1266_v55 }
 0x11f   :  { %7766 = vmatprep.mubr.msk.bf16.mxu1 %vm9187_vm2, %v14772_v2  ;;  %7880 = vmatprep.mubr.msk.bf16.mxu0 %vm9187_vm2, %v14772_v2 }
 0x121   :  { %v9987_v25 = vpop.f32.mrb[36].mxu0  ;;  %v9989_v28 = vpop.f32.mrb[36].mxu1 }
 0x122   :  { %14792 = vst [vmem:[#allocation23_spill] sm:$0xff] %v9989_v28  ;;  %v7550_v31 = vpop.f32.mrb[37].mxu0  ;;  %v7658_v34 = vpop.f32.mrb[37].mxu1 }
 0x123   :  { %v9991_v37 = vpop.f32.mrb[38].mxu0  ;;  %v9993_v40 = vpop.f32.mrb[38].mxu1  ;;  %v1269_v31 = vld [vmem:[%s14765_s0 + $0xbb] sm:$0xff] }
 0x124   :  { %14793 = vst [vmem:[#allocation24_spill] sm:$0xff] %v9993_v40  ;;  %v7551_v41 = vpop.f32.mrb[39].mxu0  ;;  %v7659_v42 = vpop.f32.mrb[39].mxu1 }
 0x125   :  { %v130_v41 = vpack.c.bf16 %v74_v23, %v73_v22  ;;  %v1338_v42 = vpack.c.bf16 %v1269_v31, %v1268_v24 }
 0x126   :  { %7767 = vmatmul.mubr.msk.bf16.gmra.mrb[144].mxu1 %vm272_vm1, %v128_v32  ;;  %7881 = vmatmul.mubr.msk.bf16.gmra.mrb[144].mxu0 %vm272_vm1, %v1336_v33 }
 0x127   :  { %7770 = vmatprep.mubr.msk.bf16.mxu1 %vm9187_vm2, %v14772_v2  ;;  %7884 = vmatprep.mubr.msk.bf16.mxu0 %vm9187_vm2, %v14772_v2 }
 0x129   :  { %v10013_v57 = vpop.f32.mrb[40].mxu0  ;;  %v10015_v58 = vpop.f32.mrb[40].mxu1 }
 0x12a   :  { %14794 = vst [vmem:[#allocation25_spill] sm:$0xff] %v10015_v58  ;;  %v7554_v59 = vpop.f32.mrb[41].mxu0  ;;  %v7662_v7 = vpop.f32.mrb[41].mxu1 }
 0x12b   :  { %v10017_v10 = vpop.f32.mrb[42].mxu0  ;;  %v10019_v15 = vpop.f32.mrb[42].mxu1  ;;  %v1270_v7 = vld [vmem:[%s14765_s0 + $0xc3] sm:$0xff] }
 0x12c   :  { %14795 = vst [vmem:[#allocation26_spill] sm:$0xff] %v10019_v15  ;;  %v7555_v16 = vpop.f32.mrb[43].mxu0  ;;  %v7663_v17 = vpop.f32.mrb[43].mxu1 }
 0x12d   :  { %v1271_v16 = vld [vmem:[%s14765_s0 + $0xcb] sm:$0xff] }
 0x12e   :  { %7771 = vmatmul.mubr.msk.bf16.gmra.mrb[148].mxu1 %vm272_vm1, %v129_v5  ;;  %7885 = vmatmul.mubr.msk.bf16.gmra.mrb[148].mxu0 %vm272_vm1, %v1337_v6  ;;  %v75_v5 = vld [vmem:[%s14765_s0 + $0x191] sm:$0xff]  ;;  %v76_v6 = vld [vmem:[%s14765_s0 + $0x199] sm:$0xff]  ;;  %v1339_v31 = vpack.c.bf16 %v1271_v16, %v1270_v7 }
 0x12f   :  { %7774 = vmatprep.mubr.msk.bf16.mxu1 %vm9187_vm2, %v14772_v2  ;;  %7888 = vmatprep.mubr.msk.bf16.mxu0 %vm9187_vm2, %v14772_v2  ;;  %v131_v24 = vpack.c.bf16 %v76_v6, %v75_v5  ;;  %v78_v5 = vld [vmem:[%s14765_s0 + $0x1a9] sm:$0xff]  ;;  %v1272_v6 = vld [vmem:[%s14765_s0 + $0xd3] sm:$0xff]  ;;  %v1273_v7 = vld [vmem:[%s14765_s0 + $0xdb] sm:$0xff] }
 0x131   :  { %v10039_v32 = vpop.f32.mrb[44].mxu0  ;;  %v10041_v33 = vpop.f32.mrb[44].mxu1 }
 0x132   :  { %14796 = vst [vmem:[#allocation27_spill] sm:$0xff] %v10041_v33  ;;  %v7558_v34 = vpop.f32.mrb[45].mxu0  ;;  %v7666_v45 = vpop.f32.mrb[45].mxu1  ;;  %v14801_v33 = vmov 0.0  }
 0x133   :  { %v10043_v50 = vpop.f32.mrb[46].mxu0  ;;  %v10045_v55 = vpop.f32.mrb[46].mxu1 }
 0x134   :  { %14797 = vst [vmem:[#allocation28_spill] sm:$0xff] %v10045_v55  ;;  %v7559_v56 = vpop.f32.mrb[47].mxu0  ;;  %v7667_v59 = vpop.f32.mrb[47].mxu1  ;;  %v79_v55 = vld [vmem:[%s14765_s0 + $0x1b1] sm:$0xff] }
 0x135   :  { %v77_v59 = vld [vmem:[%s14765_s0 + $0x1a1] sm:$0xff] }
 0x136   :  { %7775 = vmatmul.mubr.msk.bf16.gmra.mrb[152].mxu1 %vm272_vm1, %v130_v41  ;;  %7889 = vmatmul.mubr.msk.bf16.gmra.mrb[152].mxu0 %vm272_vm1, %v1338_v42 }
 0x137   :  { %7778 = vmatprep.mubr.msk.bf16.mxu1 %vm9187_vm2, %v14772_v2  ;;  %7892 = vmatprep.mubr.msk.bf16.mxu0 %vm9187_vm2, %v14772_v2 }
 0x139   :  { %v10065_v17 = vpop.f32.mrb[48].mxu0  ;;  %v10067_v22 = vpop.f32.mrb[48].mxu1 }
 0x13a   :  { %14798 = vst [vmem:[#allocation29_spill] sm:$0xff] %v10067_v22  ;;  %v7562_v23 = vpop.f32.mrb[49].mxu0  ;;  %v7670_v34 = vpop.f32.mrb[49].mxu1 }
 0x13b   :  { %v10069_v41 = vpop.f32.mrb[50].mxu0  ;;  %v10071_v42 = vpop.f32.mrb[50].mxu1  ;;  %v132_v34 = vpack.c.bf16 %v78_v5, %v77_v59 }
 0x13c   :  { %14799 = vst [vmem:[#allocation30_spill] sm:$0xff] %v10071_v42  ;;  %v7563_v45 = vpop.f32.mrb[51].mxu0  ;;  %v7671_v56 = vpop.f32.mrb[51].mxu1 }
 0x13d   :  { %v1340_v45 = vpack.c.bf16 %v1273_v7, %v1272_v6 }
 0x13e   :  { %7779 = vmatmul.mubr.msk.bf16.gmra.mrb[156].mxu1 %vm272_vm1, %v131_v24  ;;  %7893 = vmatmul.mubr.msk.bf16.gmra.mrb[156].mxu0 %vm272_vm1, %v1339_v31 }
 0x13f   :  { %7782 = vmatprep.mubr.msk.bf16.mxu1 %vm9187_vm2, %v14772_v2  ;;  %7896 = vmatprep.mubr.msk.bf16.mxu0 %vm9187_vm2, %v14772_v2 }
 0x141   :  { %v10091_v16 = vpop.f32.mrb[52].mxu0  ;;  %v10093_v23 = vpop.f32.mrb[52].mxu1 }
 0x142   :  { %14800 = vst [vmem:[#allocation31_spill] sm:$0xff] %v10093_v23  ;;  %v7566_v24 = vpop.f32.mrb[53].mxu0  ;;  %v7674_v31 = vpop.f32.mrb[53].mxu1 }
 0x143   :  { %v10095_v56 = vpop.f32.mrb[54].mxu0  ;;  %v757_v2 = vpop.f32.mrb[54].mxu1 }
 0x144   :  { %v7567_v42 = vpop.f32.mrb[55].mxu0  ;;  %v7675_v22 = vpop.f32.mrb[55].mxu1  ;;  %v80_v2 = vld [vmem:[%s14765_s0 + $0x1b9] sm:$0xff] }
 0x145   :  { %v1274_v22 = vld [vmem:[%s14765_s0 + $0xe3] sm:$0xff]  ;;  %v1275_v42 = vld [vmem:[%s14765_s0 + $0xeb] sm:$0xff]  ;;  %v133_v31 = vpack.c.bf16 %v80_v2, %v79_v55 }
 0x146   :  { %7783 = vmatmul.mubr.msk.bf16.gmra.mrb[160].mxu1 %vm272_vm1, %v132_v34  ;;  %7897 = vmatmul.mubr.msk.bf16.gmra.mrb[160].mxu0 %vm272_vm1, %v1340_v45  ;;  %v1341_v34 = vpack.c.bf16 %v1275_v42, %v1274_v22 }
 0x147   :  { %7786 = vmatprep.mubr.msk.bf16.mxu1 %vm9187_vm2, %v14801_v33  ;;  %7900 = vmatprep.mubr.msk.bf16.mxu0 %vm9187_vm2, %v14801_v33 }
 0x149   :  { %v10115_v59 = vpop.f32.mrb[56].mxu0  ;;  %v920_v5 = vpop.f32.mrb[56].mxu1 }
 0x14a   :  { %v10118_v6 = vadd.f32 %v920_v5, %v9743_v46  ;;  %v7570_v7 = vpop.f32.mrb[57].mxu0  ;;  %v7680_v24 = vpop.f32.mrb[57].mxu1  ;;  %v81_v46 = vld [vmem:[%s14765_s0 + $0x1c1] sm:$0xff] }
 0x14b   :  { %v10120_v45 = vpop.f32.mrb[58].mxu0  ;;  %v923_v23 = vpop.f32.mrb[58].mxu1 }
 0x14c   :  { %v10123_v15 = vadd.f32 %v923_v23, %v9747_v52  ;;  %v7571_v58 = vpop.f32.mrb[59].mxu0  ;;  %v7681_v40 = vpop.f32.mrb[59].mxu1  ;;  %v82_v52 = vld [vmem:[%s14765_s0 + $0x1c9] sm:$0xff] }
 0x14d   :  { %v1276_v40 = vld [vmem:[%s14765_s0 + $0xf3] sm:$0xff]  ;;  %v1277_v58 = vld [vmem:[%s14765_s0 + $0xfb] sm:$0xff]  ;;  %v134_v5 = vpack.c.bf16 %v82_v52, %v81_v46 }
 0x14e   :  { %7787 = vmatmul.mubr.msk.bf16.gmra.mrb[164].mxu1 %vm272_vm1, %v133_v31  ;;  %7901 = vmatmul.mubr.msk.bf16.gmra.mrb[164].mxu0 %vm272_vm1, %v1341_v34  ;;  %v1342_v7 = vpack.c.bf16 %v1277_v58, %v1276_v40 }
 0x14f   :  { %7790 = vmatprep.mubr.msk.bf16.mxu1 %vm9187_vm2, %v14801_v33  ;;  %7904 = vmatprep.mubr.msk.bf16.mxu0 %vm9187_vm2, %v14801_v33 }
 0x151   :  { %v10143_v55 = vpop.f32.mrb[60].mxu0  ;;  %v928_v23 = vpop.f32.mrb[60].mxu1 }
 0x152   :  { %v10146_v2 = vadd.f32 %v928_v23, %v9769_v60  ;;  %v7574_v22 = vpop.f32.mrb[61].mxu0  ;;  %v7684_v42 = vpop.f32.mrb[61].mxu1  ;;  %v83_v60 = vld [vmem:[%s14765_s0 + $0x1d1] sm:$0xff] }
 0x153   :  { %v10148_v24 = vpop.f32.mrb[62].mxu0  ;;  %v931_v31 = vpop.f32.mrb[62].mxu1 }
 0x154   :  { %v10151_v34 = vadd.f32 %v931_v31, %v9773_v3  ;;  %v7575_v28 = vpop.f32.mrb[63].mxu0  ;;  %v7685_v14 = vpop.f32.mrb[63].mxu1  ;;  %v84_v3 = vld [vmem:[%s14765_s0 + $0x1d9] sm:$0xff] }
 0x155   :  { %v1278_v14 = vld [vmem:[%s14765_s0 + $0x103] sm:$0xff]  ;;  %v1279_v28 = vld [vmem:[%s14765_s0 + $0x10b] sm:$0xff]  ;;  %v135_v22 = vpack.c.bf16 %v84_v3, %v83_v60 }
 0x156   :  { %7791 = vmatmul.mubr.msk.bf16.gmra.mrb[168].mxu1 %vm272_vm1, %v134_v5  ;;  %7905 = vmatmul.mubr.msk.bf16.gmra.mrb[168].mxu0 %vm272_vm1, %v1342_v7  ;;  %v1343_v42 = vpack.c.bf16 %v1279_v28, %v1278_v14 }
 0x157   :  { %7794 = vmatprep.mubr.msk.bf16.mxu1 %vm9187_vm2, %v14801_v33  ;;  %7908 = vmatprep.mubr.msk.bf16.mxu0 %vm9187_vm2, %v14801_v33 }
 0x159   :  { %v10171_v46 = vpop.f32.mrb[64].mxu0  ;;  %v936_v52 = vpop.f32.mrb[64].mxu1 }
 0x15a   :  { %v10174_v40 = vadd.f32 %v936_v52, %v9795_v11  ;;  %v7578_v58 = vpop.f32.mrb[65].mxu0  ;;  %v7688_v23 = vpop.f32.mrb[65].mxu1  ;;  %v85_v11 = vld [vmem:[%s14765_s0 + $0x1e1] sm:$0xff] }
 0x15b   :  { %v10176_v5 = vpop.f32.mrb[66].mxu0  ;;  %v939_v7 = vpop.f32.mrb[66].mxu1 }
 0x15c   :  { %v10179_v31 = vadd.f32 %v939_v7, %v9802_v18  ;;  %v7579_v1 = vpop.f32.mrb[67].mxu0  ;;  %v7689_v49 = vpop.f32.mrb[67].mxu1  ;;  %v86_v18 = vld [vmem:[%s14765_s0 + $0x1e9] sm:$0xff] }
 0x15d   :  { %v1280_v49 = vld [vmem:[%s14765_s0 + $0x113] sm:$0xff]  ;;  %v1281_v1 = vld [vmem:[%s14765_s0 + $0x11b] sm:$0xff]  ;;  %v136_v58 = vpack.c.bf16 %v86_v18, %v85_v11 }
 0x15e   :  { %7795 = vmatmul.mubr.msk.bf16.gmra.mrb[172].mxu1 %vm272_vm1, %v135_v22  ;;  %7909 = vmatmul.mubr.msk.bf16.gmra.mrb[172].mxu0 %vm272_vm1, %v1343_v42  ;;  %v1344_v23 = vpack.c.bf16 %v1281_v1, %v1280_v49 }
 0x15f   :  { %7798 = vmatprep.mubr.msk.bf16.mxu1 %vm9187_vm2, %v14801_v33  ;;  %7912 = vmatprep.mubr.msk.bf16.mxu0 %vm9187_vm2, %v14801_v33 }
 0x161   :  { %v10199_v60 = vpop.f32.mrb[68].mxu0  ;;  %v944_v3 = vpop.f32.mrb[68].mxu1 }
 0x162   :  { %v10202_v14 = vadd.f32 %v944_v3, %v9830_v29  ;;  %v7582_v28 = vpop.f32.mrb[69].mxu0  ;;  %v7692_v52 = vpop.f32.mrb[69].mxu1  ;;  %v87_v29 = vld [vmem:[%s14765_s0 + $0x1f1] sm:$0xff] }
 0x163   :  { %v10204_v22 = vpop.f32.mrb[70].mxu0  ;;  %v947_v42 = vpop.f32.mrb[70].mxu1 }
 0x164   :  { %v10207_v7 = vadd.f32 %v947_v42, %v9835_v35  ;;  %v7583_v39 = vpop.f32.mrb[71].mxu0  ;;  %v7693_v27 = vpop.f32.mrb[71].mxu1  ;;  %v88_v35 = vld [vmem:[%s14765_s0 + $0x1f9] sm:$0xff] }
 0x165   :  { %v1282_v27 = vld [vmem:[%s14765_s0 + $0x123] sm:$0xff]  ;;  %v1283_v39 = vld [vmem:[%s14765_s0 + $0x12b] sm:$0xff]  ;;  %v137_v28 = vpack.c.bf16 %v88_v35, %v87_v29 }
 0x166   :  { %7799 = vmatmul.mubr.msk.bf16.gmra.mrb[176].mxu1 %vm272_vm1, %v136_v58  ;;  %7913 = vmatmul.mubr.msk.bf16.gmra.mrb[176].mxu0 %vm272_vm1, %v1344_v23  ;;  %v1345_v52 = vpack.c.bf16 %v1283_v39, %v1282_v27 }
 0x167   :  { %7802 = vmatprep.mubr.msk.bf16.mxu1 %vm9187_vm2, %v14801_v33  ;;  %7916 = vmatprep.mubr.msk.bf16.mxu0 %vm9187_vm2, %v14801_v33 }
 0x169   :  { %v10227_v11 = vpop.f32.mrb[72].mxu0  ;;  %v952_v18 = vpop.f32.mrb[72].mxu1 }
 0x16a   :  { %v10230_v49 = vadd.f32 %v952_v18, %v9857_v43  ;;  %v7586_v1 = vpop.f32.mrb[73].mxu0  ;;  %v7696_v3 = vpop.f32.mrb[73].mxu1  ;;  %v89_v43 = vld [vmem:[%s14765_s0 + $0x201] sm:$0xff] }
 0x16b   :  { %v10232_v58 = vpop.f32.mrb[74].mxu0  ;;  %v955_v23 = vpop.f32.mrb[74].mxu1 }
 0x16c   :  { %v10235_v42 = vadd.f32 %v955_v23, %v9861_v51  ;;  %v7587_v21 = vpop.f32.mrb[75].mxu0  ;;  %v7697_v9 = vpop.f32.mrb[75].mxu1  ;;  %v90_v51 = vld [vmem:[%s14765_s0 + $0x209] sm:$0xff] }
 0x16d   :  { %v1284_v9 = vld [vmem:[%s14765_s0 + $0x133] sm:$0xff]  ;;  %v1285_v21 = vld [vmem:[%s14765_s0 + $0x13b] sm:$0xff]  ;;  %v138_v1 = vpack.c.bf16 %v90_v51, %v89_v43 }
 0x16e   :  { %7803 = vmatmul.mubr.msk.bf16.gmra.mrb[180].mxu1 %vm272_vm1, %v137_v28  ;;  %7917 = vmatmul.mubr.msk.bf16.gmra.mrb[180].mxu0 %vm272_vm1, %v1345_v52  ;;  %v1346_v3 = vpack.c.bf16 %v1285_v21, %v1284_v9 }
 0x16f   :  { %7806 = vmatprep.mubr.msk.bf16.mxu1 %vm9187_vm2, %v14801_v33  ;;  %7920 = vmatprep.mubr.msk.bf16.mxu0 %vm9187_vm2, %v14801_v33 }
 0x171   :  { %v10255_v29 = vpop.f32.mrb[76].mxu0  ;;  %v960_v35 = vpop.f32.mrb[76].mxu1 }
 0x172   :  { %v10258_v27 = vadd.f32 %v960_v35, %v9883_v63  ;;  %v7590_v39 = vpop.f32.mrb[77].mxu0  ;;  %v7700_v18 = vpop.f32.mrb[77].mxu1  ;;  %v91_v63 = vld [vmem:[%s14765_s0 + $0x211] sm:$0xff] }
 0x173   :  { %v10260_v28 = vpop.f32.mrb[78].mxu0  ;;  %v963_v52 = vpop.f32.mrb[78].mxu1 }
 0x174   :  { %v10263_v23 = vadd.f32 %v963_v52, %v9887_v8  ;;  %v7591_v0 = vpop.f32.mrb[79].mxu0  ;;  %v7701_v54 = vpop.f32.mrb[79].mxu1  ;;  %v92_v8 = vld [vmem:[%s14765_s0 + $0x219] sm:$0xff] }
 0x175   :  { %v1286_v54 = vld [vmem:[%s14765_s0 + $0x143] sm:$0xff]  ;;  %v1287_v0 = vld [vmem:[%s14765_s0 + $0x14b] sm:$0xff]  ;;  %v139_v39 = vpack.c.bf16 %v92_v8, %v91_v63 }
 0x176   :  { %7807 = vmatmul.mubr.msk.bf16.gmra.mrb[184].mxu1 %vm272_vm1, %v138_v1  ;;  %7921 = vmatmul.mubr.msk.bf16.gmra.mrb[184].mxu0 %vm272_vm1, %v1346_v3  ;;  %v1347_v18 = vpack.c.bf16 %v1287_v0, %v1286_v54 }
 0x177   :  { %7810 = vmatprep.mubr.msk.bf16.mxu1 %vm9187_vm2, %v14801_v33  ;;  %7924 = vmatprep.mubr.msk.bf16.mxu0 %vm9187_vm2, %v14801_v33 }
 0x179   :  { %v10283_v43 = vpop.f32.mrb[80].mxu0  ;;  %v968_v51 = vpop.f32.mrb[80].mxu1 }
 0x17a   :  { %v10286_v9 = vadd.f32 %v968_v51, %v9909_v20  ;;  %v7594_v21 = vpop.f32.mrb[81].mxu0  ;;  %v7704_v35 = vpop.f32.mrb[81].mxu1  ;;  %v93_v20 = vld [vmem:[%s14765_s0 + $0x221] sm:$0xff] }
 0x17b   :  { %v10288_v1 = vpop.f32.mrb[82].mxu0  ;;  %v971_v3 = vpop.f32.mrb[82].mxu1 }
 0x17c   :  { %v10291_v52 = vadd.f32 %v971_v3, %v9913_v26  ;;  %v7595_v44 = vpop.f32.mrb[83].mxu0  ;;  %v7705_v36 = vpop.f32.mrb[83].mxu1  ;;  %v94_v26 = vld [vmem:[%s14765_s0 + $0x229] sm:$0xff] }
 0x17d   :  { %v1288_v36 = vld [vmem:[%s14765_s0 + $0x153] sm:$0xff]  ;;  %v1289_v44 = vld [vmem:[%s14765_s0 + $0x15b] sm:$0xff]  ;;  %v140_v21 = vpack.c.bf16 %v94_v26, %v93_v20 }
 0x17e   :  { %7811 = vmatmul.mubr.msk.bf16.gmra.mrb[188].mxu1 %vm272_vm1, %v139_v39  ;;  %7925 = vmatmul.mubr.msk.bf16.gmra.mrb[188].mxu0 %vm272_vm1, %v1347_v18  ;;  %v1348_v35 = vpack.c.bf16 %v1289_v44, %v1288_v36 }
 0x17f   :  { %7814 = vmatprep.mubr.msk.bf16.mxu1 %vm9187_vm2, %v14801_v33  ;;  %7928 = vmatprep.mubr.msk.bf16.mxu0 %vm9187_vm2, %v14801_v33 }
 0x181   :  { %v10311_v63 = vpop.f32.mrb[84].mxu0  ;;  %v976_v8 = vpop.f32.mrb[84].mxu1 }
 0x182   :  { %v10314_v54 = vadd.f32 %v976_v8, %v9935_v38  ;;  %v7598_v0 = vpop.f32.mrb[85].mxu0  ;;  %v7708_v51 = vpop.f32.mrb[85].mxu1  ;;  %v95_v38 = vld [vmem:[%s14765_s0 + $0x231] sm:$0xff] }
 0x183   :  { %v10316_v39 = vpop.f32.mrb[86].mxu0  ;;  %v979_v18 = vpop.f32.mrb[86].mxu1 }
 0x184   :  { %v10319_v3 = vadd.f32 %v979_v18, %v9939_v48  ;;  %v7599_v30 = vpop.f32.mrb[87].mxu0  ;;  %v7709_v19 = vpop.f32.mrb[87].mxu1  ;;  %v96_v48 = vld [vmem:[%s14765_s0 + $0x239] sm:$0xff] }
 0x185   :  { %v1290_v19 = vld [vmem:[%s14765_s0 + $0x163] sm:$0xff]  ;;  %v1291_v30 = vld [vmem:[%s14765_s0 + $0x16b] sm:$0xff]  ;;  %v141_v0 = vpack.c.bf16 %v96_v48, %v95_v38 }
 0x186   :  { %7815 = vmatmul.mubr.msk.bf16.gmra.mrb[192].mxu1 %vm272_vm1, %v140_v21  ;;  %7929 = vmatmul.mubr.msk.bf16.gmra.mrb[192].mxu0 %vm272_vm1, %v1348_v35  ;;  %v1349_v51 = vpack.c.bf16 %v1291_v30, %v1290_v19 }
 0x187   :  { %7818 = vmatprep.mubr.msk.bf16.mxu1 %vm9187_vm2, %v14801_v33  ;;  %7932 = vmatprep.mubr.msk.bf16.mxu0 %vm9187_vm2, %v14801_v33 }
 0x189   :  { %v10339_v20 = vpop.f32.mrb[88].mxu0  ;;  %v984_v26 = vpop.f32.mrb[88].mxu1 }
 0x18a   :  { %v10342_v36 = vadd.f32 %v984_v26, %v9961_v62  ;;  %v7602_v44 = vpop.f32.mrb[89].mxu0  ;;  %v7712_v8 = vpop.f32.mrb[89].mxu1  ;;  %v97_v62 = vld [vmem:[%s14765_s0 + $0x241] sm:$0xff] }
 0x18b   :  { %v10344_v21 = vpop.f32.mrb[90].mxu0  ;;  %v987_v35 = vpop.f32.mrb[90].mxu1 }
 0x18c   :  { %v10347_v18 = vadd.f32 %v987_v35, %v9965_v13  ;;  %v7603_v12 = vpop.f32.mrb[91].mxu0  ;;  %v7713_v4 = vpop.f32.mrb[91].mxu1  ;;  %v98_v13 = vld [vmem:[%s14765_s0 + $0x249] sm:$0xff] }
 0x18d   :  { %v1292_v4 = vld [vmem:[%s14765_s0 + $0x173] sm:$0xff]  ;;  %v1293_v12 = vld [vmem:[%s14765_s0 + $0x17b] sm:$0xff]  ;;  %v142_v44 = vpack.c.bf16 %v98_v13, %v97_v62 }
 0x18e   :  { %7819 = vmatmul.mubr.msk.bf16.gmra.mrb[196].mxu1 %vm272_vm1, %v141_v0  ;;  %7933 = vmatmul.mubr.msk.bf16.gmra.mrb[196].mxu0 %vm272_vm1, %v1349_v51  ;;  %v1350_v8 = vpack.c.bf16 %v1293_v12, %v1292_v4 }
 0x18f   :  { %7822 = vmatprep.mubr.msk.bf16.mxu1 %vm9187_vm2, %v14801_v33  ;;  %7936 = vmatprep.mubr.msk.bf16.mxu0 %vm9187_vm2, %v14801_v33 }
 0x191   :  { %v10367_v38 = vpop.f32.mrb[92].mxu0  ;;  %v992_v48 = vpop.f32.mrb[92].mxu1 }
 0x192   :  { %v10370_v19 = vadd.f32 %v992_v48, %v9987_v25  ;;  %v7606_v30 = vpop.f32.mrb[93].mxu0  ;;  %v7716_v26 = vpop.f32.mrb[93].mxu1  ;;  %v99_v25 = vld [vmem:[%s14765_s0 + $0x251] sm:$0xff] }
 0x193   :  { %v10372_v0 = vpop.f32.mrb[94].mxu0  ;;  %v995_v51 = vpop.f32.mrb[94].mxu1 }
 0x194   :  { %14802 = vst [vmem:[#allocation32_spill] sm:$0xff] %v10372_v0  ;;  %v10375_v35 = vadd.f32 %v995_v51, %v9991_v37  ;;  %v7607_v61 = vpop.f32.mrb[95].mxu0  ;;  %v7717_v53 = vpop.f32.mrb[95].mxu1  ;;  %v100_v37 = vld [vmem:[%s14765_s0 + $0x259] sm:$0xff] }
 0x195   :  { %v1294_v53 = vld [vmem:[%s14765_s0 + $0x183] sm:$0xff]  ;;  %v1295_v61 = vld [vmem:[%s14765_s0 + $0x18b] sm:$0xff]  ;;  %v143_v30 = vpack.c.bf16 %v100_v37, %v99_v25 }
 0x196   :  { %7823 = vmatmul.mubr.msk.bf16.gmra.mrb[200].mxu1 %vm272_vm1, %v142_v44  ;;  %7937 = vmatmul.mubr.msk.bf16.gmra.mrb[200].mxu0 %vm272_vm1, %v1350_v8  ;;  %v1351_v26 = vpack.c.bf16 %v1295_v61, %v1294_v53 }
 0x197   :  { %7826 = vmatprep.mubr.msk.bf16.mxu1 %vm9187_vm2, %v14801_v33  ;;  %7940 = vmatprep.mubr.msk.bf16.mxu0 %vm9187_vm2, %v14801_v33 }
 0x199   :  { %v10395_v62 = vpop.f32.mrb[96].mxu0  ;;  %v1000_v13 = vpop.f32.mrb[96].mxu1 }
 0x19a   :  { %14803 = vst [vmem:[#allocation33_spill] sm:$0xff] %v10395_v62  ;;  %v10398_v4 = vadd.f32 %v1000_v13, %v10013_v57  ;;  %v7610_v12 = vpop.f32.mrb[97].mxu0  ;;  %v7720_v48 = vpop.f32.mrb[97].mxu1  ;;  %v101_v57 = vld [vmem:[%s14765_s0 + $0x261] sm:$0xff] }
 0x19b   :  { %v10400_v44 = vpop.f32.mrb[98].mxu0  ;;  %v1003_v8 = vpop.f32.mrb[98].mxu1 }
 0x19c   :  { %14804 = vst [vmem:[#allocation34_spill] sm:$0xff] %v10400_v44  ;;  %v10403_v51 = vadd.f32 %v1003_v8, %v10017_v10  ;;  %v7611_v47 = vpop.f32.mrb[99].mxu0  ;;  %v7721_v0 = vpop.f32.mrb[99].mxu1  ;;  %v102_v10 = vld [vmem:[%s14765_s0 + $0x269] sm:$0xff] }
 0x19d   :  { %v1296_v47 = vld [vmem:[%s14765_s0 + $0x193] sm:$0xff]  ;;  %v1297_v0 = vld [vmem:[%s14765_s0 + $0x19b] sm:$0xff]  ;;  %v144_v12 = vpack.c.bf16 %v102_v10, %v101_v57 }
 0x19e   :  { %7827 = vmatmul.mubr.msk.bf16.gmra.mrb[204].mxu1 %vm272_vm1, %v143_v30  ;;  %7941 = vmatmul.mubr.msk.bf16.gmra.mrb[204].mxu0 %vm272_vm1, %v1351_v26  ;;  %v1352_v48 = vpack.c.bf16 %v1297_v0, %v1296_v47 }
 0x19f   :  { %7830 = vmatprep.mubr.msk.bf16.mxu1 %vm9187_vm2, %v14801_v33  ;;  %7944 = vmatprep.mubr.msk.bf16.mxu0 %vm9187_vm2, %v14801_v33 }
 0x1a1   :  { %v10423_v25 = vpop.f32.mrb[100].mxu0  ;;  %v1008_v37 = vpop.f32.mrb[100].mxu1 }
 0x1a2   :  { %14805 = vst [vmem:[#allocation35_spill] sm:$0xff] %v10423_v25  ;;  %v10426_v53 = vadd.f32 %v1008_v37, %v10039_v32  ;;  %v7614_v61 = vpop.f32.mrb[101].mxu0  ;;  %v7724_v13 = vpop.f32.mrb[101].mxu1  ;;  %v103_v32 = vld [vmem:[%s14765_s0 + $0x271] sm:$0xff] }
 0x1a3   :  { %v10428_v30 = vpop.f32.mrb[102].mxu0  ;;  %v1011_v26 = vpop.f32.mrb[102].mxu1 }
 0x1a4   :  { %14806 = vst [vmem:[#allocation36_spill] sm:$0xff] %v10428_v30  ;;  %v10431_v8 = vadd.f32 %v1011_v26, %v10043_v50  ;;  %v7615_v44 = vpop.f32.mrb[103].mxu0  ;;  %v7725_v62 = vpop.f32.mrb[103].mxu1  ;;  %v104_v50 = vld [vmem:[%s14765_s0 + $0x279] sm:$0xff] }
 0x1a5   :  { %v1298_v62 = vld [vmem:[%s14765_s0 + $0x1a3] sm:$0xff]  ;;  %v1299_v44 = vld [vmem:[%s14765_s0 + $0x1ab] sm:$0xff]  ;;  %v145_v61 = vpack.c.bf16 %v104_v50, %v103_v32 }
 0x1a6   :  { %7831 = vmatmul.mubr.msk.bf16.gmra.mrb[208].mxu1 %vm272_vm1, %v144_v12  ;;  %7945 = vmatmul.mubr.msk.bf16.gmra.mrb[208].mxu0 %vm272_vm1, %v1352_v48  ;;  %v1353_v13 = vpack.c.bf16 %v1299_v44, %v1298_v62 }
 0x1a7   :  { %7834 = vmatprep.mubr.msk.bf16.mxu1 %vm9187_vm2, %v14801_v33  ;;  %7948 = vmatprep.mubr.msk.bf16.mxu0 %vm9187_vm2, %v14801_v33 }
 0x1a9   :  { %v10451_v57 = vpop.f32.mrb[104].mxu0  ;;  %v1016_v10 = vpop.f32.mrb[104].mxu1 }
 0x1aa   :  { %14807 = vst [vmem:[#allocation37_spill] sm:$0xff] %v10451_v57  ;;  %v10454_v47 = vadd.f32 %v1016_v10, %v10065_v17  ;;  %v7618_v0 = vpop.f32.mrb[105].mxu0  ;;  %v7728_v37 = vpop.f32.mrb[105].mxu1  ;;  %v105_v17 = vld [vmem:[%s14765_s0 + $0x281] sm:$0xff] }
 0x1ab   :  { %v10456_v12 = vpop.f32.mrb[106].mxu0  ;;  %v1019_v48 = vpop.f32.mrb[106].mxu1  ;;  %v146_v0 = vpack.c.bf16 %v105_v17, %v105_v17 }
 0x1ac   :  { %14808 = vst [vmem:[#allocation38_spill] sm:$0xff] %v10456_v12  ;;  %v10459_v26 = vadd.f32 %v1019_v48, %v10069_v41  ;;  %v7619_v30 = vpop.f32.mrb[107].mxu0  ;;  %v7729_v25 = vpop.f32.mrb[107].mxu1  ;;  %v1300_v41 = vld [vmem:[%s14765_s0 + $0x1b3] sm:$0xff] }
 0x1ad   :  { %v1301_v25 = vld [vmem:[%s14765_s0 + $0x1bb] sm:$0xff] }
 0x1ae   :  { %14809 = vst [vmem:[#allocation39_spill] sm:$0xff] %v10459_v26  ;;  %7835 = vmatmul.mubr.msk.bf16.gmra.mrb[212].mxu1 %vm272_vm1, %v145_v61  ;;  %7949 = vmatmul.mubr.msk.bf16.gmra.mrb[212].mxu0 %vm272_vm1, %v1353_v13  ;;  %v1354_v37 = vpack.c.bf16 %v1301_v25, %v1300_v41 }
 0x1af   :  { %7838 = vmatprep.mubr.msk.bf16.mxu1 %vm9187_vm2, %v14801_v33  ;;  %7952 = vmatprep.mubr.msk.bf16.mxu0 %vm9187_vm2, %v14801_v33 }
 0x1b1   :  { %v1024_v30 = vpop.f32.mrb[108].mxu1  ;;  %v1530_v32 = vpop.f32.mrb[108].mxu0 }
 0x1b2   :  { %v10477_v50 = vadd.f32 %v1024_v30, %v10091_v16  ;;  %v10480_v62 = vadd.f32 %v1530_v32, %v10118_v6  ;;  %v7732_v44 = vpop.f32.mrb[109].mxu1  ;;  %v7846_v10 = vpop.f32.mrb[109].mxu0  ;;  %v1302_v16 = vld [vmem:[%s14765_s0 + $0x1c3] sm:$0xff]  ;;  %v1938_v6 = vld [vmem:[%s14765_s0 + $0x1b] sm:$0xff] }
 0x1b3   :  { %v1027_v61 = vpop.f32.mrb[110].mxu1  ;;  %v1533_v13 = vpop.f32.mrb[110].mxu0 }
 0x1b4   :  { %v10483_v48 = vadd.f32 %v1027_v61, %v10095_v56  ;;  %v10486_v12 = vadd.f32 %v1533_v13, %v10123_v15  ;;  %v7847_v57 = vpop.f32.mrb[111].mxu0  ;;  %v7733_v26 = vpop.f32.mrb[111].mxu1  ;;  %v1303_v15 = vld [vmem:[%s14765_s0 + $0x1cb] sm:$0xff]  ;;  %v1937_v56 = vld [vmem:[%s14765_s0 + $0x13] sm:$0xff] }
 0x1b5   :  { %v1355_v32 = vpack.c.bf16 %v1303_v15, %v1302_v16  ;;  %v2018_v44 = vpack.c.bf16 %v1938_v6, %v1937_v56 }
 0x1b6   :  { %14810 = vst [vmem:[#allocation40_spill] sm:$0xff] %v10486_v12  ;;  %7839 = vmatmul.mubr.msk.bf16.gmra.mrb[216].mxu1 %vm272_vm1, %v146_v0  ;;  %7953 = vmatmul.mubr.msk.bf16.gmra.mrb[216].mxu0 %vm272_vm1, %v1354_v37 }
 0x1b7   :  { %7956 = vmatprep.mubr.msk.bf16.mxu0 %vm9187_vm2, %v14801_v33  ;;  %8010 = vmatprep.mubr.msk.bf16.mxu1 %vm9187_vm2, %v14801_v33 }
 0x1b9   :  { %v1032_v57 = vpop.f32.mrb[112].mxu1  ;;  %v1538_v26 = vpop.f32.mrb[112].mxu0 }
 0x1ba   :  { %v10507_v17 = vadd.f32 %v1032_v57, %v10115_v59  ;;  %v10510_v41 = vadd.f32 %v1538_v26, %v10146_v2  ;;  %v7736_v25 = vpop.f32.mrb[113].mxu1  ;;  %v7850_v30 = vpop.f32.mrb[113].mxu0  ;;  %v1304_v59 = vld [vmem:[%s14765_s0 + $0x1d3] sm:$0xff]  ;;  %v1939_v2 = vld [vmem:[%s14765_s0 + $0x23] sm:$0xff] }
 0x1bb   :  { %v1035_v10 = vpop.f32.mrb[114].mxu1  ;;  %v1541_v0 = vpop.f32.mrb[114].mxu0 }
 0x1bc   :  { %v10513_v37 = vadd.f32 %v1035_v10, %v10120_v45  ;;  %v10516_v61 = vadd.f32 %v1541_v0, %v10151_v34  ;;  %v7851_v13 = vpop.f32.mrb[115].mxu0  ;;  %v7737_v12 = vpop.f32.mrb[115].mxu1  ;;  %v1305_v45 = vld [vmem:[%s14765_s0 + $0x1db] sm:$0xff]  ;;  %v1940_v34 = vld [vmem:[%s14765_s0 + $0x2b] sm:$0xff] }
 0x1bd   :  { %v1356_v26 = vpack.c.bf16 %v1305_v45, %v1304_v59  ;;  %v2019_v25 = vpack.c.bf16 %v1940_v34, %v1939_v2 }
 0x1be   :  { %7957 = vmatmul.mubr.msk.bf16.gmra.mrb[220].mxu0 %vm272_vm1, %v1355_v32  ;;  %8011 = vmatmul.mubr.msk.bf16.vlgmr.msra.gmra.mrb[220].mxu1 %vm272_vm1, %v2018_v44 }
 0x1bf   :  { %7960 = vmatprep.mubr.msk.bf16.mxu0 %vm9187_vm2, %v14801_v33  ;;  %8014 = vmatprep.mubr.msk.bf16.mxu1 %vm9187_vm2, %v14801_v33 }
 0x1c1   :  { %v1040_v12 = vpop.f32.mrb[116].mxu1  ;;  %v1546_v16 = vpop.f32.mrb[116].mxu0 }
 0x1c2   :  { %v10537_v15 = vadd.f32 %v1040_v12, %v10143_v55  ;;  %v10540_v56 = vadd.f32 %v1546_v16, %v10174_v40  ;;  %v7740_v6 = vpop.f32.mrb[117].mxu1  ;;  %v7854_v57 = vpop.f32.mrb[117].mxu0  ;;  %v1306_v55 = vld [vmem:[%s14765_s0 + $0x1e3] sm:$0xff]  ;;  %v1941_v40 = vld [vmem:[%s14765_s0 + $0x33] sm:$0xff] }
 0x1c3   :  { %v1043_v30 = vpop.f32.mrb[118].mxu1  ;;  %v1549_v32 = vpop.f32.mrb[118].mxu0 }
 0x1c4   :  { %v10543_v44 = vadd.f32 %v1043_v30, %v10148_v24  ;;  %v10546_v10 = vadd.f32 %v1549_v32, %v10179_v31  ;;  %v7855_v0 = vpop.f32.mrb[119].mxu0  ;;  %v7741_v13 = vpop.f32.mrb[119].mxu1  ;;  %v1307_v24 = vld [vmem:[%s14765_s0 + $0x1eb] sm:$0xff]  ;;  %v1942_v31 = vld [vmem:[%s14765_s0 + $0x3b] sm:$0xff] }
 0x1c5   :  { %v1357_v6 = vpack.c.bf16 %v1307_v24, %v1306_v55  ;;  %v2020_v57 = vpack.c.bf16 %v1942_v31, %v1941_v40 }
 0x1c6   :  { %7961 = vmatmul.mubr.msk.bf16.gmra.mrb[224].mxu0 %vm272_vm1, %v1356_v26  ;;  %8015 = vmatmul.mubr.msk.bf16.gmra.mrb[224].mxu1 %vm272_vm1, %v2019_v25 }
 0x1c7   :  { %7964 = vmatprep.mubr.msk.bf16.mxu0 %vm9187_vm2, %v14801_v33  ;;  %8018 = vmatprep.mubr.msk.bf16.mxu1 %vm9187_vm2, %v14801_v33 }
 0x1c9   :  { %v1048_v59 = vpop.f32.mrb[120].mxu1  ;;  %v1554_v45 = vpop.f32.mrb[120].mxu0 }
 0x1ca   :  { %v10567_v2 = vadd.f32 %v1048_v59, %v10171_v46  ;;  %v10570_v34 = vadd.f32 %v1554_v45, %v10202_v14  ;;  %v7744_v12 = vpop.f32.mrb[121].mxu1  ;;  %v7858_v16 = vpop.f32.mrb[121].mxu0  ;;  %v1308_v46 = vld [vmem:[%s14765_s0 + $0x1f3] sm:$0xff]  ;;  %v1943_v14 = vld [vmem:[%s14765_s0 + $0x43] sm:$0xff] }
 0x1cb   :  { %v1051_v26 = vpop.f32.mrb[122].mxu1  ;;  %v1557_v25 = vpop.f32.mrb[122].mxu0 }
 0x1cc   :  { %v10573_v30 = vadd.f32 %v1051_v26, %v10176_v5  ;;  %v10576_v32 = vadd.f32 %v1557_v25, %v10207_v7  ;;  %v7859_v0 = vpop.f32.mrb[123].mxu0  ;;  %v7745_v13 = vpop.f32.mrb[123].mxu1  ;;  %v1309_v5 = vld [vmem:[%s14765_s0 + $0x1fb] sm:$0xff]  ;;  %v1944_v7 = vld [vmem:[%s14765_s0 + $0x4b] sm:$0xff] }
 0x1cd   :  { %v1358_v12 = vpack.c.bf16 %v1309_v5, %v1308_v46  ;;  %v2021_v16 = vpack.c.bf16 %v1944_v7, %v1943_v14 }
 0x1ce   :  { %7965 = vmatmul.mubr.msk.bf16.gmra.mrb[228].mxu0 %vm272_vm1, %v1357_v6  ;;  %8019 = vmatmul.mubr.msk.bf16.gmra.mrb[228].mxu1 %vm272_vm1, %v2020_v57 }
 0x1cf   :  { %7968 = vmatprep.mubr.msk.bf16.mxu0 %vm9187_vm2, %v14801_v33  ;;  %8022 = vmatprep.mubr.msk.bf16.mxu1 %vm9187_vm2, %v14801_v33 }
 0x1d1   :  { %v1056_v55 = vpop.f32.mrb[124].mxu1  ;;  %v1562_v24 = vpop.f32.mrb[124].mxu0 }
 0x1d2   :  { %v10597_v40 = vadd.f32 %v1056_v55, %v10199_v60  ;;  %v10600_v31 = vadd.f32 %v1562_v24, %v10230_v49  ;;  %v7748_v59 = vpop.f32.mrb[125].mxu1  ;;  %v7862_v45 = vpop.f32.mrb[125].mxu0  ;;  %v1310_v60 = vld [vmem:[%s14765_s0 + $0x203] sm:$0xff]  ;;  %v1945_v49 = vld [vmem:[%s14765_s0 + $0x53] sm:$0xff] }
 0x1d3   :  { %v1059_v6 = vpop.f32.mrb[126].mxu1  ;;  %v1565_v57 = vpop.f32.mrb[126].mxu0 }
 0x1d4   :  { %v10603_v26 = vadd.f32 %v1059_v6, %v10204_v22  ;;  %v10606_v25 = vadd.f32 %v1565_v57, %v10235_v42  ;;  %v7863_v0 = vpop.f32.mrb[127].mxu0  ;;  %v7749_v13 = vpop.f32.mrb[127].mxu1  ;;  %v1311_v22 = vld [vmem:[%s14765_s0 + $0x20b] sm:$0xff]  ;;  %v1946_v42 = vld [vmem:[%s14765_s0 + $0x5b] sm:$0xff] }
 0x1d5   :  { %v1359_v59 = vpack.c.bf16 %v1311_v22, %v1310_v60  ;;  %v2022_v45 = vpack.c.bf16 %v1946_v42, %v1945_v49 }
 0x1d6   :  { %7969 = vmatmul.mubr.msk.bf16.gmra.mrb[232].mxu0 %vm272_vm1, %v1358_v12  ;;  %8023 = vmatmul.mubr.msk.bf16.gmra.mrb[232].mxu1 %vm272_vm1, %v2021_v16 }
 0x1d7   :  { %7972 = vmatprep.mubr.msk.bf16.mxu0 %vm9187_vm2, %v14801_v33  ;;  %8026 = vmatprep.mubr.msk.bf16.mxu1 %vm9187_vm2, %v14801_v33 }
 0x1d9   :  { %v1064_v46 = vpop.f32.mrb[128].mxu1  ;;  %v1570_v5 = vpop.f32.mrb[128].mxu0 }
 0x1da   :  { %v10627_v14 = vadd.f32 %v1064_v46, %v10227_v11  ;;  %v10630_v7 = vadd.f32 %v1570_v5, %v10258_v27  ;;  %v7752_v55 = vpop.f32.mrb[129].mxu1  ;;  %v7866_v24 = vpop.f32.mrb[129].mxu0  ;;  %v1312_v11 = vld [vmem:[%s14765_s0 + $0x213] sm:$0xff]  ;;  %v1947_v27 = vld [vmem:[%s14765_s0 + $0x63] sm:$0xff] }
 0x1db   :  { %v1067_v12 = vpop.f32.mrb[130].mxu1  ;;  %v1573_v16 = vpop.f32.mrb[130].mxu0 }
 0x1dc   :  { %v10633_v6 = vadd.f32 %v1067_v12, %v10232_v58  ;;  %v10636_v57 = vadd.f32 %v1573_v16, %v10263_v23  ;;  %v7867_v0 = vpop.f32.mrb[131].mxu0  ;;  %v7753_v13 = vpop.f32.mrb[131].mxu1  ;;  %v1313_v58 = vld [vmem:[%s14765_s0 + $0x21b] sm:$0xff]  ;;  %v1948_v23 = vld [vmem:[%s14765_s0 + $0x6b] sm:$0xff] }
 0x1dd   :  { %v1360_v55 = vpack.c.bf16 %v1313_v58, %v1312_v11  ;;  %v2023_v24 = vpack.c.bf16 %v1948_v23, %v1947_v27 }
 0x1de   :  { %7973 = vmatmul.mubr.msk.bf16.gmra.mrb[236].mxu0 %vm272_vm1, %v1359_v59  ;;  %8027 = vmatmul.mubr.msk.bf16.gmra.mrb[236].mxu1 %vm272_vm1, %v2022_v45 }
 0x1df   :  { %7976 = vmatprep.mubr.msk.bf16.mxu0 %vm9187_vm2, %v14801_v33  ;;  %8030 = vmatprep.mubr.msk.bf16.mxu1 %vm9187_vm2, %v14801_v33 }
 0x1e1   :  { %v1072_v60 = vpop.f32.mrb[132].mxu1  ;;  %v1578_v22 = vpop.f32.mrb[132].mxu0 }
 0x1e2   :  { %v10657_v49 = vadd.f32 %v1072_v60, %v10255_v29  ;;  %v10660_v42 = vadd.f32 %v1578_v22, %v10286_v9  ;;  %v7756_v46 = vpop.f32.mrb[133].mxu1  ;;  %v7870_v5 = vpop.f32.mrb[133].mxu0  ;;  %v1314_v29 = vld [vmem:[%s14765_s0 + $0x223] sm:$0xff]  ;;  %v1949_v9 = vld [vmem:[%s14765_s0 + $0x73] sm:$0xff] }
 0x1e3   :  { %v1075_v59 = vpop.f32.mrb[134].mxu1  ;;  %v1581_v45 = vpop.f32.mrb[134].mxu0 }
 0x1e4   :  { %v10663_v12 = vadd.f32 %v1075_v59, %v10260_v28  ;;  %v10666_v16 = vadd.f32 %v1581_v45, %v10291_v52  ;;  %v7871_v0 = vpop.f32.mrb[135].mxu0  ;;  %v7757_v13 = vpop.f32.mrb[135].mxu1  ;;  %v1315_v28 = vld [vmem:[%s14765_s0 + $0x22b] sm:$0xff]  ;;  %v1950_v52 = vld [vmem:[%s14765_s0 + $0x7b] sm:$0xff] }
 0x1e5   :  { %v1361_v46 = vpack.c.bf16 %v1315_v28, %v1314_v29  ;;  %v2024_v5 = vpack.c.bf16 %v1950_v52, %v1949_v9 }
 0x1e6   :  { %7977 = vmatmul.mubr.msk.bf16.gmra.mrb[240].mxu0 %vm272_vm1, %v1360_v55  ;;  %8031 = vmatmul.mubr.msk.bf16.gmra.mrb[240].mxu1 %vm272_vm1, %v2023_v24 }
 0x1e7   :  { %7980 = vmatprep.mubr.msk.bf16.mxu0 %vm9187_vm2, %v14801_v33  ;;  %8034 = vmatprep.mubr.msk.bf16.mxu1 %vm9187_vm2, %v14801_v33 }
 0x1e9   :  { %v1080_v11 = vpop.f32.mrb[136].mxu1  ;;  %v1586_v58 = vpop.f32.mrb[136].mxu0 }
 0x1ea   :  { %v10687_v27 = vadd.f32 %v1080_v11, %v10283_v43  ;;  %v10690_v23 = vadd.f32 %v1586_v58, %v10314_v54  ;;  %v7760_v60 = vpop.f32.mrb[137].mxu1  ;;  %v7874_v22 = vpop.f32.mrb[137].mxu0  ;;  %v1316_v43 = vld [vmem:[%s14765_s0 + $0x233] sm:$0xff]  ;;  %v1951_v54 = vld [vmem:[%s14765_s0 + $0x83] sm:$0xff] }
 0x1eb   :  { %v1083_v55 = vpop.f32.mrb[138].mxu1  ;;  %v1589_v24 = vpop.f32.mrb[138].mxu0 }
 0x1ec   :  { %v10693_v59 = vadd.f32 %v1083_v55, %v10288_v1  ;;  %v10696_v45 = vadd.f32 %v1589_v24, %v10319_v3  ;;  %v7875_v0 = vpop.f32.mrb[139].mxu0  ;;  %v7761_v13 = vpop.f32.mrb[139].mxu1  ;;  %v1317_v1 = vld [vmem:[%s14765_s0 + $0x23b] sm:$0xff]  ;;  %v1952_v3 = vld [vmem:[%s14765_s0 + $0x8b] sm:$0xff] }
 0x1ed   :  { %v1362_v60 = vpack.c.bf16 %v1317_v1, %v1316_v43  ;;  %v2025_v22 = vpack.c.bf16 %v1952_v3, %v1951_v54 }
 0x1ee   :  { %7981 = vmatmul.mubr.msk.bf16.gmra.mrb[244].mxu0 %vm272_vm1, %v1361_v46  ;;  %8035 = vmatmul.mubr.msk.bf16.gmra.mrb[244].mxu1 %vm272_vm1, %v2024_v5 }
 0x1ef   :  { %7984 = vmatprep.mubr.msk.bf16.mxu0 %vm9187_vm2, %v14801_v33  ;;  %8038 = vmatprep.mubr.msk.bf16.mxu1 %vm9187_vm2, %v14801_v33 }
 0x1f1   :  { %v1088_v29 = vpop.f32.mrb[140].mxu1  ;;  %v1594_v28 = vpop.f32.mrb[140].mxu0 }
 0x1f2   :  { %v10717_v9 = vadd.f32 %v1088_v29, %v10311_v63  ;;  %v10720_v52 = vadd.f32 %v1594_v28, %v10342_v36  ;;  %v7764_v11 = vpop.f32.mrb[141].mxu1  ;;  %v7878_v58 = vpop.f32.mrb[141].mxu0  ;;  %v1318_v63 = vld [vmem:[%s14765_s0 + $0x243] sm:$0xff]  ;;  %v1953_v36 = vld [vmem:[%s14765_s0 + $0x93] sm:$0xff] }
 0x1f3   :  { %v1091_v46 = vpop.f32.mrb[142].mxu1  ;;  %v1597_v5 = vpop.f32.mrb[142].mxu0 }
 0x1f4   :  { %v10723_v55 = vadd.f32 %v1091_v46, %v10316_v39  ;;  %v10726_v24 = vadd.f32 %v1597_v5, %v10347_v18  ;;  %v7879_v0 = vpop.f32.mrb[143].mxu0  ;;  %v7765_v13 = vpop.f32.mrb[143].mxu1  ;;  %v1319_v39 = vld [vmem:[%s14765_s0 + $0x24b] sm:$0xff]  ;;  %v1954_v18 = vld [vmem:[%s14765_s0 + $0x9b] sm:$0xff] }
 0x1f5   :  { %v1363_v11 = vpack.c.bf16 %v1319_v39, %v1318_v63  ;;  %v2026_v58 = vpack.c.bf16 %v1954_v18, %v1953_v36 }
 0x1f6   :  { %7985 = vmatmul.mubr.msk.bf16.gmra.mrb[248].mxu0 %vm272_vm1, %v1362_v60  ;;  %8039 = vmatmul.mubr.msk.bf16.gmra.mrb[248].mxu1 %vm272_vm1, %v2025_v22 }
 0x1f7   :  { %7988 = vmatprep.mubr.msk.bf16.mxu0 %vm9187_vm2, %v14801_v33  ;;  %8042 = vmatprep.mubr.msk.bf16.mxu1 %vm9187_vm2, %v14801_v33 }
 0x1f9   :  { %v1096_v43 = vpop.f32.mrb[144].mxu1  ;;  %v1602_v1 = vpop.f32.mrb[144].mxu0 }
 0x1fa   :  { %v10747_v54 = vadd.f32 %v1096_v43, %v10339_v20  ;;  %v10750_v3 = vadd.f32 %v1602_v1, %v10370_v19  ;;  %v7768_v29 = vpop.f32.mrb[145].mxu1  ;;  %v7882_v28 = vpop.f32.mrb[145].mxu0  ;;  %v1320_v20 = vld [vmem:[%s14765_s0 + $0x253] sm:$0xff]  ;;  %v1955_v19 = vld [vmem:[%s14765_s0 + $0xa3] sm:$0xff] }
 0x1fb   :  { %v1099_v60 = vpop.f32.mrb[146].mxu1  ;;  %v1605_v22 = vpop.f32.mrb[146].mxu0 }
 0x1fc   :  { %14811 = vst [vmem:[#allocation41_spill] sm:$0xff] %v10750_v3  ;;  %v10753_v46 = vadd.f32 %v1099_v60, %v10344_v21  ;;  %v10756_v5 = vadd.f32 %v1605_v22, %v10375_v35  ;;  %v7883_v0 = vpop.f32.mrb[147].mxu0  ;;  %v7769_v13 = vpop.f32.mrb[147].mxu1  ;;  %v1321_v21 = vld [vmem:[%s14765_s0 + $0x25b] sm:$0xff]  ;;  %v1956_v35 = vld [vmem:[%s14765_s0 + $0xab] sm:$0xff] }
 0x1fd   :  { %v1364_v29 = vpack.c.bf16 %v1321_v21, %v1320_v20  ;;  %v2027_v28 = vpack.c.bf16 %v1956_v35, %v1955_v19  ;;  %v14814_v60 = vld [vmem:[#allocation32_spill] sm:$0xff]  ;;  %v14816_v19 = vld [vmem:[#allocation33_spill] sm:$0xff] }
 0x1fe   :  { %14812 = vst [vmem:[#allocation42_spill] sm:$0xff] %v10756_v5  ;;  %7989 = vmatmul.mubr.msk.bf16.gmra.mrb[252].mxu0 %vm272_vm1, %v1363_v11  ;;  %8043 = vmatmul.mubr.msk.bf16.gmra.mrb[252].mxu1 %vm272_vm1, %v2026_v58 }
 0x1ff   :  { %7992 = vmatprep.mubr.msk.bf16.mxu0 %vm9187_vm2, %v14801_v33  ;;  %8046 = vmatprep.mubr.msk.bf16.mxu1 %vm9187_vm2, %v14801_v33 }
 0x201   :  { %v1104_v63 = vpop.f32.mrb[148].mxu1  ;;  %v1610_v39 = vpop.f32.mrb[148].mxu0 }
 0x202   :  { %v10777_v36 = vadd.f32 %v1104_v63, %v10367_v38  ;;  %v10780_v18 = vadd.f32 %v1610_v39, %v10398_v4  ;;  %v7772_v43 = vpop.f32.mrb[149].mxu1  ;;  %v7886_v1 = vpop.f32.mrb[149].mxu0  ;;  %v1322_v38 = vld [vmem:[%s14765_s0 + $0x263] sm:$0xff]  ;;  %v1323_v4 = vld [vmem:[%s14765_s0 + $0x26b] sm:$0xff] }
 0x203   :  { %v1107_v11 = vpop.f32.mrb[150].mxu1  ;;  %v1613_v58 = vpop.f32.mrb[150].mxu0  ;;  %v1365_v1 = vpack.c.bf16 %v1323_v4, %v1322_v38 }
 0x204   :  { %14813 = vst [vmem:[#allocation43_spill] sm:$0xff] %v10780_v18  ;;  %v10783_v22 = vadd.f32 %v1107_v11, %v14814_v60  ;;  %v10786_v0 = vadd.f32 %v1613_v58, %v10403_v51  ;;  %v7887_v13 = vpop.f32.mrb[151].mxu0  ;;  %v7773_v5 = vpop.f32.mrb[151].mxu1  ;;  %v1957_v51 = vld [vmem:[%s14765_s0 + $0xb3] sm:$0xff]  ;;  %v14818_v58 = vld [vmem:[#allocation34_spill] sm:$0xff] }
 0x205   :  { %v1958_v5 = vld [vmem:[%s14765_s0 + $0xbb] sm:$0xff] }
 0x206   :  { %14815 = vst [vmem:[#allocation32_spill] sm:$0xff] %v10786_v0  ;;  %7993 = vmatmul.mubr.msk.bf16.gmra.mrb[0].mxu0 %vm272_vm1, %v1364_v29  ;;  %8047 = vmatmul.mubr.msk.bf16.gmra.mrb[0].mxu1 %vm272_vm1, %v2027_v28  ;;  %v2028_v29 = vpack.c.bf16 %v1958_v5, %v1957_v51  ;;  %v14820_v51 = vld [vmem:[#allocation35_spill] sm:$0xff] }
 0x207   :  { %7996 = vmatprep.mubr.msk.bf16.mxu0 %vm9187_vm2, %v14801_v33  ;;  %8050 = vmatprep.mubr.msk.bf16.mxu1 %vm9187_vm2, %v14801_v33 }
 0x209   :  { %v1112_v20 = vpop.f32.mrb[152].mxu1  ;;  %v1618_v21 = vpop.f32.mrb[152].mxu0 }
 0x20a   :  { %v10807_v35 = vadd.f32 %v1112_v20, %v14816_v19  ;;  %v10810_v63 = vadd.f32 %v1618_v21, %v10426_v53  ;;  %v7776_v39 = vpop.f32.mrb[153].mxu1  ;;  %v7890_v43 = vpop.f32.mrb[153].mxu0  ;;  %v1324_v53 = vld [vmem:[%s14765_s0 + $0x273] sm:$0xff] }
 0x20b   :  { %v1115_v28 = vpop.f32.mrb[154].mxu1  ;;  %v1621_v11 = vpop.f32.mrb[154].mxu0 }
 0x20c   :  { %14817 = vst [vmem:[#allocation33_spill] sm:$0xff] %v10810_v63  ;;  %v10813_v60 = vadd.f32 %v1115_v28, %v14818_v58  ;;  %v10816_v13 = vadd.f32 %v1621_v11, %v10431_v8  ;;  %v7891_v0 = vpop.f32.mrb[155].mxu0  ;;  %v7777_v18 = vpop.f32.mrb[155].mxu1  ;;  %v1325_v8 = vld [vmem:[%s14765_s0 + $0x27b] sm:$0xff]  ;;  %v14823_v58 = vld [vmem:[#allocation39_spill] sm:$0xff] }
 0x20d   :  { %v1959_v18 = vld [vmem:[%s14765_s0 + $0xc3] sm:$0xff]  ;;  %v1960_v0 = vld [vmem:[%s14765_s0 + $0xcb] sm:$0xff]  ;;  %v1366_v39 = vpack.c.bf16 %v1325_v8, %v1324_v53  ;;  %v14822_v28 = vld [vmem:[#allocation36_spill] sm:$0xff] }
 0x20e   :  { %14819 = vst [vmem:[#allocation34_spill] sm:$0xff] %v10816_v13  ;;  %7997 = vmatmul.mubr.msk.bf16.gmra.mrb[4].mxu0 %vm272_vm1, %v1365_v1  ;;  %8051 = vmatmul.mubr.msk.bf16.gmra.mrb[4].mxu1 %vm272_vm1, %v2028_v29  ;;  %v2029_v43 = vpack.c.bf16 %v1960_v0, %v1959_v18  ;;  %v1961_v53 = vld [vmem:[%s14765_s0 + $0xd3] sm:$0xff]  ;;  %v14825_v18 = vld [vmem:[#allocation37_spill] sm:$0xff] }
 0x20f   :  { %8000 = vmatprep.mubr.msk.bf16.mxu0 %vm9187_vm2, %v14801_v33  ;;  %8054 = vmatprep.mubr.msk.bf16.mxu1 %vm9187_vm2, %v14801_v33 }
 0x211   :  { %v1120_v38 = vpop.f32.mrb[156].mxu1  ;;  %v1626_v4 = vpop.f32.mrb[156].mxu0 }
 0x212   :  { %v10837_v5 = vadd.f32 %v1120_v38, %v14820_v51  ;;  %v10840_v20 = vadd.f32 %v1626_v4, %v10454_v47  ;;  %v7780_v21 = vpop.f32.mrb[157].mxu1  ;;  %v7894_v19 = vpop.f32.mrb[157].mxu0  ;;  %v1326_v47 = vld [vmem:[%s14765_s0 + $0x283] sm:$0xff] }
 0x213   :  { %v1123_v1 = vpop.f32.mrb[158].mxu1  ;;  %v1629_v29 = vpop.f32.mrb[158].mxu0  ;;  %v1367_v21 = vpack.c.bf16 %v1326_v47, %v1326_v47  ;;  %v2629_v47 = vld [vmem:[%s14765_s0 + $0x1c] sm:$0xff] }
 0x214   :  { %14821 = vst [vmem:[#allocation35_spill] sm:$0xff] %v10840_v20  ;;  %v10843_v11 = vadd.f32 %v1123_v1, %v14822_v28  ;;  %v10846_v13 = vadd.f32 %v1629_v29, %v14823_v58  ;;  %v7895_v63 = vpop.f32.mrb[159].mxu0  ;;  %v7781_v3 = vpop.f32.mrb[159].mxu1  ;;  %v14827_v1 = vld [vmem:[#allocation38_spill] sm:$0xff] }
 0x215   :  { %v1962_v3 = vld [vmem:[%s14765_s0 + $0xdb] sm:$0xff] }
 0x216   :  { %14824 = vst [vmem:[#allocation36_spill] sm:$0xff] %v10846_v13  ;;  %8001 = vmatmul.mubr.msk.bf16.gmra.mrb[8].mxu0 %vm272_vm1, %v1366_v39  ;;  %8055 = vmatmul.mubr.msk.bf16.gmra.mrb[8].mxu1 %vm272_vm1, %v2029_v43  ;;  %v2030_v19 = vpack.c.bf16 %v1962_v3, %v1961_v53 }
 0x217   :  { %8004 = vmatprep.mubr.msk.bf16.mxu0 %vm9187_vm2, %v14801_v33  ;;  %8058 = vmatprep.mubr.msk.bf16.mxu1 %vm9187_vm2, %v14801_v33 }
 0x219   :  { %v1128_v63 = vpop.f32.mrb[160].mxu1  ;;  %v1634_v8 = vpop.f32.mrb[160].mxu0 }
 0x21a   :  { %v10864_v0 = vadd.f32 %v1128_v63, %v14825_v18  ;;  %v10867_v38 = vadd.f32 %v1634_v8, %v10477_v50  ;;  %v7784_v4 = vpop.f32.mrb[161].mxu1  ;;  %v7898_v51 = vpop.f32.mrb[161].mxu0  ;;  %v1963_v50 = vld [vmem:[%s14765_s0 + $0xe3] sm:$0xff] }
 0x21b   :  { %v1131_v39 = vpop.f32.mrb[162].mxu1  ;;  %v1637_v43 = vpop.f32.mrb[162].mxu0  ;;  %v14829_v63 = vld [vmem:[#allocation5_spill] sm:$0xff] }
 0x21c   :  { %14826 = vst [vmem:[#allocation39_spill] sm:$0xff] %v10867_v38  ;;  %v10870_v29 = vadd.f32 %v1131_v39, %v14827_v1  ;;  %v10873_v28 = vadd.f32 %v1637_v43, %v10483_v48  ;;  %v7899_v58 = vpop.f32.mrb[163].mxu0  ;;  %v7785_v13 = vpop.f32.mrb[163].mxu1  ;;  %v1964_v48 = vld [vmem:[%s14765_s0 + $0xeb] sm:$0xff] }
 0x21d   :  { %v2628_v13 = vld [vmem:[%s14765_s0 + $0x14] sm:$0xff]  ;;  %v14831_v1 = vld [vmem:[#allocation6_spill] sm:$0xff] }
 0x21e   :  { %14828 = vst [vmem:[#allocation37_spill] sm:$0xff] %v10873_v28  ;;  %8005 = vmatmul.mubr.msk.bf16.gmra.mrb[12].mxu0 %vm272_vm1, %v1367_v21  ;;  %8059 = vmatmul.mubr.msk.bf16.gmra.mrb[12].mxu1 %vm272_vm1, %v2030_v19  ;;  %v2031_v21 = vpack.c.bf16 %v1964_v48, %v1963_v50  ;;  %v2709_v19 = vpack.c.bf16 %v2629_v47, %v2628_v13  ;;  %v14833_v13 = vld [vmem:[#allocation7_spill] sm:$0xff] }
 0x21f   :  { %8062 = vmatprep.mubr.msk.bf16.mxu1 %vm9187_vm2, %v14801_v33  ;;  %8176 = vmatprep.mubr.msk.bf16.mxu0 %vm9187_vm2, %v14801_v33 }
 0x221   :  { %v1136_v53 = vpop.f32.mrb[164].mxu1  ;;  %v1642_v3 = vpop.f32.mrb[164].mxu0 }
 0x222   :  { %v10894_v8 = vadd.f32 %v1136_v53, %v14829_v63  ;;  %v10897_v18 = vadd.f32 %v1642_v3, %v10507_v17  ;;  %v7788_v4 = vpop.f32.mrb[165].mxu1  ;;  %v7902_v51 = vpop.f32.mrb[165].mxu0  ;;  %v1965_v17 = vld [vmem:[%s14765_s0 + $0xf3] sm:$0xff] }
 0x223   :  { %v1139_v39 = vpop.f32.mrb[166].mxu1  ;;  %v1645_v43 = vpop.f32.mrb[166].mxu0 }
 0x224   :  { %14830 = vst [vmem:[#allocation38_spill] sm:$0xff] %v10897_v18  ;;  %v10900_v58 = vadd.f32 %v1139_v39, %v14831_v1  ;;  %v10903_v28 = vadd.f32 %v1645_v43, %v10513_v37  ;;  %v7903_v38 = vpop.f32.mrb[167].mxu0  ;;  %v7789_v20 = vpop.f32.mrb[167].mxu1  ;;  %v1966_v37 = vld [vmem:[%s14765_s0 + $0xfb] sm:$0xff] }
 0x225   :  { %v2630_v20 = vld [vmem:[%s14765_s0 + $0x24] sm:$0xff]  ;;  %v2631_v38 = vld [vmem:[%s14765_s0 + $0x2c] sm:$0xff]  ;;  %v2032_v4 = vpack.c.bf16 %v1966_v37, %v1965_v17  ;;  %v14835_v39 = vld [vmem:[#allocation8_spill] sm:$0xff] }
 0x226   :  { %14832 = vst [vmem:[#allocation5_spill] sm:$0xff] %v10903_v28  ;;  %8063 = vmatmul.mubr.msk.bf16.gmra.mrb[16].mxu1 %vm272_vm1, %v2031_v21  ;;  %8177 = vmatmul.mubr.msk.bf16.vlgmr.msra.gmra.mrb[16].mxu0 %vm272_vm1, %v2709_v19  ;;  %v2710_v51 = vpack.c.bf16 %v2631_v38, %v2630_v20  ;;  %v14837_v20 = vld [vmem:[#allocation9_spill] sm:$0xff] }
 0x227   :  { %8066 = vmatprep.mubr.msk.bf16.mxu1 %vm9187_vm2, %v14801_v33  ;;  %8180 = vmatprep.mubr.msk.bf16.mxu0 %vm9187_vm2, %v14801_v33 }
 0x229   :  { %v1144_v50 = vpop.f32.mrb[168].mxu1  ;;  %v1650_v48 = vpop.f32.mrb[168].mxu0 }
 0x22a   :  { %v10924_v47 = vadd.f32 %v1144_v50, %v14833_v13  ;;  %v10927_v53 = vadd.f32 %v1650_v48, %v10537_v15  ;;  %v7792_v3 = vpop.f32.mrb[169].mxu1  ;;  %v7906_v63 = vpop.f32.mrb[169].mxu0  ;;  %v1967_v15 = vld [vmem:[%s14765_s0 + $0x103] sm:$0xff] }
 0x22b   :  { %v1147_v21 = vpop.f32.mrb[170].mxu1  ;;  %v1653_v19 = vpop.f32.mrb[170].mxu0 }
 0x22c   :  { %14834 = vst [vmem:[#allocation6_spill] sm:$0xff] %v10927_v53  ;;  %v10930_v43 = vadd.f32 %v1147_v21, %v14835_v39  ;;  %v10933_v1 = vadd.f32 %v1653_v19, %v10543_v44  ;;  %v7907_v28 = vpop.f32.mrb[171].mxu0  ;;  %v7793_v18 = vpop.f32.mrb[171].mxu1  ;;  %v1968_v44 = vld [vmem:[%s14765_s0 + $0x10b] sm:$0xff] }
 0x22d   :  { %v2632_v28 = vld [vmem:[%s14765_s0 + $0x34] sm:$0xff]  ;;  %v2633_v18 = vld [vmem:[%s14765_s0 + $0x3c] sm:$0xff]  ;;  %v2033_v3 = vpack.c.bf16 %v1968_v44, %v1967_v15  ;;  %v14839_v39 = vld [vmem:[#allocation10_spill] sm:$0xff] }
 0x22e   :  { %14836 = vst [vmem:[#allocation7_spill] sm:$0xff] %v10933_v1  ;;  %8067 = vmatmul.mubr.msk.bf16.gmra.mrb[20].mxu1 %vm272_vm1, %v2032_v4  ;;  %8181 = vmatmul.mubr.msk.bf16.gmra.mrb[20].mxu0 %vm272_vm1, %v2710_v51  ;;  %v2711_v63 = vpack.c.bf16 %v2633_v18, %v2632_v28  ;;  %v6873_v4 = vld [vmem:[%s14766_s1 + $0xa] sm:$0x3]  ;;  %v6915_v15 = vld [vmem:[%s14766_s1 + $0xc] sm:$0x3]  ;;  %v1970_v28 = vld [vmem:[%s14765_s0 + $0x11b] sm:$0xff] }
 0x22f   :  { %8070 = vmatprep.mubr.msk.bf16.mxu1 %vm9187_vm2, %v14801_v33  ;;  %8184 = vmatprep.mubr.msk.bf16.mxu0 %vm9187_vm2, %v14801_v33  ;;  %v3567_v19 = vsel %vm396_vm0, %v6873_v4, 0  ;;  %v4258_v44 = vsel %vm396_vm0, %v6915_v15, 0  ;;  %v2634_v18 = vld [vmem:[%s14765_s0 + $0x44] sm:$0xff]  ;;  %v14843_v15 = vld [vmem:[#allocation12_spill] sm:$0xff] }
 0x230   :  { %8341 = vmatpush3.bf16.msra.mxu1 %v3567_v19  ;;  %8507 = vmatpush3.bf16.msra.mxu0 %v4258_v44 }
 0x231   :  { %v1152_v17 = vpop.f32.mrb[172].mxu1  ;;  %v1658_v37 = vpop.f32.mrb[172].mxu0  ;;  %8672 = vmatprep.subr.bf16.mxu1 %v14801_v33  ;;  %8838 = vmatprep.subr.bf16.mxu0 %v14801_v33 }
 0x232   :  { %v10954_v38 = vadd.f32 %v1152_v17, %v14837_v20  ;;  %v10957_v50 = vadd.f32 %v1658_v37, %v10567_v2  ;;  %v7796_v48 = vpop.f32.mrb[173].mxu1  ;;  %v7910_v13 = vpop.f32.mrb[173].mxu0  ;;  %v2635_v20 = vld [vmem:[%s14765_s0 + $0x4c] sm:$0xff] }
 0x233   :  { %v1155_v51 = vpop.f32.mrb[174].mxu1  ;;  %v1661_v21 = vpop.f32.mrb[174].mxu0 }
 0x234   :  { %14838 = vst [vmem:[#allocation8_spill] sm:$0xff] %v10957_v50  ;;  %v10964_v1 = vadd.f32 %v1155_v51, %v14839_v39  ;;  %v10967_v17 = vadd.f32 %v1661_v21, %v10573_v30  ;;  %v7911_v2 = vpop.f32.mrb[175].mxu0  ;;  %v7797_v37 = vpop.f32.mrb[175].mxu1  ;;  %v1969_v30 = vld [vmem:[%s14765_s0 + $0x113] sm:$0xff]  ;;  %v2712_v39 = vpack.c.bf16 %v2635_v20, %v2634_v18  ;;  %v14845_v18 = vld [vmem:[#allocation13_spill] sm:$0xff] }
 0x235   :  { %v2034_v19 = vpack.c.bf16 %v1970_v28, %v1969_v30 }
 0x236   :  { %14840 = vst [vmem:[#allocation9_spill] sm:$0xff] %v10967_v17  ;;  %8071 = vmatmul.mubr.msk.bf16.gmra.mrb[24].mxu1 %vm272_vm1, %v2033_v3  ;;  %8185 = vmatmul.mubr.msk.bf16.gmra.mrb[24].mxu0 %vm272_vm1, %v2711_v63  ;;  %v14841_v3 = vld [vmem:[#allocation11_spill] sm:$0xff] }
 0x237   :  { %8074 = vmatprep.mubr.msk.bf16.mxu1 %vm9187_vm2, %v14801_v33  ;;  %8188 = vmatprep.mubr.msk.bf16.mxu0 %vm9187_vm2, %v14801_v33 }
 0x239   :  { %v1160_v48 = vpop.f32.mrb[176].mxu1  ;;  %v1666_v13 = vpop.f32.mrb[176].mxu0 }
 0x23a   :  { %v10994_v63 = vadd.f32 %v1160_v48, %v14841_v3  ;;  %v10997_v4 = vadd.f32 %v1666_v13, %v10597_v40  ;;  %v7800_v51 = vpop.f32.mrb[177].mxu1  ;;  %v7914_v21 = vpop.f32.mrb[177].mxu0  ;;  %v1971_v40 = vld [vmem:[%s14765_s0 + $0x123] sm:$0xff] }
 0x23b   :  { %v1163_v2 = vpop.f32.mrb[178].mxu1  ;;  %v1669_v37 = vpop.f32.mrb[178].mxu0 }
 0x23c   :  { %14842 = vst [vmem:[#allocation10_spill] sm:$0xff] %v10997_v4  ;;  %v11000_v17 = vadd.f32 %v1163_v2, %v14843_v15  ;;  %v11003_v44 = vadd.f32 %v1669_v37, %v10603_v26  ;;  %v7915_v50 = vpop.f32.mrb[179].mxu0  ;;  %v7801_v53 = vpop.f32.mrb[179].mxu1  ;;  %v1972_v26 = vld [vmem:[%s14765_s0 + $0x12b] sm:$0xff] }
 0x23d   :  { %v2636_v53 = vld [vmem:[%s14765_s0 + $0x54] sm:$0xff]  ;;  %v2637_v50 = vld [vmem:[%s14765_s0 + $0x5c] sm:$0xff]  ;;  %v2035_v51 = vpack.c.bf16 %v1972_v26, %v1971_v40  ;;  %v14847_v2 = vld [vmem:[#allocation14_spill] sm:$0xff] }
 0x23e   :  { %14844 = vst [vmem:[#allocation11_spill] sm:$0xff] %v11003_v44  ;;  %8075 = vmatmul.mubr.msk.bf16.gmra.mrb[28].mxu1 %vm272_vm1, %v2034_v19  ;;  %8189 = vmatmul.mubr.msk.bf16.gmra.mrb[28].mxu0 %vm272_vm1, %v2712_v39  ;;  %v2713_v21 = vpack.c.bf16 %v2637_v50, %v2636_v53  ;;  %v14849_v53 = vld [vmem:[#allocation15_spill] sm:$0xff] }
 0x23f   :  { %8078 = vmatprep.mubr.msk.bf16.mxu1 %vm9187_vm2, %v14801_v33  ;;  %8192 = vmatprep.mubr.msk.bf16.mxu0 %vm9187_vm2, %v14801_v33 }
 0x241   :  { %v1168_v30 = vpop.f32.mrb[180].mxu1  ;;  %v1674_v28 = vpop.f32.mrb[180].mxu0 }
 0x242   :  { %v11024_v20 = vadd.f32 %v1168_v30, %v14845_v18  ;;  %v11027_v48 = vadd.f32 %v1674_v28, %v10627_v14  ;;  %v7804_v13 = vpop.f32.mrb[181].mxu1  ;;  %v7918_v3 = vpop.f32.mrb[181].mxu0  ;;  %v1973_v14 = vld [vmem:[%s14765_s0 + $0x133] sm:$0xff] }
 0x243   :  { %v1171_v19 = vpop.f32.mrb[182].mxu1  ;;  %v1677_v39 = vpop.f32.mrb[182].mxu0 }
 0x244   :  { %14846 = vst [vmem:[#allocation12_spill] sm:$0xff] %v11027_v48  ;;  %v11030_v37 = vadd.f32 %v1171_v19, %v14847_v2  ;;  %v11033_v15 = vadd.f32 %v1677_v39, %v10633_v6  ;;  %v7919_v44 = vpop.f32.mrb[183].mxu0  ;;  %v7805_v4 = vpop.f32.mrb[183].mxu1  ;;  %v1974_v6 = vld [vmem:[%s14765_s0 + $0x13b] sm:$0xff] }
 0x245   :  { %v2638_v4 = vld [vmem:[%s14765_s0 + $0x64] sm:$0xff]  ;;  %v2639_v44 = vld [vmem:[%s14765_s0 + $0x6c] sm:$0xff]  ;;  %v2036_v13 = vpack.c.bf16 %v1974_v6, %v1973_v14  ;;  %v14851_v19 = vld [vmem:[#allocation16_spill] sm:$0xff] }
 0x246   :  { %14848 = vst [vmem:[#allocation13_spill] sm:$0xff] %v11033_v15  ;;  %8079 = vmatmul.mubr.msk.bf16.gmra.mrb[32].mxu1 %vm272_vm1, %v2035_v51  ;;  %8193 = vmatmul.mubr.msk.bf16.gmra.mrb[32].mxu0 %vm272_vm1, %v2713_v21  ;;  %v2714_v3 = vpack.c.bf16 %v2639_v44, %v2638_v4  ;;  %v14853_v4 = vld [vmem:[#allocation17_spill] sm:$0xff] }
 0x247   :  { %8082 = vmatprep.mubr.msk.bf16.mxu1 %vm9187_vm2, %v14801_v33  ;;  %8196 = vmatprep.mubr.msk.bf16.mxu0 %vm9187_vm2, %v14801_v33 }
 0x249   :  { %v1176_v40 = vpop.f32.mrb[184].mxu1  ;;  %v1682_v26 = vpop.f32.mrb[184].mxu0 }
 0x24a   :  { %v11054_v50 = vadd.f32 %v1176_v40, %v14849_v53  ;;  %v11057_v30 = vadd.f32 %v1682_v26, %v10657_v49  ;;  %v7808_v28 = vpop.f32.mrb[185].mxu1  ;;  %v7922_v18 = vpop.f32.mrb[185].mxu0  ;;  %v1975_v49 = vld [vmem:[%s14765_s0 + $0x143] sm:$0xff] }
 0x24b   :  { %v1179_v51 = vpop.f32.mrb[186].mxu1  ;;  %v1685_v21 = vpop.f32.mrb[186].mxu0 }
 0x24c   :  { %14850 = vst [vmem:[#allocation14_spill] sm:$0xff] %v11057_v30  ;;  %v11060_v39 = vadd.f32 %v1179_v51, %v14851_v19  ;;  %v11063_v2 = vadd.f32 %v1685_v21, %v10663_v12  ;;  %v7923_v15 = vpop.f32.mrb[187].mxu0  ;;  %v7809_v48 = vpop.f32.mrb[187].mxu1  ;;  %v1976_v12 = vld [vmem:[%s14765_s0 + $0x14b] sm:$0xff] }
 0x24d   :  { %v2640_v48 = vld [vmem:[%s14765_s0 + $0x74] sm:$0xff]  ;;  %v2641_v15 = vld [vmem:[%s14765_s0 + $0x7c] sm:$0xff]  ;;  %v2037_v28 = vpack.c.bf16 %v1976_v12, %v1975_v49  ;;  %v14855_v51 = vld [vmem:[#allocation18_spill] sm:$0xff] }
 0x24e   :  { %14852 = vst [vmem:[#allocation15_spill] sm:$0xff] %v11063_v2  ;;  %8083 = vmatmul.mubr.msk.bf16.gmra.mrb[36].mxu1 %vm272_vm1, %v2036_v13  ;;  %8197 = vmatmul.mubr.msk.bf16.gmra.mrb[36].mxu0 %vm272_vm1, %v2714_v3  ;;  %v2715_v18 = vpack.c.bf16 %v2641_v15, %v2640_v48  ;;  %v14857_v48 = vld [vmem:[#allocation19_spill] sm:$0xff] }
 0x24f   :  { %8086 = vmatprep.mubr.msk.bf16.mxu1 %vm9187_vm2, %v14801_v33  ;;  %8200 = vmatprep.mubr.msk.bf16.mxu0 %vm9187_vm2, %v14801_v33 }
 0x251   :  { %v1184_v14 = vpop.f32.mrb[188].mxu1  ;;  %v1690_v6 = vpop.f32.mrb[188].mxu0 }
 0x252   :  { %v11084_v44 = vadd.f32 %v1184_v14, %v14853_v4  ;;  %v11087_v40 = vadd.f32 %v1690_v6, %v10687_v27  ;;  %v7812_v26 = vpop.f32.mrb[189].mxu1  ;;  %v7926_v53 = vpop.f32.mrb[189].mxu0  ;;  %v1977_v27 = vld [vmem:[%s14765_s0 + $0x153] sm:$0xff] }
 0x253   :  { %v1187_v13 = vpop.f32.mrb[190].mxu1  ;;  %v1693_v3 = vpop.f32.mrb[190].mxu0 }
 0x254   :  { %14854 = vst [vmem:[#allocation16_spill] sm:$0xff] %v11087_v40  ;;  %v11090_v21 = vadd.f32 %v1187_v13, %v14855_v51  ;;  %v11093_v19 = vadd.f32 %v1693_v3, %v10693_v59  ;;  %v7927_v2 = vpop.f32.mrb[191].mxu0  ;;  %v7813_v30 = vpop.f32.mrb[191].mxu1  ;;  %v1978_v59 = vld [vmem:[%s14765_s0 + $0x15b] sm:$0xff] }
 0x255   :  { %v2642_v30 = vld [vmem:[%s14765_s0 + $0x84] sm:$0xff]  ;;  %v2643_v2 = vld [vmem:[%s14765_s0 + $0x8c] sm:$0xff]  ;;  %v2038_v26 = vpack.c.bf16 %v1978_v59, %v1977_v27  ;;  %v14859_v13 = vld [vmem:[#allocation20_spill] sm:$0xff] }
 0x256   :  { %14856 = vst [vmem:[#allocation17_spill] sm:$0xff] %v11093_v19  ;;  %8087 = vmatmul.mubr.msk.bf16.gmra.mrb[40].mxu1 %vm272_vm1, %v2037_v28  ;;  %8201 = vmatmul.mubr.msk.bf16.gmra.mrb[40].mxu0 %vm272_vm1, %v2715_v18  ;;  %v2716_v53 = vpack.c.bf16 %v2643_v2, %v2642_v30  ;;  %v14861_v30 = vld [vmem:[#allocation21_spill] sm:$0xff] }
 0x257   :  { %8090 = vmatprep.mubr.msk.bf16.mxu1 %vm9187_vm2, %v14801_v33  ;;  %8204 = vmatprep.mubr.msk.bf16.mxu0 %vm9187_vm2, %v14801_v33 }
 0x259   :  { %v1192_v49 = vpop.f32.mrb[192].mxu1  ;;  %v1698_v12 = vpop.f32.mrb[192].mxu0 }
 0x25a   :  { %v11114_v15 = vadd.f32 %v1192_v49, %v14857_v48  ;;  %v11117_v14 = vadd.f32 %v1698_v12, %v10717_v9  ;;  %v7816_v6 = vpop.f32.mrb[193].mxu1  ;;  %v7930_v4 = vpop.f32.mrb[193].mxu0  ;;  %v1979_v9 = vld [vmem:[%s14765_s0 + $0x163] sm:$0xff] }
 0x25b   :  { %v1195_v28 = vpop.f32.mrb[194].mxu1  ;;  %v1701_v18 = vpop.f32.mrb[194].mxu0 }
 0x25c   :  { %14858 = vst [vmem:[#allocation18_spill] sm:$0xff] %v11117_v14  ;;  %v11120_v3 = vadd.f32 %v1195_v28, %v14859_v13  ;;  %v11123_v51 = vadd.f32 %v1701_v18, %v10723_v55  ;;  %v7931_v19 = vpop.f32.mrb[195].mxu0  ;;  %v7817_v40 = vpop.f32.mrb[195].mxu1  ;;  %v1980_v55 = vld [vmem:[%s14765_s0 + $0x16b] sm:$0xff] }
 0x25d   :  { %v2644_v40 = vld [vmem:[%s14765_s0 + $0x94] sm:$0xff]  ;;  %v2645_v19 = vld [vmem:[%s14765_s0 + $0x9c] sm:$0xff]  ;;  %v2039_v6 = vpack.c.bf16 %v1980_v55, %v1979_v9  ;;  %v14863_v28 = vld [vmem:[#allocation22_spill] sm:$0xff] }
 0x25e   :  { %14860 = vst [vmem:[#allocation19_spill] sm:$0xff] %v11123_v51  ;;  %8091 = vmatmul.mubr.msk.bf16.gmra.mrb[44].mxu1 %vm272_vm1, %v2038_v26  ;;  %8205 = vmatmul.mubr.msk.bf16.gmra.mrb[44].mxu0 %vm272_vm1, %v2716_v53  ;;  %v2717_v4 = vpack.c.bf16 %v2645_v19, %v2644_v40  ;;  %v14865_v40 = vld [vmem:[#allocation23_spill] sm:$0xff] }
 0x25f   :  { %8094 = vmatprep.mubr.msk.bf16.mxu1 %vm9187_vm2, %v14801_v33  ;;  %8208 = vmatprep.mubr.msk.bf16.mxu0 %vm9187_vm2, %v14801_v33 }
 0x261   :  { %v1200_v27 = vpop.f32.mrb[196].mxu1  ;;  %v1706_v59 = vpop.f32.mrb[196].mxu0 }
 0x262   :  { %v11144_v2 = vadd.f32 %v1200_v27, %v14861_v30  ;;  %v11147_v49 = vadd.f32 %v1706_v59, %v10747_v54  ;;  %v7820_v12 = vpop.f32.mrb[197].mxu1  ;;  %v7934_v48 = vpop.f32.mrb[197].mxu0  ;;  %v1981_v54 = vld [vmem:[%s14765_s0 + $0x173] sm:$0xff] }
 0x263   :  { %v1203_v26 = vpop.f32.mrb[198].mxu1  ;;  %v1709_v53 = vpop.f32.mrb[198].mxu0 }
 0x264   :  { %14862 = vst [vmem:[#allocation20_spill] sm:$0xff] %v11147_v49  ;;  %v11150_v18 = vadd.f32 %v1203_v26, %v14863_v28  ;;  %v11153_v13 = vadd.f32 %v1709_v53, %v10753_v46  ;;  %v7935_v51 = vpop.f32.mrb[199].mxu0  ;;  %v7821_v14 = vpop.f32.mrb[199].mxu1  ;;  %v1982_v46 = vld [vmem:[%s14765_s0 + $0x17b] sm:$0xff] }
 0x265   :  { %v2646_v14 = vld [vmem:[%s14765_s0 + $0xa4] sm:$0xff]  ;;  %v2647_v51 = vld [vmem:[%s14765_s0 + $0xac] sm:$0xff]  ;;  %v2040_v12 = vpack.c.bf16 %v1982_v46, %v1981_v54  ;;  %v14867_v26 = vld [vmem:[#allocation24_spill] sm:$0xff] }
 0x266   :  { %14864 = vst [vmem:[#allocation21_spill] sm:$0xff] %v11153_v13  ;;  %8095 = vmatmul.mubr.msk.bf16.gmra.mrb[48].mxu1 %vm272_vm1, %v2039_v6  ;;  %8209 = vmatmul.mubr.msk.bf16.gmra.mrb[48].mxu0 %vm272_vm1, %v2717_v4  ;;  %v2718_v48 = vpack.c.bf16 %v2647_v51, %v2646_v14  ;;  %v14869_v14 = vld [vmem:[#allocation25_spill] sm:$0xff] }
 0x267   :  { %8098 = vmatprep.mubr.msk.bf16.mxu1 %vm9187_vm2, %v14801_v33  ;;  %8212 = vmatprep.mubr.msk.bf16.mxu0 %vm9187_vm2, %v14801_v33 }
 0x269   :  { %v1208_v9 = vpop.f32.mrb[200].mxu1  ;;  %v1714_v55 = vpop.f32.mrb[200].mxu0 }
 0x26a   :  { %v11174_v19 = vadd.f32 %v1208_v9, %v14865_v40  ;;  %v11177_v27 = vadd.f32 %v1714_v55, %v10777_v36  ;;  %v7824_v59 = vpop.f32.mrb[201].mxu1  ;;  %v7938_v30 = vpop.f32.mrb[201].mxu0  ;;  %v1983_v36 = vld [vmem:[%s14765_s0 + $0x183] sm:$0xff] }
 0x26b   :  { %v1211_v6 = vpop.f32.mrb[202].mxu1  ;;  %v1717_v4 = vpop.f32.mrb[202].mxu0 }
 0x26c   :  { %14866 = vst [vmem:[#allocation22_spill] sm:$0xff] %v11177_v27  ;;  %v11180_v53 = vadd.f32 %v1211_v6, %v14867_v26  ;;  %v11183_v28 = vadd.f32 %v1717_v4, %v10783_v22  ;;  %v7939_v13 = vpop.f32.mrb[203].mxu0  ;;  %v7825_v49 = vpop.f32.mrb[203].mxu1  ;;  %v1984_v22 = vld [vmem:[%s14765_s0 + $0x18b] sm:$0xff] }
 0x26d   :  { %v2648_v49 = vld [vmem:[%s14765_s0 + $0xb4] sm:$0xff]  ;;  %v2649_v13 = vld [vmem:[%s14765_s0 + $0xbc] sm:$0xff]  ;;  %v2041_v59 = vpack.c.bf16 %v1984_v22, %v1983_v36  ;;  %v14871_v6 = vld [vmem:[#allocation26_spill] sm:$0xff] }
 0x26e   :  { %14868 = vst [vmem:[#allocation23_spill] sm:$0xff] %v11183_v28  ;;  %8099 = vmatmul.mubr.msk.bf16.gmra.mrb[52].mxu1 %vm272_vm1, %v2040_v12  ;;  %8213 = vmatmul.mubr.msk.bf16.gmra.mrb[52].mxu0 %vm272_vm1, %v2718_v48  ;;  %v2719_v30 = vpack.c.bf16 %v2649_v13, %v2648_v49  ;;  %v14873_v49 = vld [vmem:[#allocation27_spill] sm:$0xff] }
 0x26f   :  { %8102 = vmatprep.mubr.msk.bf16.mxu1 %vm9187_vm2, %v14801_v33  ;;  %8216 = vmatprep.mubr.msk.bf16.mxu0 %vm9187_vm2, %v14801_v33 }
 0x271   :  { %v1216_v54 = vpop.f32.mrb[204].mxu1  ;;  %v1722_v46 = vpop.f32.mrb[204].mxu0 }
 0x272   :  { %v11204_v51 = vadd.f32 %v1216_v54, %v14869_v14  ;;  %v11207_v9 = vadd.f32 %v1722_v46, %v10807_v35  ;;  %v7828_v55 = vpop.f32.mrb[205].mxu1  ;;  %v7942_v40 = vpop.f32.mrb[205].mxu0  ;;  %v1985_v35 = vld [vmem:[%s14765_s0 + $0x193] sm:$0xff] }
 0x273   :  { %v1219_v12 = vpop.f32.mrb[206].mxu1  ;;  %v1725_v48 = vpop.f32.mrb[206].mxu0 }
 0x274   :  { %14870 = vst [vmem:[#allocation24_spill] sm:$0xff] %v11207_v9  ;;  %v11210_v4 = vadd.f32 %v1219_v12, %v14871_v6  ;;  %v11213_v26 = vadd.f32 %v1725_v48, %v10813_v60  ;;  %v7943_v28 = vpop.f32.mrb[207].mxu0  ;;  %v7829_v27 = vpop.f32.mrb[207].mxu1  ;;  %v1986_v60 = vld [vmem:[%s14765_s0 + $0x19b] sm:$0xff] }
 0x275   :  { %v2650_v27 = vld [vmem:[%s14765_s0 + $0xc4] sm:$0xff]  ;;  %v2651_v28 = vld [vmem:[%s14765_s0 + $0xcc] sm:$0xff]  ;;  %v2042_v55 = vpack.c.bf16 %v1986_v60, %v1985_v35  ;;  %v14875_v12 = vld [vmem:[#allocation28_spill] sm:$0xff] }
 0x276   :  { %14872 = vst [vmem:[#allocation25_spill] sm:$0xff] %v11213_v26  ;;  %8103 = vmatmul.mubr.msk.bf16.gmra.mrb[56].mxu1 %vm272_vm1, %v2041_v59  ;;  %8217 = vmatmul.mubr.msk.bf16.gmra.mrb[56].mxu0 %vm272_vm1, %v2719_v30  ;;  %v2720_v40 = vpack.c.bf16 %v2651_v28, %v2650_v27  ;;  %v14877_v27 = vld [vmem:[#allocation29_spill] sm:$0xff] }
 0x277   :  { %8106 = vmatprep.mubr.msk.bf16.mxu1 %vm9187_vm2, %v14801_v33  ;;  %8220 = vmatprep.mubr.msk.bf16.mxu0 %vm9187_vm2, %v14801_v33 }
 0x279   :  { %v1224_v36 = vpop.f32.mrb[208].mxu1  ;;  %v1730_v22 = vpop.f32.mrb[208].mxu0 }
 0x27a   :  { %v11234_v13 = vadd.f32 %v1224_v36, %v14873_v49  ;;  %v11237_v54 = vadd.f32 %v1730_v22, %v10837_v5  ;;  %v7832_v46 = vpop.f32.mrb[209].mxu1  ;;  %v7946_v14 = vpop.f32.mrb[209].mxu0  ;;  %v1987_v5 = vld [vmem:[%s14765_s0 + $0x1a3] sm:$0xff] }
 0x27b   :  { %v1227_v59 = vpop.f32.mrb[210].mxu1  ;;  %v1733_v30 = vpop.f32.mrb[210].mxu0 }
 0x27c   :  { %14874 = vst [vmem:[#allocation26_spill] sm:$0xff] %v11237_v54  ;;  %v11240_v48 = vadd.f32 %v1227_v59, %v14875_v12  ;;  %v11243_v6 = vadd.f32 %v1733_v30, %v10843_v11  ;;  %v7947_v26 = vpop.f32.mrb[211].mxu0  ;;  %v7833_v9 = vpop.f32.mrb[211].mxu1  ;;  %v1988_v11 = vld [vmem:[%s14765_s0 + $0x1ab] sm:$0xff] }
 0x27d   :  { %v2652_v9 = vld [vmem:[%s14765_s0 + $0xd4] sm:$0xff]  ;;  %v2653_v26 = vld [vmem:[%s14765_s0 + $0xdc] sm:$0xff]  ;;  %v2043_v46 = vpack.c.bf16 %v1988_v11, %v1987_v5  ;;  %v14878_v59 = vld [vmem:[#allocation30_spill] sm:$0xff] }
 0x27e   :  { %14876 = vst [vmem:[#allocation27_spill] sm:$0xff] %v11243_v6  ;;  %8107 = vmatmul.mubr.msk.bf16.gmra.mrb[60].mxu1 %vm272_vm1, %v2042_v55  ;;  %8221 = vmatmul.mubr.msk.bf16.gmra.mrb[60].mxu0 %vm272_vm1, %v2720_v40  ;;  %v2721_v14 = vpack.c.bf16 %v2653_v26, %v2652_v9  ;;  %v14879_v9 = vld [vmem:[#allocation31_spill] sm:$0xff] }
 0x27f   :  { %8110 = vmatprep.mubr.msk.bf16.mxu1 %vm9187_vm2, %v14801_v33  ;;  %8224 = vmatprep.mubr.msk.bf16.mxu0 %vm9187_vm2, %v14801_v33 }
 0x281   :  { %v1232_v35 = vpop.f32.mrb[212].mxu1  ;;  %v1738_v60 = vpop.f32.mrb[212].mxu0 }
 0x282   :  { %v11264_v28 = vadd.f32 %v1232_v35, %v14877_v27  ;;  %v11267_v36 = vadd.f32 %v1738_v60, %v10864_v0  ;;  %v7836_v22 = vpop.f32.mrb[213].mxu1  ;;  %v7950_v49 = vpop.f32.mrb[213].mxu0  ;;  %v1989_v0 = vld [vmem:[%s14765_s0 + $0x1b3] sm:$0xff] }
 0x283   :  { %v1235_v55 = vpop.f32.mrb[214].mxu1  ;;  %v1741_v40 = vpop.f32.mrb[214].mxu0 }
 0x284   :  { %v11270_v30 = vadd.f32 %v1235_v55, %v14878_v59  ;;  %v11273_v12 = vadd.f32 %v1741_v40, %v10870_v29  ;;  %v7951_v6 = vpop.f32.mrb[215].mxu0  ;;  %v7837_v54 = vpop.f32.mrb[215].mxu1  ;;  %v1990_v29 = vld [vmem:[%s14765_s0 + $0x1bb] sm:$0xff] }
 0x285   :  { %v2654_v54 = vld [vmem:[%s14765_s0 + $0xe4] sm:$0xff]  ;;  %v2655_v6 = vld [vmem:[%s14765_s0 + $0xec] sm:$0xff]  ;;  %v2044_v22 = vpack.c.bf16 %v1990_v29, %v1989_v0  ;;  %v2656_v0 = vld [vmem:[%s14765_s0 + $0xf4] sm:$0xff] }
 0x286   :  { %8111 = vmatmul.mubr.msk.bf16.gmra.mrb[64].mxu1 %vm272_vm1, %v2043_v46  ;;  %8225 = vmatmul.mubr.msk.bf16.gmra.mrb[64].mxu0 %vm272_vm1, %v2721_v14  ;;  %v2722_v49 = vpack.c.bf16 %v2655_v6, %v2654_v54  ;;  %v2657_v29 = vld [vmem:[%s14765_s0 + $0xfc] sm:$0xff] }
 0x287   :  { %8114 = vmatprep.mubr.msk.bf16.mxu1 %vm9187_vm2, %v14801_v33  ;;  %8228 = vmatprep.mubr.msk.bf16.mxu0 %vm9187_vm2, %v14801_v33 }
 0x289   :  { %v1240_v5 = vpop.f32.mrb[216].mxu1  ;;  %v1746_v11 = vpop.f32.mrb[216].mxu0 }
 0x28a   :  { %v11294_v26 = vadd.f32 %v1240_v5, %v14879_v9  ;;  %v11297_v35 = vadd.f32 %v1746_v11, %v10894_v8  ;;  %v7954_v60 = vpop.f32.mrb[217].mxu0  ;;  %v7840_v27 = vpop.f32.mrb[217].mxu1  ;;  %v1991_v8 = vld [vmem:[%s14765_s0 + $0x1c3] sm:$0xff] }
 0x28b   :  { %v1749_v46 = vpop.f32.mrb[218].mxu0  ;;  %v1243_v14 = vpop.f32.mrb[218].mxu1 }
 0x28c   :  { %14880 = vst [vmem:[#allocation28_spill] sm:$0xff] %v11297_v35  ;;  %v11300_v55 = vadd.f32 %v1749_v46, %v10900_v58  ;;  %v7955_v40 = vpop.f32.mrb[219].mxu0  ;;  %v7841_v59 = vpop.f32.mrb[219].mxu1  ;;  %v1992_v58 = vld [vmem:[%s14765_s0 + $0x1cb] sm:$0xff] }
 0x28d   :  { %v2045_v27 = vpack.c.bf16 %v1992_v58, %v1991_v8  ;;  %v14882_v40 = vld [vmem:[#allocation40_spill] sm:$0xff] }
 0x28e   :  { %14881 = vst [vmem:[#allocation29_spill] sm:$0xff] %v11300_v55  ;;  %8115 = vmatmul.mubr.msk.bf16.gmra.mrb[68].mxu1 %vm272_vm1, %v2044_v22  ;;  %8229 = vmatmul.mubr.msk.bf16.gmra.mrb[68].mxu0 %vm272_vm1, %v2722_v49  ;;  %v2723_v22 = vpack.c.bf16 %v2657_v29, %v2656_v0 }
 0x28f   :  { %8118 = vmatprep.mubr.msk.bf16.mxu1 %vm9187_vm2, %v14801_v33  ;;  %8232 = vmatprep.mubr.msk.bf16.mxu0 %vm9187_vm2, %v14801_v33 }
 0x291   :  { %v1754_v54 = vpop.f32.mrb[220].mxu0  ;;  %v2221_v6 = vpop.f32.mrb[220].mxu1 }
 0x292   :  { %v11321_v5 = vadd.f32 %v1754_v54, %v10924_v47  ;;  %v11324_v11 = vadd.f32 %v2221_v6, %v10480_v62  ;;  %v7958_v9 = vpop.f32.mrb[221].mxu0  ;;  %v8012_v60 = vpop.f32.mrb[221].mxu1  ;;  %v1993_v62 = vld [vmem:[%s14765_s0 + $0x1d3] sm:$0xff]  ;;  %v1994_v47 = vld [vmem:[%s14765_s0 + $0x1db] sm:$0xff] }
 0x293   :  { %v1757_v49 = vpop.f32.mrb[222].mxu0  ;;  %v2224_v46 = vpop.f32.mrb[222].mxu1  ;;  %v2046_v6 = vpack.c.bf16 %v1994_v47, %v1993_v62 }
 0x294   :  { %v11327_v14 = vadd.f32 %v1757_v49, %v10930_v43  ;;  %v11330_v59 = vadd.f32 %v2224_v46, %v14882_v40  ;;  %v7959_v55 = vpop.f32.mrb[223].mxu0  ;;  %v8013_v35 = vpop.f32.mrb[223].mxu1  ;;  %v2658_v43 = vld [vmem:[%s14765_s0 + $0x104] sm:$0xff] }
 0x295   :  { %v2659_v35 = vld [vmem:[%s14765_s0 + $0x10c] sm:$0xff] }
 0x296   :  { %8119 = vmatmul.mubr.msk.bf16.gmra.mrb[72].mxu1 %vm272_vm1, %v2045_v27  ;;  %8233 = vmatmul.mubr.msk.bf16.gmra.mrb[72].mxu0 %vm272_vm1, %v2723_v22  ;;  %v2724_v9 = vpack.c.bf16 %v2659_v35, %v2658_v43 }
 0x297   :  { %8122 = vmatprep.mubr.msk.bf16.mxu1 %vm9187_vm2, %v14801_v33  ;;  %8236 = vmatprep.mubr.msk.bf16.mxu0 %vm9187_vm2, %v14801_v33 }
 0x299   :  { %v1762_v55 = vpop.f32.mrb[224].mxu0  ;;  %v2229_v8 = vpop.f32.mrb[224].mxu1 }
 0x29a   :  { %v11351_v58 = vadd.f32 %v1762_v55, %v10954_v38  ;;  %v11354_v0 = vadd.f32 %v2229_v8, %v10510_v41  ;;  %v7962_v29 = vpop.f32.mrb[225].mxu0  ;;  %v8016_v54 = vpop.f32.mrb[225].mxu1  ;;  %v1995_v41 = vld [vmem:[%s14765_s0 + $0x1e3] sm:$0xff] }
 0x29b   :  { %v1765_v60 = vpop.f32.mrb[226].mxu0  ;;  %v2232_v27 = vpop.f32.mrb[226].mxu1  ;;  %v2661_v38 = vld [vmem:[%s14765_s0 + $0x11c] sm:$0xff] }
 0x29c   :  { %v11357_v22 = vadd.f32 %v1765_v60, %v10964_v1  ;;  %v11360_v49 = vadd.f32 %v2232_v27, %v10516_v61  ;;  %v7963_v46 = vpop.f32.mrb[227].mxu0  ;;  %v8017_v40 = vpop.f32.mrb[227].mxu1  ;;  %v1996_v61 = vld [vmem:[%s14765_s0 + $0x1eb] sm:$0xff]  ;;  %v2660_v1 = vld [vmem:[%s14765_s0 + $0x114] sm:$0xff] }
 0x29d   :  { %v2047_v29 = vpack.c.bf16 %v1996_v61, %v1995_v41  ;;  %v2725_v54 = vpack.c.bf16 %v2661_v38, %v2660_v1 }
 0x29e   :  { %8123 = vmatmul.mubr.msk.bf16.gmra.mrb[76].mxu1 %vm272_vm1, %v2046_v6  ;;  %8237 = vmatmul.mubr.msk.bf16.gmra.mrb[76].mxu0 %vm272_vm1, %v2724_v9 }
 0x29f   :  { %8126 = vmatprep.mubr.msk.bf16.mxu1 %vm9187_vm2, %v14801_v33  ;;  %8240 = vmatprep.mubr.msk.bf16.mxu0 %vm9187_vm2, %v14801_v33 }
 0x2a1   :  { %v1770_v62 = vpop.f32.mrb[228].mxu0  ;;  %v2237_v47 = vpop.f32.mrb[228].mxu1 }
 0x2a2   :  { %v11381_v43 = vadd.f32 %v1770_v62, %v10994_v63  ;;  %v11384_v35 = vadd.f32 %v2237_v47, %v10540_v56  ;;  %v7966_v55 = vpop.f32.mrb[229].mxu0  ;;  %v8020_v8 = vpop.f32.mrb[229].mxu1  ;;  %v1997_v56 = vld [vmem:[%s14765_s0 + $0x1f3] sm:$0xff] }
 0x2a3   :  { %v1773_v6 = vpop.f32.mrb[230].mxu0  ;;  %v2240_v9 = vpop.f32.mrb[230].mxu1  ;;  %v2663_v63 = vld [vmem:[%s14765_s0 + $0x12c] sm:$0xff] }
 0x2a4   :  { %v11387_v60 = vadd.f32 %v1773_v6, %v11000_v17  ;;  %v11390_v27 = vadd.f32 %v2240_v9, %v10546_v10  ;;  %v7967_v46 = vpop.f32.mrb[231].mxu0  ;;  %v8021_v40 = vpop.f32.mrb[231].mxu1  ;;  %v1998_v10 = vld [vmem:[%s14765_s0 + $0x1fb] sm:$0xff]  ;;  %v2662_v17 = vld [vmem:[%s14765_s0 + $0x124] sm:$0xff] }
 0x2a5   :  { %v2048_v55 = vpack.c.bf16 %v1998_v10, %v1997_v56  ;;  %v2726_v8 = vpack.c.bf16 %v2663_v63, %v2662_v17 }
 0x2a6   :  { %8127 = vmatmul.mubr.msk.bf16.gmra.mrb[80].mxu1 %vm272_vm1, %v2047_v29  ;;  %8241 = vmatmul.mubr.msk.bf16.gmra.mrb[80].mxu0 %vm272_vm1, %v2725_v54 }
 0x2a7   :  { %8130 = vmatprep.mubr.msk.bf16.mxu1 %vm9187_vm2, %v14801_v33  ;;  %8244 = vmatprep.mubr.msk.bf16.mxu0 %vm9187_vm2, %v14801_v33 }
 0x2a9   :  { %v1778_v41 = vpop.f32.mrb[232].mxu0  ;;  %v2245_v61 = vpop.f32.mrb[232].mxu1 }
 0x2aa   :  { %v11411_v1 = vadd.f32 %v1778_v41, %v11024_v20  ;;  %v11414_v38 = vadd.f32 %v2245_v61, %v10570_v34  ;;  %v7970_v62 = vpop.f32.mrb[233].mxu0  ;;  %v8024_v47 = vpop.f32.mrb[233].mxu1  ;;  %v1999_v34 = vld [vmem:[%s14765_s0 + $0x203] sm:$0xff]  ;;  %v2664_v20 = vld [vmem:[%s14765_s0 + $0x134] sm:$0xff] }
 0x2ab   :  { %v1781_v29 = vpop.f32.mrb[234].mxu0  ;;  %v2248_v54 = vpop.f32.mrb[234].mxu1 }
 0x2ac   :  { %v11417_v6 = vadd.f32 %v1781_v29, %v11030_v37  ;;  %v11420_v9 = vadd.f32 %v2248_v54, %v10576_v32  ;;  %v7971_v46 = vpop.f32.mrb[235].mxu0  ;;  %v8025_v40 = vpop.f32.mrb[235].mxu1  ;;  %v2000_v32 = vld [vmem:[%s14765_s0 + $0x20b] sm:$0xff]  ;;  %v2665_v37 = vld [vmem:[%s14765_s0 + $0x13c] sm:$0xff] }
 0x2ad   :  { %v2049_v62 = vpack.c.bf16 %v2000_v32, %v1999_v34  ;;  %v2727_v47 = vpack.c.bf16 %v2665_v37, %v2664_v20 }
 0x2ae   :  { %8131 = vmatmul.mubr.msk.bf16.gmra.mrb[84].mxu1 %vm272_vm1, %v2048_v55  ;;  %8245 = vmatmul.mubr.msk.bf16.gmra.mrb[84].mxu0 %vm272_vm1, %v2726_v8 }
 0x2af   :  { %8134 = vmatprep.mubr.msk.bf16.mxu1 %vm9187_vm2, %v14801_v33  ;;  %8248 = vmatprep.mubr.msk.bf16.mxu0 %vm9187_vm2, %v14801_v33 }
 0x2b1   :  { %v1786_v56 = vpop.f32.mrb[236].mxu0  ;;  %v2253_v10 = vpop.f32.mrb[236].mxu1 }
 0x2b2   :  { %v11441_v17 = vadd.f32 %v1786_v56, %v11054_v50  ;;  %v11444_v63 = vadd.f32 %v2253_v10, %v10600_v31  ;;  %v7974_v41 = vpop.f32.mrb[237].mxu0  ;;  %v8028_v61 = vpop.f32.mrb[237].mxu1  ;;  %v2001_v31 = vld [vmem:[%s14765_s0 + $0x213] sm:$0xff]  ;;  %v2666_v50 = vld [vmem:[%s14765_s0 + $0x144] sm:$0xff] }
 0x2b3   :  { %v1789_v55 = vpop.f32.mrb[238].mxu0  ;;  %v2256_v8 = vpop.f32.mrb[238].mxu1 }
 0x2b4   :  { %v11447_v29 = vadd.f32 %v1789_v55, %v11060_v39  ;;  %v11450_v54 = vadd.f32 %v2256_v8, %v10606_v25  ;;  %v7975_v46 = vpop.f32.mrb[239].mxu0  ;;  %v8029_v40 = vpop.f32.mrb[239].mxu1  ;;  %v2002_v25 = vld [vmem:[%s14765_s0 + $0x21b] sm:$0xff]  ;;  %v2667_v39 = vld [vmem:[%s14765_s0 + $0x14c] sm:$0xff] }
 0x2b5   :  { %v2050_v41 = vpack.c.bf16 %v2002_v25, %v2001_v31  ;;  %v2728_v61 = vpack.c.bf16 %v2667_v39, %v2666_v50 }
 0x2b6   :  { %8135 = vmatmul.mubr.msk.bf16.gmra.mrb[88].mxu1 %vm272_vm1, %v2049_v62  ;;  %8249 = vmatmul.mubr.msk.bf16.gmra.mrb[88].mxu0 %vm272_vm1, %v2727_v47 }
 0x2b7   :  { %8138 = vmatprep.mubr.msk.bf16.mxu1 %vm9187_vm2, %v14801_v33  ;;  %8252 = vmatprep.mubr.msk.bf16.mxu0 %vm9187_vm2, %v14801_v33 }
 0x2b9   :  { %v1794_v34 = vpop.f32.mrb[240].mxu0  ;;  %v2261_v32 = vpop.f32.mrb[240].mxu1 }
 0x2ba   :  { %v11471_v20 = vadd.f32 %v1794_v34, %v11084_v44  ;;  %v11474_v37 = vadd.f32 %v2261_v32, %v10630_v7  ;;  %v7978_v56 = vpop.f32.mrb[241].mxu0  ;;  %v8032_v10 = vpop.f32.mrb[241].mxu1  ;;  %v2003_v7 = vld [vmem:[%s14765_s0 + $0x223] sm:$0xff]  ;;  %v2668_v44 = vld [vmem:[%s14765_s0 + $0x154] sm:$0xff] }
 0x2bb   :  { %v1797_v62 = vpop.f32.mrb[242].mxu0  ;;  %v2264_v47 = vpop.f32.mrb[242].mxu1 }
 0x2bc   :  { %14883 = vst [vmem:[#allocation30_spill] sm:$0xff] %v11471_v20  ;;  %v11477_v55 = vadd.f32 %v1797_v62, %v11090_v21  ;;  %v11480_v8 = vadd.f32 %v2264_v47, %v10636_v57  ;;  %v7979_v46 = vpop.f32.mrb[243].mxu0  ;;  %v8033_v40 = vpop.f32.mrb[243].mxu1  ;;  %v2004_v57 = vld [vmem:[%s14765_s0 + $0x22b] sm:$0xff]  ;;  %v2669_v21 = vld [vmem:[%s14765_s0 + $0x15c] sm:$0xff] }
 0x2bd   :  { %v2051_v56 = vpack.c.bf16 %v2004_v57, %v2003_v7  ;;  %v2729_v10 = vpack.c.bf16 %v2669_v21, %v2668_v44 }
 0x2be   :  { %14884 = vst [vmem:[#allocation31_spill] sm:$0xff] %v11477_v55  ;;  %8139 = vmatmul.mubr.msk.bf16.gmra.mrb[92].mxu1 %vm272_vm1, %v2050_v41  ;;  %8253 = vmatmul.mubr.msk.bf16.gmra.mrb[92].mxu0 %vm272_vm1, %v2728_v61 }
 0x2bf   :  { %8142 = vmatprep.mubr.msk.bf16.mxu1 %vm9187_vm2, %v14801_v33  ;;  %8256 = vmatprep.mubr.msk.bf16.mxu0 %vm9187_vm2, %v14801_v33 }
 0x2c1   :  { %v1802_v31 = vpop.f32.mrb[244].mxu0  ;;  %v2269_v25 = vpop.f32.mrb[244].mxu1 }
 0x2c2   :  { %v11501_v50 = vadd.f32 %v1802_v31, %v11114_v15  ;;  %v11504_v39 = vadd.f32 %v2269_v25, %v10660_v42  ;;  %v7982_v34 = vpop.f32.mrb[245].mxu0  ;;  %v8036_v32 = vpop.f32.mrb[245].mxu1  ;;  %v2005_v42 = vld [vmem:[%s14765_s0 + $0x233] sm:$0xff]  ;;  %v2670_v15 = vld [vmem:[%s14765_s0 + $0x164] sm:$0xff] }
 0x2c3   :  { %v1805_v41 = vpop.f32.mrb[246].mxu0  ;;  %v2272_v61 = vpop.f32.mrb[246].mxu1 }
 0x2c4   :  { %14885 = vst [vmem:[#allocation40_spill] sm:$0xff] %v11501_v50  ;;  %v11507_v62 = vadd.f32 %v1805_v41, %v11120_v3  ;;  %v11510_v47 = vadd.f32 %v2272_v61, %v10666_v16  ;;  %v7983_v46 = vpop.f32.mrb[247].mxu0  ;;  %v8037_v40 = vpop.f32.mrb[247].mxu1  ;;  %v2006_v16 = vld [vmem:[%s14765_s0 + $0x23b] sm:$0xff]  ;;  %v2671_v3 = vld [vmem:[%s14765_s0 + $0x16c] sm:$0xff] }
 0x2c5   :  { %v2052_v34 = vpack.c.bf16 %v2006_v16, %v2005_v42  ;;  %v2730_v32 = vpack.c.bf16 %v2671_v3, %v2670_v15 }
 0x2c6   :  { %14886 = vst [vmem:[#allocation44_spill] sm:$0xff] %v11507_v62  ;;  %8143 = vmatmul.mubr.msk.bf16.gmra.mrb[96].mxu1 %vm272_vm1, %v2051_v56  ;;  %8257 = vmatmul.mubr.msk.bf16.gmra.mrb[96].mxu0 %vm272_vm1, %v2729_v10 }
 0x2c7   :  { %8146 = vmatprep.mubr.msk.bf16.mxu1 %vm9187_vm2, %v14801_v33  ;;  %8260 = vmatprep.mubr.msk.bf16.mxu0 %vm9187_vm2, %v14801_v33 }
 0x2c9   :  { %v1810_v7 = vpop.f32.mrb[248].mxu0  ;;  %v2277_v57 = vpop.f32.mrb[248].mxu1 }
 0x2ca   :  { %v11531_v44 = vadd.f32 %v1810_v7, %v11144_v2  ;;  %v11534_v21 = vadd.f32 %v2277_v57, %v10690_v23  ;;  %v7986_v31 = vpop.f32.mrb[249].mxu0  ;;  %v8040_v25 = vpop.f32.mrb[249].mxu1  ;;  %v2007_v23 = vld [vmem:[%s14765_s0 + $0x243] sm:$0xff]  ;;  %v2672_v2 = vld [vmem:[%s14765_s0 + $0x174] sm:$0xff] }
 0x2cb   :  { %v1813_v56 = vpop.f32.mrb[250].mxu0  ;;  %v2280_v10 = vpop.f32.mrb[250].mxu1 }
 0x2cc   :  { %14887 = vst [vmem:[#allocation45_spill] sm:$0xff] %v11531_v44  ;;  %v11537_v41 = vadd.f32 %v1813_v56, %v11150_v18  ;;  %v11540_v61 = vadd.f32 %v2280_v10, %v10696_v45  ;;  %v7987_v46 = vpop.f32.mrb[251].mxu0  ;;  %v8041_v40 = vpop.f32.mrb[251].mxu1  ;;  %v2008_v45 = vld [vmem:[%s14765_s0 + $0x24b] sm:$0xff]  ;;  %v2673_v18 = vld [vmem:[%s14765_s0 + $0x17c] sm:$0xff] }
 0x2cd   :  { %v2053_v31 = vpack.c.bf16 %v2008_v45, %v2007_v23  ;;  %v2731_v25 = vpack.c.bf16 %v2673_v18, %v2672_v2  ;;  %v14892_v18 = vld [vmem:[#allocation41_spill] sm:$0xff] }
 0x2ce   :  { %14888 = vst [vmem:[#allocation46_spill] sm:$0xff] %v11537_v41  ;;  %8147 = vmatmul.mubr.msk.bf16.gmra.mrb[100].mxu1 %vm272_vm1, %v2052_v34  ;;  %8261 = vmatmul.mubr.msk.bf16.gmra.mrb[100].mxu0 %vm272_vm1, %v2730_v32 }
 0x2cf   :  { %8150 = vmatprep.mubr.msk.bf16.mxu1 %vm9187_vm2, %v14801_v33  ;;  %8264 = vmatprep.mubr.msk.bf16.mxu0 %vm9187_vm2, %v14801_v33 }
 0x2d1   :  { %v1818_v42 = vpop.f32.mrb[252].mxu0  ;;  %v2285_v16 = vpop.f32.mrb[252].mxu1 }
 0x2d2   :  { %v11561_v15 = vadd.f32 %v1818_v42, %v11174_v19  ;;  %v11564_v3 = vadd.f32 %v2285_v16, %v10720_v52  ;;  %v7990_v7 = vpop.f32.mrb[253].mxu0  ;;  %v8044_v57 = vpop.f32.mrb[253].mxu1  ;;  %v2009_v52 = vld [vmem:[%s14765_s0 + $0x253] sm:$0xff]  ;;  %v2674_v19 = vld [vmem:[%s14765_s0 + $0x184] sm:$0xff] }
 0x2d3   :  { %v1821_v34 = vpop.f32.mrb[254].mxu0  ;;  %v2288_v32 = vpop.f32.mrb[254].mxu1 }
 0x2d4   :  { %14889 = vst [vmem:[#allocation47_spill] sm:$0xff] %v11561_v15  ;;  %v11567_v56 = vadd.f32 %v1821_v34, %v11180_v53  ;;  %v11570_v10 = vadd.f32 %v2288_v32, %v10726_v24  ;;  %v7991_v46 = vpop.f32.mrb[255].mxu0  ;;  %v8045_v40 = vpop.f32.mrb[255].mxu1  ;;  %v2010_v24 = vld [vmem:[%s14765_s0 + $0x25b] sm:$0xff]  ;;  %v2675_v53 = vld [vmem:[%s14765_s0 + $0x18c] sm:$0xff] }
 0x2d5   :  { %v2054_v57 = vpack.c.bf16 %v2010_v24, %v2009_v52  ;;  %v14894_v46 = vld [vmem:[#allocation42_spill] sm:$0xff] }
 0x2d6   :  { %14890 = vst [vmem:[#allocation48_spill] sm:$0xff] %v11567_v56  ;;  %8151 = vmatmul.mubr.msk.bf16.gmra.mrb[104].mxu1 %vm272_vm1, %v2053_v31  ;;  %8265 = vmatmul.mubr.msk.bf16.gmra.mrb[104].mxu0 %vm272_vm1, %v2731_v25  ;;  %v2732_v31 = vpack.c.bf16 %v2675_v53, %v2674_v19  ;;  %v14896_v53 = vld [vmem:[#allocation43_spill] sm:$0xff] }
 0x2d7   :  { %8154 = vmatprep.mubr.msk.bf16.mxu1 %vm9187_vm2, %v14801_v33  ;;  %8268 = vmatprep.mubr.msk.bf16.mxu0 %vm9187_vm2, %v14801_v33 }
 0x2d9   :  { %v1826_v23 = vpop.f32.mrb[0].mxu0  ;;  %v2293_v45 = vpop.f32.mrb[0].mxu1 }
 0x2da   :  { %v11591_v2 = vadd.f32 %v1826_v23, %v11204_v51  ;;  %v11594_v42 = vadd.f32 %v2293_v45, %v14892_v18  ;;  %v7994_v16 = vpop.f32.mrb[1].mxu0  ;;  %v8048_v7 = vpop.f32.mrb[1].mxu1  ;;  %v2011_v51 = vld [vmem:[%s14765_s0 + $0x263] sm:$0xff] }
 0x2db   :  { %v1829_v25 = vpop.f32.mrb[2].mxu0  ;;  %v2296_v34 = vpop.f32.mrb[2].mxu1 }
 0x2dc   :  { %14891 = vst [vmem:[#allocation49_spill] sm:$0xff] %v11591_v2  ;;  %v11597_v32 = vadd.f32 %v1829_v25, %v11210_v4  ;;  %v11600_v40 = vadd.f32 %v2296_v34, %v14894_v46  ;;  %v7995_v56 = vpop.f32.mrb[3].mxu0  ;;  %v8049_v15 = vpop.f32.mrb[3].mxu1  ;;  %v2012_v4 = vld [vmem:[%s14765_s0 + $0x26b] sm:$0xff]  ;;  %v14898_v34 = vld [vmem:[#allocation32_spill] sm:$0xff] }
 0x2dd   :  { %v2676_v15 = vld [vmem:[%s14765_s0 + $0x194] sm:$0xff]  ;;  %v2677_v56 = vld [vmem:[%s14765_s0 + $0x19c] sm:$0xff]  ;;  %v2055_v16 = vpack.c.bf16 %v2012_v4, %v2011_v51 }
 0x2de   :  { %14893 = vst [vmem:[#allocation41_spill] sm:$0xff] %v11597_v32  ;;  %8155 = vmatmul.mubr.msk.bf16.gmra.mrb[108].mxu1 %vm272_vm1, %v2054_v57  ;;  %8269 = vmatmul.mubr.msk.bf16.gmra.mrb[108].mxu0 %vm272_vm1, %v2732_v31  ;;  %v2733_v7 = vpack.c.bf16 %v2677_v56, %v2676_v15  ;;  %v14900_v56 = vld [vmem:[#allocation33_spill] sm:$0xff] }
 0x2df   :  { %8158 = vmatprep.mubr.msk.bf16.mxu1 %vm9187_vm2, %v14801_v33  ;;  %8272 = vmatprep.mubr.msk.bf16.mxu0 %vm9187_vm2, %v14801_v33 }
 0x2e1   :  { %v1834_v52 = vpop.f32.mrb[4].mxu0  ;;  %v2301_v24 = vpop.f32.mrb[4].mxu1 }
 0x2e2   :  { %v11621_v19 = vadd.f32 %v1834_v52, %v11234_v13  ;;  %v11624_v23 = vadd.f32 %v2301_v24, %v14896_v53  ;;  %v7998_v45 = vpop.f32.mrb[5].mxu0  ;;  %v8052_v18 = vpop.f32.mrb[5].mxu1  ;;  %v2013_v13 = vld [vmem:[%s14765_s0 + $0x273] sm:$0xff] }
 0x2e3   :  { %v1837_v57 = vpop.f32.mrb[6].mxu0  ;;  %v2304_v31 = vpop.f32.mrb[6].mxu1 }
 0x2e4   :  { %14895 = vst [vmem:[#allocation42_spill] sm:$0xff] %v11621_v19  ;;  %v11627_v25 = vadd.f32 %v1837_v57, %v11240_v48  ;;  %v11630_v46 = vadd.f32 %v2304_v31, %v14898_v34  ;;  %v7999_v32 = vpop.f32.mrb[7].mxu0  ;;  %v8053_v2 = vpop.f32.mrb[7].mxu1  ;;  %v2014_v48 = vld [vmem:[%s14765_s0 + $0x27b] sm:$0xff]  ;;  %v14902_v31 = vld [vmem:[#allocation34_spill] sm:$0xff] }
 0x2e5   :  { %v2678_v2 = vld [vmem:[%s14765_s0 + $0x1a4] sm:$0xff]  ;;  %v2679_v32 = vld [vmem:[%s14765_s0 + $0x1ac] sm:$0xff]  ;;  %v2056_v45 = vpack.c.bf16 %v2014_v48, %v2013_v13 }
 0x2e6   :  { %14897 = vst [vmem:[#allocation43_spill] sm:$0xff] %v11627_v25  ;;  %8159 = vmatmul.mubr.msk.bf16.gmra.mrb[112].mxu1 %vm272_vm1, %v2055_v16  ;;  %8273 = vmatmul.mubr.msk.bf16.gmra.mrb[112].mxu0 %vm272_vm1, %v2733_v7  ;;  %v2734_v18 = vpack.c.bf16 %v2679_v32, %v2678_v2  ;;  %v14904_v32 = vld [vmem:[#allocation35_spill] sm:$0xff] }
 0x2e7   :  { %8162 = vmatprep.mubr.msk.bf16.mxu1 %vm9187_vm2, %v14801_v33  ;;  %8276 = vmatprep.mubr.msk.bf16.mxu0 %vm9187_vm2, %v14801_v33 }
 0x2e9   :  { %v1842_v51 = vpop.f32.mrb[8].mxu0  ;;  %v2309_v4 = vpop.f32.mrb[8].mxu1 }
 0x2ea   :  { %v11651_v15 = vadd.f32 %v1842_v51, %v11264_v28  ;;  %v11654_v52 = vadd.f32 %v2309_v4, %v14900_v56  ;;  %v8002_v24 = vpop.f32.mrb[9].mxu0  ;;  %v8056_v53 = vpop.f32.mrb[9].mxu1  ;;  %v2015_v28 = vld [vmem:[%s14765_s0 + $0x283] sm:$0xff] }
 0x2eb   :  { %v1845_v16 = vpop.f32.mrb[10].mxu0  ;;  %v2312_v7 = vpop.f32.mrb[10].mxu1 }
 0x2ec   :  { %14899 = vst [vmem:[#allocation32_spill] sm:$0xff] %v11651_v15  ;;  %v11657_v57 = vadd.f32 %v1845_v16, %v11270_v30  ;;  %v11660_v34 = vadd.f32 %v2312_v7, %v14902_v31  ;;  %v8003_v25 = vpop.f32.mrb[11].mxu0  ;;  %v8057_v19 = vpop.f32.mrb[11].mxu1  ;;  %v2016_v30 = vld [vmem:[%s14765_s0 + $0x28b] sm:$0xff]  ;;  %v14905_v16 = vld [vmem:[#allocation36_spill] sm:$0xff] }
 0x2ed   :  { %v2680_v19 = vld [vmem:[%s14765_s0 + $0x1b4] sm:$0xff]  ;;  %v2681_v25 = vld [vmem:[%s14765_s0 + $0x1bc] sm:$0xff]  ;;  %v2057_v24 = vpack.c.bf16 %v2016_v30, %v2015_v28  ;;  %v2682_v28 = vld [vmem:[%s14765_s0 + $0x1c4] sm:$0xff] }
 0x2ee   :  { %14901 = vst [vmem:[#allocation33_spill] sm:$0xff] %v11657_v57  ;;  %8163 = vmatmul.mubr.msk.bf16.gmra.mrb[116].mxu1 %vm272_vm1, %v2056_v45  ;;  %8277 = vmatmul.mubr.msk.bf16.gmra.mrb[116].mxu0 %vm272_vm1, %v2734_v18  ;;  %v2735_v53 = vpack.c.bf16 %v2681_v25, %v2680_v19  ;;  %v14906_v25 = vld [vmem:[#allocation39_spill] sm:$0xff] }
 0x2ef   :  { %8166 = vmatprep.mubr.msk.bf16.mxu1 %vm9187_vm2, %v14801_v33  ;;  %8280 = vmatprep.mubr.msk.bf16.mxu0 %vm9187_vm2, %v14801_v33 }
 0x2f1   :  { %v1850_v13 = vpop.f32.mrb[12].mxu0  ;;  %v2317_v48 = vpop.f32.mrb[12].mxu1 }
 0x2f2   :  { %v11681_v2 = vadd.f32 %v1850_v13, %v11294_v26  ;;  %v11684_v51 = vadd.f32 %v2317_v48, %v14904_v32  ;;  %v8006_v4 = vpop.f32.mrb[13].mxu0  ;;  %v8060_v56 = vpop.f32.mrb[13].mxu1  ;;  %v2017_v26 = vld [vmem:[%s14765_s0 + $0x293] sm:$0xff] }
 0x2f3   :  { %v1853_v45 = vpop.f32.mrb[14].mxu0  ;;  %v2320_v18 = vpop.f32.mrb[14].mxu1  ;;  %v2058_v56 = vpack.c.bf16 %v2017_v26, %v2017_v26 }
 0x2f4   :  { %14903 = vst [vmem:[#allocation34_spill] sm:$0xff] %v11681_v2  ;;  %v11687_v7 = vadd.f32 %v2320_v18, %v14905_v16  ;;  %v8007_v31 = vpop.f32.mrb[15].mxu0  ;;  %v8061_v57 = vpop.f32.mrb[15].mxu1  ;;  %v14908_v18 = vld [vmem:[#allocation37_spill] sm:$0xff] }
 0x2f5   :  { %v2683_v57 = vld [vmem:[%s14765_s0 + $0x1cc] sm:$0xff] }
 0x2f6   :  { %8167 = vmatmul.mubr.msk.bf16.gmra.mrb[120].mxu1 %vm272_vm1, %v2057_v24  ;;  %8281 = vmatmul.mubr.msk.bf16.gmra.mrb[120].mxu0 %vm272_vm1, %v2735_v53  ;;  %v2736_v24 = vpack.c.bf16 %v2683_v57, %v2682_v28  ;;  %v14910_v57 = vld [vmem:[#allocation38_spill] sm:$0xff] }
 0x2f7   :  { %8170 = vmatprep.mubr.msk.bf16.mxu1 %vm9187_vm2, %v14801_v33  ;;  %8284 = vmatprep.mubr.msk.bf16.mxu0 %vm9187_vm2, %v14801_v33 }
 0x2f9   :  { %v2325_v30 = vpop.f32.mrb[16].mxu1  ;;  %v2912_v19 = vpop.f32.mrb[16].mxu0 }
 0x2fa   :  { %v11705_v13 = vadd.f32 %v2325_v30, %v14906_v25  ;;  %v11708_v48 = vadd.f32 %v2912_v19, %v11324_v11  ;;  %v8064_v32 = vpop.f32.mrb[17].mxu1  ;;  %v8178_v4 = vpop.f32.mrb[17].mxu0  ;;  %v2684_v11 = vld [vmem:[%s14765_s0 + $0x1d4] sm:$0xff] }
 0x2fb   :  { %v2328_v53 = vpop.f32.mrb[18].mxu1  ;;  %v2915_v45 = vpop.f32.mrb[18].mxu0 }
 0x2fc   :  { %14907 = vst [vmem:[#allocation35_spill] sm:$0xff] %v11708_v48  ;;  %v11711_v16 = vadd.f32 %v2328_v53, %v14908_v18  ;;  %v11714_v31 = vadd.f32 %v2915_v45, %v11330_v59  ;;  %v8179_v2 = vpop.f32.mrb[19].mxu0  ;;  %v8065_v15 = vpop.f32.mrb[19].mxu1  ;;  %v2685_v59 = vld [vmem:[%s14765_s0 + $0x1dc] sm:$0xff] }
 0x2fd   :  { %v3319_v15 = vld [vmem:[%s14765_s0 + $0x15] sm:$0xff]  ;;  %v3320_v2 = vld [vmem:[%s14765_s0 + $0x1d] sm:$0xff]  ;;  %v2737_v4 = vpack.c.bf16 %v2685_v59, %v2684_v11 }
 0x2fe   :  { %14909 = vst [vmem:[#allocation36_spill] sm:$0xff] %v11714_v31  ;;  %8171 = vmatmul.mubr.msk.bf16.gmra.mrb[124].mxu1 %vm272_vm1, %v2058_v56  ;;  %8285 = vmatmul.mubr.msk.bf16.gmra.mrb[124].mxu0 %vm272_vm1, %v2736_v24  ;;  %v3400_v56 = vpack.c.bf16 %v3320_v2, %v3319_v15  ;;  %v14912_v45 = vld [vmem:[#allocation5_spill] sm:$0xff]  ;;  %v14914_v15 = vld [vmem:[#allocation6_spill] sm:$0xff] }
 0x2ff   :  { %8288 = vmatprep.mubr.msk.bf16.mxu0 %vm9187_vm2, %v14801_v33  ;;  %8342 = vmatprep.mubr.msk.bf16.mxu1 %vm9187_vm2, %v14801_v33 }
 0x301   :  { %v2333_v26 = vpop.f32.mrb[20].mxu1  ;;  %v2920_v28 = vpop.f32.mrb[20].mxu0 }
 0x302   :  { %v11735_v30 = vadd.f32 %v2333_v26, %v14910_v57  ;;  %v11738_v19 = vadd.f32 %v2920_v28, %v11354_v0  ;;  %v8068_v25 = vpop.f32.mrb[21].mxu1  ;;  %v8182_v32 = vpop.f32.mrb[21].mxu0  ;;  %v2686_v0 = vld [vmem:[%s14765_s0 + $0x1e4] sm:$0xff] }
 0x303   :  { %v2336_v24 = vpop.f32.mrb[22].mxu1  ;;  %v2923_v53 = vpop.f32.mrb[22].mxu0 }
 0x304   :  { %14911 = vst [vmem:[#allocation39_spill] sm:$0xff] %v11738_v19  ;;  %v11741_v18 = vadd.f32 %v2336_v24, %v14912_v45  ;;  %v11744_v31 = vadd.f32 %v2923_v53, %v11360_v49  ;;  %v8183_v48 = vpop.f32.mrb[23].mxu0  ;;  %v8069_v41 = vpop.f32.mrb[23].mxu1  ;;  %v2687_v49 = vld [vmem:[%s14765_s0 + $0x1ec] sm:$0xff] }
 0x305   :  { %v3321_v41 = vld [vmem:[%s14765_s0 + $0x25] sm:$0xff]  ;;  %v3322_v48 = vld [vmem:[%s14765_s0 + $0x2d] sm:$0xff]  ;;  %v2738_v25 = vpack.c.bf16 %v2687_v49, %v2686_v0 }
 0x306   :  { %14913 = vst [vmem:[#allocation37_spill] sm:$0xff] %v11744_v31  ;;  %8289 = vmatmul.mubr.msk.bf16.gmra.mrb[128].mxu0 %vm272_vm1, %v2737_v4  ;;  %8343 = vmatmul.mubr.msk.bf16.vlgmr.msra.gmra.mrb[128].mxu1 %vm272_vm1, %v3400_v56  ;;  %v11770_v32 = vpack.c.bf16 %v3322_v48, %v3321_v41  ;;  %v14916_v24 = vld [vmem:[#allocation7_spill] sm:$0xff]  ;;  %v14918_v41 = vld [vmem:[#allocation8_spill] sm:$0xff] }
 0x307   :  { %8292 = vmatprep.mubr.msk.bf16.mxu0 %vm9187_vm2, %v14801_v33  ;;  %8346 = vmatprep.mubr.msk.bf16.mxu1 %vm9187_vm2, %v14801_v33 }
 0x309   :  { %v2341_v11 = vpop.f32.mrb[24].mxu1  ;;  %v2928_v59 = vpop.f32.mrb[24].mxu0 }
 0x30a   :  { %v11765_v2 = vadd.f32 %v2341_v11, %v14914_v15  ;;  %v11768_v26 = vadd.f32 %v2928_v59, %v11384_v35  ;;  %v8072_v28 = vpop.f32.mrb[25].mxu1  ;;  %v8186_v57 = vpop.f32.mrb[25].mxu0  ;;  %v2688_v35 = vld [vmem:[%s14765_s0 + $0x1f4] sm:$0xff] }
 0x30b   :  { %v2344_v4 = vpop.f32.mrb[26].mxu1  ;;  %v2931_v56 = vpop.f32.mrb[26].mxu0 }
 0x30c   :  { %14915 = vst [vmem:[#allocation38_spill] sm:$0xff] %v11768_v26  ;;  %v11773_v53 = vadd.f32 %v2344_v4, %v14916_v24  ;;  %v11776_v45 = vadd.f32 %v2931_v56, %v11390_v27  ;;  %v8187_v31 = vpop.f32.mrb[27].mxu0  ;;  %v8073_v19 = vpop.f32.mrb[27].mxu1  ;;  %v2689_v27 = vld [vmem:[%s14765_s0 + $0x1fc] sm:$0xff] }
 0x30d   :  { %v3323_v31 = vld [vmem:[%s14765_s0 + $0x35] sm:$0xff]  ;;  %v3324_v19 = vld [vmem:[%s14765_s0 + $0x3d] sm:$0xff]  ;;  %v2739_v28 = vpack.c.bf16 %v2689_v27, %v2688_v35 }
 0x30e   :  { %14917 = vst [vmem:[#allocation5_spill] sm:$0xff] %v11776_v45  ;;  %8293 = vmatmul.mubr.msk.bf16.gmra.mrb[132].mxu0 %vm272_vm1, %v2738_v25  ;;  %8347 = vmatmul.mubr.msk.bf16.gmra.mrb[132].mxu1 %vm272_vm1, %v11770_v32  ;;  %v11803_v57 = vpack.c.bf16 %v3324_v19, %v3323_v31  ;;  %v14920_v56 = vld [vmem:[#allocation9_spill] sm:$0xff]  ;;  %v14922_v31 = vld [vmem:[#allocation10_spill] sm:$0xff] }
 0x30f   :  { %8296 = vmatprep.mubr.msk.bf16.mxu0 %vm9187_vm2, %v14801_v33  ;;  %8350 = vmatprep.mubr.msk.bf16.mxu1 %vm9187_vm2, %v14801_v33 }
 0x311   :  { %v2349_v0 = vpop.f32.mrb[28].mxu1  ;;  %v2936_v49 = vpop.f32.mrb[28].mxu0 }
 0x312   :  { %v11798_v48 = vadd.f32 %v2349_v0, %v14918_v41  ;;  %v11801_v11 = vadd.f32 %v2936_v49, %v11414_v38  ;;  %v8076_v59 = vpop.f32.mrb[29].mxu1  ;;  %v8190_v15 = vpop.f32.mrb[29].mxu0  ;;  %v2690_v38 = vld [vmem:[%s14765_s0 + $0x204] sm:$0xff] }
 0x313   :  { %v2352_v25 = vpop.f32.mrb[30].mxu1  ;;  %v2939_v4 = vpop.f32.mrb[30].mxu0 }
 0x314   :  { %14919 = vst [vmem:[#allocation6_spill] sm:$0xff] %v11801_v11  ;;  %v11806_v24 = vadd.f32 %v2352_v25, %v14920_v56  ;;  %v11809_v45 = vadd.f32 %v2939_v4, %v11420_v9  ;;  %v8191_v26 = vpop.f32.mrb[31].mxu0  ;;  %v8077_v44 = vpop.f32.mrb[31].mxu1  ;;  %v2691_v9 = vld [vmem:[%s14765_s0 + $0x20c] sm:$0xff] }
 0x315   :  { %v3325_v44 = vld [vmem:[%s14765_s0 + $0x45] sm:$0xff]  ;;  %v3326_v26 = vld [vmem:[%s14765_s0 + $0x4d] sm:$0xff]  ;;  %v2740_v59 = vpack.c.bf16 %v2691_v9, %v2690_v38 }
 0x316   :  { %14921 = vst [vmem:[#allocation7_spill] sm:$0xff] %v11809_v45  ;;  %8297 = vmatmul.mubr.msk.bf16.gmra.mrb[136].mxu0 %vm272_vm1, %v2739_v28  ;;  %8351 = vmatmul.mubr.msk.bf16.gmra.mrb[136].mxu1 %vm272_vm1, %v11803_v57  ;;  %v11836_v15 = vpack.c.bf16 %v3326_v26, %v3325_v44  ;;  %v14924_v4 = vld [vmem:[#allocation11_spill] sm:$0xff]  ;;  %v14926_v44 = vld [vmem:[#allocation12_spill] sm:$0xff] }
 0x317   :  { %8300 = vmatprep.mubr.msk.bf16.mxu0 %vm9187_vm2, %v14801_v33  ;;  %8354 = vmatprep.mubr.msk.bf16.mxu1 %vm9187_vm2, %v14801_v33 }
 0x319   :  { %v2357_v35 = vpop.f32.mrb[32].mxu1  ;;  %v2944_v27 = vpop.f32.mrb[32].mxu0 }
 0x31a   :  { %v11831_v19 = vadd.f32 %v2357_v35, %v14922_v31  ;;  %v11834_v0 = vadd.f32 %v2944_v27, %v11444_v63  ;;  %v8080_v49 = vpop.f32.mrb[33].mxu1  ;;  %v8194_v41 = vpop.f32.mrb[33].mxu0  ;;  %v2692_v63 = vld [vmem:[%s14765_s0 + $0x214] sm:$0xff] }
 0x31b   :  { %v2360_v28 = vpop.f32.mrb[34].mxu1  ;;  %v2947_v25 = vpop.f32.mrb[34].mxu0 }
 0x31c   :  { %14923 = vst [vmem:[#allocation8_spill] sm:$0xff] %v11834_v0  ;;  %v11839_v56 = vadd.f32 %v2360_v28, %v14924_v4  ;;  %v11842_v45 = vadd.f32 %v2947_v25, %v11450_v54  ;;  %v8195_v11 = vpop.f32.mrb[35].mxu0  ;;  %v8081_v62 = vpop.f32.mrb[35].mxu1  ;;  %v2693_v54 = vld [vmem:[%s14765_s0 + $0x21c] sm:$0xff] }
 0x31d   :  { %v3327_v62 = vld [vmem:[%s14765_s0 + $0x55] sm:$0xff]  ;;  %v3328_v11 = vld [vmem:[%s14765_s0 + $0x5d] sm:$0xff]  ;;  %v2741_v49 = vpack.c.bf16 %v2693_v54, %v2692_v63 }
 0x31e   :  { %14925 = vst [vmem:[#allocation9_spill] sm:$0xff] %v11842_v45  ;;  %8301 = vmatmul.mubr.msk.bf16.gmra.mrb[140].mxu0 %vm272_vm1, %v2740_v59  ;;  %8355 = vmatmul.mubr.msk.bf16.gmra.mrb[140].mxu1 %vm272_vm1, %v11836_v15  ;;  %v11869_v41 = vpack.c.bf16 %v3328_v11, %v3327_v62  ;;  %v14928_v25 = vld [vmem:[#allocation13_spill] sm:$0xff]  ;;  %v14930_v62 = vld [vmem:[#allocation14_spill] sm:$0xff] }
 0x31f   :  { %8304 = vmatprep.mubr.msk.bf16.mxu0 %vm9187_vm2, %v14801_v33  ;;  %8358 = vmatprep.mubr.msk.bf16.mxu1 %vm9187_vm2, %v14801_v33 }
 0x321   :  { %v2365_v38 = vpop.f32.mrb[36].mxu1  ;;  %v2952_v9 = vpop.f32.mrb[36].mxu0 }
 0x322   :  { %v11864_v26 = vadd.f32 %v2365_v38, %v14926_v44  ;;  %v11867_v35 = vadd.f32 %v2952_v9, %v11474_v37  ;;  %v8084_v27 = vpop.f32.mrb[37].mxu1  ;;  %v8198_v31 = vpop.f32.mrb[37].mxu0  ;;  %v2694_v37 = vld [vmem:[%s14765_s0 + $0x224] sm:$0xff] }
 0x323   :  { %v2368_v59 = vpop.f32.mrb[38].mxu1  ;;  %v2955_v28 = vpop.f32.mrb[38].mxu0 }
 0x324   :  { %14927 = vst [vmem:[#allocation10_spill] sm:$0xff] %v11867_v35  ;;  %v11872_v4 = vadd.f32 %v2368_v59, %v14928_v25  ;;  %v11875_v45 = vadd.f32 %v2955_v28, %v11480_v8  ;;  %v8199_v0 = vpop.f32.mrb[39].mxu0  ;;  %v8085_v50 = vpop.f32.mrb[39].mxu1  ;;  %v2695_v8 = vld [vmem:[%s14765_s0 + $0x22c] sm:$0xff] }
 0x325   :  { %v3329_v50 = vld [vmem:[%s14765_s0 + $0x65] sm:$0xff]  ;;  %v3330_v0 = vld [vmem:[%s14765_s0 + $0x6d] sm:$0xff]  ;;  %v2742_v27 = vpack.c.bf16 %v2695_v8, %v2694_v37 }
 0x326   :  { %14929 = vst [vmem:[#allocation11_spill] sm:$0xff] %v11875_v45  ;;  %8305 = vmatmul.mubr.msk.bf16.gmra.mrb[144].mxu0 %vm272_vm1, %v2741_v49  ;;  %8359 = vmatmul.mubr.msk.bf16.gmra.mrb[144].mxu1 %vm272_vm1, %v11869_v41  ;;  %v11902_v31 = vpack.c.bf16 %v3330_v0, %v3329_v50  ;;  %v14932_v28 = vld [vmem:[#allocation15_spill] sm:$0xff]  ;;  %v14934_v50 = vld [vmem:[#allocation16_spill] sm:$0xff] }
 0x327   :  { %8308 = vmatprep.mubr.msk.bf16.mxu0 %vm9187_vm2, %v14801_v33  ;;  %8362 = vmatprep.mubr.msk.bf16.mxu1 %vm9187_vm2, %v14801_v33 }
 0x329   :  { %v2373_v63 = vpop.f32.mrb[40].mxu1  ;;  %v2960_v54 = vpop.f32.mrb[40].mxu0 }
 0x32a   :  { %v11897_v11 = vadd.f32 %v2373_v63, %v14930_v62  ;;  %v11900_v38 = vadd.f32 %v2960_v54, %v11504_v39  ;;  %v8088_v9 = vpop.f32.mrb[41].mxu1  ;;  %v8202_v44 = vpop.f32.mrb[41].mxu0  ;;  %v2696_v39 = vld [vmem:[%s14765_s0 + $0x234] sm:$0xff] }
 0x32b   :  { %v2376_v49 = vpop.f32.mrb[42].mxu1  ;;  %v2963_v59 = vpop.f32.mrb[42].mxu0 }
 0x32c   :  { %14931 = vst [vmem:[#allocation12_spill] sm:$0xff] %v11900_v38  ;;  %v11905_v25 = vadd.f32 %v2376_v49, %v14932_v28  ;;  %v11908_v45 = vadd.f32 %v2963_v59, %v11510_v47  ;;  %v8203_v35 = vpop.f32.mrb[43].mxu0  ;;  %v8089_v55 = vpop.f32.mrb[43].mxu1  ;;  %v2697_v47 = vld [vmem:[%s14765_s0 + $0x23c] sm:$0xff] }
 0x32d   :  { %v3331_v55 = vld [vmem:[%s14765_s0 + $0x75] sm:$0xff]  ;;  %v3332_v35 = vld [vmem:[%s14765_s0 + $0x7d] sm:$0xff]  ;;  %v2743_v9 = vpack.c.bf16 %v2697_v47, %v2696_v39 }
 0x32e   :  { %14933 = vst [vmem:[#allocation13_spill] sm:$0xff] %v11908_v45  ;;  %8309 = vmatmul.mubr.msk.bf16.gmra.mrb[148].mxu0 %vm272_vm1, %v2742_v27  ;;  %8363 = vmatmul.mubr.msk.bf16.gmra.mrb[148].mxu1 %vm272_vm1, %v11902_v31  ;;  %v11935_v44 = vpack.c.bf16 %v3332_v35, %v3331_v55  ;;  %v14936_v59 = vld [vmem:[#allocation17_spill] sm:$0xff]  ;;  %v14939_v55 = vld [vmem:[#allocation18_spill] sm:$0xff] }
 0x32f   :  { %8312 = vmatprep.mubr.msk.bf16.mxu0 %vm9187_vm2, %v14801_v33  ;;  %8366 = vmatprep.mubr.msk.bf16.mxu1 %vm9187_vm2, %v14801_v33 }
 0x331   :  { %v2381_v37 = vpop.f32.mrb[44].mxu1  ;;  %v2968_v8 = vpop.f32.mrb[44].mxu0 }
 0x332   :  { %v11930_v0 = vadd.f32 %v2381_v37, %v14934_v50  ;;  %v11933_v63 = vadd.f32 %v2968_v8, %v11534_v21  ;;  %v8092_v54 = vpop.f32.mrb[45].mxu1  ;;  %v8206_v62 = vpop.f32.mrb[45].mxu0  ;;  %v2698_v21 = vld [vmem:[%s14765_s0 + $0x244] sm:$0xff] }
 0x333   :  { %v2384_v27 = vpop.f32.mrb[46].mxu1  ;;  %v2971_v49 = vpop.f32.mrb[46].mxu0 }
 0x334   :  { %14935 = vst [vmem:[#allocation14_spill] sm:$0xff] %v11933_v63  ;;  %v11938_v28 = vadd.f32 %v2384_v27, %v14936_v59  ;;  %v11941_v45 = vadd.f32 %v2971_v49, %v11540_v61  ;;  %v8207_v38 = vpop.f32.mrb[47].mxu0  ;;  %v8093_v20 = vpop.f32.mrb[47].mxu1  ;;  %v2699_v61 = vld [vmem:[%s14765_s0 + $0x24c] sm:$0xff] }
 0x335   :  { %v3333_v20 = vld [vmem:[%s14765_s0 + $0x85] sm:$0xff]  ;;  %v3334_v38 = vld [vmem:[%s14765_s0 + $0x8d] sm:$0xff]  ;;  %v2744_v54 = vpack.c.bf16 %v2699_v61, %v2698_v21 }
 0x336   :  { %14937 = vst [vmem:[#allocation15_spill] sm:$0xff] %v11938_v28  ;;  %14938 = vst [vmem:[#allocation16_spill] sm:$0xff] %v11941_v45  ;;  %8313 = vmatmul.mubr.msk.bf16.gmra.mrb[152].mxu0 %vm272_vm1, %v2743_v9  ;;  %8367 = vmatmul.mubr.msk.bf16.gmra.mrb[152].mxu1 %vm272_vm1, %v11935_v44  ;;  %v11968_v62 = vpack.c.bf16 %v3334_v38, %v3333_v20  ;;  %v14941_v49 = vld [vmem:[#allocation19_spill] sm:$0xff]  ;;  %v14944_v20 = vld [vmem:[#allocation20_spill] sm:$0xff] }
 0x337   :  { %8316 = vmatprep.mubr.msk.bf16.mxu0 %vm9187_vm2, %v14801_v33  ;;  %8370 = vmatprep.mubr.msk.bf16.mxu1 %vm9187_vm2, %v14801_v33 }
 0x339   :  { %v2389_v39 = vpop.f32.mrb[48].mxu1  ;;  %v2976_v47 = vpop.f32.mrb[48].mxu0 }
 0x33a   :  { %v11963_v35 = vadd.f32 %v2389_v39, %v14939_v55  ;;  %v11966_v37 = vadd.f32 %v2976_v47, %v11564_v3  ;;  %v8096_v8 = vpop.f32.mrb[49].mxu1  ;;  %v8210_v50 = vpop.f32.mrb[49].mxu0  ;;  %v2700_v3 = vld [vmem:[%s14765_s0 + $0x254] sm:$0xff] }
 0x33b   :  { %v2392_v9 = vpop.f32.mrb[50].mxu1  ;;  %v2979_v27 = vpop.f32.mrb[50].mxu0 }
 0x33c   :  { %14940 = vst [vmem:[#allocation17_spill] sm:$0xff] %v11966_v37  ;;  %v11971_v59 = vadd.f32 %v2392_v9, %v14941_v49  ;;  %v11974_v45 = vadd.f32 %v2979_v27, %v11570_v10  ;;  %v8211_v63 = vpop.f32.mrb[51].mxu0  ;;  %v8097_v28 = vpop.f32.mrb[51].mxu1  ;;  %v2701_v10 = vld [vmem:[%s14765_s0 + $0x25c] sm:$0xff] }
 0x33d   :  { %v3335_v63 = vld [vmem:[%s14765_s0 + $0x95] sm:$0xff]  ;;  %v3336_v28 = vld [vmem:[%s14765_s0 + $0x9d] sm:$0xff]  ;;  %v2745_v8 = vpack.c.bf16 %v2701_v10, %v2700_v3 }
 0x33e   :  { %14942 = vst [vmem:[#allocation18_spill] sm:$0xff] %v11971_v59  ;;  %14943 = vst [vmem:[#allocation19_spill] sm:$0xff] %v11974_v45  ;;  %8317 = vmatmul.mubr.msk.bf16.gmra.mrb[156].mxu0 %vm272_vm1, %v2744_v54  ;;  %8371 = vmatmul.mubr.msk.bf16.gmra.mrb[156].mxu1 %vm272_vm1, %v11968_v62  ;;  %v12001_v50 = vpack.c.bf16 %v3336_v28, %v3335_v63  ;;  %v14946_v27 = vld [vmem:[#allocation21_spill] sm:$0xff]  ;;  %v14949_v63 = vld [vmem:[#allocation22_spill] sm:$0xff] }
 0x33f   :  { %8320 = vmatprep.mubr.msk.bf16.mxu0 %vm9187_vm2, %v14801_v33  ;;  %8374 = vmatprep.mubr.msk.bf16.mxu1 %vm9187_vm2, %v14801_v33 }
 0x341   :  { %v2397_v21 = vpop.f32.mrb[52].mxu1  ;;  %v2984_v61 = vpop.f32.mrb[52].mxu0 }
 0x342   :  { %v11996_v38 = vadd.f32 %v2397_v21, %v14944_v20  ;;  %v11999_v39 = vadd.f32 %v2984_v61, %v11594_v42  ;;  %v8100_v47 = vpop.f32.mrb[53].mxu1  ;;  %v8214_v55 = vpop.f32.mrb[53].mxu0  ;;  %v2702_v42 = vld [vmem:[%s14765_s0 + $0x264] sm:$0xff] }
 0x343   :  { %v2400_v54 = vpop.f32.mrb[54].mxu1  ;;  %v2987_v9 = vpop.f32.mrb[54].mxu0 }
 0x344   :  { %14945 = vst [vmem:[#allocation20_spill] sm:$0xff] %v11999_v39  ;;  %v12004_v49 = vadd.f32 %v2400_v54, %v14946_v27  ;;  %v12007_v45 = vadd.f32 %v2987_v9, %v11600_v40  ;;  %v8215_v37 = vpop.f32.mrb[55].mxu0  ;;  %v8101_v59 = vpop.f32.mrb[55].mxu1  ;;  %v2703_v40 = vld [vmem:[%s14765_s0 + $0x26c] sm:$0xff] }
 0x345   :  { %v3337_v37 = vld [vmem:[%s14765_s0 + $0xa5] sm:$0xff]  ;;  %v3338_v59 = vld [vmem:[%s14765_s0 + $0xad] sm:$0xff]  ;;  %v2746_v47 = vpack.c.bf16 %v2703_v40, %v2702_v42 }
 0x346   :  { %14947 = vst [vmem:[#allocation21_spill] sm:$0xff] %v12004_v49  ;;  %14948 = vst [vmem:[#allocation50_spill] sm:$0xff] %v12007_v45  ;;  %8321 = vmatmul.mubr.msk.bf16.gmra.mrb[160].mxu0 %vm272_vm1, %v2745_v8  ;;  %8375 = vmatmul.mubr.msk.bf16.gmra.mrb[160].mxu1 %vm272_vm1, %v12001_v50  ;;  %v12034_v55 = vpack.c.bf16 %v3338_v59, %v3337_v37  ;;  %v14951_v9 = vld [vmem:[#allocation23_spill] sm:$0xff]  ;;  %v14954_v37 = vld [vmem:[#allocation24_spill] sm:$0xff] }
 0x347   :  { %8324 = vmatprep.mubr.msk.bf16.mxu0 %vm9187_vm2, %v14801_v33  ;;  %8378 = vmatprep.mubr.msk.bf16.mxu1 %vm9187_vm2, %v14801_v33 }
 0x349   :  { %v2405_v3 = vpop.f32.mrb[56].mxu1  ;;  %v2992_v10 = vpop.f32.mrb[56].mxu0 }
 0x34a   :  { %v12029_v28 = vadd.f32 %v2405_v3, %v14949_v63  ;;  %v12032_v21 = vadd.f32 %v2992_v10, %v11624_v23  ;;  %v8104_v61 = vpop.f32.mrb[57].mxu1  ;;  %v8218_v20 = vpop.f32.mrb[57].mxu0  ;;  %v2704_v23 = vld [vmem:[%s14765_s0 + $0x274] sm:$0xff] }
 0x34b   :  { %v2408_v8 = vpop.f32.mrb[58].mxu1  ;;  %v2995_v54 = vpop.f32.mrb[58].mxu0 }
 0x34c   :  { %14950 = vst [vmem:[#allocation22_spill] sm:$0xff] %v12032_v21  ;;  %v12037_v27 = vadd.f32 %v2408_v8, %v14951_v9  ;;  %v12040_v45 = vadd.f32 %v2995_v54, %v11630_v46  ;;  %v8219_v39 = vpop.f32.mrb[59].mxu0  ;;  %v8105_v49 = vpop.f32.mrb[59].mxu1  ;;  %v2705_v46 = vld [vmem:[%s14765_s0 + $0x27c] sm:$0xff] }
 0x34d   :  { %v3339_v39 = vld [vmem:[%s14765_s0 + $0xb5] sm:$0xff]  ;;  %v3340_v49 = vld [vmem:[%s14765_s0 + $0xbd] sm:$0xff]  ;;  %v2747_v61 = vpack.c.bf16 %v2705_v46, %v2704_v23 }
 0x34e   :  { %14952 = vst [vmem:[#allocation23_spill] sm:$0xff] %v12037_v27  ;;  %14953 = vst [vmem:[#allocation51_spill] sm:$0xff] %v12040_v45  ;;  %8325 = vmatmul.mubr.msk.bf16.gmra.mrb[164].mxu0 %vm272_vm1, %v2746_v47  ;;  %8379 = vmatmul.mubr.msk.bf16.gmra.mrb[164].mxu1 %vm272_vm1, %v12034_v55  ;;  %v12067_v20 = vpack.c.bf16 %v3340_v49, %v3339_v39  ;;  %v14956_v54 = vld [vmem:[#allocation25_spill] sm:$0xff]  ;;  %v14959_v39 = vld [vmem:[#allocation26_spill] sm:$0xff] }
 0x34f   :  { %8328 = vmatprep.mubr.msk.bf16.mxu0 %vm9187_vm2, %v14801_v33  ;;  %8382 = vmatprep.mubr.msk.bf16.mxu1 %vm9187_vm2, %v14801_v33 }
 0x351   :  { %v2413_v42 = vpop.f32.mrb[60].mxu1  ;;  %v3000_v40 = vpop.f32.mrb[60].mxu0 }
 0x352   :  { %v12062_v59 = vadd.f32 %v2413_v42, %v14954_v37  ;;  %v12065_v3 = vadd.f32 %v3000_v40, %v11654_v52  ;;  %v8108_v10 = vpop.f32.mrb[61].mxu1  ;;  %v8222_v63 = vpop.f32.mrb[61].mxu0  ;;  %v2706_v52 = vld [vmem:[%s14765_s0 + $0x284] sm:$0xff] }
 0x353   :  { %v2416_v47 = vpop.f32.mrb[62].mxu1  ;;  %v3003_v8 = vpop.f32.mrb[62].mxu0 }
 0x354   :  { %14955 = vst [vmem:[#allocation24_spill] sm:$0xff] %v12065_v3  ;;  %v12070_v9 = vadd.f32 %v2416_v47, %v14956_v54  ;;  %v12073_v45 = vadd.f32 %v3003_v8, %v11660_v34  ;;  %v8223_v21 = vpop.f32.mrb[63].mxu0  ;;  %v8109_v27 = vpop.f32.mrb[63].mxu1  ;;  %v2707_v34 = vld [vmem:[%s14765_s0 + $0x28c] sm:$0xff] }
 0x355   :  { %v3341_v21 = vld [vmem:[%s14765_s0 + $0xc5] sm:$0xff]  ;;  %v3342_v27 = vld [vmem:[%s14765_s0 + $0xcd] sm:$0xff]  ;;  %v2748_v10 = vpack.c.bf16 %v2707_v34, %v2706_v52 }
 0x356   :  { %14957 = vst [vmem:[#allocation25_spill] sm:$0xff] %v12070_v9  ;;  %14958 = vst [vmem:[#allocation52_spill] sm:$0xff] %v12073_v45  ;;  %8329 = vmatmul.mubr.msk.bf16.gmra.mrb[168].mxu0 %vm272_vm1, %v2747_v61  ;;  %8383 = vmatmul.mubr.msk.bf16.gmra.mrb[168].mxu1 %vm272_vm1, %v12067_v20  ;;  %v12100_v63 = vpack.c.bf16 %v3342_v27, %v3341_v21  ;;  %v14960_v8 = vld [vmem:[#allocation27_spill] sm:$0xff] }
 0x357   :  { %8332 = vmatprep.mubr.msk.bf16.mxu0 %vm9187_vm2, %v14801_v33  ;;  %8386 = vmatprep.mubr.msk.bf16.mxu1 %vm9187_vm2, %v14801_v33 }
 0x359   :  { %v2421_v23 = vpop.f32.mrb[64].mxu1  ;;  %v3008_v46 = vpop.f32.mrb[64].mxu0 }
 0x35a   :  { %v12095_v49 = vadd.f32 %v2421_v23, %v14959_v39  ;;  %v12098_v42 = vadd.f32 %v3008_v46, %v11684_v51  ;;  %v8112_v40 = vpop.f32.mrb[65].mxu1  ;;  %v8226_v37 = vpop.f32.mrb[65].mxu0  ;;  %v2708_v51 = vld [vmem:[%s14765_s0 + $0x294] sm:$0xff] }
 0x35b   :  { %v2424_v61 = vpop.f32.mrb[66].mxu1  ;;  %v3011_v47 = vpop.f32.mrb[66].mxu0  ;;  %v2749_v46 = vpack.c.bf16 %v2708_v51, %v2708_v51  ;;  %v14962_v51 = vld [vmem:[#allocation28_spill] sm:$0xff] }
 0x35c   :  { %v12103_v54 = vadd.f32 %v2424_v61, %v14960_v8  ;;  %v12106_v45 = vadd.f32 %v3011_v47, %v11687_v7  ;;  %v8227_v3 = vpop.f32.mrb[67].mxu0  ;;  %v8113_v9 = vpop.f32.mrb[67].mxu1  ;;  %v3343_v7 = vld [vmem:[%s14765_s0 + $0xd5] sm:$0xff] }
 0x35d   :  { %v3344_v3 = vld [vmem:[%s14765_s0 + $0xdd] sm:$0xff] }
 0x35e   :  { %8333 = vmatmul.mubr.msk.bf16.gmra.mrb[172].mxu0 %vm272_vm1, %v2748_v10  ;;  %8387 = vmatmul.mubr.msk.bf16.gmra.mrb[172].mxu1 %vm272_vm1, %v12100_v63  ;;  %v12130_v39 = vpack.c.bf16 %v3344_v3, %v3343_v7 }
 0x35f   :  { %8336 = vmatprep.mubr.msk.bf16.mxu0 %vm9187_vm2, %v14801_v33  ;;  %8390 = vmatprep.mubr.msk.bf16.mxu1 %vm9187_vm2, %v14801_v33 }
 0x361   :  { %v2429_v9 = vpop.f32.mrb[68].mxu1  ;;  %v3016_v52 = vpop.f32.mrb[68].mxu0 }
 0x362   :  { %v12125_v34 = vadd.f32 %v2429_v9, %v11267_v36  ;;  %v12128_v21 = vadd.f32 %v3016_v52, %v11705_v13  ;;  %v8116_v27 = vpop.f32.mrb[69].mxu1  ;;  %v8230_v23 = vpop.f32.mrb[69].mxu0  ;;  %v3345_v36 = vld [vmem:[%s14765_s0 + $0xe5] sm:$0xff] }
 0x363   :  { %v2432_v40 = vpop.f32.mrb[70].mxu1  ;;  %v3019_v37 = vpop.f32.mrb[70].mxu0 }
 0x364   :  { %v12133_v10 = vadd.f32 %v2432_v40, %v11273_v12  ;;  %v12136_v61 = vadd.f32 %v3019_v37, %v11711_v16  ;;  %v8231_v47 = vpop.f32.mrb[71].mxu0  ;;  %v8117_v8 = vpop.f32.mrb[71].mxu1  ;;  %v3346_v12 = vld [vmem:[%s14765_s0 + $0xed] sm:$0xff]  ;;  %v14963_v40 = vld [vmem:[#allocation29_spill] sm:$0xff] }
 0x365   :  { %v12157_v27 = vpack.c.bf16 %v3346_v12, %v3345_v36 }
 0x366   :  { %14961 = vst [vmem:[#allocation26_spill] sm:$0xff] %v12136_v61  ;;  %8337 = vmatmul.mubr.msk.bf16.gmra.mrb[176].mxu0 %vm272_vm1, %v2749_v46  ;;  %8391 = vmatmul.mubr.msk.bf16.gmra.mrb[176].mxu1 %vm272_vm1, %v12130_v39 }
 0x367   :  { %8394 = vmatprep.mubr.msk.bf16.mxu1 %vm9187_vm2, %v14801_v33  ;;  %8508 = vmatprep.mubr.msk.bf16.mxu0 %vm9187_vm2, %v14801_v33 }
 0x369   :  { %v2437_v13 = vpop.f32.mrb[72].mxu1  ;;  %v3024_v16 = vpop.f32.mrb[72].mxu0 }
 0x36a   :  { %v12152_v7 = vadd.f32 %v2437_v13, %v14962_v51  ;;  %v12155_v3 = vadd.f32 %v3024_v16, %v11735_v30  ;;  %v8120_v9 = vpop.f32.mrb[73].mxu1  ;;  %v8234_v52 = vpop.f32.mrb[73].mxu0  ;;  %v3347_v30 = vld [vmem:[%s14765_s0 + $0xf5] sm:$0xff] }
 0x36b   :  { %v2440_v23 = vpop.f32.mrb[74].mxu1  ;;  %v3027_v46 = vpop.f32.mrb[74].mxu0 }
 0x36c   :  { %v12160_v37 = vadd.f32 %v2440_v23, %v14963_v40  ;;  %v12163_v47 = vadd.f32 %v3027_v46, %v11741_v18  ;;  %v8235_v8 = vpop.f32.mrb[75].mxu0  ;;  %v8121_v61 = vpop.f32.mrb[75].mxu1  ;;  %v3348_v18 = vld [vmem:[%s14765_s0 + $0xfd] sm:$0xff] }
 0x36d   :  { %v12185_v51 = vpack.c.bf16 %v3348_v18, %v3347_v30 }
 0x36e   :  { %8395 = vmatmul.mubr.msk.bf16.gmra.mrb[180].mxu1 %vm272_vm1, %v12157_v27  ;;  %8509 = vmatmul.mubr.msk.bf16.vlgmr.msra.gmra.mrb[180].mxu0 %vm272_vm1, %v11770_v32 }
 0x36f   :  { %8398 = vmatprep.mubr.msk.bf16.mxu1 %vm9187_vm2, %v14801_v33  ;;  %8512 = vmatprep.mubr.msk.bf16.mxu0 %vm9187_vm2, %v14801_v33 }
 0x371   :  { %v2445_v61 = vpop.f32.mrb[76].mxu1  ;;  %v3032_v36 = vpop.f32.mrb[76].mxu0 }
 0x372   :  { %v12180_v12 = vadd.f32 %v2445_v61, %v11321_v5  ;;  %v12183_v32 = vadd.f32 %v3032_v36, %v11765_v2  ;;  %v8124_v13 = vpop.f32.mrb[77].mxu1  ;;  %v8238_v16 = vpop.f32.mrb[77].mxu0  ;;  %v3349_v5 = vld [vmem:[%s14765_s0 + $0x105] sm:$0xff] }
 0x373   :  { %v2448_v9 = vpop.f32.mrb[78].mxu1  ;;  %v3035_v52 = vpop.f32.mrb[78].mxu0  ;;  %v6957_v13 = vld [vmem:[%s14766_s1 + $0xe] sm:$0x3] }
 0x374   :  { %v12188_v23 = vadd.f32 %v2448_v9, %v11327_v14  ;;  %v12191_v46 = vadd.f32 %v3035_v52, %v11773_v53  ;;  %v8239_v40 = vpop.f32.mrb[79].mxu0  ;;  %v8125_v8 = vpop.f32.mrb[79].mxu1  ;;  %v3350_v14 = vld [vmem:[%s14765_s0 + $0x10d] sm:$0xff]  ;;  %v4949_v52 = vsel %vm396_vm0, %v6957_v13, 0 }
 0x375   :  { %v12213_v36 = vpack.c.bf16 %v3350_v14, %v3349_v5  ;;  %8673 = vmatpush3.bf16.msra.mxu1 %v4949_v52  ;;  %v6999_v5 = vld [vmem:[%s14766_s1 + $0x10] sm:$0x3] }
 0x376   :  { %8399 = vmatmul.mubr.msk.bf16.gmra.mrb[184].mxu1 %vm272_vm1, %v12185_v51  ;;  %8513 = vmatmul.mubr.msk.bf16.gmra.mrb[184].mxu0 %vm272_vm1, %v11803_v57  ;;  %v5640_v14 = vsel %vm396_vm0, %v6999_v5, 0 }
 0x377   :  { %8402 = vmatprep.mubr.msk.bf16.mxu1 %vm9187_vm2, %v14801_v33  ;;  %8516 = vmatprep.mubr.msk.bf16.mxu0 %vm9187_vm2, %v14801_v33 }
 0x378   :  { %8839 = vmatpush3.bf16.msra.mxu0 %v5640_v14 }
 0x379   :  { %v2453_v2 = vpop.f32.mrb[80].mxu1  ;;  %v3040_v53 = vpop.f32.mrb[80].mxu0 }
 0x37a   :  { %v12208_v30 = vadd.f32 %v2453_v2, %v11351_v58  ;;  %v12211_v57 = vadd.f32 %v3040_v53, %v11798_v48  ;;  %v8128_v18 = vpop.f32.mrb[81].mxu1  ;;  %v8242_v61 = vpop.f32.mrb[81].mxu0 }
 0x37b   :  { %v2456_v16 = vpop.f32.mrb[82].mxu1  ;;  %v3043_v9 = vpop.f32.mrb[82].mxu0 }
 0x37c   :  { %v12220_v40 = vadd.f32 %v2456_v16, %v11357_v22  ;;  %v12223_v58 = vadd.f32 %v3043_v9, %v11806_v24  ;;  %v8243_v48 = vpop.f32.mrb[83].mxu0  ;;  %v8129_v8 = vpop.f32.mrb[83].mxu1  ;;  %v3351_v22 = vld [vmem:[%s14765_s0 + $0x115] sm:$0xff]  ;;  %v3352_v24 = vld [vmem:[%s14765_s0 + $0x11d] sm:$0xff] }
 0x37d   :  { %v12249_v16 = vpack.c.bf16 %v3352_v24, %v3351_v22 }
 0x37e   :  { %14964 = vst [vmem:[#allocation27_spill] sm:$0xff] %v12223_v58  ;;  %8403 = vmatmul.mubr.msk.bf16.gmra.mrb[188].mxu1 %vm272_vm1, %v12213_v36  ;;  %8517 = vmatmul.mubr.msk.bf16.gmra.mrb[188].mxu0 %vm272_vm1, %v11836_v15 }
 0x37f   :  { %8406 = vmatprep.mubr.msk.bf16.mxu1 %vm9187_vm2, %v14801_v33  ;;  %8520 = vmatprep.mubr.msk.bf16.mxu0 %vm9187_vm2, %v14801_v33 }
 0x381   :  { %v2461_v2 = vpop.f32.mrb[84].mxu1  ;;  %v3048_v53 = vpop.f32.mrb[84].mxu0 }
 0x382   :  { %v12244_v18 = vadd.f32 %v2461_v2, %v11381_v43  ;;  %v12247_v15 = vadd.f32 %v3048_v53, %v11831_v19  ;;  %v8132_v61 = vpop.f32.mrb[85].mxu1  ;;  %v8246_v13 = vpop.f32.mrb[85].mxu0  ;;  %v3353_v43 = vld [vmem:[%s14765_s0 + $0x125] sm:$0xff] }
 0x383   :  { %v2464_v9 = vpop.f32.mrb[86].mxu1  ;;  %v3051_v52 = vpop.f32.mrb[86].mxu0 }
 0x384   :  { %14965 = vst [vmem:[#allocation28_spill] sm:$0xff] %v12247_v15  ;;  %v12252_v48 = vadd.f32 %v2464_v9, %v11387_v60  ;;  %v12255_v8 = vadd.f32 %v3051_v52, %v11839_v56  ;;  %v8247_v5 = vpop.f32.mrb[87].mxu0  ;;  %v8133_v14 = vpop.f32.mrb[87].mxu1  ;;  %v3354_v60 = vld [vmem:[%s14765_s0 + $0x12d] sm:$0xff] }
 0x385   :  { %v12277_v53 = vpack.c.bf16 %v3354_v60, %v3353_v43 }
 0x386   :  { %14966 = vst [vmem:[#allocation29_spill] sm:$0xff] %v12255_v8  ;;  %8407 = vmatmul.mubr.msk.bf16.gmra.mrb[192].mxu1 %vm272_vm1, %v12249_v16  ;;  %8521 = vmatmul.mubr.msk.bf16.gmra.mrb[192].mxu0 %vm272_vm1, %v11869_v41 }
 0x387   :  { %8410 = vmatprep.mubr.msk.bf16.mxu1 %vm9187_vm2, %v14801_v33  ;;  %8524 = vmatprep.mubr.msk.bf16.mxu0 %vm9187_vm2, %v14801_v33 }
 0x389   :  { %v2469_v19 = vpop.f32.mrb[88].mxu1  ;;  %v3056_v56 = vpop.f32.mrb[88].mxu0 }
 0x38a   :  { %v12272_v22 = vadd.f32 %v2469_v19, %v11411_v1  ;;  %v12275_v41 = vadd.f32 %v3056_v56, %v11864_v26  ;;  %v8136_v24 = vpop.f32.mrb[89].mxu1  ;;  %v8250_v2 = vpop.f32.mrb[89].mxu0  ;;  %v3355_v1 = vld [vmem:[%s14765_s0 + $0x135] sm:$0xff] }
 0x38b   :  { %v2472_v61 = vpop.f32.mrb[90].mxu1  ;;  %v3059_v13 = vpop.f32.mrb[90].mxu0 }
 0x38c   :  { %14967 = vst [vmem:[#allocation53_spill] sm:$0xff] %v12275_v41  ;;  %v12280_v9 = vadd.f32 %v2472_v61, %v11417_v6  ;;  %v12283_v52 = vadd.f32 %v3059_v13, %v11872_v4  ;;  %v8251_v5 = vpop.f32.mrb[91].mxu0  ;;  %v8137_v14 = vpop.f32.mrb[91].mxu1  ;;  %v3356_v6 = vld [vmem:[%s14765_s0 + $0x13d] sm:$0xff] }
 0x38d   :  { %v12305_v56 = vpack.c.bf16 %v3356_v6, %v3355_v1  ;;  %v14971_v1 = vld [vmem:[#allocation30_spill] sm:$0xff] }
 0x38e   :  { %14968 = vst [vmem:[#allocation54_spill] sm:$0xff] %v12283_v52  ;;  %8411 = vmatmul.mubr.msk.bf16.gmra.mrb[196].mxu1 %vm272_vm1, %v12277_v53  ;;  %8525 = vmatmul.mubr.msk.bf16.gmra.mrb[196].mxu0 %vm272_vm1, %v11902_v31 }
 0x38f   :  { %8414 = vmatprep.mubr.msk.bf16.mxu1 %vm9187_vm2, %v14801_v33  ;;  %8528 = vmatprep.mubr.msk.bf16.mxu0 %vm9187_vm2, %v14801_v33 }
 0x391   :  { %v2477_v26 = vpop.f32.mrb[92].mxu1  ;;  %v3064_v4 = vpop.f32.mrb[92].mxu0 }
 0x392   :  { %v12300_v43 = vadd.f32 %v2477_v26, %v11441_v17  ;;  %v12303_v31 = vadd.f32 %v3064_v4, %v11897_v11  ;;  %v8140_v60 = vpop.f32.mrb[93].mxu1  ;;  %v8254_v19 = vpop.f32.mrb[93].mxu0  ;;  %v3357_v17 = vld [vmem:[%s14765_s0 + $0x145] sm:$0xff] }
 0x393   :  { %v2480_v24 = vpop.f32.mrb[94].mxu1  ;;  %v3067_v2 = vpop.f32.mrb[94].mxu0 }
 0x394   :  { %14969 = vst [vmem:[#allocation55_spill] sm:$0xff] %v12303_v31  ;;  %v12308_v61 = vadd.f32 %v2480_v24, %v11447_v29  ;;  %v12311_v13 = vadd.f32 %v3067_v2, %v11905_v25  ;;  %v8255_v5 = vpop.f32.mrb[95].mxu0  ;;  %v8141_v14 = vpop.f32.mrb[95].mxu1  ;;  %v3358_v29 = vld [vmem:[%s14765_s0 + $0x14d] sm:$0xff] }
 0x395   :  { %v12330_v4 = vpack.c.bf16 %v3358_v29, %v3357_v17  ;;  %v14973_v2 = vld [vmem:[#allocation31_spill] sm:$0xff]  ;;  %v14976_v29 = vld [vmem:[#allocation40_spill] sm:$0xff] }
 0x396   :  { %14970 = vst [vmem:[#allocation56_spill] sm:$0xff] %v12311_v13  ;;  %8415 = vmatmul.mubr.msk.bf16.gmra.mrb[200].mxu1 %vm272_vm1, %v12305_v56  ;;  %8529 = vmatmul.mubr.msk.bf16.gmra.mrb[200].mxu0 %vm272_vm1, %v11935_v44  ;;  %v14974_v31 = vld [vmem:[#allocation15_spill] sm:$0xff] }
 0x397   :  { %8418 = vmatprep.mubr.msk.bf16.mxu1 %vm9187_vm2, %v14801_v33  ;;  %8532 = vmatprep.mubr.msk.bf16.mxu0 %vm9187_vm2, %v14801_v33 }
 0x399   :  { %v2485_v11 = vpop.f32.mrb[96].mxu1  ;;  %v3072_v25 = vpop.f32.mrb[96].mxu0 }
 0x39a   :  { %v12328_v6 = vadd.f32 %v2485_v11, %v14971_v1  ;;  %v8144_v44 = vpop.f32.mrb[97].mxu1  ;;  %v8258_v26 = vpop.f32.mrb[97].mxu0  ;;  %v12333_v60 = vadd.f32 %v3072_v25, %v11930_v0  ;;  %v3359_v0 = vld [vmem:[%s14765_s0 + $0x155] sm:$0xff] }
 0x39b   :  { %v2488_v19 = vpop.f32.mrb[98].mxu1  ;;  %v3075_v24 = vpop.f32.mrb[98].mxu0 }
 0x39c   :  { %14972 = vst [vmem:[#allocation30_spill] sm:$0xff] %v12333_v60  ;;  %v12336_v5 = vadd.f32 %v2488_v19, %v14973_v2  ;;  %v8259_v14 = vpop.f32.mrb[99].mxu0  ;;  %v8145_v13 = vpop.f32.mrb[99].mxu1  ;;  %v12339_v52 = vadd.f32 %v3075_v24, %v14974_v31  ;;  %v3360_v31 = vld [vmem:[%s14765_s0 + $0x15d] sm:$0xff]  ;;  %v14979_v60 = vld [vmem:[#allocation18_spill] sm:$0xff] }
 0x39d   :  { %v12358_v1 = vpack.c.bf16 %v3360_v31, %v3359_v0  ;;  %v14978_v24 = vld [vmem:[#allocation44_spill] sm:$0xff]  ;;  %v14981_v31 = vld [vmem:[#allocation45_spill] sm:$0xff] }
 0x39e   :  { %14975 = vst [vmem:[#allocation31_spill] sm:$0xff] %v12339_v52  ;;  %8419 = vmatmul.mubr.msk.bf16.gmra.mrb[204].mxu1 %vm272_vm1, %v12330_v4  ;;  %8533 = vmatmul.mubr.msk.bf16.gmra.mrb[204].mxu0 %vm272_vm1, %v11968_v62 }
 0x39f   :  { %8422 = vmatprep.mubr.msk.bf16.mxu1 %vm9187_vm2, %v14801_v33  ;;  %8536 = vmatprep.mubr.msk.bf16.mxu0 %vm9187_vm2, %v14801_v33 }
 0x3a1   :  { %v2493_v13 = vpop.f32.mrb[100].mxu1  ;;  %v3080_v17 = vpop.f32.mrb[100].mxu0 }
 0x3a2   :  { %v12356_v11 = vadd.f32 %v2493_v13, %v14976_v29  ;;  %v8148_v62 = vpop.f32.mrb[101].mxu1  ;;  %v8262_v25 = vpop.f32.mrb[101].mxu0  ;;  %v12361_v44 = vadd.f32 %v3080_v17, %v11963_v35  ;;  %v3361_v35 = vld [vmem:[%s14765_s0 + $0x165] sm:$0xff] }
 0x3a3   :  { %v2496_v26 = vpop.f32.mrb[102].mxu1  ;;  %v3083_v19 = vpop.f32.mrb[102].mxu0 }
 0x3a4   :  { %14977 = vst [vmem:[#allocation15_spill] sm:$0xff] %v12361_v44  ;;  %v12364_v2 = vadd.f32 %v2496_v26, %v14978_v24  ;;  %v8263_v14 = vpop.f32.mrb[103].mxu0  ;;  %v8149_v52 = vpop.f32.mrb[103].mxu1  ;;  %v12367_v41 = vadd.f32 %v3083_v19, %v14979_v60  ;;  %v14983_v19 = vld [vmem:[#allocation46_spill] sm:$0xff]  ;;  %v14984_v44 = vld [vmem:[#allocation21_spill] sm:$0xff] }
 0x3a5   :  { %v3362_v52 = vld [vmem:[%s14765_s0 + $0x16d] sm:$0xff] }
 0x3a6   :  { %14980 = vst [vmem:[#allocation40_spill] sm:$0xff] %v12367_v41  ;;  %8423 = vmatmul.mubr.msk.bf16.gmra.mrb[208].mxu1 %vm272_vm1, %v12358_v1  ;;  %8537 = vmatmul.mubr.msk.bf16.gmra.mrb[208].mxu0 %vm272_vm1, %v12001_v50  ;;  %v12386_v29 = vpack.c.bf16 %v3362_v52, %v3361_v35  ;;  %v14986_v52 = vld [vmem:[#allocation47_spill] sm:$0xff] }
 0x3a7   :  { %8426 = vmatprep.mubr.msk.bf16.mxu1 %vm9187_vm2, %v14801_v33  ;;  %8540 = vmatprep.mubr.msk.bf16.mxu0 %vm9187_vm2, %v14801_v33 }
 0x3a9   :  { %v2501_v60 = vpop.f32.mrb[104].mxu1  ;;  %v3088_v0 = vpop.f32.mrb[104].mxu0 }
 0x3aa   :  { %v12384_v13 = vadd.f32 %v2501_v60, %v14981_v31  ;;  %v8152_v50 = vpop.f32.mrb[105].mxu1  ;;  %v8266_v17 = vpop.f32.mrb[105].mxu0  ;;  %v12389_v62 = vadd.f32 %v3088_v0, %v11996_v38  ;;  %v3363_v38 = vld [vmem:[%s14765_s0 + $0x175] sm:$0xff] }
 0x3ab   :  { %v2504_v25 = vpop.f32.mrb[106].mxu1  ;;  %v3091_v26 = vpop.f32.mrb[106].mxu0 }
 0x3ac   :  { %14982 = vst [vmem:[#allocation44_spill] sm:$0xff] %v12389_v62  ;;  %v12392_v24 = vadd.f32 %v2504_v25, %v14983_v19  ;;  %v8267_v14 = vpop.f32.mrb[107].mxu0  ;;  %v8153_v41 = vpop.f32.mrb[107].mxu1  ;;  %v12395_v8 = vadd.f32 %v3091_v26, %v14984_v44  ;;  %v14988_v26 = vld [vmem:[#allocation48_spill] sm:$0xff]  ;;  %v14989_v62 = vld [vmem:[#allocation23_spill] sm:$0xff] }
 0x3ad   :  { %v3364_v41 = vld [vmem:[%s14765_s0 + $0x17d] sm:$0xff] }
 0x3ae   :  { %14985 = vst [vmem:[#allocation18_spill] sm:$0xff] %v12395_v8  ;;  %8427 = vmatmul.mubr.msk.bf16.gmra.mrb[212].mxu1 %vm272_vm1, %v12386_v29  ;;  %8541 = vmatmul.mubr.msk.bf16.gmra.mrb[212].mxu0 %vm272_vm1, %v12034_v55  ;;  %v12414_v31 = vpack.c.bf16 %v3364_v41, %v3363_v38  ;;  %v14991_v41 = vld [vmem:[#allocation49_spill] sm:$0xff] }
 0x3af   :  { %8430 = vmatprep.mubr.msk.bf16.mxu1 %vm9187_vm2, %v14801_v33  ;;  %8544 = vmatprep.mubr.msk.bf16.mxu0 %vm9187_vm2, %v14801_v33 }
 0x3b1   :  { %v2509_v44 = vpop.f32.mrb[108].mxu1  ;;  %v3096_v35 = vpop.f32.mrb[108].mxu0 }
 0x3b2   :  { %v12412_v60 = vadd.f32 %v2509_v44, %v14986_v52  ;;  %v8156_v55 = vpop.f32.mrb[109].mxu1  ;;  %v8270_v0 = vpop.f32.mrb[109].mxu0  ;;  %v12417_v50 = vadd.f32 %v3096_v35, %v12029_v28  ;;  %v3365_v28 = vld [vmem:[%s14765_s0 + $0x185] sm:$0xff] }
 0x3b3   :  { %v2512_v17 = vpop.f32.mrb[110].mxu1  ;;  %v3099_v25 = vpop.f32.mrb[110].mxu0 }
 0x3b4   :  { %14987 = vst [vmem:[#allocation45_spill] sm:$0xff] %v12417_v50  ;;  %v12420_v19 = vadd.f32 %v2512_v17, %v14988_v26  ;;  %v8271_v14 = vpop.f32.mrb[111].mxu0  ;;  %v8157_v8 = vpop.f32.mrb[111].mxu1  ;;  %v12423_v15 = vadd.f32 %v3099_v25, %v14989_v62  ;;  %v14993_v25 = vld [vmem:[#allocation41_spill] sm:$0xff] }
 0x3b5   :  { %v3366_v8 = vld [vmem:[%s14765_s0 + $0x18d] sm:$0xff]  ;;  %v14994_v50 = vld [vmem:[#allocation25_spill] sm:$0xff] }
 0x3b6   :  { %14990 = vst [vmem:[#allocation46_spill] sm:$0xff] %v12423_v15  ;;  %8431 = vmatmul.mubr.msk.bf16.gmra.mrb[216].mxu1 %vm272_vm1, %v12414_v31  ;;  %8545 = vmatmul.mubr.msk.bf16.gmra.mrb[216].mxu0 %vm272_vm1, %v12067_v20  ;;  %v12442_v52 = vpack.c.bf16 %v3366_v8, %v3365_v28  ;;  %v14996_v8 = vld [vmem:[#allocation42_spill] sm:$0xff] }
 0x3b7   :  { %8434 = vmatprep.mubr.msk.bf16.mxu1 %vm9187_vm2, %v14801_v33  ;;  %8548 = vmatprep.mubr.msk.bf16.mxu0 %vm9187_vm2, %v14801_v33 }
 0x3b9   :  { %v2517_v62 = vpop.f32.mrb[112].mxu1  ;;  %v3104_v38 = vpop.f32.mrb[112].mxu0 }
 0x3ba   :  { %v12440_v44 = vadd.f32 %v2517_v62, %v14991_v41  ;;  %v8160_v20 = vpop.f32.mrb[113].mxu1  ;;  %v8274_v35 = vpop.f32.mrb[113].mxu0  ;;  %v12445_v55 = vadd.f32 %v3104_v38, %v12062_v59  ;;  %v3367_v59 = vld [vmem:[%s14765_s0 + $0x195] sm:$0xff] }
 0x3bb   :  { %v2520_v0 = vpop.f32.mrb[114].mxu1  ;;  %v3107_v17 = vpop.f32.mrb[114].mxu0 }
 0x3bc   :  { %14992 = vst [vmem:[#allocation21_spill] sm:$0xff] %v12445_v55  ;;  %v12448_v26 = vadd.f32 %v2520_v0, %v14993_v25  ;;  %v8275_v14 = vpop.f32.mrb[115].mxu0  ;;  %v8161_v15 = vpop.f32.mrb[115].mxu1  ;;  %v12451_v58 = vadd.f32 %v3107_v17, %v14994_v50  ;;  %v14998_v17 = vld [vmem:[#allocation43_spill] sm:$0xff] }
 0x3bd   :  { %v3368_v15 = vld [vmem:[%s14765_s0 + $0x19d] sm:$0xff] }
 0x3be   :  { %14995 = vst [vmem:[#allocation47_spill] sm:$0xff] %v12451_v58  ;;  %8435 = vmatmul.mubr.msk.bf16.gmra.mrb[220].mxu1 %vm272_vm1, %v12442_v52  ;;  %8549 = vmatmul.mubr.msk.bf16.gmra.mrb[220].mxu0 %vm272_vm1, %v12100_v63  ;;  %v12470_v41 = vpack.c.bf16 %v3368_v15, %v3367_v59  ;;  %v15000_v15 = vld [vmem:[#allocation32_spill] sm:$0xff] }
 0x3bf   :  { %8438 = vmatprep.mubr.msk.bf16.mxu1 %vm9187_vm2, %v14801_v33  ;;  %8552 = vmatprep.mubr.msk.bf16.mxu0 %vm9187_vm2, %v14801_v33 }
 0x3c1   :  { %v2525_v50 = vpop.f32.mrb[116].mxu1  ;;  %v3112_v28 = vpop.f32.mrb[116].mxu0 }
 0x3c2   :  { %v12468_v62 = vadd.f32 %v2525_v50, %v14996_v8  ;;  %v8164_v63 = vpop.f32.mrb[117].mxu1  ;;  %v8278_v38 = vpop.f32.mrb[117].mxu0  ;;  %v12473_v20 = vadd.f32 %v3112_v28, %v12095_v49  ;;  %v3369_v49 = vld [vmem:[%s14765_s0 + $0x1a5] sm:$0xff] }
 0x3c3   :  { %v2528_v35 = vpop.f32.mrb[118].mxu1  ;;  %v3115_v0 = vpop.f32.mrb[118].mxu0 }
 0x3c4   :  { %14997 = vst [vmem:[#allocation48_spill] sm:$0xff] %v12473_v20  ;;  %v12476_v25 = vadd.f32 %v2528_v35, %v14998_v17  ;;  %v8279_v14 = vpop.f32.mrb[119].mxu0  ;;  %v8165_v58 = vpop.f32.mrb[119].mxu1  ;;  %v12479_v55 = vadd.f32 %v3115_v0, %v12103_v54  ;;  %v3370_v54 = vld [vmem:[%s14765_s0 + $0x1ad] sm:$0xff]  ;;  %v15001_v0 = vld [vmem:[#allocation33_spill] sm:$0xff] }
 0x3c5   :  { %v12498_v8 = vpack.c.bf16 %v3370_v54, %v3369_v49  ;;  %v15003_v54 = vld [vmem:[#allocation34_spill] sm:$0xff] }
 0x3c6   :  { %14999 = vst [vmem:[#allocation23_spill] sm:$0xff] %v12479_v55  ;;  %8439 = vmatmul.mubr.msk.bf16.gmra.mrb[224].mxu1 %vm272_vm1, %v12470_v41  ;;  %8553 = vmatmul.mubr.msk.bf16.gmra.mrb[224].mxu0 %vm272_vm1, %v12130_v39 }
 0x3c7   :  { %8442 = vmatprep.mubr.msk.bf16.mxu1 %vm9187_vm2, %v14801_v33  ;;  %8556 = vmatprep.mubr.msk.bf16.mxu0 %vm9187_vm2, %v14801_v33 }
 0x3c9   :  { %v2533_v58 = vpop.f32.mrb[120].mxu1  ;;  %v3120_v59 = vpop.f32.mrb[120].mxu0 }
 0x3ca   :  { %v12496_v50 = vadd.f32 %v2533_v58, %v15000_v15  ;;  %v8168_v39 = vpop.f32.mrb[121].mxu1  ;;  %v8282_v28 = vpop.f32.mrb[121].mxu0  ;;  %v12501_v63 = vadd.f32 %v3120_v59, %v12125_v34  ;;  %v3371_v34 = vld [vmem:[%s14765_s0 + $0x1b5] sm:$0xff] }
 0x3cb   :  { %v2536_v38 = vpop.f32.mrb[122].mxu1  ;;  %v3123_v35 = vpop.f32.mrb[122].mxu0 }
 0x3cc   :  { %v12504_v17 = vadd.f32 %v2536_v38, %v15001_v0  ;;  %v8283_v14 = vpop.f32.mrb[123].mxu0  ;;  %v8169_v55 = vpop.f32.mrb[123].mxu1  ;;  %v12507_v20 = vadd.f32 %v3123_v35, %v12133_v10  ;;  %v3372_v10 = vld [vmem:[%s14765_s0 + $0x1bd] sm:$0xff] }
 0x3cd   :  { %v12526_v15 = vpack.c.bf16 %v3372_v10, %v3371_v34 }
 0x3ce   :  { %15002 = vst [vmem:[#allocation49_spill] sm:$0xff] %v12507_v20  ;;  %8443 = vmatmul.mubr.msk.bf16.gmra.mrb[228].mxu1 %vm272_vm1, %v12498_v8  ;;  %8557 = vmatmul.mubr.msk.bf16.gmra.mrb[228].mxu0 %vm272_vm1, %v12157_v27 }
 0x3cf   :  { %8446 = vmatprep.mubr.msk.bf16.mxu1 %vm9187_vm2, %v14801_v33  ;;  %8560 = vmatprep.mubr.msk.bf16.mxu0 %vm9187_vm2, %v14801_v33 }
 0x3d1   :  { %v2541_v55 = vpop.f32.mrb[124].mxu1  ;;  %v3128_v49 = vpop.f32.mrb[124].mxu0 }
 0x3d2   :  { %v12524_v58 = vadd.f32 %v2541_v55, %v15003_v54  ;;  %v8286_v27 = vpop.f32.mrb[125].mxu0  ;;  %v8172_v59 = vpop.f32.mrb[125].mxu1  ;;  %v12529_v39 = vadd.f32 %v3128_v49, %v12152_v7  ;;  %v3373_v7 = vld [vmem:[%s14765_s0 + $0x1c5] sm:$0xff]  ;;  %v15006_v55 = vld [vmem:[#allocation35_spill] sm:$0xff] }
 0x3d3   :  { %v3131_v28 = vpop.f32.mrb[126].mxu0  ;;  %v2544_v38 = vpop.f32.mrb[126].mxu1 }
 0x3d4   :  { %15004 = vst [vmem:[#allocation41_spill] sm:$0xff] %v12529_v39  ;;  %v8287_v35 = vpop.f32.mrb[127].mxu0  ;;  %v8173_v0 = vpop.f32.mrb[127].mxu1  ;;  %v12532_v14 = vadd.f32 %v3131_v28, %v12160_v37  ;;  %v3374_v37 = vld [vmem:[%s14765_s0 + $0x1cd] sm:$0xff] }
 0x3d5   :  { %v12551_v27 = vpack.c.bf16 %v3374_v37, %v3373_v7  ;;  %v15008_v35 = vld [vmem:[#allocation36_spill] sm:$0xff]  ;;  %v15010_v7 = vld [vmem:[#allocation39_spill] sm:$0xff] }
 0x3d6   :  { %15005 = vst [vmem:[#allocation25_spill] sm:$0xff] %v12532_v14  ;;  %8447 = vmatmul.mubr.msk.bf16.gmra.mrb[232].mxu1 %vm272_vm1, %v12526_v15  ;;  %8561 = vmatmul.mubr.msk.bf16.gmra.mrb[232].mxu0 %vm272_vm1, %v12185_v51 }
 0x3d7   :  { %8450 = vmatprep.mubr.msk.bf16.mxu1 %vm9187_vm2, %v14801_v33  ;;  %8564 = vmatprep.mubr.msk.bf16.mxu0 %vm9187_vm2, %v14801_v33 }
 0x3d9   :  { %v3136_v34 = vpop.f32.mrb[128].mxu0  ;;  %v3603_v10 = vpop.f32.mrb[128].mxu1 }
 0x3da   :  { %v12549_v49 = vadd.f32 %v3603_v10, %v15006_v55  ;;  %v8290_v51 = vpop.f32.mrb[129].mxu0  ;;  %v8344_v54 = vpop.f32.mrb[129].mxu1  ;;  %v12554_v59 = vadd.f32 %v3136_v34, %v12180_v12  ;;  %v3375_v12 = vld [vmem:[%s14765_s0 + $0x1d5] sm:$0xff] }
 0x3db   :  { %v3139_v28 = vpop.f32.mrb[130].mxu0  ;;  %v3606_v38 = vpop.f32.mrb[130].mxu1 }
 0x3dc   :  { %15007 = vst [vmem:[#allocation42_spill] sm:$0xff] %v12554_v59  ;;  %v12557_v0 = vadd.f32 %v3606_v38, %v15008_v35  ;;  %v8291_v14 = vpop.f32.mrb[131].mxu0  ;;  %v8345_v39 = vpop.f32.mrb[131].mxu1  ;;  %v12560_v20 = vadd.f32 %v3139_v28, %v12188_v23  ;;  %v3376_v23 = vld [vmem:[%s14765_s0 + $0x1dd] sm:$0xff] }
 0x3dd   :  { %v12579_v10 = vpack.c.bf16 %v3376_v23, %v3375_v12  ;;  %v15012_v28 = vld [vmem:[#allocation37_spill] sm:$0xff]  ;;  %v15014_v23 = vld [vmem:[#allocation38_spill] sm:$0xff] }
 0x3de   :  { %15009 = vst [vmem:[#allocation43_spill] sm:$0xff] %v12560_v20  ;;  %8451 = vmatmul.mubr.msk.bf16.gmra.mrb[236].mxu1 %vm272_vm1, %v12551_v27  ;;  %8565 = vmatmul.mubr.msk.bf16.gmra.mrb[236].mxu0 %vm272_vm1, %v12213_v36 }
 0x3df   :  { %8454 = vmatprep.mubr.msk.bf16.mxu1 %vm9187_vm2, %v14801_v33  ;;  %8568 = vmatprep.mubr.msk.bf16.mxu0 %vm9187_vm2, %v14801_v33 }
 0x3e1   :  { %v3144_v39 = vpop.f32.mrb[132].mxu0  ;;  %v3611_v14 = vpop.f32.mrb[132].mxu1 }
 0x3e2   :  { %v12577_v37 = vadd.f32 %v3611_v14, %v15010_v7  ;;  %v8294_v36 = vpop.f32.mrb[133].mxu0  ;;  %v8348_v34 = vpop.f32.mrb[133].mxu1  ;;  %v12582_v55 = vadd.f32 %v3144_v39, %v12208_v30  ;;  %v3377_v30 = vld [vmem:[%s14765_s0 + $0x1e5] sm:$0xff] }
 0x3e3   :  { %v3147_v51 = vpop.f32.mrb[134].mxu0  ;;  %v3614_v54 = vpop.f32.mrb[134].mxu1 }
 0x3e4   :  { %15011 = vst [vmem:[#allocation32_spill] sm:$0xff] %v12582_v55  ;;  %v12585_v38 = vadd.f32 %v3614_v54, %v15012_v28  ;;  %v8295_v35 = vpop.f32.mrb[135].mxu0  ;;  %v8349_v20 = vpop.f32.mrb[135].mxu1  ;;  %v12588_v59 = vadd.f32 %v3147_v51, %v12220_v40  ;;  %v3378_v40 = vld [vmem:[%s14765_s0 + $0x1ed] sm:$0xff]  ;;  %v15016_v54 = vld [vmem:[#allocation5_spill] sm:$0xff] }
 0x3e5   :  { %v12607_v7 = vpack.c.bf16 %v3378_v40, %v3377_v30  ;;  %v15018_v40 = vld [vmem:[#allocation6_spill] sm:$0xff] }
 0x3e6   :  { %15013 = vst [vmem:[#allocation33_spill] sm:$0xff] %v12588_v59  ;;  %8455 = vmatmul.mubr.msk.bf16.gmra.mrb[240].mxu1 %vm272_vm1, %v12579_v10  ;;  %8569 = vmatmul.mubr.msk.bf16.gmra.mrb[240].mxu0 %vm272_vm1, %v12249_v16 }
 0x3e7   :  { %8458 = vmatprep.mubr.msk.bf16.mxu1 %vm9187_vm2, %v14801_v33  ;;  %8572 = vmatprep.mubr.msk.bf16.mxu0 %vm9187_vm2, %v14801_v33 }
 0x3e9   :  { %v3152_v20 = vpop.f32.mrb[136].mxu0  ;;  %v3619_v12 = vpop.f32.mrb[136].mxu1 }
 0x3ea   :  { %v12605_v39 = vadd.f32 %v3619_v12, %v15014_v23  ;;  %v8298_v16 = vpop.f32.mrb[137].mxu0  ;;  %v8352_v14 = vpop.f32.mrb[137].mxu1  ;;  %v12610_v36 = vadd.f32 %v3152_v20, %v12244_v18  ;;  %v3379_v18 = vld [vmem:[%s14765_s0 + $0x1f5] sm:$0xff] }
 0x3eb   :  { %v3155_v34 = vpop.f32.mrb[138].mxu0  ;;  %v3622_v51 = vpop.f32.mrb[138].mxu1 }
 0x3ec   :  { %15015 = vst [vmem:[#allocation34_spill] sm:$0xff] %v12610_v36  ;;  %v12613_v28 = vadd.f32 %v3622_v51, %v15016_v54  ;;  %v8299_v35 = vpop.f32.mrb[139].mxu0  ;;  %v8353_v59 = vpop.f32.mrb[139].mxu1  ;;  %v12616_v55 = vadd.f32 %v3155_v34, %v12252_v48  ;;  %v3380_v48 = vld [vmem:[%s14765_s0 + $0x1fd] sm:$0xff]  ;;  %v15020_v51 = vld [vmem:[#allocation7_spill] sm:$0xff] }
 0x3ed   :  { %v12635_v23 = vpack.c.bf16 %v3380_v48, %v3379_v18  ;;  %v15022_v48 = vld [vmem:[#allocation8_spill] sm:$0xff] }
 0x3ee   :  { %15017 = vst [vmem:[#allocation35_spill] sm:$0xff] %v12616_v55  ;;  %8459 = vmatmul.mubr.msk.bf16.gmra.mrb[244].mxu1 %vm272_vm1, %v12607_v7  ;;  %8573 = vmatmul.mubr.msk.bf16.gmra.mrb[244].mxu0 %vm272_vm1, %v12277_v53 }
 0x3ef   :  { %8462 = vmatprep.mubr.msk.bf16.mxu1 %vm9187_vm2, %v14801_v33  ;;  %8576 = vmatprep.mubr.msk.bf16.mxu0 %vm9187_vm2, %v14801_v33 }
 0x3f1   :  { %v3160_v59 = vpop.f32.mrb[140].mxu0  ;;  %v3627_v30 = vpop.f32.mrb[140].mxu1 }
 0x3f2   :  { %v12633_v20 = vadd.f32 %v3627_v30, %v15018_v40  ;;  %v8302_v53 = vpop.f32.mrb[141].mxu0  ;;  %v8356_v12 = vpop.f32.mrb[141].mxu1  ;;  %v12638_v16 = vadd.f32 %v3160_v59, %v12272_v22  ;;  %v3381_v22 = vld [vmem:[%s14765_s0 + $0x205] sm:$0xff] }
 0x3f3   :  { %v3163_v14 = vpop.f32.mrb[142].mxu0  ;;  %v3630_v34 = vpop.f32.mrb[142].mxu1 }
 0x3f4   :  { %15019 = vst [vmem:[#allocation36_spill] sm:$0xff] %v12638_v16  ;;  %v12641_v54 = vadd.f32 %v3630_v34, %v15020_v51  ;;  %v8303_v35 = vpop.f32.mrb[143].mxu0  ;;  %v8357_v55 = vpop.f32.mrb[143].mxu1  ;;  %v12644_v36 = vadd.f32 %v3163_v14, %v12280_v9  ;;  %v3382_v9 = vld [vmem:[%s14765_s0 + $0x20d] sm:$0xff]  ;;  %v15024_v34 = vld [vmem:[#allocation9_spill] sm:$0xff] }
 0x3f5   :  { %v12663_v40 = vpack.c.bf16 %v3382_v9, %v3381_v22  ;;  %v15026_v9 = vld [vmem:[#allocation10_spill] sm:$0xff] }
 0x3f6   :  { %15021 = vst [vmem:[#allocation39_spill] sm:$0xff] %v12644_v36  ;;  %8463 = vmatmul.mubr.msk.bf16.gmra.mrb[248].mxu1 %vm272_vm1, %v12635_v23  ;;  %8577 = vmatmul.mubr.msk.bf16.gmra.mrb[248].mxu0 %vm272_vm1, %v12305_v56 }
 0x3f7   :  { %8466 = vmatprep.mubr.msk.bf16.mxu1 %vm9187_vm2, %v14801_v33  ;;  %8580 = vmatprep.mubr.msk.bf16.mxu0 %vm9187_vm2, %v14801_v33 }
 0x3f9   :  { %v3168_v55 = vpop.f32.mrb[144].mxu0  ;;  %v3635_v18 = vpop.f32.mrb[144].mxu1 }
 0x3fa   :  { %v12661_v59 = vadd.f32 %v3635_v18, %v15022_v48  ;;  %v8306_v56 = vpop.f32.mrb[145].mxu0  ;;  %v8360_v30 = vpop.f32.mrb[145].mxu1  ;;  %v12666_v53 = vadd.f32 %v3168_v55, %v12300_v43  ;;  %v3383_v43 = vld [vmem:[%s14765_s0 + $0x215] sm:$0xff] }
 0x3fb   :  { %v3171_v12 = vpop.f32.mrb[146].mxu0  ;;  %v3638_v14 = vpop.f32.mrb[146].mxu1 }
 0x3fc   :  { %15023 = vst [vmem:[#allocation37_spill] sm:$0xff] %v12666_v53  ;;  %v12669_v51 = vadd.f32 %v3638_v14, %v15024_v34  ;;  %v8307_v35 = vpop.f32.mrb[147].mxu0  ;;  %v8361_v36 = vpop.f32.mrb[147].mxu1  ;;  %v12672_v16 = vadd.f32 %v3171_v12, %v12308_v61  ;;  %v3384_v61 = vld [vmem:[%s14765_s0 + $0x21d] sm:$0xff]  ;;  %v15028_v14 = vld [vmem:[#allocation11_spill] sm:$0xff] }
 0x3fd   :  { %v12691_v48 = vpack.c.bf16 %v3384_v61, %v3383_v43  ;;  %v15030_v61 = vld [vmem:[#allocation12_spill] sm:$0xff] }
 0x3fe   :  { %15025 = vst [vmem:[#allocation38_spill] sm:$0xff] %v12672_v16  ;;  %8467 = vmatmul.mubr.msk.bf16.gmra.mrb[252].mxu1 %vm272_vm1, %v12663_v40  ;;  %8581 = vmatmul.mubr.msk.bf16.gmra.mrb[252].mxu0 %vm272_vm1, %v12330_v4 }
 0x3ff   :  { %8470 = vmatprep.mubr.msk.bf16.mxu1 %vm9187_vm2, %v14801_v33  ;;  %8584 = vmatprep.mubr.msk.bf16.mxu0 %vm9187_vm2, %v14801_v33 }
 0x401   :  { %v3176_v36 = vpop.f32.mrb[148].mxu0  ;;  %v3643_v22 = vpop.f32.mrb[148].mxu1 }
 0x402   :  { %v12689_v55 = vadd.f32 %v3643_v22, %v15026_v9  ;;  %v8310_v4 = vpop.f32.mrb[149].mxu0  ;;  %v8364_v18 = vpop.f32.mrb[149].mxu1  ;;  %v12694_v56 = vadd.f32 %v3176_v36, %v12328_v6  ;;  %v3385_v6 = vld [vmem:[%s14765_s0 + $0x225] sm:$0xff] }
 0x403   :  { %v3179_v30 = vpop.f32.mrb[150].mxu0  ;;  %v3646_v12 = vpop.f32.mrb[150].mxu1 }
 0x404   :  { %15027 = vst [vmem:[#allocation5_spill] sm:$0xff] %v12694_v56  ;;  %v12697_v34 = vadd.f32 %v3646_v12, %v15028_v14  ;;  %v8311_v35 = vpop.f32.mrb[151].mxu0  ;;  %v8365_v16 = vpop.f32.mrb[151].mxu1  ;;  %v12700_v53 = vadd.f32 %v3179_v30, %v12336_v5  ;;  %v3386_v5 = vld [vmem:[%s14765_s0 + $0x22d] sm:$0xff]  ;;  %v15032_v12 = vld [vmem:[#allocation13_spill] sm:$0xff] }
 0x405   :  { %v12719_v9 = vpack.c.bf16 %v3386_v5, %v3385_v6  ;;  %v15034_v5 = vld [vmem:[#allocation14_spill] sm:$0xff] }
 0x406   :  { %15029 = vst [vmem:[#allocation6_spill] sm:$0xff] %v12700_v53  ;;  %8471 = vmatmul.mubr.msk.bf16.gmra.mrb[0].mxu1 %vm272_vm1, %v12691_v48  ;;  %8585 = vmatmul.mubr.msk.bf16.gmra.mrb[0].mxu0 %vm272_vm1, %v12358_v1 }
 0x407   :  { %8474 = vmatprep.mubr.msk.bf16.mxu1 %vm9187_vm2, %v14801_v33  ;;  %8588 = vmatprep.mubr.msk.bf16.mxu0 %vm9187_vm2, %v14801_v33 }
 0x409   :  { %v3184_v16 = vpop.f32.mrb[152].mxu0  ;;  %v3651_v43 = vpop.f32.mrb[152].mxu1 }
 0x40a   :  { %v12717_v36 = vadd.f32 %v3651_v43, %v15030_v61  ;;  %v8314_v1 = vpop.f32.mrb[153].mxu0  ;;  %v8368_v22 = vpop.f32.mrb[153].mxu1  ;;  %v12722_v4 = vadd.f32 %v3184_v16, %v12356_v11  ;;  %v3387_v11 = vld [vmem:[%s14765_s0 + $0x235] sm:$0xff] }
 0x40b   :  { %v3187_v18 = vpop.f32.mrb[154].mxu0  ;;  %v3654_v30 = vpop.f32.mrb[154].mxu1 }
 0x40c   :  { %15031 = vst [vmem:[#allocation7_spill] sm:$0xff] %v12722_v4  ;;  %v12725_v14 = vadd.f32 %v3654_v30, %v15032_v12  ;;  %v8315_v35 = vpop.f32.mrb[155].mxu0  ;;  %v8369_v53 = vpop.f32.mrb[155].mxu1  ;;  %v12728_v56 = vadd.f32 %v3187_v18, %v12364_v2  ;;  %v3388_v2 = vld [vmem:[%s14765_s0 + $0x23d] sm:$0xff] }
 0x40d   :  { %v12747_v61 = vpack.c.bf16 %v3388_v2, %v3387_v11  ;;  %v15036_v30 = vld [vmem:[#allocation16_spill] sm:$0xff]  ;;  %v15038_v2 = vld [vmem:[#allocation17_spill] sm:$0xff] }
 0x40e   :  { %15033 = vst [vmem:[#allocation8_spill] sm:$0xff] %v12728_v56  ;;  %8475 = vmatmul.mubr.msk.bf16.gmra.mrb[4].mxu1 %vm272_vm1, %v12719_v9  ;;  %8589 = vmatmul.mubr.msk.bf16.gmra.mrb[4].mxu0 %vm272_vm1, %v12386_v29 }
 0x40f   :  { %8478 = vmatprep.mubr.msk.bf16.mxu1 %vm9187_vm2, %v14801_v33  ;;  %8592 = vmatprep.mubr.msk.bf16.mxu0 %vm9187_vm2, %v14801_v33 }
 0x411   :  { %v3192_v53 = vpop.f32.mrb[156].mxu0  ;;  %v3659_v6 = vpop.f32.mrb[156].mxu1 }
 0x412   :  { %v12745_v16 = vadd.f32 %v3659_v6, %v15034_v5  ;;  %v8318_v29 = vpop.f32.mrb[157].mxu0  ;;  %v8372_v43 = vpop.f32.mrb[157].mxu1  ;;  %v12750_v1 = vadd.f32 %v3192_v53, %v12384_v13  ;;  %v3389_v13 = vld [vmem:[%s14765_s0 + $0x245] sm:$0xff] }
 0x413   :  { %v3195_v22 = vpop.f32.mrb[158].mxu0  ;;  %v3662_v18 = vpop.f32.mrb[158].mxu1 }
 0x414   :  { %15035 = vst [vmem:[#allocation9_spill] sm:$0xff] %v12750_v1  ;;  %v12753_v12 = vadd.f32 %v3662_v18, %v15036_v30  ;;  %v8319_v35 = vpop.f32.mrb[159].mxu0  ;;  %v8373_v56 = vpop.f32.mrb[159].mxu1  ;;  %v12756_v4 = vadd.f32 %v3195_v22, %v12392_v24  ;;  %v3390_v24 = vld [vmem:[%s14765_s0 + $0x24d] sm:$0xff] }
 0x415   :  { %v12775_v5 = vpack.c.bf16 %v3390_v24, %v3389_v13  ;;  %v15040_v18 = vld [vmem:[#allocation19_spill] sm:$0xff]  ;;  %v15042_v24 = vld [vmem:[#allocation20_spill] sm:$0xff] }
 0x416   :  { %15037 = vst [vmem:[#allocation10_spill] sm:$0xff] %v12756_v4  ;;  %8479 = vmatmul.mubr.msk.bf16.gmra.mrb[8].mxu1 %vm272_vm1, %v12747_v61  ;;  %8593 = vmatmul.mubr.msk.bf16.gmra.mrb[8].mxu0 %vm272_vm1, %v12414_v31 }
 0x417   :  { %8482 = vmatprep.mubr.msk.bf16.mxu1 %vm9187_vm2, %v14801_v33  ;;  %8596 = vmatprep.mubr.msk.bf16.mxu0 %vm9187_vm2, %v14801_v33 }
 0x419   :  { %v3200_v56 = vpop.f32.mrb[160].mxu0  ;;  %v3667_v11 = vpop.f32.mrb[160].mxu1 }
 0x41a   :  { %v12773_v53 = vadd.f32 %v3667_v11, %v15038_v2  ;;  %v8322_v31 = vpop.f32.mrb[161].mxu0  ;;  %v8376_v6 = vpop.f32.mrb[161].mxu1  ;;  %v12778_v29 = vadd.f32 %v3200_v56, %v12412_v60  ;;  %v3391_v60 = vld [vmem:[%s14765_s0 + $0x255] sm:$0xff] }
 0x41b   :  { %v3203_v43 = vpop.f32.mrb[162].mxu0  ;;  %v3670_v22 = vpop.f32.mrb[162].mxu1 }
 0x41c   :  { %15039 = vst [vmem:[#allocation11_spill] sm:$0xff] %v12778_v29  ;;  %v12781_v30 = vadd.f32 %v3670_v22, %v15040_v18  ;;  %v8323_v35 = vpop.f32.mrb[163].mxu0  ;;  %v8377_v4 = vpop.f32.mrb[163].mxu1  ;;  %v12784_v1 = vadd.f32 %v3203_v43, %v12420_v19  ;;  %v3392_v19 = vld [vmem:[%s14765_s0 + $0x25d] sm:$0xff]  ;;  %v15044_v22 = vld [vmem:[#allocation50_spill] sm:$0xff] }
 0x41d   :  { %v12803_v2 = vpack.c.bf16 %v3392_v19, %v3391_v60  ;;  %v15046_v19 = vld [vmem:[#allocation22_spill] sm:$0xff] }
 0x41e   :  { %15041 = vst [vmem:[#allocation12_spill] sm:$0xff] %v12784_v1  ;;  %8483 = vmatmul.mubr.msk.bf16.gmra.mrb[12].mxu1 %vm272_vm1, %v12775_v5  ;;  %8597 = vmatmul.mubr.msk.bf16.gmra.mrb[12].mxu0 %vm272_vm1, %v12442_v52 }
 0x41f   :  { %8486 = vmatprep.mubr.msk.bf16.mxu1 %vm9187_vm2, %v14801_v33  ;;  %8600 = vmatprep.mubr.msk.bf16.mxu0 %vm9187_vm2, %v14801_v33 }
 0x421   :  { %v3208_v4 = vpop.f32.mrb[164].mxu0  ;;  %v3675_v13 = vpop.f32.mrb[164].mxu1 }
 0x422   :  { %v12801_v56 = vadd.f32 %v3675_v13, %v15042_v24  ;;  %v8326_v52 = vpop.f32.mrb[165].mxu0  ;;  %v8380_v11 = vpop.f32.mrb[165].mxu1  ;;  %v12806_v31 = vadd.f32 %v3208_v4, %v12440_v44  ;;  %v3393_v44 = vld [vmem:[%s14765_s0 + $0x265] sm:$0xff] }
 0x423   :  { %v3211_v6 = vpop.f32.mrb[166].mxu0  ;;  %v3678_v43 = vpop.f32.mrb[166].mxu1 }
 0x424   :  { %15043 = vst [vmem:[#allocation13_spill] sm:$0xff] %v12806_v31  ;;  %v12809_v18 = vadd.f32 %v3678_v43, %v15044_v22  ;;  %v8327_v35 = vpop.f32.mrb[167].mxu0  ;;  %v8381_v1 = vpop.f32.mrb[167].mxu1  ;;  %v12812_v29 = vadd.f32 %v3211_v6, %v12448_v26  ;;  %v3394_v26 = vld [vmem:[%s14765_s0 + $0x26d] sm:$0xff] }
 0x425   :  { %v12831_v24 = vpack.c.bf16 %v3394_v26, %v3393_v44  ;;  %v15048_v43 = vld [vmem:[#allocation51_spill] sm:$0xff]  ;;  %v15050_v26 = vld [vmem:[#allocation24_spill] sm:$0xff] }
 0x426   :  { %15045 = vst [vmem:[#allocation14_spill] sm:$0xff] %v12812_v29  ;;  %8487 = vmatmul.mubr.msk.bf16.gmra.mrb[16].mxu1 %vm272_vm1, %v12803_v2  ;;  %8601 = vmatmul.mubr.msk.bf16.gmra.mrb[16].mxu0 %vm272_vm1, %v12470_v41 }
 0x427   :  { %8490 = vmatprep.mubr.msk.bf16.mxu1 %vm9187_vm2, %v14801_v33  ;;  %8604 = vmatprep.mubr.msk.bf16.mxu0 %vm9187_vm2, %v14801_v33 }
 0x429   :  { %v3216_v1 = vpop.f32.mrb[168].mxu0  ;;  %v3683_v60 = vpop.f32.mrb[168].mxu1 }
 0x42a   :  { %v12829_v4 = vadd.f32 %v3683_v60, %v15046_v19  ;;  %v8330_v41 = vpop.f32.mrb[169].mxu0  ;;  %v8384_v13 = vpop.f32.mrb[169].mxu1  ;;  %v12834_v52 = vadd.f32 %v3216_v1, %v12468_v62  ;;  %v3395_v62 = vld [vmem:[%s14765_s0 + $0x275] sm:$0xff] }
 0x42b   :  { %v3219_v11 = vpop.f32.mrb[170].mxu0  ;;  %v3686_v6 = vpop.f32.mrb[170].mxu1 }
 0x42c   :  { %15047 = vst [vmem:[#allocation16_spill] sm:$0xff] %v12834_v52  ;;  %v12837_v22 = vadd.f32 %v3686_v6, %v15048_v43  ;;  %v8331_v35 = vpop.f32.mrb[171].mxu0  ;;  %v8385_v29 = vpop.f32.mrb[171].mxu1  ;;  %v12840_v31 = vadd.f32 %v3219_v11, %v12476_v25  ;;  %v3396_v25 = vld [vmem:[%s14765_s0 + $0x27d] sm:$0xff] }
 0x42d   :  { %v12859_v19 = vpack.c.bf16 %v3396_v25, %v3395_v62  ;;  %v15051_v6 = vld [vmem:[#allocation52_spill] sm:$0xff] }
 0x42e   :  { %15049 = vst [vmem:[#allocation17_spill] sm:$0xff] %v12840_v31  ;;  %8491 = vmatmul.mubr.msk.bf16.gmra.mrb[20].mxu1 %vm272_vm1, %v12831_v24  ;;  %8605 = vmatmul.mubr.msk.bf16.gmra.mrb[20].mxu0 %vm272_vm1, %v12498_v8 }
 0x42f   :  { %8494 = vmatprep.mubr.msk.bf16.mxu1 %vm9187_vm2, %v14801_v33  ;;  %8608 = vmatprep.mubr.msk.bf16.mxu0 %vm9187_vm2, %v14801_v33 }
 0x431   :  { %v3224_v29 = vpop.f32.mrb[172].mxu0  ;;  %v3691_v44 = vpop.f32.mrb[172].mxu1 }
 0x432   :  { %v12857_v1 = vadd.f32 %v3691_v44, %v15050_v26  ;;  %v8334_v8 = vpop.f32.mrb[173].mxu0  ;;  %v8388_v60 = vpop.f32.mrb[173].mxu1  ;;  %v12862_v41 = vadd.f32 %v3224_v29, %v12496_v50  ;;  %v3397_v50 = vld [vmem:[%s14765_s0 + $0x285] sm:$0xff] }
 0x433   :  { %v3227_v13 = vpop.f32.mrb[174].mxu0  ;;  %v3694_v11 = vpop.f32.mrb[174].mxu1 }
 0x434   :  { %v12865_v43 = vadd.f32 %v3694_v11, %v15051_v6  ;;  %v8335_v35 = vpop.f32.mrb[175].mxu0  ;;  %v8389_v31 = vpop.f32.mrb[175].mxu1  ;;  %v12868_v52 = vadd.f32 %v3227_v13, %v12504_v17  ;;  %v3398_v17 = vld [vmem:[%s14765_s0 + $0x28d] sm:$0xff] }
 0x435   :  { %v12887_v44 = vpack.c.bf16 %v3398_v17, %v3397_v50 }
 0x436   :  { %8495 = vmatmul.mubr.msk.bf16.gmra.mrb[24].mxu1 %vm272_vm1, %v12859_v19  ;;  %8609 = vmatmul.mubr.msk.bf16.gmra.mrb[24].mxu0 %vm272_vm1, %v12526_v15 }
 0x437   :  { %8498 = vmatprep.mubr.msk.bf16.mxu1 %vm9187_vm2, %v14801_v33  ;;  %8612 = vmatprep.mubr.msk.bf16.mxu0 %vm9187_vm2, %v14801_v33 }
 0x439   :  { %v3232_v31 = vpop.f32.mrb[176].mxu0  ;;  %v3699_v62 = vpop.f32.mrb[176].mxu1 }
 0x43a   :  { %v12885_v25 = vadd.f32 %v3699_v62, %v12098_v42  ;;  %v8338_v15 = vpop.f32.mrb[177].mxu0  ;;  %v8392_v29 = vpop.f32.mrb[177].mxu1  ;;  %v12890_v26 = vadd.f32 %v3232_v31, %v12524_v58  ;;  %v12906_v42 = vld [vmem:[%s14765_s0 + $0x295] sm:$0xff] }
 0x43b   :  { %v3235_v8 = vpop.f32.mrb[178].mxu0  ;;  %v3702_v60 = vpop.f32.mrb[178].mxu1  ;;  %v15052_v29 = vld [vmem:[#allocation26_spill] sm:$0xff] }
 0x43c   :  { %v12893_v13 = vadd.f32 %v3702_v60, %v12106_v45  ;;  %v8339_v11 = vpop.f32.mrb[179].mxu0  ;;  %v8393_v6 = vpop.f32.mrb[179].mxu1 }
 0x43e   :  { %8499 = vmatmul.mubr.msk.bf16.gmra.mrb[28].mxu1 %vm272_vm1, %v12887_v44  ;;  %8613 = vmatmul.mubr.msk.bf16.gmra.mrb[28].mxu0 %vm272_vm1, %v12551_v27  ;;  %v3440_v27 = vpack.c.bf16 %v12906_v42, %v12906_v42 }
 0x43f   :  { %8502 = vmatprep.mubr.msk.bf16.mxu1 %vm9187_vm2, %v14801_v33  ;;  %8616 = vmatprep.mubr.msk.bf16.mxu0 %vm9187_vm2, %v14801_v33 }
 0x441   :  { %v3707_v45 = vpop.f32.mrb[180].mxu1  ;;  %v4294_v58 = vpop.f32.mrb[180].mxu0 }
 0x442   :  { %v12909_v35 = vadd.f32 %v3707_v45, %v12128_v21  ;;  %v8396_v50 = vpop.f32.mrb[181].mxu1  ;;  %v8510_v17 = vpop.f32.mrb[181].mxu0  ;;  %v12914_v31 = vadd.f32 %v4294_v58, %v12549_v49  ;;  %v4701_v21 = vld [vmem:[%s14765_s0 + $0x26] sm:$0xff]  ;;  %v4702_v49 = vld [vmem:[%s14765_s0 + $0x2e] sm:$0xff] }
 0x443   :  { %v3710_v62 = vpop.f32.mrb[182].mxu1  ;;  %v4297_v15 = vpop.f32.mrb[182].mxu0  ;;  %v4782_v17 = vpack.c.bf16 %v4702_v49, %v4701_v21 }
 0x444   :  { %v12917_v8 = vadd.f32 %v3710_v62, %v15052_v29  ;;  %v8511_v60 = vpop.f32.mrb[183].mxu0  ;;  %v8397_v11 = vpop.f32.mrb[183].mxu1  ;;  %v12920_v6 = vadd.f32 %v4297_v15, %v12557_v0 }
 0x446   :  { %15053 = vst [vmem:[#allocation19_spill] sm:$0xff] %v12920_v6  ;;  %8503 = vmatmul.mubr.msk.bf16.gmra.mrb[32].mxu1 %vm272_vm1, %v3440_v27  ;;  %8617 = vmatmul.mubr.msk.bf16.gmra.mrb[32].mxu0 %vm272_vm1, %v12579_v10 }
 0x447   :  { %8620 = vmatprep.mubr.msk.bf16.mxu0 %vm9187_vm2, %v14801_v33  ;;  %8674 = vmatprep.mubr.msk.bf16.mxu1 %vm9187_vm2, %v14801_v33 }
 0x449   :  { %v3715_v0 = vpop.f32.mrb[184].mxu1  ;;  %v4302_v45 = vpop.f32.mrb[184].mxu0 }
 0x44a   :  { %v12936_v58 = vadd.f32 %v3715_v0, %v12155_v3  ;;  %v8400_v10 = vpop.f32.mrb[185].mxu1  ;;  %v8514_v50 = vpop.f32.mrb[185].mxu0  ;;  %v12939_v27 = vadd.f32 %v4302_v45, %v12577_v37  ;;  %v4703_v3 = vld [vmem:[%s14765_s0 + $0x36] sm:$0xff] }
 0x44b   :  { %v3718_v62 = vpop.f32.mrb[186].mxu1  ;;  %v4305_v15 = vpop.f32.mrb[186].mxu0 }
 0x44c   :  { %v12942_v29 = vadd.f32 %v3718_v62, %v12163_v47  ;;  %v8515_v60 = vpop.f32.mrb[187].mxu0  ;;  %v8401_v11 = vpop.f32.mrb[187].mxu1  ;;  %v12945_v6 = vadd.f32 %v4305_v15, %v12585_v38  ;;  %v4704_v47 = vld [vmem:[%s14765_s0 + $0x3e] sm:$0xff] }
 0x44d   :  { %v4783_v0 = vpack.c.bf16 %v4704_v47, %v4703_v3 }
 0x44e   :  { %8621 = vmatmul.mubr.msk.bf16.gmra.mrb[36].mxu0 %vm272_vm1, %v12607_v7  ;;  %8675 = vmatmul.mubr.msk.bf16.vlgmr.msra.gmra.mrb[36].mxu1 %vm272_vm1, %v4782_v17 }
 0x44f   :  { %8624 = vmatprep.mubr.msk.bf16.mxu0 %vm9187_vm2, %v14801_v33  ;;  %8678 = vmatprep.mubr.msk.bf16.mxu1 %vm9187_vm2, %v14801_v33 }
 0x451   :  { %v3723_v37 = vpop.f32.mrb[188].mxu1  ;;  %v4310_v38 = vpop.f32.mrb[188].mxu0 }
 0x452   :  { %v12961_v7 = vadd.f32 %v3723_v37, %v12183_v32  ;;  %v8404_v21 = vpop.f32.mrb[189].mxu1  ;;  %v8518_v49 = vpop.f32.mrb[189].mxu0  ;;  %v12964_v45 = vadd.f32 %v4310_v38, %v12605_v39  ;;  %v4705_v32 = vld [vmem:[%s14765_s0 + $0x46] sm:$0xff] }
 0x453   :  { %v3726_v10 = vpop.f32.mrb[190].mxu1  ;;  %v4313_v50 = vpop.f32.mrb[190].mxu0  ;;  %v15054_v49 = vld [vmem:[#allocation27_spill] sm:$0xff] }
 0x454   :  { %v12967_v17 = vadd.f32 %v3726_v10, %v12191_v46  ;;  %v8519_v62 = vpop.f32.mrb[191].mxu0  ;;  %v8405_v15 = vpop.f32.mrb[191].mxu1  ;;  %v12970_v60 = vadd.f32 %v4313_v50, %v12613_v28  ;;  %v4706_v46 = vld [vmem:[%s14765_s0 + $0x4e] sm:$0xff] }
 0x455   :  { %v4784_v47 = vpack.c.bf16 %v4706_v46, %v4705_v32  ;;  %v15055_v32 = vld [vmem:[#allocation28_spill] sm:$0xff] }
 0x456   :  { %8625 = vmatmul.mubr.msk.bf16.gmra.mrb[40].mxu0 %vm272_vm1, %v12635_v23  ;;  %8679 = vmatmul.mubr.msk.bf16.gmra.mrb[40].mxu1 %vm272_vm1, %v4783_v0 }
 0x457   :  { %8628 = vmatprep.mubr.msk.bf16.mxu0 %vm9187_vm2, %v14801_v33  ;;  %8682 = vmatprep.mubr.msk.bf16.mxu1 %vm9187_vm2, %v14801_v33 }
 0x459   :  { %v3731_v39 = vpop.f32.mrb[192].mxu1  ;;  %v4318_v28 = vpop.f32.mrb[192].mxu0 }
 0x45a   :  { %v12986_v23 = vadd.f32 %v3731_v39, %v12211_v57  ;;  %v8408_v11 = vpop.f32.mrb[193].mxu1  ;;  %v8522_v3 = vpop.f32.mrb[193].mxu0  ;;  %v12989_v37 = vadd.f32 %v4318_v28, %v12633_v20  ;;  %v4707_v57 = vld [vmem:[%s14765_s0 + $0x56] sm:$0xff]  ;;  %v4708_v20 = vld [vmem:[%s14765_s0 + $0x5e] sm:$0xff] }
 0x45b   :  { %v3734_v38 = vpop.f32.mrb[194].mxu1  ;;  %v4321_v21 = vpop.f32.mrb[194].mxu0  ;;  %v4785_v28 = vpack.c.bf16 %v4708_v20, %v4707_v57 }
 0x45c   :  { %v12992_v0 = vadd.f32 %v3734_v38, %v15054_v49  ;;  %v8523_v10 = vpop.f32.mrb[195].mxu0  ;;  %v8409_v50 = vpop.f32.mrb[195].mxu1  ;;  %v12995_v62 = vadd.f32 %v4321_v21, %v12641_v54  ;;  %v15056_v38 = vld [vmem:[#allocation29_spill] sm:$0xff] }
 0x45e   :  { %8629 = vmatmul.mubr.msk.bf16.gmra.mrb[44].mxu0 %vm272_vm1, %v12663_v40  ;;  %8683 = vmatmul.mubr.msk.bf16.gmra.mrb[44].mxu1 %vm272_vm1, %v4784_v47 }
 0x45f   :  { %8632 = vmatprep.mubr.msk.bf16.mxu0 %vm9187_vm2, %v14801_v33  ;;  %8686 = vmatprep.mubr.msk.bf16.mxu1 %vm9187_vm2, %v14801_v33 }
 0x461   :  { %v3739_v54 = vpop.f32.mrb[196].mxu1  ;;  %v4326_v15 = vpop.f32.mrb[196].mxu0 }
 0x462   :  { %v13011_v40 = vadd.f32 %v3739_v54, %v15055_v32  ;;  %v8412_v46 = vpop.f32.mrb[197].mxu1  ;;  %v8526_v39 = vpop.f32.mrb[197].mxu0  ;;  %v13014_v11 = vadd.f32 %v4326_v15, %v12661_v59  ;;  %v4709_v59 = vld [vmem:[%s14765_s0 + $0x66] sm:$0xff] }
 0x463   :  { %v3742_v3 = vpop.f32.mrb[198].mxu1  ;;  %v4329_v47 = vpop.f32.mrb[198].mxu0  ;;  %v15058_v32 = vld [vmem:[#allocation53_spill] sm:$0xff] }
 0x464   :  { %v13017_v21 = vadd.f32 %v3742_v3, %v15056_v38  ;;  %v8527_v49 = vpop.f32.mrb[199].mxu0  ;;  %v8413_v10 = vpop.f32.mrb[199].mxu1  ;;  %v13020_v50 = vadd.f32 %v4329_v47, %v12669_v51  ;;  %v4710_v51 = vld [vmem:[%s14765_s0 + $0x6e] sm:$0xff] }
 0x465   :  { %v4786_v15 = vpack.c.bf16 %v4710_v51, %v4709_v59  ;;  %v15059_v49 = vld [vmem:[#allocation54_spill] sm:$0xff] }
 0x466   :  { %15057 = vst [vmem:[#allocation20_spill] sm:$0xff] %v13020_v50  ;;  %8633 = vmatmul.mubr.msk.bf16.gmra.mrb[48].mxu0 %vm272_vm1, %v12691_v48  ;;  %8687 = vmatmul.mubr.msk.bf16.gmra.mrb[48].mxu1 %vm272_vm1, %v4785_v28 }
 0x467   :  { %8636 = vmatprep.mubr.msk.bf16.mxu0 %vm9187_vm2, %v14801_v33  ;;  %8690 = vmatprep.mubr.msk.bf16.mxu1 %vm9187_vm2, %v14801_v33 }
 0x469   :  { %v3747_v57 = vpop.f32.mrb[200].mxu1  ;;  %v4334_v20 = vpop.f32.mrb[200].mxu0 }
 0x46a   :  { %v8416_v54 = vpop.f32.mrb[201].mxu1  ;;  %v8530_v48 = vpop.f32.mrb[201].mxu0  ;;  %v13036_v46 = vadd.f32 %v3747_v57, %v15058_v32  ;;  %v13039_v39 = vadd.f32 %v4334_v20, %v12689_v55  ;;  %v4711_v55 = vld [vmem:[%s14765_s0 + $0x76] sm:$0xff] }
 0x46b   :  { %v3750_v28 = vpop.f32.mrb[202].mxu1  ;;  %v4337_v3 = vpop.f32.mrb[202].mxu0  ;;  %v15061_v54 = vld [vmem:[#allocation55_spill] sm:$0xff] }
 0x46c   :  { %v8531_v47 = vpop.f32.mrb[203].mxu0  ;;  %v8417_v38 = vpop.f32.mrb[203].mxu1  ;;  %v13042_v10 = vadd.f32 %v3750_v28, %v15059_v49  ;;  %v13045_v50 = vadd.f32 %v4337_v3, %v12697_v34  ;;  %v4712_v34 = vld [vmem:[%s14765_s0 + $0x7e] sm:$0xff] }
 0x46d   :  { %v4787_v20 = vpack.c.bf16 %v4712_v34, %v4711_v55  ;;  %v15062_v38 = vld [vmem:[#allocation56_spill] sm:$0xff] }
 0x46e   :  { %15060 = vst [vmem:[#allocation50_spill] sm:$0xff] %v13045_v50  ;;  %8637 = vmatmul.mubr.msk.bf16.gmra.mrb[52].mxu0 %vm272_vm1, %v12719_v9  ;;  %8691 = vmatmul.mubr.msk.bf16.gmra.mrb[52].mxu1 %vm272_vm1, %v4786_v15 }
 0x46f   :  { %8640 = vmatprep.mubr.msk.bf16.mxu0 %vm9187_vm2, %v14801_v33  ;;  %8694 = vmatprep.mubr.msk.bf16.mxu1 %vm9187_vm2, %v14801_v33 }
 0x471   :  { %v3755_v59 = vpop.f32.mrb[204].mxu1  ;;  %v4342_v51 = vpop.f32.mrb[204].mxu0 }
 0x472   :  { %v8420_v57 = vpop.f32.mrb[205].mxu1  ;;  %v8534_v9 = vpop.f32.mrb[205].mxu0  ;;  %v13061_v48 = vadd.f32 %v3755_v59, %v15061_v54  ;;  %v13064_v15 = vadd.f32 %v4342_v51, %v12717_v36  ;;  %v4713_v36 = vld [vmem:[%s14765_s0 + $0x86] sm:$0xff] }
 0x473   :  { %v3758_v32 = vpop.f32.mrb[206].mxu1  ;;  %v4345_v28 = vpop.f32.mrb[206].mxu0  ;;  %v15064_v59 = vld [vmem:[#allocation30_spill] sm:$0xff] }
 0x474   :  { %v8535_v3 = vpop.f32.mrb[207].mxu0  ;;  %v8421_v47 = vpop.f32.mrb[207].mxu1  ;;  %v13067_v49 = vadd.f32 %v3758_v32, %v15062_v38  ;;  %v13070_v50 = vadd.f32 %v4345_v28, %v12725_v14  ;;  %v4714_v14 = vld [vmem:[%s14765_s0 + $0x8e] sm:$0xff] }
 0x475   :  { %v4788_v9 = vpack.c.bf16 %v4714_v14, %v4713_v36  ;;  %v15065_v28 = vld [vmem:[#allocation31_spill] sm:$0xff] }
 0x476   :  { %15063 = vst [vmem:[#allocation22_spill] sm:$0xff] %v13070_v50  ;;  %8641 = vmatmul.mubr.msk.bf16.gmra.mrb[56].mxu0 %vm272_vm1, %v12747_v61  ;;  %8695 = vmatmul.mubr.msk.bf16.gmra.mrb[56].mxu1 %vm272_vm1, %v4787_v20 }
 0x477   :  { %8644 = vmatprep.mubr.msk.bf16.mxu0 %vm9187_vm2, %v14801_v33  ;;  %8698 = vmatprep.mubr.msk.bf16.mxu1 %vm9187_vm2, %v14801_v33 }
 0x479   :  { %v3763_v55 = vpop.f32.mrb[208].mxu1  ;;  %v4350_v34 = vpop.f32.mrb[208].mxu0 }
 0x47a   :  { %v13086_v61 = vadd.f32 %v3763_v55, %v15064_v59  ;;  %v8424_v51 = vpop.f32.mrb[209].mxu1  ;;  %v8538_v57 = vpop.f32.mrb[209].mxu0  ;;  %v13089_v20 = vadd.f32 %v4350_v34, %v12745_v16  ;;  %v4715_v16 = vld [vmem:[%s14765_s0 + $0x96] sm:$0xff] }
 0x47b   :  { %v3766_v54 = vpop.f32.mrb[210].mxu1  ;;  %v4353_v32 = vpop.f32.mrb[210].mxu0  ;;  %v15067_v55 = vld [vmem:[#allocation15_spill] sm:$0xff] }
 0x47c   :  { %v13092_v3 = vadd.f32 %v3766_v54, %v15065_v28  ;;  %v8539_v47 = vpop.f32.mrb[211].mxu0  ;;  %v8425_v38 = vpop.f32.mrb[211].mxu1  ;;  %v13095_v50 = vadd.f32 %v4353_v32, %v12753_v12  ;;  %v4716_v12 = vld [vmem:[%s14765_s0 + $0x9e] sm:$0xff] }
 0x47d   :  { %v4789_v51 = vpack.c.bf16 %v4716_v12, %v4715_v16  ;;  %v15068_v32 = vld [vmem:[#allocation40_spill] sm:$0xff] }
 0x47e   :  { %15066 = vst [vmem:[#allocation51_spill] sm:$0xff] %v13095_v50  ;;  %8645 = vmatmul.mubr.msk.bf16.gmra.mrb[60].mxu0 %vm272_vm1, %v12775_v5  ;;  %8699 = vmatmul.mubr.msk.bf16.gmra.mrb[60].mxu1 %vm272_vm1, %v4788_v9 }
 0x47f   :  { %8648 = vmatprep.mubr.msk.bf16.mxu0 %vm9187_vm2, %v14801_v33  ;;  %8702 = vmatprep.mubr.msk.bf16.mxu1 %vm9187_vm2, %v14801_v33 }
 0x481   :  { %v3771_v36 = vpop.f32.mrb[212].mxu1  ;;  %v4358_v14 = vpop.f32.mrb[212].mxu0 }
 0x482   :  { %v13111_v5 = vadd.f32 %v3771_v36, %v15067_v55  ;;  %v8428_v34 = vpop.f32.mrb[213].mxu1  ;;  %v8542_v59 = vpop.f32.mrb[213].mxu0  ;;  %v13114_v57 = vadd.f32 %v4358_v14, %v12773_v53  ;;  %v4717_v53 = vld [vmem:[%s14765_s0 + $0xa6] sm:$0xff]  ;;  %v15070_v36 = vld [vmem:[#allocation44_spill] sm:$0xff] }
 0x483   :  { %v3774_v9 = vpop.f32.mrb[214].mxu1  ;;  %v4361_v54 = vpop.f32.mrb[214].mxu0 }
 0x484   :  { %v13117_v28 = vadd.f32 %v3774_v9, %v15068_v32  ;;  %v8543_v47 = vpop.f32.mrb[215].mxu0  ;;  %v8429_v38 = vpop.f32.mrb[215].mxu1  ;;  %v13120_v50 = vadd.f32 %v4361_v54, %v12781_v30  ;;  %v4718_v30 = vld [vmem:[%s14765_s0 + $0xae] sm:$0xff] }
 0x485   :  { %v4790_v34 = vpack.c.bf16 %v4718_v30, %v4717_v53  ;;  %v15071_v54 = vld [vmem:[#allocation18_spill] sm:$0xff] }
 0x486   :  { %15069 = vst [vmem:[#allocation24_spill] sm:$0xff] %v13120_v50  ;;  %8649 = vmatmul.mubr.msk.bf16.gmra.mrb[64].mxu0 %vm272_vm1, %v12803_v2  ;;  %8703 = vmatmul.mubr.msk.bf16.gmra.mrb[64].mxu1 %vm272_vm1, %v4789_v51 }
 0x487   :  { %8652 = vmatprep.mubr.msk.bf16.mxu0 %vm9187_vm2, %v14801_v33  ;;  %8706 = vmatprep.mubr.msk.bf16.mxu1 %vm9187_vm2, %v14801_v33 }
 0x489   :  { %v3779_v16 = vpop.f32.mrb[216].mxu1  ;;  %v4366_v12 = vpop.f32.mrb[216].mxu0 }
 0x48a   :  { %v13136_v2 = vadd.f32 %v3779_v16, %v15070_v36  ;;  %v8432_v14 = vpop.f32.mrb[217].mxu1  ;;  %v8546_v55 = vpop.f32.mrb[217].mxu0  ;;  %v13139_v59 = vadd.f32 %v4366_v12, %v12801_v56  ;;  %v4719_v56 = vld [vmem:[%s14765_s0 + $0xb6] sm:$0xff]  ;;  %v15073_v16 = vld [vmem:[#allocation45_spill] sm:$0xff] }
 0x48b   :  { %v3782_v51 = vpop.f32.mrb[218].mxu1  ;;  %v4369_v9 = vpop.f32.mrb[218].mxu0 }
 0x48c   :  { %v13142_v32 = vadd.f32 %v3782_v51, %v15071_v54  ;;  %v8547_v47 = vpop.f32.mrb[219].mxu0  ;;  %v8433_v38 = vpop.f32.mrb[219].mxu1  ;;  %v13145_v50 = vadd.f32 %v4369_v9, %v12809_v18  ;;  %v4720_v18 = vld [vmem:[%s14765_s0 + $0xbe] sm:$0xff]  ;;  %v15075_v9 = vld [vmem:[#allocation46_spill] sm:$0xff] }
 0x48d   :  { %v4791_v14 = vpack.c.bf16 %v4720_v18, %v4719_v56 }
 0x48e   :  { %15072 = vst [vmem:[#allocation52_spill] sm:$0xff] %v13145_v50  ;;  %8653 = vmatmul.mubr.msk.bf16.gmra.mrb[68].mxu0 %vm272_vm1, %v12831_v24  ;;  %8707 = vmatmul.mubr.msk.bf16.gmra.mrb[68].mxu1 %vm272_vm1, %v4790_v34 }
 0x48f   :  { %8656 = vmatprep.mubr.msk.bf16.mxu0 %vm9187_vm2, %v14801_v33  ;;  %8710 = vmatprep.mubr.msk.bf16.mxu1 %vm9187_vm2, %v14801_v33 }
 0x491   :  { %v3787_v53 = vpop.f32.mrb[220].mxu1  ;;  %v4374_v30 = vpop.f32.mrb[220].mxu0 }
 0x492   :  { %v13161_v24 = vadd.f32 %v3787_v53, %v15073_v16  ;;  %v8436_v12 = vpop.f32.mrb[221].mxu1  ;;  %v8550_v36 = vpop.f32.mrb[221].mxu0  ;;  %v13164_v55 = vadd.f32 %v4374_v30, %v12829_v4  ;;  %v4721_v4 = vld [vmem:[%s14765_s0 + $0xc6] sm:$0xff] }
 0x493   :  { %v3790_v34 = vpop.f32.mrb[222].mxu1  ;;  %v4377_v51 = vpop.f32.mrb[222].mxu0  ;;  %v15077_v53 = vld [vmem:[#allocation21_spill] sm:$0xff] }
 0x494   :  { %15074 = vst [vmem:[#allocation26_spill] sm:$0xff] %v13164_v55  ;;  %v13167_v54 = vadd.f32 %v3790_v34, %v15075_v9  ;;  %v8551_v47 = vpop.f32.mrb[223].mxu0  ;;  %v8437_v38 = vpop.f32.mrb[223].mxu1  ;;  %v13170_v50 = vadd.f32 %v4377_v51, %v12837_v22  ;;  %v4722_v22 = vld [vmem:[%s14765_s0 + $0xce] sm:$0xff] }
 0x495   :  { %v4792_v12 = vpack.c.bf16 %v4722_v22, %v4721_v4  ;;  %v15079_v51 = vld [vmem:[#allocation47_spill] sm:$0xff] }
 0x496   :  { %15076 = vst [vmem:[#allocation27_spill] sm:$0xff] %v13170_v50  ;;  %8657 = vmatmul.mubr.msk.bf16.gmra.mrb[72].mxu0 %vm272_vm1, %v12859_v19  ;;  %8711 = vmatmul.mubr.msk.bf16.gmra.mrb[72].mxu1 %vm272_vm1, %v4791_v14 }
 0x497   :  { %8660 = vmatprep.mubr.msk.bf16.mxu0 %vm9187_vm2, %v14801_v33  ;;  %8714 = vmatprep.mubr.msk.bf16.mxu1 %vm9187_vm2, %v14801_v33 }
 0x499   :  { %v3795_v56 = vpop.f32.mrb[224].mxu1  ;;  %v4382_v18 = vpop.f32.mrb[224].mxu0 }
 0x49a   :  { %v13186_v19 = vadd.f32 %v3795_v56, %v15077_v53  ;;  %v8440_v30 = vpop.f32.mrb[225].mxu1  ;;  %v8554_v16 = vpop.f32.mrb[225].mxu0  ;;  %v13189_v36 = vadd.f32 %v4382_v18, %v12857_v1  ;;  %v4089_v1 = vld [vmem:[%s14765_s0 + $0x29d] sm:$0xff] }
 0x49b   :  { %v3798_v14 = vpop.f32.mrb[226].mxu1  ;;  %v4385_v34 = vpop.f32.mrb[226].mxu0  ;;  %v15081_v56 = vld [vmem:[#allocation48_spill] sm:$0xff]  ;;  %v4130_v16 = vpack.c.bf16 %v4089_v1, %v12906_v42  ;;  %v4725_v42 = vld [vmem:[%s14765_s0 + $0xe6] sm:$0xff] }
 0x49c   :  { %15078 = vst [vmem:[#allocation28_spill] sm:$0xff] %v13189_v36  ;;  %v13192_v9 = vadd.f32 %v3798_v14, %v15079_v51  ;;  %v8555_v47 = vpop.f32.mrb[227].mxu0  ;;  %v8441_v38 = vpop.f32.mrb[227].mxu1  ;;  %v13195_v50 = vadd.f32 %v4385_v34, %v12865_v43  ;;  %v4723_v43 = vld [vmem:[%s14765_s0 + $0xd6] sm:$0xff] }
 0x49d   :  { %v15082_v47 = vld [vmem:[#allocation23_spill] sm:$0xff] }
 0x49e   :  { %15080 = vst [vmem:[#allocation29_spill] sm:$0xff] %v13195_v50  ;;  %8661 = vmatmul.mubr.msk.bf16.gmra.mrb[76].mxu0 %vm272_vm1, %v12887_v44  ;;  %8715 = vmatmul.mubr.msk.bf16.gmra.mrb[76].mxu1 %vm272_vm1, %v4792_v12  ;;  %v4724_v44 = vld [vmem:[%s14765_s0 + $0xde] sm:$0xff] }
 0x49f   :  { %8664 = vmatprep.mubr.msk.bf16.mxu0 %vm9187_vm2, %v14801_v33  ;;  %8718 = vmatprep.mubr.msk.bf16.mxu1 %vm9187_vm2, %v14801_v33  ;;  %v4793_v12 = vpack.c.bf16 %v4724_v44, %v4723_v43 }
 0x4a1   :  { %v3803_v4 = vpop.f32.mrb[228].mxu1  ;;  %v4390_v22 = vpop.f32.mrb[228].mxu0 }
 0x4a2   :  { %v13214_v18 = vadd.f32 %v3803_v4, %v15081_v56  ;;  %v8444_v53 = vpop.f32.mrb[229].mxu1  ;;  %v8558_v30 = vpop.f32.mrb[229].mxu0  ;;  %v13218_v14 = vadd.f32 %v4390_v22, %v12885_v25  ;;  %v4090_v25 = vld [vmem:[%s14765_s0 + $0x2a5] sm:$0xff] }
 0x4a3   :  { %v3806_v34 = vpop.f32.mrb[230].mxu1  ;;  %v4393_v51 = vpop.f32.mrb[230].mxu0  ;;  %v4131_v4 = vpack.c.bf16 %v4090_v25, %v4090_v25  ;;  %v5393_v25 = vld [vmem:[%s14765_s0 + $0x2f] sm:$0xff] }
 0x4a4   :  { %v13221_v38 = vadd.f32 %v3806_v34, %v15082_v47  ;;  %v8559_v50 = vpop.f32.mrb[231].mxu0  ;;  %v8445_v36 = vpop.f32.mrb[231].mxu1  ;;  %v13224_v55 = vadd.f32 %v4393_v51, %v12893_v13  ;;  %v4726_v13 = vld [vmem:[%s14765_s0 + $0xee] sm:$0xff] }
 0x4a5   :  { %v4794_v22 = vpack.c.bf16 %v4726_v13, %v4725_v42 }
 0x4a6   :  { %15083 = vst [vmem:[#allocation53_spill] sm:$0xff] %v13224_v55  ;;  %8665 = vmatmul.mubr.msk.bf16.gmra.mrb[80].mxu0 %vm272_vm1, %v4130_v16  ;;  %8719 = vmatmul.mubr.msk.bf16.gmra.mrb[80].mxu1 %vm272_vm1, %v4793_v12  ;;  %v15085_v16 = vld [vmem:[#allocation49_spill] sm:$0xff] }
 0x4a7   :  { %8668 = vmatprep.mubr.msk.bf16.mxu0 %vm9187_vm2, %v14801_v33  ;;  %8722 = vmatprep.mubr.msk.bf16.mxu1 %vm9187_vm2, %v14801_v33 }
 0x4a9   :  { %v3811_v50 = vpop.f32.mrb[232].mxu1  ;;  %v4398_v36 = vpop.f32.mrb[232].mxu0 }
 0x4aa   :  { %v13242_v1 = vadd.f32 %v3811_v50, %v12501_v63  ;;  %v8448_v43 = vpop.f32.mrb[233].mxu1  ;;  %v8562_v44 = vpop.f32.mrb[233].mxu0  ;;  %v13245_v56 = vadd.f32 %v4398_v36, %v12909_v35  ;;  %v4727_v63 = vld [vmem:[%s14765_s0 + $0xf6] sm:$0xff]  ;;  %v4728_v35 = vld [vmem:[%s14765_s0 + $0xfe] sm:$0xff] }
 0x4ab   :  { %v3814_v53 = vpop.f32.mrb[234].mxu1  ;;  %v4401_v30 = vpop.f32.mrb[234].mxu0  ;;  %v15087_v50 = vld [vmem:[#allocation41_spill] sm:$0xff] }
 0x4ac   :  { %15084 = vst [vmem:[#allocation54_spill] sm:$0xff] %v13245_v56  ;;  %v13248_v12 = vadd.f32 %v3814_v53, %v15085_v16  ;;  %v8563_v34 = vpop.f32.mrb[235].mxu0  ;;  %v8449_v51 = vpop.f32.mrb[235].mxu1  ;;  %v13251_v47 = vadd.f32 %v4401_v30, %v12917_v8  ;;  %v5392_v8 = vld [vmem:[%s14765_s0 + $0x27] sm:$0xff] }
 0x4ad   :  { %v15089_v34 = vld [vmem:[#allocation25_spill] sm:$0xff] }
 0x4ae   :  { %15086 = vst [vmem:[#allocation55_spill] sm:$0xff] %v13251_v47  ;;  %8669 = vmatmul.mubr.msk.bf16.gmra.mrb[84].mxu0 %vm272_vm1, %v4131_v4  ;;  %8723 = vmatmul.mubr.msk.bf16.gmra.mrb[84].mxu1 %vm272_vm1, %v4794_v22  ;;  %v4795_v4 = vpack.c.bf16 %v4728_v35, %v4727_v63  ;;  %v5473_v22 = vpack.c.bf16 %v5393_v25, %v5392_v8  ;;  %v4729_v63 = vld [vmem:[%s14765_s0 + $0x106] sm:$0xff] }
 0x4af   :  { %8726 = vmatprep.mubr.msk.bf16.mxu1 %vm9187_vm2, %v14801_v33  ;;  %8840 = vmatprep.mubr.msk.bf16.mxu0 %vm9187_vm2, %v14801_v33  ;;  %v15091_v8 = vld [vmem:[#allocation42_spill] sm:$0xff] }
 0x4b1   :  { %v3819_v42 = vpop.f32.mrb[236].mxu1  ;;  %v4406_v13 = vpop.f32.mrb[236].mxu0 }
 0x4b2   :  { %v13272_v36 = vadd.f32 %v3819_v42, %v15087_v50  ;;  %v8452_v43 = vpop.f32.mrb[237].mxu1  ;;  %v8566_v44 = vpop.f32.mrb[237].mxu0  ;;  %v13275_v53 = vadd.f32 %v4406_v13, %v12936_v58  ;;  %v4730_v58 = vld [vmem:[%s14765_s0 + $0x10e] sm:$0xff] }
 0x4b3   :  { %v3822_v30 = vpop.f32.mrb[238].mxu1  ;;  %v4409_v16 = vpop.f32.mrb[238].mxu0  ;;  %v4796_v50 = vpack.c.bf16 %v4730_v58, %v4729_v63  ;;  %v4731_v63 = vld [vmem:[%s14765_s0 + $0x116] sm:$0xff] }
 0x4b4   :  { %15088 = vst [vmem:[#allocation56_spill] sm:$0xff] %v13275_v53  ;;  %v13278_v51 = vadd.f32 %v3822_v30, %v15089_v34  ;;  %v8567_v47 = vpop.f32.mrb[239].mxu0  ;;  %v8453_v56 = vpop.f32.mrb[239].mxu1  ;;  %v13281_v55 = vadd.f32 %v4409_v16, %v12942_v29  ;;  %v5394_v29 = vld [vmem:[%s14765_s0 + $0x37] sm:$0xff] }
 0x4b5   :  { %v5395_v56 = vld [vmem:[%s14765_s0 + $0x3f] sm:$0xff]  ;;  %v15093_v30 = vld [vmem:[#allocation43_spill] sm:$0xff] }
 0x4b6   :  { %15090 = vst [vmem:[#allocation30_spill] sm:$0xff] %v13281_v55  ;;  %8727 = vmatmul.mubr.msk.bf16.gmra.mrb[88].mxu1 %vm272_vm1, %v4795_v4  ;;  %8841 = vmatmul.mubr.msk.bf16.vlgmr.msra.gmra.mrb[88].mxu0 %vm272_vm1, %v5473_v22  ;;  %v5474_v43 = vpack.c.bf16 %v5395_v56, %v5394_v29  ;;  %v15095_v56 = vld [vmem:[#allocation32_spill] sm:$0xff] }
 0x4b7   :  { %8730 = vmatprep.mubr.msk.bf16.mxu1 %vm9187_vm2, %v14801_v33  ;;  %8844 = vmatprep.mubr.msk.bf16.mxu0 %vm9187_vm2, %v14801_v33 }
 0x4b9   :  { %v3827_v47 = vpop.f32.mrb[240].mxu1  ;;  %v4414_v35 = vpop.f32.mrb[240].mxu0 }
 0x4ba   :  { %v13302_v25 = vadd.f32 %v3827_v47, %v15091_v8  ;;  %v8456_v42 = vpop.f32.mrb[241].mxu1  ;;  %v8570_v13 = vpop.f32.mrb[241].mxu0  ;;  %v13305_v44 = vadd.f32 %v4414_v35, %v12961_v7  ;;  %v4732_v7 = vld [vmem:[%s14765_s0 + $0x11e] sm:$0xff] }
 0x4bb   :  { %v3830_v4 = vpop.f32.mrb[242].mxu1  ;;  %v4417_v22 = vpop.f32.mrb[242].mxu0  ;;  %v4797_v42 = vpack.c.bf16 %v4732_v7, %v4731_v63  ;;  %v4733_v63 = vld [vmem:[%s14765_s0 + $0x126] sm:$0xff] }
 0x4bc   :  { %15092 = vst [vmem:[#allocation31_spill] sm:$0xff] %v13305_v44  ;;  %v13308_v16 = vadd.f32 %v3830_v4, %v15093_v30  ;;  %v8571_v34 = vpop.f32.mrb[243].mxu0  ;;  %v8457_v55 = vpop.f32.mrb[243].mxu1  ;;  %v13311_v53 = vadd.f32 %v4417_v22, %v12967_v17  ;;  %v5396_v17 = vld [vmem:[%s14765_s0 + $0x47] sm:$0xff] }
 0x4bd   :  { %v5397_v55 = vld [vmem:[%s14765_s0 + $0x4f] sm:$0xff]  ;;  %v15097_v22 = vld [vmem:[#allocation33_spill] sm:$0xff] }
 0x4be   :  { %15094 = vst [vmem:[#allocation15_spill] sm:$0xff] %v13311_v53  ;;  %8731 = vmatmul.mubr.msk.bf16.gmra.mrb[92].mxu1 %vm272_vm1, %v4796_v50  ;;  %8845 = vmatmul.mubr.msk.bf16.gmra.mrb[92].mxu0 %vm272_vm1, %v5474_v43  ;;  %v5475_v13 = vpack.c.bf16 %v5397_v55, %v5396_v17  ;;  %v15099_v55 = vld [vmem:[#allocation34_spill] sm:$0xff] }
 0x4bf   :  { %8734 = vmatprep.mubr.msk.bf16.mxu1 %vm9187_vm2, %v14801_v33  ;;  %8848 = vmatprep.mubr.msk.bf16.mxu0 %vm9187_vm2, %v14801_v33 }
 0x4c1   :  { %v3835_v58 = vpop.f32.mrb[244].mxu1  ;;  %v4422_v29 = vpop.f32.mrb[244].mxu0 }
 0x4c2   :  { %v13332_v47 = vadd.f32 %v3835_v58, %v15095_v56  ;;  %v8460_v35 = vpop.f32.mrb[245].mxu1  ;;  %v8574_v8 = vpop.f32.mrb[245].mxu0  ;;  %v13335_v50 = vadd.f32 %v4422_v29, %v12986_v23  ;;  %v4734_v23 = vld [vmem:[%s14765_s0 + $0x12e] sm:$0xff] }
 0x4c3   :  { %v3838_v43 = vpop.f32.mrb[246].mxu1  ;;  %v4425_v4 = vpop.f32.mrb[246].mxu0  ;;  %v4798_v35 = vpack.c.bf16 %v4734_v23, %v4733_v63  ;;  %v4735_v63 = vld [vmem:[%s14765_s0 + $0x136] sm:$0xff] }
 0x4c4   :  { %15096 = vst [vmem:[#allocation40_spill] sm:$0xff] %v13335_v50  ;;  %v13338_v30 = vadd.f32 %v3838_v43, %v15097_v22  ;;  %v8575_v34 = vpop.f32.mrb[247].mxu0  ;;  %v8461_v53 = vpop.f32.mrb[247].mxu1  ;;  %v13341_v44 = vadd.f32 %v4425_v4, %v12992_v0  ;;  %v5398_v0 = vld [vmem:[%s14765_s0 + $0x57] sm:$0xff] }
 0x4c5   :  { %v5399_v53 = vld [vmem:[%s14765_s0 + $0x5f] sm:$0xff]  ;;  %v15101_v4 = vld [vmem:[#allocation35_spill] sm:$0xff] }
 0x4c6   :  { %15098 = vst [vmem:[#allocation44_spill] sm:$0xff] %v13341_v44  ;;  %8735 = vmatmul.mubr.msk.bf16.gmra.mrb[96].mxu1 %vm272_vm1, %v4797_v42  ;;  %8849 = vmatmul.mubr.msk.bf16.gmra.mrb[96].mxu0 %vm272_vm1, %v5475_v13  ;;  %v5476_v8 = vpack.c.bf16 %v5399_v53, %v5398_v0  ;;  %v15103_v53 = vld [vmem:[#allocation36_spill] sm:$0xff] }
 0x4c7   :  { %8738 = vmatprep.mubr.msk.bf16.mxu1 %vm9187_vm2, %v14801_v33  ;;  %8852 = vmatprep.mubr.msk.bf16.mxu0 %vm9187_vm2, %v14801_v33 }
 0x4c9   :  { %v3843_v7 = vpop.f32.mrb[248].mxu1  ;;  %v4430_v17 = vpop.f32.mrb[248].mxu0 }
 0x4ca   :  { %v13362_v58 = vadd.f32 %v3843_v7, %v15099_v55  ;;  %v8464_v29 = vpop.f32.mrb[249].mxu1  ;;  %v8578_v56 = vpop.f32.mrb[249].mxu0  ;;  %v13365_v42 = vadd.f32 %v4430_v17, %v13011_v40  ;;  %v4736_v40 = vld [vmem:[%s14765_s0 + $0x13e] sm:$0xff] }
 0x4cb   :  { %v3846_v13 = vpop.f32.mrb[250].mxu1  ;;  %v4433_v43 = vpop.f32.mrb[250].mxu0  ;;  %v4799_v56 = vpack.c.bf16 %v4736_v40, %v4735_v63 }
 0x4cc   :  { %15100 = vst [vmem:[#allocation18_spill] sm:$0xff] %v13365_v42  ;;  %v13368_v22 = vadd.f32 %v3846_v13, %v15101_v4  ;;  %v8579_v34 = vpop.f32.mrb[251].mxu0  ;;  %v8465_v44 = vpop.f32.mrb[251].mxu1  ;;  %v13371_v50 = vadd.f32 %v4433_v43, %v13017_v21  ;;  %v5400_v21 = vld [vmem:[%s14765_s0 + $0x67] sm:$0xff]  ;;  %v15105_v43 = vld [vmem:[#allocation39_spill] sm:$0xff] }
 0x4cd   :  { %v5401_v44 = vld [vmem:[%s14765_s0 + $0x6f] sm:$0xff] }
 0x4ce   :  { %15102 = vst [vmem:[#allocation45_spill] sm:$0xff] %v13371_v50  ;;  %8739 = vmatmul.mubr.msk.bf16.gmra.mrb[100].mxu1 %vm272_vm1, %v4798_v35  ;;  %8853 = vmatmul.mubr.msk.bf16.gmra.mrb[100].mxu0 %vm272_vm1, %v5476_v8  ;;  %v5477_v35 = vpack.c.bf16 %v5401_v44, %v5400_v21  ;;  %v15107_v21 = vld [vmem:[#allocation37_spill] sm:$0xff] }
 0x4cf   :  { %8742 = vmatprep.mubr.msk.bf16.mxu1 %vm9187_vm2, %v14801_v33  ;;  %8856 = vmatprep.mubr.msk.bf16.mxu0 %vm9187_vm2, %v14801_v33 }
 0x4d1   :  { %v3851_v23 = vpop.f32.mrb[252].mxu1  ;;  %v4438_v0 = vpop.f32.mrb[252].mxu0 }
 0x4d2   :  { %v13392_v7 = vadd.f32 %v3851_v23, %v15103_v53  ;;  %v13395_v17 = vadd.f32 %v4438_v0, %v13036_v46  ;;  %v8468_v55 = vpop.f32.mrb[253].mxu1  ;;  %v8582_v29 = vpop.f32.mrb[253].mxu0  ;;  %v4737_v46 = vld [vmem:[%s14765_s0 + $0x146] sm:$0xff] }
 0x4d3   :  { %v3854_v8 = vpop.f32.mrb[254].mxu1  ;;  %v4441_v13 = vpop.f32.mrb[254].mxu0 }
 0x4d4   :  { %15104 = vst [vmem:[#allocation46_spill] sm:$0xff] %v13395_v17  ;;  %v13398_v4 = vadd.f32 %v3854_v8, %v15105_v43  ;;  %v13401_v34 = vadd.f32 %v4441_v13, %v13042_v10  ;;  %v8583_v50 = vpop.f32.mrb[255].mxu0  ;;  %v8469_v42 = vpop.f32.mrb[255].mxu1  ;;  %v4738_v10 = vld [vmem:[%s14765_s0 + $0x14e] sm:$0xff] }
 0x4d5   :  { %v5402_v50 = vld [vmem:[%s14765_s0 + $0x77] sm:$0xff]  ;;  %v5403_v42 = vld [vmem:[%s14765_s0 + $0x7f] sm:$0xff]  ;;  %v4800_v55 = vpack.c.bf16 %v4738_v10, %v4737_v46  ;;  %v15109_v8 = vld [vmem:[#allocation38_spill] sm:$0xff] }
 0x4d6   :  { %15106 = vst [vmem:[#allocation21_spill] sm:$0xff] %v13401_v34  ;;  %8743 = vmatmul.mubr.msk.bf16.gmra.mrb[104].mxu1 %vm272_vm1, %v4799_v56  ;;  %8857 = vmatmul.mubr.msk.bf16.gmra.mrb[104].mxu0 %vm272_vm1, %v5477_v35  ;;  %v5478_v29 = vpack.c.bf16 %v5403_v42, %v5402_v50  ;;  %v15111_v50 = vld [vmem:[#allocation5_spill] sm:$0xff] }
 0x4d7   :  { %8746 = vmatprep.mubr.msk.bf16.mxu1 %vm9187_vm2, %v14801_v33  ;;  %8860 = vmatprep.mubr.msk.bf16.mxu0 %vm9187_vm2, %v14801_v33 }
 0x4d9   :  { %v3859_v63 = vpop.f32.mrb[0].mxu1  ;;  %v4446_v40 = vpop.f32.mrb[0].mxu0 }
 0x4da   :  { %v13422_v44 = vadd.f32 %v3859_v63, %v15107_v21  ;;  %v13425_v23 = vadd.f32 %v4446_v40, %v13061_v48  ;;  %v8472_v0 = vpop.f32.mrb[1].mxu1  ;;  %v8586_v53 = vpop.f32.mrb[1].mxu0  ;;  %v4739_v48 = vld [vmem:[%s14765_s0 + $0x156] sm:$0xff] }
 0x4db   :  { %v3862_v56 = vpop.f32.mrb[2].mxu1  ;;  %v4449_v35 = vpop.f32.mrb[2].mxu0 }
 0x4dc   :  { %15108 = vst [vmem:[#allocation47_spill] sm:$0xff] %v13425_v23  ;;  %v13428_v13 = vadd.f32 %v3862_v56, %v15109_v8  ;;  %v13431_v43 = vadd.f32 %v4449_v35, %v13067_v49  ;;  %v8587_v34 = vpop.f32.mrb[3].mxu0  ;;  %v8473_v17 = vpop.f32.mrb[3].mxu1  ;;  %v4740_v49 = vld [vmem:[%s14765_s0 + $0x15e] sm:$0xff]  ;;  %v15113_v56 = vld [vmem:[#allocation6_spill] sm:$0xff] }
 0x4dd   :  { %v5404_v17 = vld [vmem:[%s14765_s0 + $0x87] sm:$0xff]  ;;  %v5405_v34 = vld [vmem:[%s14765_s0 + $0x8f] sm:$0xff]  ;;  %v4801_v0 = vpack.c.bf16 %v4740_v49, %v4739_v48 }
 0x4de   :  { %15110 = vst [vmem:[#allocation48_spill] sm:$0xff] %v13431_v43  ;;  %8747 = vmatmul.mubr.msk.bf16.gmra.mrb[108].mxu1 %vm272_vm1, %v4800_v55  ;;  %8861 = vmatmul.mubr.msk.bf16.gmra.mrb[108].mxu0 %vm272_vm1, %v5478_v29  ;;  %v5479_v53 = vpack.c.bf16 %v5405_v34, %v5404_v17  ;;  %v15115_v17 = vld [vmem:[#allocation7_spill] sm:$0xff] }
 0x4df   :  { %8750 = vmatprep.mubr.msk.bf16.mxu1 %vm9187_vm2, %v14801_v33  ;;  %8864 = vmatprep.mubr.msk.bf16.mxu0 %vm9187_vm2, %v14801_v33 }
 0x4e1   :  { %v3867_v46 = vpop.f32.mrb[4].mxu1  ;;  %v4454_v10 = vpop.f32.mrb[4].mxu0 }
 0x4e2   :  { %v13452_v42 = vadd.f32 %v3867_v46, %v15111_v50  ;;  %v13455_v63 = vadd.f32 %v4454_v10, %v13086_v61  ;;  %v8476_v40 = vpop.f32.mrb[5].mxu1  ;;  %v8590_v21 = vpop.f32.mrb[5].mxu0  ;;  %v4741_v61 = vld [vmem:[%s14765_s0 + $0x166] sm:$0xff] }
 0x4e3   :  { %v3870_v55 = vpop.f32.mrb[6].mxu1  ;;  %v4457_v29 = vpop.f32.mrb[6].mxu0 }
 0x4e4   :  { %15112 = vst [vmem:[#allocation23_spill] sm:$0xff] %v13455_v63  ;;  %v13458_v35 = vadd.f32 %v3870_v55, %v15113_v56  ;;  %v13461_v8 = vadd.f32 %v4457_v29, %v13092_v3  ;;  %v8591_v43 = vpop.f32.mrb[7].mxu0  ;;  %v8477_v23 = vpop.f32.mrb[7].mxu1  ;;  %v4742_v3 = vld [vmem:[%s14765_s0 + $0x16e] sm:$0xff]  ;;  %v15117_v55 = vld [vmem:[#allocation8_spill] sm:$0xff] }
 0x4e5   :  { %v5406_v23 = vld [vmem:[%s14765_s0 + $0x97] sm:$0xff]  ;;  %v5407_v43 = vld [vmem:[%s14765_s0 + $0x9f] sm:$0xff]  ;;  %v4802_v40 = vpack.c.bf16 %v4742_v3, %v4741_v61 }
 0x4e6   :  { %15114 = vst [vmem:[#allocation49_spill] sm:$0xff] %v13461_v8  ;;  %8751 = vmatmul.mubr.msk.bf16.gmra.mrb[112].mxu1 %vm272_vm1, %v4801_v0  ;;  %8865 = vmatmul.mubr.msk.bf16.gmra.mrb[112].mxu0 %vm272_vm1, %v5479_v53  ;;  %v5480_v21 = vpack.c.bf16 %v5407_v43, %v5406_v23  ;;  %v15119_v23 = vld [vmem:[#allocation9_spill] sm:$0xff] }
 0x4e7   :  { %8754 = vmatprep.mubr.msk.bf16.mxu1 %vm9187_vm2, %v14801_v33  ;;  %8868 = vmatprep.mubr.msk.bf16.mxu0 %vm9187_vm2, %v14801_v33 }
 0x4e9   :  { %v3875_v48 = vpop.f32.mrb[8].mxu1  ;;  %v4462_v49 = vpop.f32.mrb[8].mxu0 }
 0x4ea   :  { %v13482_v34 = vadd.f32 %v3875_v48, %v15115_v17  ;;  %v13485_v46 = vadd.f32 %v4462_v49, %v13111_v5  ;;  %v8480_v10 = vpop.f32.mrb[9].mxu1  ;;  %v8594_v50 = vpop.f32.mrb[9].mxu0  ;;  %v4743_v5 = vld [vmem:[%s14765_s0 + $0x176] sm:$0xff] }
 0x4eb   :  { %v3878_v0 = vpop.f32.mrb[10].mxu1  ;;  %v4465_v53 = vpop.f32.mrb[10].mxu0 }
 0x4ec   :  { %15116 = vst [vmem:[#allocation41_spill] sm:$0xff] %v13485_v46  ;;  %v13488_v29 = vadd.f32 %v3878_v0, %v15117_v55  ;;  %v13491_v56 = vadd.f32 %v4465_v53, %v13117_v28  ;;  %v8595_v8 = vpop.f32.mrb[11].mxu0  ;;  %v8481_v63 = vpop.f32.mrb[11].mxu1  ;;  %v4744_v28 = vld [vmem:[%s14765_s0 + $0x17e] sm:$0xff]  ;;  %v15121_v0 = vld [vmem:[#allocation10_spill] sm:$0xff] }
 0x4ed   :  { %v5408_v63 = vld [vmem:[%s14765_s0 + $0xa7] sm:$0xff]  ;;  %v5409_v8 = vld [vmem:[%s14765_s0 + $0xaf] sm:$0xff]  ;;  %v4803_v10 = vpack.c.bf16 %v4744_v28, %v4743_v5 }
 0x4ee   :  { %15118 = vst [vmem:[#allocation25_spill] sm:$0xff] %v13491_v56  ;;  %8755 = vmatmul.mubr.msk.bf16.gmra.mrb[116].mxu1 %vm272_vm1, %v4802_v40  ;;  %8869 = vmatmul.mubr.msk.bf16.gmra.mrb[116].mxu0 %vm272_vm1, %v5480_v21  ;;  %v5481_v50 = vpack.c.bf16 %v5409_v8, %v5408_v63  ;;  %v15123_v63 = vld [vmem:[#allocation11_spill] sm:$0xff] }
 0x4ef   :  { %8758 = vmatprep.mubr.msk.bf16.mxu1 %vm9187_vm2, %v14801_v33  ;;  %8872 = vmatprep.mubr.msk.bf16.mxu0 %vm9187_vm2, %v14801_v33 }
 0x4f1   :  { %v3883_v61 = vpop.f32.mrb[12].mxu1  ;;  %v4470_v3 = vpop.f32.mrb[12].mxu0 }
 0x4f2   :  { %v13512_v43 = vadd.f32 %v3883_v61, %v15119_v23  ;;  %v13515_v48 = vadd.f32 %v4470_v3, %v13136_v2  ;;  %v8484_v49 = vpop.f32.mrb[13].mxu1  ;;  %v8598_v17 = vpop.f32.mrb[13].mxu0  ;;  %v4745_v2 = vld [vmem:[%s14765_s0 + $0x186] sm:$0xff] }
 0x4f3   :  { %v3886_v40 = vpop.f32.mrb[14].mxu1  ;;  %v4473_v21 = vpop.f32.mrb[14].mxu0 }
 0x4f4   :  { %15120 = vst [vmem:[#allocation42_spill] sm:$0xff] %v13515_v48  ;;  %v13518_v53 = vadd.f32 %v3886_v40, %v15121_v0  ;;  %v13521_v55 = vadd.f32 %v4473_v21, %v13142_v32  ;;  %v8599_v56 = vpop.f32.mrb[15].mxu0  ;;  %v8485_v46 = vpop.f32.mrb[15].mxu1  ;;  %v4746_v32 = vld [vmem:[%s14765_s0 + $0x18e] sm:$0xff]  ;;  %v15125_v40 = vld [vmem:[#allocation12_spill] sm:$0xff] }
 0x4f5   :  { %v5410_v46 = vld [vmem:[%s14765_s0 + $0xb7] sm:$0xff]  ;;  %v5411_v56 = vld [vmem:[%s14765_s0 + $0xbf] sm:$0xff]  ;;  %v4804_v49 = vpack.c.bf16 %v4746_v32, %v4745_v2 }
 0x4f6   :  { %15122 = vst [vmem:[#allocation43_spill] sm:$0xff] %v13521_v55  ;;  %8759 = vmatmul.mubr.msk.bf16.gmra.mrb[120].mxu1 %vm272_vm1, %v4803_v10  ;;  %8873 = vmatmul.mubr.msk.bf16.gmra.mrb[120].mxu0 %vm272_vm1, %v5481_v50  ;;  %v5482_v17 = vpack.c.bf16 %v5411_v56, %v5410_v46  ;;  %v15127_v46 = vld [vmem:[#allocation13_spill] sm:$0xff] }
 0x4f7   :  { %8762 = vmatprep.mubr.msk.bf16.mxu1 %vm9187_vm2, %v14801_v33  ;;  %8876 = vmatprep.mubr.msk.bf16.mxu0 %vm9187_vm2, %v14801_v33 }
 0x4f9   :  { %v3891_v5 = vpop.f32.mrb[16].mxu1  ;;  %v4478_v28 = vpop.f32.mrb[16].mxu0 }
 0x4fa   :  { %v13542_v8 = vadd.f32 %v3891_v5, %v15123_v63  ;;  %v13545_v61 = vadd.f32 %v4478_v28, %v13161_v24  ;;  %v8488_v3 = vpop.f32.mrb[17].mxu1  ;;  %v8602_v23 = vpop.f32.mrb[17].mxu0  ;;  %v4747_v24 = vld [vmem:[%s14765_s0 + $0x196] sm:$0xff] }
 0x4fb   :  { %v3894_v10 = vpop.f32.mrb[18].mxu1  ;;  %v4481_v50 = vpop.f32.mrb[18].mxu0 }
 0x4fc   :  { %15124 = vst [vmem:[#allocation32_spill] sm:$0xff] %v13545_v61  ;;  %v13548_v21 = vadd.f32 %v3894_v10, %v15125_v40  ;;  %v13551_v0 = vadd.f32 %v4481_v50, %v13167_v54  ;;  %v8603_v55 = vpop.f32.mrb[19].mxu0  ;;  %v8489_v48 = vpop.f32.mrb[19].mxu1  ;;  %v4748_v54 = vld [vmem:[%s14765_s0 + $0x19e] sm:$0xff]  ;;  %v15129_v10 = vld [vmem:[#allocation14_spill] sm:$0xff] }
 0x4fd   :  { %v5412_v48 = vld [vmem:[%s14765_s0 + $0xc7] sm:$0xff]  ;;  %v5413_v55 = vld [vmem:[%s14765_s0 + $0xcf] sm:$0xff]  ;;  %v4805_v3 = vpack.c.bf16 %v4748_v54, %v4747_v24 }
 0x4fe   :  { %15126 = vst [vmem:[#allocation33_spill] sm:$0xff] %v13551_v0  ;;  %8763 = vmatmul.mubr.msk.bf16.gmra.mrb[124].mxu1 %vm272_vm1, %v4804_v49  ;;  %8877 = vmatmul.mubr.msk.bf16.gmra.mrb[124].mxu0 %vm272_vm1, %v5482_v17  ;;  %v5483_v23 = vpack.c.bf16 %v5413_v55, %v5412_v48  ;;  %v15131_v48 = vld [vmem:[#allocation16_spill] sm:$0xff] }
 0x4ff   :  { %8766 = vmatprep.mubr.msk.bf16.mxu1 %vm9187_vm2, %v14801_v33  ;;  %8880 = vmatprep.mubr.msk.bf16.mxu0 %vm9187_vm2, %v14801_v33 }
 0x501   :  { %v3899_v2 = vpop.f32.mrb[20].mxu1  ;;  %v4486_v32 = vpop.f32.mrb[20].mxu0 }
 0x502   :  { %v13572_v56 = vadd.f32 %v3899_v2, %v15127_v46  ;;  %v13575_v5 = vadd.f32 %v4486_v32, %v13186_v19  ;;  %v8492_v28 = vpop.f32.mrb[21].mxu1  ;;  %v8606_v63 = vpop.f32.mrb[21].mxu0  ;;  %v4749_v19 = vld [vmem:[%s14765_s0 + $0x1a6] sm:$0xff] }
 0x503   :  { %v3902_v49 = vpop.f32.mrb[22].mxu1  ;;  %v4489_v17 = vpop.f32.mrb[22].mxu0 }
 0x504   :  { %15128 = vst [vmem:[#allocation34_spill] sm:$0xff] %v13575_v5  ;;  %v13578_v50 = vadd.f32 %v3902_v49, %v15129_v10  ;;  %v13581_v40 = vadd.f32 %v4489_v17, %v13192_v9  ;;  %v8607_v0 = vpop.f32.mrb[23].mxu0  ;;  %v8493_v61 = vpop.f32.mrb[23].mxu1  ;;  %v4750_v9 = vld [vmem:[%s14765_s0 + $0x1ae] sm:$0xff]  ;;  %v15132_v49 = vld [vmem:[#allocation17_spill] sm:$0xff] }
 0x505   :  { %v5414_v61 = vld [vmem:[%s14765_s0 + $0xd7] sm:$0xff]  ;;  %v5415_v0 = vld [vmem:[%s14765_s0 + $0xdf] sm:$0xff]  ;;  %v4806_v28 = vpack.c.bf16 %v4750_v9, %v4749_v19 }
 0x506   :  { %15130 = vst [vmem:[#allocation35_spill] sm:$0xff] %v13581_v40  ;;  %8767 = vmatmul.mubr.msk.bf16.gmra.mrb[128].mxu1 %vm272_vm1, %v4805_v3  ;;  %8881 = vmatmul.mubr.msk.bf16.gmra.mrb[128].mxu0 %vm272_vm1, %v5483_v23  ;;  %v5484_v63 = vpack.c.bf16 %v5415_v0, %v5414_v61 }
 0x507   :  { %8770 = vmatprep.mubr.msk.bf16.mxu1 %vm9187_vm2, %v14801_v33  ;;  %8884 = vmatprep.mubr.msk.bf16.mxu0 %vm9187_vm2, %v14801_v33 }
 0x509   :  { %v3907_v24 = vpop.f32.mrb[24].mxu1  ;;  %v4494_v54 = vpop.f32.mrb[24].mxu0 }
 0x50a   :  { %v13602_v55 = vadd.f32 %v3907_v24, %v15131_v48  ;;  %v13605_v2 = vadd.f32 %v4494_v54, %v13214_v18  ;;  %v8496_v32 = vpop.f32.mrb[25].mxu1  ;;  %v8610_v46 = vpop.f32.mrb[25].mxu0  ;;  %v4751_v18 = vld [vmem:[%s14765_s0 + $0x1b6] sm:$0xff] }
 0x50b   :  { %v3910_v3 = vpop.f32.mrb[26].mxu1  ;;  %v4497_v23 = vpop.f32.mrb[26].mxu0 }
 0x50c   :  { %v13608_v17 = vadd.f32 %v3910_v3, %v15132_v49  ;;  %v13611_v10 = vadd.f32 %v4497_v23, %v13221_v38  ;;  %v8611_v40 = vpop.f32.mrb[27].mxu0  ;;  %v8497_v5 = vpop.f32.mrb[27].mxu1  ;;  %v4752_v38 = vld [vmem:[%s14765_s0 + $0x1be] sm:$0xff] }
 0x50d   :  { %v5416_v5 = vld [vmem:[%s14765_s0 + $0xe7] sm:$0xff]  ;;  %v5417_v40 = vld [vmem:[%s14765_s0 + $0xef] sm:$0xff]  ;;  %v4807_v48 = vpack.c.bf16 %v4752_v38, %v4751_v18 }
 0x50e   :  { %8771 = vmatmul.mubr.msk.bf16.gmra.mrb[132].mxu1 %vm272_vm1, %v4806_v28  ;;  %8885 = vmatmul.mubr.msk.bf16.gmra.mrb[132].mxu0 %vm272_vm1, %v5484_v63  ;;  %v5485_v32 = vpack.c.bf16 %v5417_v40, %v5416_v5 }
 0x50f   :  { %8774 = vmatprep.mubr.msk.bf16.mxu1 %vm9187_vm2, %v14801_v33  ;;  %8888 = vmatprep.mubr.msk.bf16.mxu0 %vm9187_vm2, %v14801_v33 }
 0x511   :  { %v3915_v19 = vpop.f32.mrb[28].mxu1  ;;  %v4502_v9 = vpop.f32.mrb[28].mxu0 }
 0x512   :  { %v13632_v61 = vadd.f32 %v3915_v19, %v12862_v41  ;;  %v13635_v0 = vadd.f32 %v4502_v9, %v13242_v1  ;;  %v8500_v24 = vpop.f32.mrb[29].mxu1  ;;  %v8614_v54 = vpop.f32.mrb[29].mxu0  ;;  %v4753_v41 = vld [vmem:[%s14765_s0 + $0x1c6] sm:$0xff]  ;;  %v5418_v1 = vld [vmem:[%s14765_s0 + $0xf7] sm:$0xff] }
 0x513   :  { %v3918_v46 = vpop.f32.mrb[30].mxu1  ;;  %v4505_v28 = vpop.f32.mrb[30].mxu0 }
 0x514   :  { %v13638_v63 = vadd.f32 %v3918_v46, %v12868_v52  ;;  %v13641_v3 = vadd.f32 %v4505_v28, %v13248_v12  ;;  %v8615_v23 = vpop.f32.mrb[31].mxu0  ;;  %v8501_v49 = vpop.f32.mrb[31].mxu1  ;;  %v4754_v52 = vld [vmem:[%s14765_s0 + $0x1ce] sm:$0xff]  ;;  %v5419_v12 = vld [vmem:[%s14765_s0 + $0xff] sm:$0xff] }
 0x515   :  { %v4808_v24 = vpack.c.bf16 %v4754_v52, %v4753_v41  ;;  %v5486_v54 = vpack.c.bf16 %v5419_v12, %v5418_v1  ;;  %v5421_v49 = vld [vmem:[%s14765_s0 + $0x10f] sm:$0xff] }
 0x516   :  { %8775 = vmatmul.mubr.msk.bf16.gmra.mrb[136].mxu1 %vm272_vm1, %v4807_v48  ;;  %8889 = vmatmul.mubr.msk.bf16.gmra.mrb[136].mxu0 %vm272_vm1, %v5485_v32 }
 0x517   :  { %8778 = vmatprep.mubr.msk.bf16.mxu1 %vm9187_vm2, %v14801_v33  ;;  %8892 = vmatprep.mubr.msk.bf16.mxu0 %vm9187_vm2, %v14801_v33 }
 0x519   :  { %v3923_v18 = vpop.f32.mrb[32].mxu1  ;;  %v4510_v38 = vpop.f32.mrb[32].mxu0 }
 0x51a   :  { %v13662_v5 = vadd.f32 %v3923_v18, %v12890_v26  ;;  %v13665_v40 = vadd.f32 %v4510_v38, %v13272_v36  ;;  %v8618_v19 = vpop.f32.mrb[33].mxu0  ;;  %v8504_v9 = vpop.f32.mrb[33].mxu1  ;;  %v4755_v26 = vld [vmem:[%s14765_s0 + $0x1d6] sm:$0xff]  ;;  %v4756_v36 = vld [vmem:[%s14765_s0 + $0x1de] sm:$0xff] }
 0x51b   :  { %v4513_v48 = vpop.f32.mrb[34].mxu0  ;;  %v3926_v32 = vpop.f32.mrb[34].mxu1  ;;  %v4809_v19 = vpack.c.bf16 %v4756_v36, %v4755_v26 }
 0x51c   :  { %v13668_v46 = vadd.f32 %v4513_v48, %v13278_v51  ;;  %v8619_v28 = vpop.f32.mrb[35].mxu0  ;;  %v8505_v23 = vpop.f32.mrb[35].mxu1  ;;  %v5420_v51 = vld [vmem:[%s14765_s0 + $0x107] sm:$0xff]  ;;  %v15134_v32 = vld [vmem:[#allocation19_spill] sm:$0xff] }
 0x51d   :  { %v5487_v9 = vpack.c.bf16 %v5421_v49, %v5420_v51 }
 0x51e   :  { %15133 = vst [vmem:[#allocation36_spill] sm:$0xff] %v13668_v46  ;;  %8779 = vmatmul.mubr.msk.bf16.gmra.mrb[140].mxu1 %vm272_vm1, %v4808_v24  ;;  %8893 = vmatmul.mubr.msk.bf16.gmra.mrb[140].mxu0 %vm272_vm1, %v5486_v54 }
 0x51f   :  { %8782 = vmatprep.mubr.msk.bf16.mxu1 %vm9187_vm2, %v14801_v33  ;;  %8896 = vmatprep.mubr.msk.bf16.mxu0 %vm9187_vm2, %v14801_v33 }
 0x521   :  { %v4518_v41 = vpop.f32.mrb[36].mxu0  ;;  %v4985_v52 = vpop.f32.mrb[36].mxu1 }
 0x522   :  { %v13689_v1 = vadd.f32 %v4518_v41, %v13302_v25  ;;  %v13692_v12 = vadd.f32 %v4985_v52, %v12914_v31  ;;  %v8622_v18 = vpop.f32.mrb[37].mxu0  ;;  %v8676_v38 = vpop.f32.mrb[37].mxu1  ;;  %v4757_v31 = vld [vmem:[%s14765_s0 + $0x1e6] sm:$0xff]  ;;  %v4758_v25 = vld [vmem:[%s14765_s0 + $0x1ee] sm:$0xff] }
 0x523   :  { %v4521_v24 = vpop.f32.mrb[38].mxu0  ;;  %v4988_v54 = vpop.f32.mrb[38].mxu1  ;;  %v4810_v18 = vpack.c.bf16 %v4758_v25, %v4757_v31 }
 0x524   :  { %v13695_v48 = vadd.f32 %v4521_v24, %v13308_v16  ;;  %v13698_v28 = vadd.f32 %v4988_v54, %v15134_v32  ;;  %v8623_v23 = vpop.f32.mrb[39].mxu0  ;;  %v8677_v46 = vpop.f32.mrb[39].mxu1  ;;  %v5422_v16 = vld [vmem:[%s14765_s0 + $0x117] sm:$0xff] }
 0x525   :  { %v5423_v46 = vld [vmem:[%s14765_s0 + $0x11f] sm:$0xff] }
 0x526   :  { %8783 = vmatmul.mubr.msk.bf16.gmra.mrb[144].mxu1 %vm272_vm1, %v4809_v19  ;;  %8897 = vmatmul.mubr.msk.bf16.gmra.mrb[144].mxu0 %vm272_vm1, %v5487_v9  ;;  %v5488_v38 = vpack.c.bf16 %v5423_v46, %v5422_v16 }
 0x527   :  { %8786 = vmatprep.mubr.msk.bf16.mxu1 %vm9187_vm2, %v14801_v33  ;;  %8900 = vmatprep.mubr.msk.bf16.mxu0 %vm9187_vm2, %v14801_v33 }
 0x529   :  { %v4526_v26 = vpop.f32.mrb[40].mxu0  ;;  %v4993_v36 = vpop.f32.mrb[40].mxu1 }
 0x52a   :  { %v13719_v51 = vadd.f32 %v4526_v26, %v13332_v47  ;;  %v13722_v49 = vadd.f32 %v4993_v36, %v12939_v27  ;;  %v8626_v41 = vpop.f32.mrb[41].mxu0  ;;  %v8680_v52 = vpop.f32.mrb[41].mxu1  ;;  %v4759_v27 = vld [vmem:[%s14765_s0 + $0x1f6] sm:$0xff]  ;;  %v5424_v47 = vld [vmem:[%s14765_s0 + $0x127] sm:$0xff] }
 0x52b   :  { %v4529_v19 = vpop.f32.mrb[42].mxu0  ;;  %v4996_v9 = vpop.f32.mrb[42].mxu1 }
 0x52c   :  { %v13725_v24 = vadd.f32 %v4529_v19, %v13338_v30  ;;  %v13728_v54 = vadd.f32 %v4996_v9, %v12945_v6  ;;  %v8627_v32 = vpop.f32.mrb[43].mxu0  ;;  %v8681_v23 = vpop.f32.mrb[43].mxu1  ;;  %v4760_v6 = vld [vmem:[%s14765_s0 + $0x1fe] sm:$0xff]  ;;  %v5425_v30 = vld [vmem:[%s14765_s0 + $0x12f] sm:$0xff] }
 0x52d   :  { %v4811_v41 = vpack.c.bf16 %v4760_v6, %v4759_v27  ;;  %v5489_v52 = vpack.c.bf16 %v5425_v30, %v5424_v47 }
 0x52e   :  { %8787 = vmatmul.mubr.msk.bf16.gmra.mrb[148].mxu1 %vm272_vm1, %v4810_v18  ;;  %8901 = vmatmul.mubr.msk.bf16.gmra.mrb[148].mxu0 %vm272_vm1, %v5488_v38 }
 0x52f   :  { %8790 = vmatprep.mubr.msk.bf16.mxu1 %vm9187_vm2, %v14801_v33  ;;  %8904 = vmatprep.mubr.msk.bf16.mxu0 %vm9187_vm2, %v14801_v33 }
 0x531   :  { %v4534_v31 = vpop.f32.mrb[44].mxu0  ;;  %v5001_v25 = vpop.f32.mrb[44].mxu1 }
 0x532   :  { %v13749_v16 = vadd.f32 %v4534_v31, %v13362_v58  ;;  %v13752_v46 = vadd.f32 %v5001_v25, %v12964_v45  ;;  %v8630_v26 = vpop.f32.mrb[45].mxu0  ;;  %v8684_v36 = vpop.f32.mrb[45].mxu1  ;;  %v4761_v45 = vld [vmem:[%s14765_s0 + $0x206] sm:$0xff]  ;;  %v5426_v58 = vld [vmem:[%s14765_s0 + $0x137] sm:$0xff] }
 0x533   :  { %v4537_v18 = vpop.f32.mrb[46].mxu0  ;;  %v5004_v38 = vpop.f32.mrb[46].mxu1 }
 0x534   :  { %v13755_v19 = vadd.f32 %v4537_v18, %v13368_v22  ;;  %v13758_v9 = vadd.f32 %v5004_v38, %v12970_v60  ;;  %v8631_v32 = vpop.f32.mrb[47].mxu0  ;;  %v8685_v23 = vpop.f32.mrb[47].mxu1  ;;  %v4762_v60 = vld [vmem:[%s14765_s0 + $0x20e] sm:$0xff]  ;;  %v5427_v22 = vld [vmem:[%s14765_s0 + $0x13f] sm:$0xff] }
 0x535   :  { %v4812_v26 = vpack.c.bf16 %v4762_v60, %v4761_v45  ;;  %v5490_v36 = vpack.c.bf16 %v5427_v22, %v5426_v58 }
 0x536   :  { %8791 = vmatmul.mubr.msk.bf16.gmra.mrb[152].mxu1 %vm272_vm1, %v4811_v41  ;;  %8905 = vmatmul.mubr.msk.bf16.gmra.mrb[152].mxu0 %vm272_vm1, %v5489_v52 }
 0x537   :  { %8794 = vmatprep.mubr.msk.bf16.mxu1 %vm9187_vm2, %v14801_v33  ;;  %8908 = vmatprep.mubr.msk.bf16.mxu0 %vm9187_vm2, %v14801_v33 }
 0x539   :  { %v4542_v27 = vpop.f32.mrb[48].mxu0  ;;  %v5009_v6 = vpop.f32.mrb[48].mxu1 }
 0x53a   :  { %v13779_v47 = vadd.f32 %v4542_v27, %v13392_v7  ;;  %v13782_v30 = vadd.f32 %v5009_v6, %v12989_v37  ;;  %v8634_v31 = vpop.f32.mrb[49].mxu0  ;;  %v8688_v25 = vpop.f32.mrb[49].mxu1  ;;  %v4763_v37 = vld [vmem:[%s14765_s0 + $0x216] sm:$0xff]  ;;  %v5428_v7 = vld [vmem:[%s14765_s0 + $0x147] sm:$0xff] }
 0x53b   :  { %v4545_v41 = vpop.f32.mrb[50].mxu0  ;;  %v5012_v52 = vpop.f32.mrb[50].mxu1 }
 0x53c   :  { %v13785_v18 = vadd.f32 %v4545_v41, %v13398_v4  ;;  %v13788_v38 = vadd.f32 %v5012_v52, %v12995_v62  ;;  %v8635_v32 = vpop.f32.mrb[51].mxu0  ;;  %v8689_v23 = vpop.f32.mrb[51].mxu1  ;;  %v4764_v62 = vld [vmem:[%s14765_s0 + $0x21e] sm:$0xff]  ;;  %v5429_v4 = vld [vmem:[%s14765_s0 + $0x14f] sm:$0xff] }
 0x53d   :  { %v4813_v31 = vpack.c.bf16 %v4764_v62, %v4763_v37  ;;  %v5491_v25 = vpack.c.bf16 %v5429_v4, %v5428_v7  ;;  %v15138_v52 = vld [vmem:[#allocation20_spill] sm:$0xff] }
 0x53e   :  { %15135 = vst [vmem:[#allocation39_spill] sm:$0xff] %v13785_v18  ;;  %8795 = vmatmul.mubr.msk.bf16.gmra.mrb[156].mxu1 %vm272_vm1, %v4812_v26  ;;  %8909 = vmatmul.mubr.msk.bf16.gmra.mrb[156].mxu0 %vm272_vm1, %v5490_v36 }
 0x53f   :  { %8798 = vmatprep.mubr.msk.bf16.mxu1 %vm9187_vm2, %v14801_v33  ;;  %8912 = vmatprep.mubr.msk.bf16.mxu0 %vm9187_vm2, %v14801_v33 }
 0x541   :  { %v4550_v45 = vpop.f32.mrb[52].mxu0  ;;  %v5017_v60 = vpop.f32.mrb[52].mxu1 }
 0x542   :  { %v13809_v58 = vadd.f32 %v4550_v45, %v13422_v44  ;;  %v13812_v22 = vadd.f32 %v5017_v60, %v13014_v11  ;;  %v8638_v27 = vpop.f32.mrb[53].mxu0  ;;  %v8692_v6 = vpop.f32.mrb[53].mxu1  ;;  %v4765_v11 = vld [vmem:[%s14765_s0 + $0x226] sm:$0xff]  ;;  %v4766_v44 = vld [vmem:[%s14765_s0 + $0x22e] sm:$0xff] }
 0x543   :  { %v4553_v26 = vpop.f32.mrb[54].mxu0  ;;  %v5020_v36 = vpop.f32.mrb[54].mxu1  ;;  %v4814_v27 = vpack.c.bf16 %v4766_v44, %v4765_v11 }
 0x544   :  { %15136 = vst [vmem:[#allocation37_spill] sm:$0xff] %v13809_v58  ;;  %v13815_v41 = vadd.f32 %v4553_v26, %v13428_v13  ;;  %v13818_v32 = vadd.f32 %v5020_v36, %v15138_v52  ;;  %v8639_v23 = vpop.f32.mrb[55].mxu0  ;;  %v8693_v18 = vpop.f32.mrb[55].mxu1  ;;  %v5430_v13 = vld [vmem:[%s14765_s0 + $0x157] sm:$0xff]  ;;  %v15141_v36 = vld [vmem:[#allocation50_spill] sm:$0xff] }
 0x545   :  { %v5431_v18 = vld [vmem:[%s14765_s0 + $0x15f] sm:$0xff] }
 0x546   :  { %15137 = vst [vmem:[#allocation38_spill] sm:$0xff] %v13815_v41  ;;  %8799 = vmatmul.mubr.msk.bf16.gmra.mrb[160].mxu1 %vm272_vm1, %v4813_v31  ;;  %8913 = vmatmul.mubr.msk.bf16.gmra.mrb[160].mxu0 %vm272_vm1, %v5491_v25  ;;  %v5492_v6 = vpack.c.bf16 %v5431_v18, %v5430_v13 }
 0x547   :  { %8802 = vmatprep.mubr.msk.bf16.mxu1 %vm9187_vm2, %v14801_v33  ;;  %8916 = vmatprep.mubr.msk.bf16.mxu0 %vm9187_vm2, %v14801_v33 }
 0x549   :  { %v4558_v37 = vpop.f32.mrb[56].mxu0  ;;  %v5025_v62 = vpop.f32.mrb[56].mxu1 }
 0x54a   :  { %v13839_v7 = vadd.f32 %v4558_v37, %v13452_v42  ;;  %v13842_v4 = vadd.f32 %v5025_v62, %v13039_v39  ;;  %v8642_v45 = vpop.f32.mrb[57].mxu0  ;;  %v8696_v60 = vpop.f32.mrb[57].mxu1  ;;  %v4767_v39 = vld [vmem:[%s14765_s0 + $0x236] sm:$0xff]  ;;  %v4768_v42 = vld [vmem:[%s14765_s0 + $0x23e] sm:$0xff] }
 0x54b   :  { %v4561_v31 = vpop.f32.mrb[58].mxu0  ;;  %v5028_v25 = vpop.f32.mrb[58].mxu1  ;;  %v4815_v45 = vpack.c.bf16 %v4768_v42, %v4767_v39 }
 0x54c   :  { %15139 = vst [vmem:[#allocation5_spill] sm:$0xff] %v13839_v7  ;;  %v13845_v26 = vadd.f32 %v4561_v31, %v13458_v35  ;;  %v13848_v52 = vadd.f32 %v5028_v25, %v15141_v36  ;;  %v8643_v23 = vpop.f32.mrb[59].mxu0  ;;  %v8697_v41 = vpop.f32.mrb[59].mxu1  ;;  %v5432_v35 = vld [vmem:[%s14765_s0 + $0x167] sm:$0xff] }
 0x54d   :  { %v5433_v41 = vld [vmem:[%s14765_s0 + $0x16f] sm:$0xff] }
 0x54e   :  { %15140 = vst [vmem:[#allocation6_spill] sm:$0xff] %v13845_v26  ;;  %8803 = vmatmul.mubr.msk.bf16.gmra.mrb[164].mxu1 %vm272_vm1, %v4814_v27  ;;  %8917 = vmatmul.mubr.msk.bf16.gmra.mrb[164].mxu0 %vm272_vm1, %v5492_v6  ;;  %v5493_v60 = vpack.c.bf16 %v5433_v41, %v5432_v35  ;;  %v15144_v25 = vld [vmem:[#allocation22_spill] sm:$0xff] }
 0x54f   :  { %8806 = vmatprep.mubr.msk.bf16.mxu1 %vm9187_vm2, %v14801_v33  ;;  %8920 = vmatprep.mubr.msk.bf16.mxu0 %vm9187_vm2, %v14801_v33 }
 0x551   :  { %v4566_v11 = vpop.f32.mrb[60].mxu0  ;;  %v5033_v44 = vpop.f32.mrb[60].mxu1 }
 0x552   :  { %v13869_v13 = vadd.f32 %v4566_v11, %v13482_v34  ;;  %v13872_v18 = vadd.f32 %v5033_v44, %v13064_v15  ;;  %v8646_v37 = vpop.f32.mrb[61].mxu0  ;;  %v8700_v62 = vpop.f32.mrb[61].mxu1  ;;  %v4769_v15 = vld [vmem:[%s14765_s0 + $0x246] sm:$0xff]  ;;  %v4770_v34 = vld [vmem:[%s14765_s0 + $0x24e] sm:$0xff] }
 0x553   :  { %v4569_v27 = vpop.f32.mrb[62].mxu0  ;;  %v5036_v6 = vpop.f32.mrb[62].mxu1  ;;  %v4816_v37 = vpack.c.bf16 %v4770_v34, %v4769_v15 }
 0x554   :  { %15142 = vst [vmem:[#allocation7_spill] sm:$0xff] %v13869_v13  ;;  %v13875_v31 = vadd.f32 %v4569_v27, %v13488_v29  ;;  %v13878_v36 = vadd.f32 %v5036_v6, %v15144_v25  ;;  %v8647_v23 = vpop.f32.mrb[63].mxu0  ;;  %v8701_v26 = vpop.f32.mrb[63].mxu1  ;;  %v5434_v29 = vld [vmem:[%s14765_s0 + $0x177] sm:$0xff] }
 0x555   :  { %v5435_v26 = vld [vmem:[%s14765_s0 + $0x17f] sm:$0xff]  ;;  %v15147_v6 = vld [vmem:[#allocation51_spill] sm:$0xff] }
 0x556   :  { %15143 = vst [vmem:[#allocation8_spill] sm:$0xff] %v13875_v31  ;;  %8807 = vmatmul.mubr.msk.bf16.gmra.mrb[168].mxu1 %vm272_vm1, %v4815_v45  ;;  %8921 = vmatmul.mubr.msk.bf16.gmra.mrb[168].mxu0 %vm272_vm1, %v5493_v60  ;;  %v5494_v62 = vpack.c.bf16 %v5435_v26, %v5434_v29 }
 0x557   :  { %8810 = vmatprep.mubr.msk.bf16.mxu1 %vm9187_vm2, %v14801_v33  ;;  %8924 = vmatprep.mubr.msk.bf16.mxu0 %vm9187_vm2, %v14801_v33 }
 0x559   :  { %v4574_v39 = vpop.f32.mrb[64].mxu0  ;;  %v5041_v42 = vpop.f32.mrb[64].mxu1 }
 0x55a   :  { %v13899_v35 = vadd.f32 %v4574_v39, %v13512_v43  ;;  %v13902_v41 = vadd.f32 %v5041_v42, %v13089_v20  ;;  %v8650_v11 = vpop.f32.mrb[65].mxu0  ;;  %v8704_v44 = vpop.f32.mrb[65].mxu1  ;;  %v4771_v20 = vld [vmem:[%s14765_s0 + $0x256] sm:$0xff]  ;;  %v4772_v43 = vld [vmem:[%s14765_s0 + $0x25e] sm:$0xff] }
 0x55b   :  { %v4577_v45 = vpop.f32.mrb[66].mxu0  ;;  %v5044_v60 = vpop.f32.mrb[66].mxu1  ;;  %v4817_v11 = vpack.c.bf16 %v4772_v43, %v4771_v20 }
 0x55c   :  { %15145 = vst [vmem:[#allocation9_spill] sm:$0xff] %v13899_v35  ;;  %v13905_v27 = vadd.f32 %v4577_v45, %v13518_v53  ;;  %v13908_v25 = vadd.f32 %v5044_v60, %v15147_v6  ;;  %v8651_v23 = vpop.f32.mrb[67].mxu0  ;;  %v8705_v31 = vpop.f32.mrb[67].mxu1  ;;  %v5436_v53 = vld [vmem:[%s14765_s0 + $0x187] sm:$0xff]  ;;  %v15150_v60 = vld [vmem:[#allocation24_spill] sm:$0xff] }
 0x55d   :  { %v5437_v31 = vld [vmem:[%s14765_s0 + $0x18f] sm:$0xff] }
 0x55e   :  { %15146 = vst [vmem:[#allocation10_spill] sm:$0xff] %v13905_v27  ;;  %8811 = vmatmul.mubr.msk.bf16.gmra.mrb[172].mxu1 %vm272_vm1, %v4816_v37  ;;  %8925 = vmatmul.mubr.msk.bf16.gmra.mrb[172].mxu0 %vm272_vm1, %v5494_v62  ;;  %v5495_v44 = vpack.c.bf16 %v5437_v31, %v5436_v53 }
 0x55f   :  { %8814 = vmatprep.mubr.msk.bf16.mxu1 %vm9187_vm2, %v14801_v33  ;;  %8928 = vmatprep.mubr.msk.bf16.mxu0 %vm9187_vm2, %v14801_v33 }
 0x561   :  { %v4582_v15 = vpop.f32.mrb[68].mxu0  ;;  %v5049_v34 = vpop.f32.mrb[68].mxu1 }
 0x562   :  { %v13929_v29 = vadd.f32 %v4582_v15, %v13542_v8  ;;  %v13932_v26 = vadd.f32 %v5049_v34, %v13114_v57  ;;  %v8654_v39 = vpop.f32.mrb[69].mxu0  ;;  %v8708_v42 = vpop.f32.mrb[69].mxu1  ;;  %v4773_v57 = vld [vmem:[%s14765_s0 + $0x266] sm:$0xff]  ;;  %v4774_v8 = vld [vmem:[%s14765_s0 + $0x26e] sm:$0xff] }
 0x563   :  { %v4585_v37 = vpop.f32.mrb[70].mxu0  ;;  %v5052_v62 = vpop.f32.mrb[70].mxu1  ;;  %v4818_v39 = vpack.c.bf16 %v4774_v8, %v4773_v57 }
 0x564   :  { %15148 = vst [vmem:[#allocation11_spill] sm:$0xff] %v13929_v29  ;;  %v13935_v45 = vadd.f32 %v4585_v37, %v13548_v21  ;;  %v13938_v6 = vadd.f32 %v5052_v62, %v15150_v60  ;;  %v8655_v23 = vpop.f32.mrb[71].mxu0  ;;  %v8709_v27 = vpop.f32.mrb[71].mxu1  ;;  %v5438_v21 = vld [vmem:[%s14765_s0 + $0x197] sm:$0xff] }
 0x565   :  { %v5439_v27 = vld [vmem:[%s14765_s0 + $0x19f] sm:$0xff] }
 0x566   :  { %15149 = vst [vmem:[#allocation12_spill] sm:$0xff] %v13935_v45  ;;  %8815 = vmatmul.mubr.msk.bf16.gmra.mrb[176].mxu1 %vm272_vm1, %v4817_v11  ;;  %8929 = vmatmul.mubr.msk.bf16.gmra.mrb[176].mxu0 %vm272_vm1, %v5495_v44  ;;  %v5496_v42 = vpack.c.bf16 %v5439_v27, %v5438_v21  ;;  %v15153_v62 = vld [vmem:[#allocation52_spill] sm:$0xff]  ;;  %v15155_v27 = vld [vmem:[#allocation26_spill] sm:$0xff] }
 0x567   :  { %8818 = vmatprep.mubr.msk.bf16.mxu1 %vm9187_vm2, %v14801_v33  ;;  %8932 = vmatprep.mubr.msk.bf16.mxu0 %vm9187_vm2, %v14801_v33 }
 0x569   :  { %v4590_v20 = vpop.f32.mrb[72].mxu0  ;;  %v5057_v43 = vpop.f32.mrb[72].mxu1 }
 0x56a   :  { %v13959_v53 = vadd.f32 %v4590_v20, %v13572_v56  ;;  %v13962_v31 = vadd.f32 %v5057_v43, %v13139_v59  ;;  %v8658_v15 = vpop.f32.mrb[73].mxu0  ;;  %v8712_v34 = vpop.f32.mrb[73].mxu1  ;;  %v4775_v59 = vld [vmem:[%s14765_s0 + $0x276] sm:$0xff]  ;;  %v4776_v56 = vld [vmem:[%s14765_s0 + $0x27e] sm:$0xff] }
 0x56b   :  { %v4593_v11 = vpop.f32.mrb[74].mxu0  ;;  %v5060_v44 = vpop.f32.mrb[74].mxu1  ;;  %v4819_v34 = vpack.c.bf16 %v4776_v56, %v4775_v59 }
 0x56c   :  { %15151 = vst [vmem:[#allocation13_spill] sm:$0xff] %v13959_v53  ;;  %v13965_v37 = vadd.f32 %v4593_v11, %v13578_v50  ;;  %v13968_v60 = vadd.f32 %v5060_v44, %v15153_v62  ;;  %v8659_v23 = vpop.f32.mrb[75].mxu0  ;;  %v8713_v45 = vpop.f32.mrb[75].mxu1  ;;  %v5440_v50 = vld [vmem:[%s14765_s0 + $0x1a7] sm:$0xff]  ;;  %v15157_v62 = vld [vmem:[#allocation27_spill] sm:$0xff] }
 0x56d   :  { %v5441_v45 = vld [vmem:[%s14765_s0 + $0x1af] sm:$0xff] }
 0x56e   :  { %15152 = vst [vmem:[#allocation14_spill] sm:$0xff] %v13965_v37  ;;  %8819 = vmatmul.mubr.msk.bf16.gmra.mrb[180].mxu1 %vm272_vm1, %v4818_v39  ;;  %8933 = vmatmul.mubr.msk.bf16.gmra.mrb[180].mxu0 %vm272_vm1, %v5496_v42  ;;  %v5497_v39 = vpack.c.bf16 %v5441_v45, %v5440_v50  ;;  %v15159_v45 = vld [vmem:[#allocation28_spill] sm:$0xff] }
 0x56f   :  { %8822 = vmatprep.mubr.msk.bf16.mxu1 %vm9187_vm2, %v14801_v33  ;;  %8936 = vmatprep.mubr.msk.bf16.mxu0 %vm9187_vm2, %v14801_v33 }
 0x571   :  { %v4598_v57 = vpop.f32.mrb[76].mxu0  ;;  %v5065_v8 = vpop.f32.mrb[76].mxu1 }
 0x572   :  { %v13989_v21 = vadd.f32 %v4598_v57, %v13602_v55  ;;  %v13992_v20 = vadd.f32 %v5065_v8, %v15155_v27  ;;  %v8662_v43 = vpop.f32.mrb[77].mxu0  ;;  %v8716_v15 = vpop.f32.mrb[77].mxu1  ;;  %v4777_v55 = vld [vmem:[%s14765_s0 + $0x286] sm:$0xff] }
 0x573   :  { %v4601_v42 = vpop.f32.mrb[78].mxu0  ;;  %v5068_v11 = vpop.f32.mrb[78].mxu1 }
 0x574   :  { %15154 = vst [vmem:[#allocation16_spill] sm:$0xff] %v13989_v21  ;;  %v13995_v44 = vadd.f32 %v4601_v42, %v13608_v17  ;;  %v13998_v23 = vadd.f32 %v5068_v11, %v15157_v62  ;;  %v8663_v37 = vpop.f32.mrb[79].mxu0  ;;  %v8717_v53 = vpop.f32.mrb[79].mxu1  ;;  %v4778_v17 = vld [vmem:[%s14765_s0 + $0x28e] sm:$0xff]  ;;  %v15161_v11 = vld [vmem:[#allocation29_spill] sm:$0xff] }
 0x575   :  { %v5442_v53 = vld [vmem:[%s14765_s0 + $0x1b7] sm:$0xff]  ;;  %v5443_v37 = vld [vmem:[%s14765_s0 + $0x1bf] sm:$0xff]  ;;  %v4820_v43 = vpack.c.bf16 %v4778_v17, %v4777_v55 }
 0x576   :  { %15156 = vst [vmem:[#allocation17_spill] sm:$0xff] %v13995_v44  ;;  %8823 = vmatmul.mubr.msk.bf16.gmra.mrb[184].mxu1 %vm272_vm1, %v4819_v34  ;;  %8937 = vmatmul.mubr.msk.bf16.gmra.mrb[184].mxu0 %vm272_vm1, %v5497_v39  ;;  %v5498_v15 = vpack.c.bf16 %v5443_v37, %v5442_v53 }
 0x577   :  { %8826 = vmatprep.mubr.msk.bf16.mxu1 %vm9187_vm2, %v14801_v33  ;;  %8940 = vmatprep.mubr.msk.bf16.mxu0 %vm9187_vm2, %v14801_v33 }
 0x579   :  { %v4606_v59 = vpop.f32.mrb[80].mxu0  ;;  %v5073_v56 = vpop.f32.mrb[80].mxu1 }
 0x57a   :  { %v14019_v50 = vadd.f32 %v4606_v59, %v13632_v61  ;;  %v14022_v57 = vadd.f32 %v5073_v56, %v15159_v45  ;;  %v8666_v8 = vpop.f32.mrb[81].mxu0  ;;  %v8720_v27 = vpop.f32.mrb[81].mxu1  ;;  %v4779_v61 = vld [vmem:[%s14765_s0 + $0x296] sm:$0xff] }
 0x57b   :  { %v4609_v34 = vpop.f32.mrb[82].mxu0  ;;  %v5076_v39 = vpop.f32.mrb[82].mxu1 }
 0x57c   :  { %15158 = vst [vmem:[#allocation19_spill] sm:$0xff] %v14019_v50  ;;  %v14025_v42 = vadd.f32 %v4609_v34, %v13638_v63  ;;  %v14028_v62 = vadd.f32 %v5076_v39, %v15161_v11  ;;  %v8667_v44 = vpop.f32.mrb[83].mxu0  ;;  %v8721_v21 = vpop.f32.mrb[83].mxu1  ;;  %v4780_v63 = vld [vmem:[%s14765_s0 + $0x29e] sm:$0xff] }
 0x57d   :  { %v5444_v21 = vld [vmem:[%s14765_s0 + $0x1c7] sm:$0xff]  ;;  %v5445_v44 = vld [vmem:[%s14765_s0 + $0x1cf] sm:$0xff]  ;;  %v4821_v45 = vpack.c.bf16 %v4780_v63, %v4779_v61  ;;  %v5447_v61 = vld [vmem:[%s14765_s0 + $0x1df] sm:$0xff] }
 0x57e   :  { %15160 = vst [vmem:[#allocation20_spill] sm:$0xff] %v14025_v42  ;;  %8827 = vmatmul.mubr.msk.bf16.gmra.mrb[188].mxu1 %vm272_vm1, %v4820_v43  ;;  %8941 = vmatmul.mubr.msk.bf16.gmra.mrb[188].mxu0 %vm272_vm1, %v5498_v15  ;;  %v5499_v8 = vpack.c.bf16 %v5445_v44, %v5444_v21  ;;  %v15163_v15 = vld [vmem:[#allocation53_spill] sm:$0xff]  ;;  %v14075_v44 = vld [vmem:[%s14767_s2] ss:$0 sm:$0xff] }
 0x57f   :  { %8830 = vmatprep.mubr.msk.bf16.mxu1 %vm9187_vm2, %v14801_v33  ;;  %8944 = vmatprep.mubr.msk.bf16.mxu0 %vm9187_vm2, %v14801_v33 }
 0x581   :  { %v4614_v55 = vpop.f32.mrb[84].mxu0  ;;  %v5081_v17 = vpop.f32.mrb[84].mxu1 }
 0x582   :  { %v14049_v53 = vadd.f32 %v4614_v55, %v13662_v5  ;;  %v14052_v37 = vadd.f32 %v5081_v17, %v13218_v14  ;;  %v8670_v59 = vpop.f32.mrb[85].mxu0  ;;  %v8724_v56 = vpop.f32.mrb[85].mxu1  ;;  %v4781_v14 = vld [vmem:[%s14765_s0 + $0x2a6] sm:$0xff]  ;;  %v5446_v5 = vld [vmem:[%s14765_s0 + $0x1d7] sm:$0xff] }
 0x583   :  { %v4617_v27 = vpop.f32.mrb[86].mxu0  ;;  %v5084_v43 = vpop.f32.mrb[86].mxu1  ;;  %v15164_v55 = vld [vmem:[#allocation54_spill] sm:$0xff] }
 0x584   :  { %15162 = vst [vmem:[#allocation50_spill] sm:$0xff] %v14049_v53  ;;  %v14055_v34 = vadd.f32 %v5084_v43, %v15163_v15  ;;  %v8671_v39 = vpop.f32.mrb[87].mxu0  ;;  %v8725_v11 = vpop.f32.mrb[87].mxu1  ;;  %v5500_v27 = vpack.c.bf16 %v5447_v61, %v5446_v5  ;;  %v15166_v61 = vld [vmem:[#allocation56_spill] sm:$0xff] }
 0x585   :  { %v15165_v11 = vld [vmem:[#allocation55_spill] sm:$0xff] }
 0x586   :  { %8831 = vmatmul.mubr.msk.bf16.gmra.mrb[192].mxu1 %vm272_vm1, %v4821_v45  ;;  %8945 = vmatmul.mubr.msk.bf16.gmra.mrb[192].mxu0 %vm272_vm1, %v5499_v8  ;;  %v4822_v8 = vpack.c.bf16 %v4781_v14, %v4781_v14  ;;  %v5449_v14 = vld [vmem:[%s14765_s0 + $0x1ef] sm:$0xff] }
 0x587   :  { %8834 = vmatprep.mubr.msk.bf16.mxu1 %vm9187_vm2, %v14801_v33  ;;  %8948 = vmatprep.mubr.msk.bf16.mxu0 %vm9187_vm2, %v14801_v33 }
 0x589   :  { %v5089_v63 = vpop.f32.mrb[88].mxu1  ;;  %v5676_v21 = vpop.f32.mrb[88].mxu0 }
 0x58a   :  { %v14078_v17 = vadd.f32 %v5089_v63, %v15164_v55  ;;  %v6002_v59 = vadd.f32 %v5676_v21, %v13692_v12  ;;  %v8728_v56 = vpop.f32.mrb[89].mxu1  ;;  %v8842_v45 = vpop.f32.mrb[89].mxu0  ;;  %v5448_v12 = vld [vmem:[%s14765_s0 + $0x1e7] sm:$0xff] }
 0x58b   :  { %v5092_v43 = vpop.f32.mrb[90].mxu1  ;;  %v5679_v15 = vpop.f32.mrb[90].mxu0  ;;  %v5501_v45 = vpack.c.bf16 %v5449_v14, %v5448_v12  ;;  %v5451_v12 = vld [vmem:[%s14765_s0 + $0x1ff] sm:$0xff] }
 0x58c   :  { %v6090_v39 = vadd.f32 %v14075_v44, %v6002_v59  ;;  %v14083_v53 = vadd.f32 %v5092_v43, %v15165_v11  ;;  %v6003_v42 = vadd.f32 %v5679_v15, %v13698_v28  ;;  %v8843_v50 = vpop.f32.mrb[91].mxu0  ;;  %v8729_v29 = vpop.f32.mrb[91].mxu1  ;;  %v15167_v15 = vld [vmem:[#allocation30_spill] sm:$0xff] }
 0x58e   :  { %v6091_v63 = vadd.f32 %v14075_v44, %v6003_v42  ;;  %8835 = vmatmul.mubr.msk.bf16.gmra.mrb[196].mxu1 %vm272_vm1, %v4822_v8  ;;  %8949 = vmatmul.mubr.msk.bf16.gmra.mrb[196].mxu0 %vm272_vm1, %v5500_v27  ;;  %v6171_v28 = vmax.f32 %v6090_v39, 0.0 }
 0x58f   :  { %8952 = vmatprep.mubr.msk.bf16.mxu0 %vm9187_vm2, %v14801_v33 }
 0x590   :  { %v6172_v50 = vmax.f32 %v6091_v63, 0.0 }
 0x591   :  { %v5097_v29 = vpop.f32.mrb[92].mxu1  ;;  %v5684_v5 = vpop.f32.mrb[92].mxu0 }
 0x592   :  { %v14097_v42 = vpack.c.bf16 %v6172_v50, %v6171_v28  ;;  %v14100_v21 = vadd.f32 %v5097_v29, %v15166_v61  ;;  %v6004_v55 = vadd.f32 %v5684_v5, %v13722_v49  ;;  %v8732_v59 = vpop.f32.mrb[93].mxu1  ;;  %v8846_v56 = vpop.f32.mrb[93].mxu0  ;;  %v5450_v49 = vld [vmem:[%s14765_s0 + $0x1f7] sm:$0xff] }
 0x593   :  { %v5100_v8 = vpop.f32.mrb[94].mxu1  ;;  %v5687_v27 = vpop.f32.mrb[94].mxu0 }
 0x594   :  { %v6092_v43 = vadd.f32 %v14075_v44, %v6004_v55  ;;  %v14105_v11 = vadd.f32 %v5100_v8, %v15167_v15  ;;  %v6005_v39 = vadd.f32 %v5687_v27, %v13728_v54  ;;  %v8847_v63 = vpop.f32.mrb[95].mxu0  ;;  %v8733_v28 = vpop.f32.mrb[95].mxu1  ;;  %v15168_v55 = vld [vmem:[#allocation31_spill] sm:$0xff]  ;;  %v5502_v27 = vpack.c.bf16 %v5451_v12, %v5450_v49 }
 0x595   :  { %v15169_v28 = vld [vmem:[#allocation15_spill] sm:$0xff] }
 0x596   :  { %v6093_v50 = vadd.f32 %v14075_v44, %v6005_v39  ;;  %8953 = vmatmul.mubr.msk.bf16.gmra.mrb[200].mxu0 %vm272_vm1, %v5501_v45  ;;  %v6173_v14 = vmax.f32 %v6092_v43, 0.0  ;;  %v5453_v49 = vld [vmem:[%s14765_s0 + $0x20f] sm:$0xff] }
 0x597   :  { %8956 = vmatprep.mubr.msk.bf16.mxu0 %vm9187_vm2, %v14801_v33 }
 0x598   :  { %v6174_v29 = vmax.f32 %v6093_v50, 0.0 }
 0x599   :  { %v5105_v54 = vpop.f32.mrb[96].mxu1  ;;  %v5692_v5 = vpop.f32.mrb[96].mxu0 }
 0x59a   :  { %v14118_v61 = vpack.c.bf16 %v6174_v29, %v6173_v14  ;;  %v14121_v59 = vadd.f32 %v5105_v54, %v15168_v55  ;;  %v6006_v56 = vadd.f32 %v5692_v5, %v13752_v46  ;;  %v8736_v45 = vpop.f32.mrb[97].mxu1  ;;  %v8850_v8 = vpop.f32.mrb[97].mxu0  ;;  %v5452_v46 = vld [vmem:[%s14765_s0 + $0x207] sm:$0xff] }
 0x59b   :  { %v5108_v15 = vpop.f32.mrb[98].mxu1  ;;  %v5695_v39 = vpop.f32.mrb[98].mxu0 }
 0x59c   :  { %v6094_v63 = vadd.f32 %v14075_v44, %v6006_v56  ;;  %v14126_v35 = vadd.f32 %v5108_v15, %v15169_v28  ;;  %v6007_v43 = vadd.f32 %v5695_v39, %v13758_v9  ;;  %v8851_v50 = vpop.f32.mrb[99].mxu0  ;;  %v8737_v14 = vpop.f32.mrb[99].mxu1  ;;  %v15170_v56 = vld [vmem:[#allocation40_spill] sm:$0xff]  ;;  %v5503_v39 = vpack.c.bf16 %v5453_v49, %v5452_v46 }
 0x59d   :  { %v15171_v14 = vld [vmem:[#allocation44_spill] sm:$0xff] }
 0x59e   :  { %v6095_v29 = vadd.f32 %v14075_v44, %v6007_v43  ;;  %8957 = vmatmul.mubr.msk.bf16.gmra.mrb[204].mxu0 %vm272_vm1, %v5502_v27  ;;  %v6175_v12 = vmax.f32 %v6094_v63, 0.0  ;;  %v5455_v46 = vld [vmem:[%s14765_s0 + $0x21f] sm:$0xff] }
 0x59f   :  { %8960 = vmatprep.mubr.msk.bf16.mxu0 %vm9187_vm2, %v14801_v33 }
 0x5a0   :  { %v6176_v54 = vmax.f32 %v6095_v29, 0.0 }
 0x5a1   :  { %v5113_v9 = vpop.f32.mrb[100].mxu1  ;;  %v5700_v5 = vpop.f32.mrb[100].mxu0 }
 0x5a2   :  { %v14139_v55 = vpack.c.bf16 %v6176_v54, %v6175_v12  ;;  %v14142_v45 = vadd.f32 %v5113_v9, %v15170_v56  ;;  %v6008_v8 = vadd.f32 %v5700_v5, %v13782_v30  ;;  %v8740_v27 = vpop.f32.mrb[101].mxu1  ;;  %v8854_v15 = vpop.f32.mrb[101].mxu0  ;;  %v5454_v30 = vld [vmem:[%s14765_s0 + $0x217] sm:$0xff] }
 0x5a3   :  { %v5116_v28 = vpop.f32.mrb[102].mxu1  ;;  %v5703_v43 = vpop.f32.mrb[102].mxu0 }
 0x5a4   :  { %v6096_v50 = vadd.f32 %v14075_v44, %v6008_v8  ;;  %v14147_v13 = vadd.f32 %v5116_v28, %v15171_v14  ;;  %v6009_v63 = vadd.f32 %v5703_v43, %v13788_v38  ;;  %v8855_v29 = vpop.f32.mrb[103].mxu0  ;;  %v8741_v12 = vpop.f32.mrb[103].mxu1  ;;  %v15172_v8 = vld [vmem:[#allocation18_spill] sm:$0xff]  ;;  %v5504_v43 = vpack.c.bf16 %v5455_v46, %v5454_v30 }
 0x5a5   :  { %v15173_v12 = vld [vmem:[#allocation45_spill] sm:$0xff]  ;;  %v5457_v30 = vld [vmem:[%s14765_s0 + $0x22f] sm:$0xff] }
 0x5a6   :  { %v6097_v54 = vadd.f32 %v14075_v44, %v6009_v63  ;;  %8961 = vmatmul.mubr.msk.bf16.gmra.mrb[208].mxu0 %vm272_vm1, %v5503_v39  ;;  %v6177_v49 = vmax.f32 %v6096_v50, 0.0 }
 0x5a7   :  { %8964 = vmatprep.mubr.msk.bf16.mxu0 %vm9187_vm2, %v14801_v33 }
 0x5a8   :  { %v6178_v9 = vmax.f32 %v6097_v54, 0.0 }
 0x5a9   :  { %v5121_v38 = vpop.f32.mrb[104].mxu1  ;;  %v5708_v5 = vpop.f32.mrb[104].mxu0 }
 0x5aa   :  { %v14160_v56 = vpack.c.bf16 %v6178_v9, %v6177_v49  ;;  %v14163_v27 = vadd.f32 %v5121_v38, %v15172_v8  ;;  %v6010_v15 = vadd.f32 %v5708_v5, %v13812_v22  ;;  %v8744_v39 = vpop.f32.mrb[105].mxu1  ;;  %v8858_v28 = vpop.f32.mrb[105].mxu0  ;;  %v5456_v22 = vld [vmem:[%s14765_s0 + $0x227] sm:$0xff] }
 0x5ab   :  { %v5124_v14 = vpop.f32.mrb[106].mxu1  ;;  %v5711_v63 = vpop.f32.mrb[106].mxu0 }
 0x5ac   :  { %v6098_v29 = vadd.f32 %v14075_v44, %v6010_v15  ;;  %v14168_v7 = vadd.f32 %v5124_v14, %v15173_v12  ;;  %v6011_v50 = vadd.f32 %v5711_v63, %v13818_v32  ;;  %v8859_v54 = vpop.f32.mrb[107].mxu0  ;;  %v8745_v49 = vpop.f32.mrb[107].mxu1  ;;  %v15174_v15 = vld [vmem:[#allocation46_spill] sm:$0xff]  ;;  %v5505_v63 = vpack.c.bf16 %v5457_v30, %v5456_v22  ;;  %v5459_v22 = vld [vmem:[%s14765_s0 + $0x23f] sm:$0xff] }
 0x5ad   :  { %v15175_v49 = vld [vmem:[#allocation21_spill] sm:$0xff] }
 0x5ae   :  { %v6099_v9 = vadd.f32 %v14075_v44, %v6011_v50  ;;  %8965 = vmatmul.mubr.msk.bf16.gmra.mrb[212].mxu0 %vm272_vm1, %v5504_v43  ;;  %v6179_v46 = vmax.f32 %v6098_v29, 0.0 }
 0x5af   :  { %8968 = vmatprep.mubr.msk.bf16.mxu0 %vm9187_vm2, %v14801_v33 }
 0x5b0   :  { %v6180_v38 = vmax.f32 %v6099_v9, 0.0 }
 0x5b1   :  { %v5129_v32 = vpop.f32.mrb[108].mxu1  ;;  %v5716_v5 = vpop.f32.mrb[108].mxu0 }
 0x5b2   :  { %v14181_v8 = vpack.c.bf16 %v6180_v38, %v6179_v46  ;;  %v14184_v39 = vadd.f32 %v5129_v32, %v15174_v15  ;;  %v6012_v28 = vadd.f32 %v5716_v5, %v13842_v4  ;;  %v8748_v43 = vpop.f32.mrb[109].mxu1  ;;  %v8862_v14 = vpop.f32.mrb[109].mxu0  ;;  %v5458_v4 = vld [vmem:[%s14765_s0 + $0x237] sm:$0xff] }
 0x5b3   :  { %v5132_v12 = vpop.f32.mrb[110].mxu1  ;;  %v5719_v50 = vpop.f32.mrb[110].mxu0 }
 0x5b4   :  { %v6100_v54 = vadd.f32 %v14075_v44, %v6012_v28  ;;  %v14189_v58 = vadd.f32 %v5132_v12, %v15175_v49  ;;  %v6013_v29 = vadd.f32 %v5719_v50, %v13848_v52  ;;  %v8863_v9 = vpop.f32.mrb[111].mxu0  ;;  %v8749_v46 = vpop.f32.mrb[111].mxu1  ;;  %v15177_v28 = vld [vmem:[#allocation47_spill] sm:$0xff]  ;;  %v5506_v50 = vpack.c.bf16 %v5459_v22, %v5458_v4 }
 0x5b5   :  { %v15179_v46 = vld [vmem:[#allocation48_spill] sm:$0xff]  ;;  %v5461_v4 = vld [vmem:[%s14765_s0 + $0x24f] sm:$0xff] }
 0x5b6   :  { %15176 = vst [vmem:[#allocation22_spill] sm:$0xff] %v14189_v58  ;;  %v6101_v38 = vadd.f32 %v14075_v44, %v6013_v29  ;;  %8969 = vmatmul.mubr.msk.bf16.gmra.mrb[216].mxu0 %vm272_vm1, %v5505_v63  ;;  %v6181_v30 = vmax.f32 %v6100_v54, 0.0 }
 0x5b7   :  { %8972 = vmatprep.mubr.msk.bf16.mxu0 %vm9187_vm2, %v14801_v33 }
 0x5b8   :  { %v6182_v32 = vmax.f32 %v6101_v38, 0.0 }
 0x5b9   :  { %v5137_v52 = vpop.f32.mrb[112].mxu1  ;;  %v5724_v5 = vpop.f32.mrb[112].mxu0 }
 0x5ba   :  { %v14202_v15 = vpack.c.bf16 %v6182_v32, %v6181_v30  ;;  %v14205_v43 = vadd.f32 %v5137_v52, %v15177_v28  ;;  %v6014_v14 = vadd.f32 %v5724_v5, %v13872_v18  ;;  %v8752_v63 = vpop.f32.mrb[113].mxu1  ;;  %v8866_v12 = vpop.f32.mrb[113].mxu0  ;;  %v5460_v18 = vld [vmem:[%s14765_s0 + $0x247] sm:$0xff] }
 0x5bb   :  { %v5140_v49 = vpop.f32.mrb[114].mxu1  ;;  %v5727_v29 = vpop.f32.mrb[114].mxu0 }
 0x5bc   :  { %15178 = vst [vmem:[#allocation51_spill] sm:$0xff] %v14205_v43  ;;  %v6102_v9 = vadd.f32 %v14075_v44, %v6014_v14  ;;  %v14210_v58 = vadd.f32 %v5140_v49, %v15179_v46  ;;  %v6015_v54 = vadd.f32 %v5727_v29, %v13878_v36  ;;  %v8867_v38 = vpop.f32.mrb[115].mxu0  ;;  %v8753_v30 = vpop.f32.mrb[115].mxu1  ;;  %v15181_v14 = vld [vmem:[#allocation23_spill] sm:$0xff]  ;;  %v5507_v29 = vpack.c.bf16 %v5461_v4, %v5460_v18  ;;  %v5463_v18 = vld [vmem:[%s14765_s0 + $0x25f] sm:$0xff] }
 0x5bd   :  { %v15183_v30 = vld [vmem:[#allocation49_spill] sm:$0xff] }
 0x5be   :  { %15180 = vst [vmem:[#allocation24_spill] sm:$0xff] %v14210_v58  ;;  %v6103_v32 = vadd.f32 %v14075_v44, %v6015_v54  ;;  %8973 = vmatmul.mubr.msk.bf16.gmra.mrb[220].mxu0 %vm272_vm1, %v5506_v50  ;;  %v6183_v22 = vmax.f32 %v6102_v9, 0.0 }
 0x5bf   :  { %8976 = vmatprep.mubr.msk.bf16.mxu0 %vm9187_vm2, %v14801_v33 }
 0x5c0   :  { %v6184_v52 = vmax.f32 %v6103_v32, 0.0 }
 0x5c1   :  { %v5145_v36 = vpop.f32.mrb[116].mxu1  ;;  %v5732_v5 = vpop.f32.mrb[116].mxu0 }
 0x5c2   :  { %v14223_v28 = vpack.c.bf16 %v6184_v52, %v6183_v22  ;;  %v14226_v63 = vadd.f32 %v5145_v36, %v15181_v14  ;;  %v6016_v12 = vadd.f32 %v5732_v5, %v13902_v41  ;;  %v8756_v50 = vpop.f32.mrb[117].mxu1  ;;  %v8870_v49 = vpop.f32.mrb[117].mxu0  ;;  %v5462_v41 = vld [vmem:[%s14765_s0 + $0x257] sm:$0xff] }
 0x5c3   :  { %v5148_v46 = vpop.f32.mrb[118].mxu1  ;;  %v5735_v54 = vpop.f32.mrb[118].mxu0  ;;  %v5508_v14 = vpack.c.bf16 %v5463_v18, %v5462_v41  ;;  %v15185_v50 = vld [vmem:[#allocation41_spill] sm:$0xff] }
 0x5c4   :  { %15182 = vst [vmem:[#allocation52_spill] sm:$0xff] %v14226_v63  ;;  %v6104_v38 = vadd.f32 %v14075_v44, %v6016_v12  ;;  %v14231_v58 = vadd.f32 %v5148_v46, %v15183_v30  ;;  %v6017_v9 = vadd.f32 %v5735_v54, %v13908_v25  ;;  %v8871_v32 = vpop.f32.mrb[119].mxu0  ;;  %v8757_v22 = vpop.f32.mrb[119].mxu1  ;;  %v9188_v30 = vmov 1983009808  }
 0x5c6   :  { %15184 = vst [vmem:[#allocation26_spill] sm:$0xff] %v14231_v58  ;;  %v6105_v52 = vadd.f32 %v14075_v44, %v6017_v9  ;;  %8977 = vmatmul.mubr.msk.bf16.gmra.mrb[224].mxu0 %vm272_vm1, %v5507_v29  ;;  %v6185_v4 = vmax.f32 %v6104_v38, 0.0  ;;  %v6258_v9 = vunpack.c.l.s4 %v9188_v30  ;;  %v6260_v58 = vlaneseq }
 0x5c7   :  { %8980 = vmatprep.mubr.msk.bf16.mxu0 %vm9187_vm2, %v14801_v33 }
 0x5c8   :  { %v6186_v36 = vmax.f32 %v6105_v52, 0.0  ;;  %v15187_v52 = vld [vmem:[#allocation25_spill] sm:$0xff] }
 0x5c9   :  { %v5153_v25 = vpop.f32.mrb[120].mxu1  ;;  %v5740_v5 = vpop.f32.mrb[120].mxu0 }
 0x5ca   :  { %v14244_v12 = vpack.c.bf16 %v6186_v36, %v6185_v4  ;;  %v14247_v49 = vadd.f32 %v5153_v25, %v15185_v50  ;;  %v6018_v29 = vadd.f32 %v5740_v5, %v13932_v26  ;;  %v8760_v46 = vpop.f32.mrb[121].mxu1  ;;  %v8874_v54 = vpop.f32.mrb[121].mxu0  ;;  %v6259_v36 = vunpack.c.0.s8 %v6258_v9  ;;  %v5464_v5 = vld [vmem:[%s14765_s0 + $0x267] sm:$0xff]  ;;  %v5465_v50 = vld [vmem:[%s14765_s0 + $0x26f] sm:$0xff] }
 0x5cb   :  { %v5156_v32 = vpop.f32.mrb[122].mxu1  ;;  %v5743_v22 = vpop.f32.mrb[122].mxu0  ;;  %v6261_v25 = vshrl.u32 %v6260_v58, 7  ;;  %v15189_v9 = vld [vmem:[#allocation42_spill] sm:$0xff] }
 0x5cc   :  { %15186 = vst [vmem:[#allocation27_spill] sm:$0xff] %v14247_v49  ;;  %v6106_v38 = vadd.f32 %v14075_v44, %v6018_v29  ;;  %v14252_v63 = vadd.f32 %v5156_v32, %v15187_v52  ;;  %v6019_v41 = vadd.f32 %v5743_v22, %v13938_v6  ;;  %v8875_v18 = vpop.f32.mrb[123].mxu0  ;;  %v8761_v4 = vpop.f32.mrb[123].mxu1  ;;  %v14268_v6 = vld [vmem:[%s14768_s3] sm:$0xff] }
 0x5cd   :  { %v14270_v58 = vsub.s32 %v6259_v36, %v6261_v25  ;;  %v5509_v4 = vpack.c.bf16 %v5465_v50, %v5464_v5 }
 0x5ce   :  { %15188 = vst [vmem:[#allocation28_spill] sm:$0xff] %v14252_v63  ;;  %v6107_v26 = vadd.f32 %v14075_v44, %v6019_v41  ;;  %8981 = vmatmul.mubr.msk.bf16.gmra.mrb[228].mxu0 %vm272_vm1, %v5508_v14  ;;  %v6187_v29 = vmax.f32 %v6106_v38, 0.0 }
 0x5cf   :  { %8984 = vmatprep.mubr.msk.bf16.mxu0 %vm9187_vm2, %v14801_v33  ;;  %v14274_v30 = vrot.slane %v14268_v6, %v14270_v58 }
 0x5d0   :  { %v6188_v14 = vmax.f32 %v6107_v26, 0.0  ;;  %v15190_v26 = vld [vmem:[#allocation43_spill] sm:$0xff] }
 0x5d1   :  { %v5161_v46 = vpop.f32.mrb[124].mxu1  ;;  %v5748_v54 = vpop.f32.mrb[124].mxu0  ;;  %v6271_v38 = vcombine.high %v14274_v30, %v14274_v30 }
 0x5d2   :  { %v14277_v32 = vadd.f32 %v5161_v46, %v15189_v9  ;;  %v6020_v22 = vadd.f32 %v5748_v54, %v13962_v31  ;;  %v8764_v52 = vpop.f32.mrb[125].mxu1  ;;  %v8878_v41 = vpop.f32.mrb[125].mxu0  ;;  %v9039_v18 = vpack.c.bf16 %v6188_v14, %v6187_v29  ;;  %v15191_v14 = vld [vmem:[#allocation32_spill] sm:$0xff] }
 0x5d3   :  { %v5164_v63 = vpop.f32.mrb[126].mxu1  ;;  %v5751_v36 = vpop.f32.mrb[126].mxu0  ;;  %6353 = vmatprep.mubr.f32.mxu1 %v6271_v38 }
 0x5d4   :  { %v6108_v25 = vadd.f32 %v14075_v44, %v6020_v22  ;;  %v14284_v49 = vadd.f32 %v5164_v63, %v15190_v26  ;;  %v6021_v43 = vadd.f32 %v5751_v36, %v13968_v60  ;;  %9040 = vmatprep.subr.bf16.mxu1 %v9039_v18  ;;  %v8765_v46 = vpop.f32.mrb[127].mxu1  ;;  %v8879_v9 = vpop.f32.mrb[127].mxu0  ;;  %v5466_v63 = vld [vmem:[%s14765_s0 + $0x277] sm:$0xff]  ;;  %v5467_v60 = vld [vmem:[%s14765_s0 + $0x27f] sm:$0xff] }
 0x5d5   :  { %9042 = vmatpush3.bf16.msra.mxu1 %v14097_v42  ;;  %v5510_v18 = vpack.c.bf16 %v5467_v60, %v5466_v63  ;;  %v15192_v26 = vld [vmem:[#allocation33_spill] sm:$0xff] }
 0x5d6   :  { %v6109_v31 = vadd.f32 %v14075_v44, %v6021_v43  ;;  %8985 = vmatmul.mubr.msk.bf16.gmra.mrb[232].mxu0 %vm272_vm1, %v5509_v4  ;;  %v6189_v5 = vmax.f32 %v6108_v25, 0.0  ;;  %v5468_v63 = vld [vmem:[%s14765_s0 + $0x287] sm:$0xff] }
 0x5d7   :  { %8988 = vmatprep.mubr.msk.bf16.mxu0 %vm9187_vm2, %v14801_v33 }
 0x5d8   :  { %v6190_v50 = vmax.f32 %v6109_v31, 0.0 }
 0x5d9   :  { %v5169_v29 = vpop.f32.mrb[128].mxu1  ;;  %v5756_v42 = vpop.f32.mrb[128].mxu0 }
 0x5da   :  { %v14299_v54 = vadd.f32 %v5169_v29, %v15191_v14  ;;  %v6022_v43 = vadd.f32 %v5756_v42, %v13992_v20  ;;  %v8768_v22 = vpop.f32.mrb[129].mxu1  ;;  %v8882_v52 = vpop.f32.mrb[129].mxu0  ;;  %v9043_v41 = vpack.c.bf16 %v6190_v50, %v6189_v5 }
 0x5db   :  { %v5172_v4 = vpop.f32.mrb[130].mxu1  ;;  %v5759_v36 = vpop.f32.mrb[130].mxu0 }
 0x5dc   :  { %v6110_v38 = vadd.f32 %v14075_v44, %v6022_v43  ;;  %v14304_v46 = vadd.f32 %v5172_v4, %v15192_v26  ;;  %v6023_v25 = vadd.f32 %v5759_v36, %v13998_v23  ;;  %9044 = vmatprep.subr.bf16.mxu1 %v9043_v41  ;;  %v8769_v9 = vpop.f32.mrb[131].mxu1  ;;  %v8883_v31 = vpop.f32.mrb[131].mxu0  ;;  %v5469_v23 = vld [vmem:[%s14765_s0 + $0x28f] sm:$0xff] }
 0x5dd   :  { %9046 = vmatpush3.bf16.msra.mxu1 %v14118_v61  ;;  %v15193_v61 = vld [vmem:[#allocation34_spill] sm:$0xff]  ;;  %v5511_v41 = vpack.c.bf16 %v5469_v23, %v5468_v63  ;;  %v15194_v26 = vld [vmem:[#allocation35_spill] sm:$0xff] }
 0x5de   :  { %v6111_v20 = vadd.f32 %v14075_v44, %v6023_v25  ;;  %8989 = vmatmul.mubr.msk.bf16.gmra.mrb[236].mxu0 %vm272_vm1, %v5510_v18  ;;  %v6191_v60 = vmax.f32 %v6110_v38, 0.0 }
 0x5df   :  { %8992 = vmatprep.mubr.msk.bf16.mxu0 %vm9187_vm2, %v14801_v33 }
 0x5e0   :  { %v6192_v5 = vmax.f32 %v6111_v20, 0.0  ;;  %v5470_v20 = vld [vmem:[%s14765_s0 + $0x297] sm:$0xff] }
 0x5e1   :  { %v5177_v50 = vpop.f32.mrb[132].mxu1  ;;  %v5764_v29 = vpop.f32.mrb[132].mxu0 }
 0x5e2   :  { %v14319_v42 = vadd.f32 %v5177_v50, %v15193_v61  ;;  %v6024_v14 = vadd.f32 %v5764_v29, %v14022_v57  ;;  %v8772_v43 = vpop.f32.mrb[133].mxu1  ;;  %v8886_v22 = vpop.f32.mrb[133].mxu0  ;;  %v9047_v52 = vpack.c.bf16 %v6192_v5, %v6191_v60 }
 0x5e3   :  { %v5180_v18 = vpop.f32.mrb[134].mxu1  ;;  %v5767_v4 = vpop.f32.mrb[134].mxu0 }
 0x5e4   :  { %v6112_v36 = vadd.f32 %v14075_v44, %v6024_v14  ;;  %v14324_v25 = vadd.f32 %v5180_v18, %v15194_v26  ;;  %v6025_v38 = vadd.f32 %v5767_v4, %v14028_v62  ;;  %9048 = vmatprep.subr.bf16.mxu1 %v9047_v52  ;;  %v8773_v9 = vpop.f32.mrb[135].mxu1  ;;  %v8887_v31 = vpop.f32.mrb[135].mxu0  ;;  %v5471_v62 = vld [vmem:[%s14765_s0 + $0x29f] sm:$0xff] }
 0x5e5   :  { %9050 = vmatpush3.bf16.msra.mxu1 %v14139_v55  ;;  %v5512_v43 = vpack.c.bf16 %v5471_v62, %v5470_v20 }
 0x5e6   :  { %v6113_v57 = vadd.f32 %v14075_v44, %v6025_v38  ;;  %8993 = vmatmul.mubr.msk.bf16.gmra.mrb[240].mxu0 %vm272_vm1, %v5511_v41  ;;  %v6193_v63 = vmax.f32 %v6112_v36, 0.0 }
 0x5e7   :  { %8996 = vmatprep.mubr.msk.bf16.mxu0 %vm9187_vm2, %v14801_v33 }
 0x5e8   :  { %v6194_v23 = vmax.f32 %v6113_v57, 0.0 }
 0x5e9   :  { %v5185_v60 = vpop.f32.mrb[136].mxu1  ;;  %v5772_v5 = vpop.f32.mrb[136].mxu0 }
 0x5ea   :  { %v14339_v55 = vadd.f32 %v5185_v60, %v13605_v2  ;;  %v6026_v50 = vadd.f32 %v5772_v5, %v14052_v37  ;;  %v8776_v29 = vpop.f32.mrb[137].mxu1  ;;  %v8890_v61 = vpop.f32.mrb[137].mxu0  ;;  %v9051_v14 = vpack.c.bf16 %v6194_v23, %v6193_v63  ;;  %v5472_v37 = vld [vmem:[%s14765_s0 + $0x2a7] sm:$0xff] }
 0x5eb   :  { %v5188_v22 = vpop.f32.mrb[138].mxu1  ;;  %v5775_v52 = vpop.f32.mrb[138].mxu0  ;;  %v5513_v63 = vpack.c.bf16 %v5472_v37, %v5472_v37  ;;  %v15195_v37 = vld [vmem:[#allocation36_spill] sm:$0xff] }
 0x5ec   :  { %v6114_v41 = vadd.f32 %v14075_v44, %v6026_v50  ;;  %v14344_v18 = vadd.f32 %v5188_v22, %v13611_v10  ;;  %v6027_v4 = vadd.f32 %v5775_v52, %v14055_v34  ;;  %9052 = vmatprep.subr.bf16.mxu1 %v9051_v14  ;;  %v8777_v36 = vpop.f32.mrb[139].mxu1  ;;  %v8891_v26 = vpop.f32.mrb[139].mxu0 }
 0x5ed   :  { %9054 = vmatpush3.bf16.msra.mxu1 %v14160_v56 }
 0x5ee   :  { %v6115_v2 = vadd.f32 %v14075_v44, %v6027_v4  ;;  %8997 = vmatmul.mubr.msk.bf16.gmra.mrb[244].mxu0 %vm272_vm1, %v5512_v43  ;;  %v6195_v10 = vmax.f32 %v6114_v41, 0.0 }
 0x5ef   :  { %9000 = vmatprep.mubr.msk.bf16.mxu0 %vm9187_vm2, %v14801_v33 }
 0x5f0   :  { %v6196_v38 = vmax.f32 %v6115_v2, 0.0 }
 0x5f1   :  { %v5193_v9 = vpop.f32.mrb[140].mxu1  ;;  %v5780_v34 = vpop.f32.mrb[140].mxu0 }
 0x5f2   :  { %v14356_v31 = vadd.f32 %v5193_v9, %v13635_v0  ;;  %v6028_v56 = vadd.f32 %v5780_v34, %v14078_v17  ;;  %v8780_v57 = vpop.f32.mrb[141].mxu1  ;;  %v8894_v20 = vpop.f32.mrb[141].mxu0  ;;  %v9055_v62 = vpack.c.bf16 %v6196_v38, %v6195_v10 }
 0x5f3   :  { %v5196_v23 = vpop.f32.mrb[142].mxu1  ;;  %v5783_v60 = vpop.f32.mrb[142].mxu0 }
 0x5f4   :  { %v6116_v5 = vadd.f32 %v14075_v44, %v6028_v56  ;;  %v14361_v50 = vadd.f32 %v5196_v23, %v13641_v3  ;;  %v6029_v29 = vadd.f32 %v5783_v60, %v14083_v53  ;;  %9056 = vmatprep.subr.bf16.mxu1 %v9055_v62  ;;  %v8781_v61 = vpop.f32.mrb[143].mxu1  ;;  %v8895_v14 = vpop.f32.mrb[143].mxu0 }
 0x5f5   :  { %9058 = vmatpush3.bf16.msra.mxu1 %v14181_v8 }
 0x5f6   :  { %v6117_v0 = vadd.f32 %v14075_v44, %v6029_v29  ;;  %9001 = vmatmul.mubr.msk.bf16.gmra.mrb[248].mxu0 %vm272_vm1, %v5513_v63  ;;  %v6197_v17 = vmax.f32 %v6116_v5, 0.0 }
 0x5f8   :  { %v6198_v43 = vmax.f32 %v6117_v0, 0.0 }
 0x5f9   :  { %v5201_v22 = vpop.f32.mrb[144].mxu1  ;;  %v5788_v52 = vpop.f32.mrb[144].mxu0 }
 0x5fa   :  { %v14368_v41 = vadd.f32 %v5201_v22, %v13665_v40  ;;  %v6030_v3 = vadd.f32 %v5788_v52, %v14100_v21  ;;  %v8784_v4 = vpop.f32.mrb[145].mxu1  ;;  %v8898_v53 = vpop.f32.mrb[145].mxu0  ;;  %v9059_v36 = vpack.c.bf16 %v6198_v43, %v6197_v17 }
 0x5fb   :  { %v5204_v26 = vpop.f32.mrb[146].mxu1  ;;  %v5791_v2 = vpop.f32.mrb[146].mxu0 }
 0x5fc   :  { %v6118_v8 = vadd.f32 %v14075_v44, %v6030_v3  ;;  %v14373_v10 = vadd.f32 %v5204_v26, %v15195_v37  ;;  %v6031_v38 = vadd.f32 %v5791_v2, %v14105_v11  ;;  %9060 = vmatprep.subr.bf16.mxu1 %v9059_v36  ;;  %v8785_v9 = vpop.f32.mrb[147].mxu1  ;;  %v8899_v34 = vpop.f32.mrb[147].mxu0  ;;  %v6256_v3 = vcombine.high %v14268_v6, %v14268_v6 }
 0x5fd   :  { %9062 = vmatpush3.bf16.msra.mxu1 %v14202_v15 }
 0x5fe   :  { %v6119_v40 = vadd.f32 %v14075_v44, %v6031_v38  ;;  %v6199_v21 = vmax.f32 %v6118_v8, 0.0 }
 0x600   :  { %v6200_v56 = vmax.f32 %v6119_v40, 0.0 }
 0x601   :  { %v5209_v57 = vpop.f32.mrb[148].mxu1  ;;  %v5796_v20 = vpop.f32.mrb[148].mxu0 }
 0x602   :  { %v14379_v62 = vadd.f32 %v5209_v57, %v13689_v1  ;;  %v6032_v63 = vadd.f32 %v5796_v20, %v14121_v59  ;;  %v8788_v23 = vpop.f32.mrb[149].mxu1  ;;  %v8902_v60 = vpop.f32.mrb[149].mxu0  ;;  %v9063_v5 = vpack.c.bf16 %v6200_v56, %v6199_v21 }
 0x603   :  { %v5212_v11 = vpop.f32.mrb[150].mxu1  ;;  %v5799_v29 = vpop.f32.mrb[150].mxu0 }
 0x604   :  { %v6120_v61 = vadd.f32 %v14075_v44, %v6032_v63  ;;  %v14384_v15 = vadd.f32 %v5212_v11, %v13695_v48  ;;  %v6033_v14 = vadd.f32 %v5799_v29, %v14126_v35  ;;  %9064 = vmatprep.subr.bf16.mxu1 %v9063_v5  ;;  %v8789_v0 = vpop.f32.mrb[151].mxu1  ;;  %v8903_v17 = vpop.f32.mrb[151].mxu0 }
 0x605   :  { %9066 = vmatpush3.bf16.msra.mxu1 %v14223_v28  ;;  %v14396_v28 = vrot.slane %v6256_v3, %v14270_v58 }
 0x606   :  { %v6121_v1 = vadd.f32 %v14075_v44, %v6033_v14  ;;  %v6201_v59 = vmax.f32 %v6120_v61, 0.0 }
 0x608   :  { %v6202_v43 = vmax.f32 %v6121_v1, 0.0 }
 0x609   :  { %v5217_v22 = vpop.f32.mrb[152].mxu1  ;;  %v5804_v52 = vpop.f32.mrb[152].mxu0 }
 0x60a   :  { %v14392_v4 = vadd.f32 %v5217_v22, %v13719_v51  ;;  %v6034_v48 = vadd.f32 %v5804_v52, %v14142_v45  ;;  %v8792_v35 = vpop.f32.mrb[153].mxu1  ;;  %v8906_v53 = vpop.f32.mrb[153].mxu0  ;;  %v9067_v36 = vpack.c.bf16 %v6202_v43, %v6201_v59  ;;  %v6272_v45 = vcombine.high %v14396_v28, %v14396_v28  ;;  %v15196_v52 = vld [vmem:[#allocation39_spill] sm:$0xff] }
 0x60b   :  { %v5220_v26 = vpop.f32.mrb[154].mxu1  ;;  %v5807_v2 = vpop.f32.mrb[154].mxu0 }
 0x60c   :  { %v6122_v8 = vadd.f32 %v14075_v44, %v6034_v48  ;;  %v14400_v37 = vadd.f32 %v5220_v26, %v13725_v24  ;;  %v6035_v6 = vadd.f32 %v5807_v2, %v14147_v13  ;;  %9068 = vmatprep.subr.bf16.mxu1 %v9067_v36  ;;  %v8793_v51 = vpop.f32.mrb[155].mxu1  ;;  %v8907_v38 = vpop.f32.mrb[155].mxu0  ;;  %v15197_v48 = vld [vmem:[#allocation22_spill] sm:$0xff] }
 0x60d   :  { %9070 = vmatpush3.bf16.msra.mxu1 %v14244_v12  ;;  %v15198_v51 = vld [vmem:[#allocation37_spill] sm:$0xff] }
 0x60e   :  { %v6123_v9 = vadd.f32 %v14075_v44, %v6035_v6  ;;  %v6203_v34 = vmax.f32 %v6122_v8, 0.0 }
 0x610   :  { %v6204_v58 = vmax.f32 %v6123_v9, 0.0  ;;  %6354 = vmatmul.mubr.f32.vlgmr.msra.gmra.mrb[200].mxu1 %v14274_v30 }
 0x611   :  { %v5225_v40 = vpop.f32.mrb[156].mxu1  ;;  %v5812_v21 = vpop.f32.mrb[156].mxu0  ;;  %6423 = vmatprep.mubr.f32.mxu1 %v6272_v45  ;;  %v15199_v45 = vld [vmem:[#allocation51_spill] sm:$0xff] }
 0x612   :  { %v14408_v24 = vpack.c.bf16 %v6204_v58, %v6203_v34  ;;  %v14411_v13 = vadd.f32 %v5225_v40, %v13749_v16  ;;  %v6036_v56 = vadd.f32 %v5812_v21, %v14163_v27  ;;  %v8796_v12 = vpop.f32.mrb[157].mxu1  ;;  %v8910_v57 = vpop.f32.mrb[157].mxu0 }
 0x613   :  { %v5228_v20 = vpop.f32.mrb[158].mxu1  ;;  %v5815_v63 = vpop.f32.mrb[158].mxu0  ;;  %v15200_v12 = vld [vmem:[#allocation38_spill] sm:$0xff] }
 0x614   :  { %v6124_v23 = vadd.f32 %v14075_v44, %v6036_v56  ;;  %v14416_v60 = vadd.f32 %v5228_v20, %v13755_v19  ;;  %v6037_v30 = vadd.f32 %v5815_v63, %v14168_v7  ;;  %v8797_v5 = vpop.f32.mrb[159].mxu1  ;;  %v8911_v11 = vpop.f32.mrb[159].mxu0  ;;  %v15201_v20 = vld [vmem:[#allocation24_spill] sm:$0xff] }
 0x616   :  { %v6125_v29 = vadd.f32 %v14075_v44, %v6037_v30  ;;  %v6205_v61 = vmax.f32 %v6124_v23, 0.0 }
 0x618   :  { %v6206_v16 = vmax.f32 %v6125_v29, 0.0 }
 0x619   :  { %v5233_v14 = vpop.f32.mrb[160].mxu1  ;;  %v5820_v0 = vpop.f32.mrb[160].mxu0 }
 0x61a   :  { %v14420_v27 = vpack.c.bf16 %v6206_v16, %v6205_v61  ;;  %v14423_v17 = vadd.f32 %v5233_v14, %v13779_v47  ;;  %v6038_v1 = vadd.f32 %v5820_v0, %v14184_v39  ;;  %v8800_v59 = vpop.f32.mrb[161].mxu1  ;;  %v8914_v19 = vpop.f32.mrb[161].mxu0  ;;  %v15202_v0 = vld [vmem:[#allocation5_spill] sm:$0xff] }
 0x61b   :  { %v5236_v43 = vpop.f32.mrb[162].mxu1  ;;  %v5823_v22 = vpop.f32.mrb[162].mxu0  ;;  %v15203_v59 = vld [vmem:[#allocation52_spill] sm:$0xff] }
 0x61c   :  { %v6126_v7 = vadd.f32 %v14075_v44, %v6038_v1  ;;  %v14428_v3 = vadd.f32 %v5236_v43, %v15196_v52  ;;  %v6039_v35 = vadd.f32 %v5823_v22, %v15197_v48  ;;  %v8801_v53 = vpop.f32.mrb[163].mxu1  ;;  %v8915_v36 = vpop.f32.mrb[163].mxu0 }
 0x61d   :  { %v15205_v36 = vld [vmem:[#allocation26_spill] sm:$0xff] }
 0x61e   :  { %v6127_v26 = vadd.f32 %v14075_v44, %v6039_v35  ;;  %v6207_v2 = vmax.f32 %v6126_v7, 0.0  ;;  %v15204_v35 = vld [vmem:[#allocation6_spill] sm:$0xff] }
 0x620   :  { %v6208_v47 = vmax.f32 %v6127_v26, 0.0 }
 0x621   :  { %v5241_v8 = vpop.f32.mrb[164].mxu1  ;;  %v5828_v6 = vpop.f32.mrb[164].mxu0 }
 0x622   :  { %v14432_v39 = vpack.c.bf16 %v6208_v47, %v6207_v2  ;;  %v14435_v38 = vadd.f32 %v5241_v8, %v15198_v51  ;;  %v6040_v9 = vadd.f32 %v5828_v6, %v15199_v45  ;;  %v8804_v34 = vpop.f32.mrb[165].mxu1  ;;  %v8918_v58 = vpop.f32.mrb[165].mxu0 }
 0x623   :  { %v5244_v40 = vpop.f32.mrb[166].mxu1  ;;  %v5831_v21 = vpop.f32.mrb[166].mxu0  ;;  %v15206_v58 = vld [vmem:[#allocation7_spill] sm:$0xff] }
 0x624   :  { %v6128_v56 = vadd.f32 %v14075_v44, %v6040_v9  ;;  %v14440_v57 = vadd.f32 %v5244_v40, %v15200_v12  ;;  %v6041_v63 = vadd.f32 %v5831_v21, %v15201_v20  ;;  %v8805_v23 = vpop.f32.mrb[167].mxu1  ;;  %v8919_v30 = vpop.f32.mrb[167].mxu0  ;;  %v15207_v21 = vld [vmem:[#allocation27_spill] sm:$0xff] }
 0x626   :  { %v6129_v5 = vadd.f32 %v14075_v44, %v6041_v63  ;;  %v6209_v11 = vmax.f32 %v6128_v56, 0.0 }
 0x628   :  { %v6210_v29 = vmax.f32 %v6129_v5, 0.0  ;;  %v15208_v5 = vld [vmem:[#allocation8_spill] sm:$0xff] }
 0x629   :  { %v5249_v61 = vpop.f32.mrb[168].mxu1  ;;  %v5836_v16 = vpop.f32.mrb[168].mxu0 }
 0x62a   :  { %v14444_v14 = vpack.c.bf16 %v6210_v29, %v6209_v11  ;;  %v14447_v1 = vadd.f32 %v5249_v61, %v15202_v0  ;;  %v6042_v19 = vadd.f32 %v5836_v16, %v15203_v59  ;;  %v8808_v43 = vpop.f32.mrb[169].mxu1  ;;  %v8922_v22 = vpop.f32.mrb[169].mxu0  ;;  %v15209_v29 = vld [vmem:[#allocation28_spill] sm:$0xff] }
 0x62b   :  { %v5252_v7 = vpop.f32.mrb[170].mxu1  ;;  %v5839_v52 = vpop.f32.mrb[170].mxu0 }
 0x62c   :  { %v6130_v48 = vadd.f32 %v14075_v44, %v6042_v19  ;;  %v14452_v53 = vadd.f32 %v5252_v7, %v15204_v35  ;;  %v6043_v26 = vadd.f32 %v5839_v52, %v15205_v36  ;;  %v8809_v2 = vpop.f32.mrb[171].mxu1  ;;  %v8923_v47 = vpop.f32.mrb[171].mxu0 }
 0x62e   :  { %v6131_v8 = vadd.f32 %v14075_v44, %v6043_v26  ;;  %v6211_v6 = vmax.f32 %v6130_v48, 0.0  ;;  %v15210_v48 = vld [vmem:[#allocation9_spill] sm:$0xff] }
 0x630   :  { %v6212_v51 = vmax.f32 %v6131_v8, 0.0 }
 0x631   :  { %v5257_v45 = vpop.f32.mrb[172].mxu1  ;;  %v5844_v9 = vpop.f32.mrb[172].mxu0 }
 0x632   :  { %v14456_v34 = vpack.c.bf16 %v6212_v51, %v6211_v6  ;;  %v14459_v40 = vadd.f32 %v5257_v45, %v15206_v58  ;;  %v6044_v56 = vadd.f32 %v5844_v9, %v15207_v21  ;;  %v8812_v12 = vpop.f32.mrb[173].mxu1  ;;  %v8926_v20 = vpop.f32.mrb[173].mxu0  ;;  %v15211_v51 = vld [vmem:[#allocation10_spill] sm:$0xff] }
 0x633   :  { %v5260_v63 = vpop.f32.mrb[174].mxu1  ;;  %v5847_v23 = vpop.f32.mrb[174].mxu0 }
 0x634   :  { %v6132_v30 = vadd.f32 %v14075_v44, %v6044_v56  ;;  %v14464_v11 = vadd.f32 %v5260_v63, %v15208_v5  ;;  %v6045_v61 = vadd.f32 %v5847_v23, %v15209_v29  ;;  %v8813_v16 = vpop.f32.mrb[175].mxu1  ;;  %v8927_v0 = vpop.f32.mrb[175].mxu0 }
 0x636   :  { %v6133_v59 = vadd.f32 %v14075_v44, %v6045_v61  ;;  %v6213_v19 = vmax.f32 %v6132_v30, 0.0  ;;  %v15212_v30 = vld [vmem:[#allocation11_spill] sm:$0xff] }
 0x638   :  { %v6214_v43 = vmax.f32 %v6133_v59, 0.0 }
 0x639   :  { %v5265_v22 = vpop.f32.mrb[176].mxu1  ;;  %v5852_v7 = vpop.f32.mrb[176].mxu0 }
 0x63a   :  { %v14468_v52 = vpack.c.bf16 %v6214_v43, %v6213_v19  ;;  %v14471_v35 = vadd.f32 %v5265_v22, %v15210_v48  ;;  %v6046_v36 = vadd.f32 %v5852_v7, %v14277_v32  ;;  %v8816_v26 = vpop.f32.mrb[177].mxu1  ;;  %v8930_v2 = vpop.f32.mrb[177].mxu0  ;;  %v15213_v19 = vld [vmem:[#allocation12_spill] sm:$0xff] }
 0x63b   :  { %v5268_v47 = vpop.f32.mrb[178].mxu1  ;;  %v5855_v8 = vpop.f32.mrb[178].mxu0 }
 0x63c   :  { %v6134_v6 = vadd.f32 %v14075_v44, %v6046_v36  ;;  %v14476_v45 = vadd.f32 %v5268_v47, %v15211_v51  ;;  %v6047_v9 = vadd.f32 %v5855_v8, %v14284_v49  ;;  %v8817_v58 = vpop.f32.mrb[179].mxu1  ;;  %v8931_v21 = vpop.f32.mrb[179].mxu0 }
 0x63e   :  { %v6135_v56 = vadd.f32 %v14075_v44, %v6047_v9  ;;  %v6215_v12 = vmax.f32 %v6134_v6, 0.0  ;;  %v15214_v6 = vld [vmem:[#allocation13_spill] sm:$0xff] }
 0x640   :  { %v6216_v20 = vmax.f32 %v6135_v56, 0.0 }
 0x641   :  { %v5273_v63 = vpop.f32.mrb[180].mxu1  ;;  %v5860_v23 = vpop.f32.mrb[180].mxu0 }
 0x642   :  { %v14480_v32 = vpack.c.bf16 %v6216_v20, %v6215_v12  ;;  %v14483_v5 = vadd.f32 %v5273_v63, %v15212_v30  ;;  %v6048_v29 = vadd.f32 %v5860_v23, %v14299_v54  ;;  %v8820_v61 = vpop.f32.mrb[181].mxu1  ;;  %v8934_v16 = vpop.f32.mrb[181].mxu0  ;;  %v15215_v20 = vld [vmem:[#allocation14_spill] sm:$0xff] }
 0x643   :  { %v5276_v0 = vpop.f32.mrb[182].mxu1  ;;  %v5863_v59 = vpop.f32.mrb[182].mxu0 }
 0x644   :  { %v6136_v49 = vadd.f32 %v14075_v44, %v6048_v29  ;;  %v14488_v43 = vadd.f32 %v5276_v0, %v15213_v19  ;;  %v6049_v22 = vadd.f32 %v5863_v59, %v14304_v46  ;;  %v8821_v7 = vpop.f32.mrb[183].mxu1  ;;  %v8935_v48 = vpop.f32.mrb[183].mxu0  ;;  %v14501_v46 = vld [vmem:[%s14767_s2] ss:$0 sm:$0xff] }
 0x646   :  { %v6137_v36 = vadd.f32 %v14075_v44, %v6049_v22  ;;  %v6217_v26 = vmax.f32 %v6136_v49, 0.0  ;;  %v15216_v49 = vld [vmem:[#allocation16_spill] sm:$0xff] }
 0x648   :  { %v6218_v2 = vmax.f32 %v6137_v36, 0.0 }
 0x649   :  { %v5281_v47 = vpop.f32.mrb[184].mxu1  ;;  %v5868_v8 = vpop.f32.mrb[184].mxu0 }
 0x64a   :  { %v14492_v54 = vpack.c.bf16 %v6218_v2, %v6217_v26  ;;  %v14495_v51 = vadd.f32 %v5281_v47, %v15214_v6  ;;  %v6050_v9 = vadd.f32 %v5868_v8, %v14319_v42  ;;  %v8824_v58 = vpop.f32.mrb[185].mxu1  ;;  %v8938_v21 = vpop.f32.mrb[185].mxu0  ;;  %v15217_v47 = vld [vmem:[#allocation17_spill] sm:$0xff] }
 0x64b   :  { %v5284_v56 = vpop.f32.mrb[186].mxu1  ;;  %v5871_v12 = vpop.f32.mrb[186].mxu0 }
 0x64c   :  { %v6138_v44 = vadd.f32 %v14501_v46, %v6050_v9  ;;  %v14505_v63 = vadd.f32 %v5284_v56, %v15215_v20  ;;  %v6051_v23 = vadd.f32 %v5871_v12, %v14324_v25  ;;  %v8825_v30 = vpop.f32.mrb[187].mxu1  ;;  %v8939_v29 = vpop.f32.mrb[187].mxu0  ;;  %v15218_v20 = vld [vmem:[#allocation19_spill] sm:$0xff] }
 0x64e   :  { %v6139_v42 = vadd.f32 %v14501_v46, %v6051_v23  ;;  %v6219_v61 = vmax.f32 %v6138_v44, 0.0 }
 0x650   :  { %v6220_v16 = vmax.f32 %v6139_v42, 0.0 }
 0x651   :  { %v5289_v0 = vpop.f32.mrb[188].mxu1  ;;  %v5876_v59 = vpop.f32.mrb[188].mxu0 }
 0x652   :  { %v14510_v19 = vadd.f32 %v5289_v0, %v15216_v49  ;;  %v6052_v22 = vadd.f32 %v5876_v59, %v14339_v55  ;;  %v8828_v7 = vpop.f32.mrb[189].mxu1  ;;  %v8942_v48 = vpop.f32.mrb[189].mxu0  ;;  %v9071_v36 = vpack.c.bf16 %v6220_v16, %v6219_v61  ;;  %v14532_v0 = vld [vmem:[%s14769_s4 + $0x8] sm:$0xff]  ;;  %v15219_v49 = vld [vmem:[#allocation20_spill] sm:$0xff] }
 0x653   :  { %v5292_v26 = vpop.f32.mrb[190].mxu1  ;;  %v5879_v2 = vpop.f32.mrb[190].mxu0 }
 0x654   :  { %v6140_v25 = vadd.f32 %v14501_v46, %v6052_v22  ;;  %v14515_v8 = vadd.f32 %v5292_v26, %v15217_v47  ;;  %v6053_v6 = vadd.f32 %v5879_v2, %v14344_v18  ;;  %9072 = vmatprep.subr.bf16.mxu1 %v9071_v36  ;;  %v8829_v9 = vpop.f32.mrb[191].mxu1  ;;  %v8943_v58 = vpop.f32.mrb[191].mxu0  ;;  %v14544_v26 = vld [vmem:[%s14769_s4 + $0x10] sm:$0xff] }
 0x655   :  { %9074 = vmatpush3.bf16.msra.mxu1 %v14408_v24  ;;  %v14527_v24 = vld [vmem:[%s14769_s4] sm:$0xff]  ;;  %v15220_v58 = vld [vmem:[#allocation50_spill] sm:$0xff] }
 0x656   :  { %v6141_v21 = vadd.f32 %v14501_v46, %v6053_v6  ;;  %v6221_v55 = vmax.f32 %v6140_v25, 0.0  ;;  %v6515_v2 = vmul.f32 %v14527_v24, %v14527_v24  ;;  %v6516_v25 = vmul.f32 %v14532_v0, %v14532_v0 }
 0x658   :  { %v6222_v56 = vmax.f32 %v6141_v21, 0.0 }
 0x659   :  { %v5297_v12 = vpop.f32.mrb[192].mxu1  ;;  %v5884_v44 = vpop.f32.mrb[192].mxu0 }
 0x65a   :  { %v14521_v23 = vadd.f32 %v5297_v12, %v15218_v20  ;;  %v6054_v30 = vadd.f32 %v5884_v44, %v14356_v31  ;;  %v8832_v29 = vpop.f32.mrb[193].mxu1  ;;  %v8946_v42 = vpop.f32.mrb[193].mxu0  ;;  %v9075_v61 = vpack.c.bf16 %v6222_v56, %v6221_v55  ;;  %v6531_v20 = vadd.f32 %v6516_v25, %v6515_v2 }
 0x65b   :  { %v5300_v18 = vpop.f32.mrb[194].mxu1  ;;  %v5887_v16 = vpop.f32.mrb[194].mxu0  ;;  %v14559_v42 = vld [vmem:[%s14769_s4 + $0x18] sm:$0xff] }
 0x65c   :  { %v6142_v59 = vadd.f32 %v14501_v46, %v6054_v30  ;;  %v14536_v22 = vadd.f32 %v5300_v18, %v15219_v49  ;;  %v6055_v31 = vadd.f32 %v5887_v16, %v14361_v50  ;;  %9076 = vmatprep.subr.bf16.mxu1 %v9075_v61  ;;  %v8833_v7 = vpop.f32.mrb[195].mxu1  ;;  %v8947_v48 = vpop.f32.mrb[195].mxu0  ;;  %v6518_v49 = vmul.f32 %v14559_v42, %v14559_v42 }
 0x65d   :  { %9078 = vmatpush3.bf16.msra.mxu1 %v14420_v27  ;;  %v6517_v27 = vmul.f32 %v14544_v26, %v14544_v26  ;;  %v14570_v7 = vld [vmem:[%s14769_s4 + $0x20] sm:$0xff] }
 0x65e   :  { %v6143_v36 = vadd.f32 %v14501_v46, %v6055_v31  ;;  %v6223_v47 = vmax.f32 %v6142_v59, 0.0 }
 0x65f   :  { %v6532_v31 = vadd.f32 %v6531_v20, %v6517_v27 }
 0x660   :  { %v6224_v50 = vmax.f32 %v6143_v36, 0.0 }
 0x661   :  { %v5305_v6 = vpop.f32.mrb[196].mxu1  ;;  %v5892_v9 = vpop.f32.mrb[196].mxu0 }
 0x662   :  { %v14553_v21 = vadd.f32 %v5305_v6, %v15220_v58  ;;  %v6056_v55 = vadd.f32 %v5892_v9, %v14368_v41  ;;  %v8950_v56 = vpop.f32.mrb[197].mxu0  ;;  %v9079_v12 = vpack.c.bf16 %v6224_v50, %v6223_v47  ;;  %v8836_v44 = vpop.f32.mrb[197].mxu1  ;;  %v6533_v50 = vadd.f32 %v6532_v31, %v6518_v49  ;;  %v14578_v9 = vld [vmem:[%s14769_s4 + $0x28] sm:$0xff] }
 0x663   :  { %v5895_v30 = vpop.f32.mrb[198].mxu0  ;;  %v5308_v29 = vpop.f32.mrb[198].mxu1  ;;  %v6520_v56 = vmul.f32 %v14578_v9, %v14578_v9  ;;  %v14589_v44 = vld [vmem:[%s14769_s4 + $0x30] sm:$0xff] }
 0x664   :  { %v6144_v61 = vadd.f32 %v14501_v46, %v6056_v55  ;;  %v6057_v18 = vadd.f32 %v5895_v30, %v14373_v10  ;;  %9080 = vmatprep.subr.bf16.mxu1 %v9079_v12  ;;  %v8951_v16 = vpop.f32.mrb[199].mxu0  ;;  %v8837_v59 = vpop.f32.mrb[199].mxu1 }
 0x665   :  { %9082 = vmatpush3.bf16.msra.mxu1 %v14432_v39  ;;  %v6519_v39 = vmul.f32 %v14570_v7, %v14570_v7 }
 0x666   :  { %v6145_v41 = vadd.f32 %v14501_v46, %v6057_v18  ;;  %v6225_v48 = vmax.f32 %v6144_v61, 0.0 }
 0x667   :  { %v6534_v12 = vadd.f32 %v6533_v50, %v6519_v39 }
 0x668   :  { %v6226_v36 = vmax.f32 %v6145_v41, 0.0  ;;  %v14597_v41 = vld [vmem:[%s14769_s4 + $0x38] sm:$0xff] }
 0x669   :  { %v5900_v2 = vpop.f32.mrb[200].mxu0  ;;  %v6535_v16 = vadd.f32 %v6534_v12, %v6520_v56 }
 0x66a   :  { %v6058_v10 = vadd.f32 %v5900_v2, %v14379_v62  ;;  %v8954_v25 = vpop.f32.mrb[201].mxu0  ;;  %v9083_v47 = vpack.c.bf16 %v6226_v36, %v6225_v48  ;;  %v6522_v36 = vmul.f32 %v14597_v41, %v14597_v41 }
 0x66b   :  { %v5903_v6 = vpop.f32.mrb[202].mxu0 }
 0x66c   :  { %v6146_v27 = vadd.f32 %v14501_v46, %v6058_v10  ;;  %v6059_v58 = vadd.f32 %v5903_v6, %v14384_v15  ;;  %9084 = vmatprep.subr.bf16.mxu1 %v9083_v47  ;;  %v8955_v55 = vpop.f32.mrb[203].mxu0  ;;  %v14608_v10 = vld [vmem:[%s14769_s4 + $0x40] sm:$0xff] }
 0x66d   :  { %9086 = vmatpush3.bf16.msra.mxu1 %v14444_v14  ;;  %v6521_v14 = vmul.f32 %v14589_v44, %v14589_v44  ;;  %v14616_v55 = vld [vmem:[%s14769_s4 + $0x48] sm:$0xff] }
 0x66e   :  { %v6147_v62 = vadd.f32 %v14501_v46, %v6059_v58  ;;  %v6227_v20 = vmax.f32 %v6146_v27, 0.0 }
 0x66f   :  { %v6536_v2 = vadd.f32 %v6535_v16, %v6521_v14 }
 0x670   :  { %v6228_v30 = vmax.f32 %v6147_v62, 0.0 }
 0x671   :  { %v5908_v29 = vpop.f32.mrb[204].mxu0  ;;  %v6537_v27 = vadd.f32 %v6536_v2, %v6522_v36 }
 0x672   :  { %v6060_v15 = vadd.f32 %v5908_v29, %v14392_v4  ;;  %v8958_v61 = vpop.f32.mrb[205].mxu0  ;;  %v9087_v18 = vpack.c.bf16 %v6228_v30, %v6227_v20  ;;  %v6524_v20 = vmul.f32 %v14616_v55, %v14616_v55  ;;  %v14627_v29 = vld [vmem:[%s14769_s4 + $0x50] sm:$0xff] }
 0x673   :  { %v5911_v59 = vpop.f32.mrb[206].mxu0 }
 0x674   :  { %v6148_v49 = vadd.f32 %v14501_v46, %v6060_v15  ;;  %v6061_v31 = vadd.f32 %v5911_v59, %v14400_v37  ;;  %9088 = vmatprep.subr.bf16.mxu1 %v9087_v18  ;;  %v8959_v48 = vpop.f32.mrb[207].mxu0 }
 0x675   :  { %9090 = vmatpush3.bf16.msra.mxu1 %v14456_v34  ;;  %v6523_v34 = vmul.f32 %v14608_v10, %v14608_v10 }
 0x676   :  { %v6149_v4 = vadd.f32 %v14501_v46, %v6061_v31  ;;  %v6229_v25 = vmax.f32 %v6148_v49, 0.0  ;;  %v14635_v31 = vld [vmem:[%s14769_s4 + $0x58] sm:$0xff] }
 0x677   :  { %v6538_v30 = vadd.f32 %v6537_v27, %v6523_v34  ;;  %v6526_v2 = vmul.f32 %v14635_v31, %v14635_v31 }
 0x678   :  { %v6230_v47 = vmax.f32 %v6149_v4, 0.0 }
 0x679   :  { %v5916_v39 = vpop.f32.mrb[208].mxu0  ;;  %v6539_v59 = vadd.f32 %v6538_v30, %v6524_v20 }
 0x67a   :  { %v6062_v37 = vadd.f32 %v5916_v39, %v14411_v13  ;;  %v8962_v50 = vpop.f32.mrb[209].mxu0  ;;  %v9091_v6 = vpack.c.bf16 %v6230_v47, %v6229_v25  ;;  %v14646_v47 = vld [vmem:[%s14769_s4 + $0x60] sm:$0xff] }
 0x67b   :  { %v5919_v58 = vpop.f32.mrb[210].mxu0  ;;  %v6527_v27 = vmul.f32 %v14646_v47, %v14646_v47 }
 0x67c   :  { %v6150_v62 = vadd.f32 %v14501_v46, %v6062_v37  ;;  %v6063_v56 = vadd.f32 %v5919_v58, %v14416_v60  ;;  %9092 = vmatprep.subr.bf16.mxu1 %v9091_v6  ;;  %v8963_v12 = vpop.f32.mrb[211].mxu0 }
 0x67d   :  { %9094 = vmatpush3.bf16.msra.mxu1 %v14468_v52  ;;  %v6525_v52 = vmul.f32 %v14627_v29, %v14627_v29 }
 0x67e   :  { %v6151_v13 = vadd.f32 %v14501_v46, %v6063_v56  ;;  %v6231_v15 = vmax.f32 %v6150_v62, 0.0  ;;  %v14659_v56 = vld [vmem:[%s14769_s4 + $0x68] sm:$0xff] }
 0x67f   :  { %v6540_v25 = vadd.f32 %v6539_v59, %v6525_v52 }
 0x680   :  { %v6232_v61 = vmax.f32 %v6151_v13, 0.0 }
 0x681   :  { %v5924_v18 = vpop.f32.mrb[212].mxu0  ;;  %v6541_v58 = vadd.f32 %v6540_v25, %v6526_v2 }
 0x682   :  { %v6064_v60 = vadd.f32 %v5924_v18, %v14423_v17  ;;  %v8966_v14 = vpop.f32.mrb[213].mxu0  ;;  %v9095_v16 = vpack.c.bf16 %v6232_v61, %v6231_v15  ;;  %v9189_v15 = vmov 0.0|0.0   ;;  %v6528_v61 = vmul.f32 %v14659_v56, %v14659_v56 }
 0x683   :  { %v5927_v49 = vpop.f32.mrb[214].mxu0  ;;  %v6542_v18 = vadd.f32 %v6541_v58, %v6527_v27 }
 0x684   :  { %v6152_v48 = vadd.f32 %v14501_v46, %v6064_v60  ;;  %v6065_v4 = vadd.f32 %v5927_v49, %v14428_v3  ;;  %9096 = vmatprep.subr.bf16.mxu1 %v9095_v16  ;;  %v8967_v36 = vpop.f32.mrb[215].mxu0 }
 0x685   :  { %9098 = vmatpush3.bf16.msra.mxu1 %v14480_v32  ;;  %v14652_v32 = vld.sshfl [vmem:[%s14768_s3 + $0x8] sm:$0x33 pattern:$0x76325410]  ;;  %v14682_v36 = vld [vmem:[%s14769_s4 + $0x78] sm:$0xff] }
 0x686   :  { %v6153_v17 = vadd.f32 %v14501_v46, %v6065_v4  ;;  %v6233_v39 = vmax.f32 %v6152_v48, 0.0  ;;  %v6280_v20 = vcombine.high %v14652_v32, %v14652_v32  ;;  %v6543_v48 = vadd.f32 %v6542_v18, %v6528_v61 }
 0x687   :  { %v6530_v25 = vmul.f32 %v14682_v36, %v14682_v36 }
 0x688   :  { %v6234_v37 = vmax.f32 %v6153_v17, 0.0 }
 0x689   :  { %v5932_v50 = vpop.f32.mrb[216].mxu0 }
 0x68a   :  { %v6066_v3 = vadd.f32 %v5932_v50, %v14435_v38  ;;  %v8970_v6 = vpop.f32.mrb[217].mxu0  ;;  %v9099_v34 = vpack.c.bf16 %v6234_v37, %v6233_v39 }
 0x68b   :  { %v5935_v62 = vpop.f32.mrb[218].mxu0 }
 0x68c   :  { %v6154_v12 = vadd.f32 %v14501_v46, %v6066_v3  ;;  %v6067_v38 = vadd.f32 %v5935_v62, %v14440_v57  ;;  %9100 = vmatprep.subr.bf16.mxu1 %v9099_v34  ;;  %v8971_v13 = vpop.f32.mrb[219].mxu0  ;;  %v14673_v57 = vld [vmem:[%s14769_s4 + $0x70] sm:$0xff] }
 0x68d   :  { %9102 = vmatpush3.bf16.msra.mxu1 %v14492_v54  ;;  %v6529_v49 = vmul.f32 %v14673_v57, %v14673_v57 }
 0x68e   :  { %v6155_v30 = vadd.f32 %v14501_v46, %v6067_v38  ;;  %9103 = vmatprep.subr.bf16.mxu1 %v9189_v15  ;;  %v6235_v60 = vmax.f32 %v6154_v12, 0.0 }
 0x68f   :  { %v6544_v39 = vadd.f32 %v6543_v48, %v6529_v49 }
 0x690   :  { %v6236_v54 = vmax.f32 %v6155_v30, 0.0  ;;  %6424 = vmatmul.mubr.f32.vlgmr.msra.gmra.mrb[202].mxu1 %v14396_v28 }
 0x691   :  { %v5940_v14 = vpop.f32.mrb[220].mxu0  ;;  %7043 = vmatprep.mubr.msk.f32.mxu1 %vm6286_vm3, %v6280_v20  ;;  %v6545_v58 = vadd.f32 %v6544_v39, %v6530_v25 }
 0x692   :  { %v9104_v16 = vpack.c.bf16 %v6236_v54, %v6235_v60  ;;  %v6068_v52 = vadd.f32 %v5940_v14, %v14447_v1  ;;  %v8974_v59 = vpop.f32.mrb[221].mxu0 }
 0x693   :  { %v5943_v4 = vpop.f32.mrb[222].mxu0  ;;  %v6546_v20 = vrot.slane %v6545_v58, 4 }
 0x694   :  { %v6156_v17 = vadd.f32 %v14501_v46, %v6068_v52  ;;  %v6069_v28 = vadd.f32 %v5943_v4, %v14452_v53  ;;  %9105 = vmatpush1.bf16.msra.mxu1 %v9104_v16  ;;  %v8975_v2 = vpop.f32.mrb[223].mxu0 }
 0x695   :  { %9106 = vmatprep.subr.bf16.mxu1 %v9189_v15  ;;  %v6547_v14 = vadd.f32 %v6546_v20, %v6545_v58 }
 0x696   :  { %v6157_v1 = vadd.f32 %v14501_v46, %v6069_v28  ;;  %v6237_v37 = vmax.f32 %v6156_v17, 0.0 }
 0x697   :  { %v6548_v48 = vrot.slane %v6547_v14, 2 }
 0x698   :  { %v6238_v50 = vmax.f32 %v6157_v1, 0.0 }
 0x699   :  { %v5948_v3 = vpop.f32.mrb[224].mxu0  ;;  %v6549_v25 = vadd.f32 %v6548_v48, %v6547_v14 }
 0x69a   :  { %v9107_v6 = vpack.c.bf16 %v6238_v50, %v6237_v37  ;;  %v6070_v34 = vadd.f32 %v5948_v3, %v14459_v40  ;;  %v8978_v27 = vpop.f32.mrb[225].mxu0 }
 0x69b   :  { %v5951_v62 = vpop.f32.mrb[226].mxu0 }
 0x69c   :  { %v6158_v53 = vadd.f32 %v14501_v46, %v6070_v34  ;;  %v6071_v12 = vadd.f32 %v5951_v62, %v14464_v11  ;;  %9108 = vmatpush1.bf16.msra.mxu1 %v9107_v6  ;;  %v8979_v38 = vpop.f32.mrb[227].mxu0  ;;  %v6550_v6 = vrot.slane %v6549_v25, 1 }
 0x69d   :  { %9109 = vmatprep.subr.bf16.mxu1 %v9189_v15 }
 0x69e   :  { %v6159_v13 = vadd.f32 %v14501_v46, %v6071_v12  ;;  %v6239_v30 = vmax.f32 %v6158_v53, 0.0  ;;  %v6551_v12 = vadd.f32 %v6550_v6, %v6549_v25 }
 0x6a0   :  { %v6240_v61 = vmax.f32 %v6159_v13, 0.0  ;;  %9159 = vrsqrt.f32 %v6551_v12  ;;  %vm6552_vm4 = vcmp.gt.f32.partialorder %v6551_v12, 0.0625 }
 0x6a1   :  { %v5956_v18 = vpop.f32.mrb[228].mxu0 }
 0x6a2   :  { %v9110_v60 = vpack.c.bf16 %v6240_v61, %v6239_v30  ;;  %v6072_v40 = vadd.f32 %v5956_v18, %v14471_v35  ;;  %v8982_v54 = vpop.f32.mrb[229].mxu0 }
 0x6a3   :  { %v5959_v16 = vpop.f32.mrb[230].mxu0 }
 0x6a4   :  { %v6160_v52 = vadd.f32 %v14501_v46, %v6072_v40  ;;  %v6073_v11 = vadd.f32 %v5959_v16, %v14476_v45  ;;  %9111 = vmatpush1.bf16.msra.mxu1 %v9110_v60  ;;  %v8983_v59 = vpop.f32.mrb[231].mxu0 }
 0x6a5   :  { %9112 = vmatprep.subr.bf16.mxu1 %v9189_v15 }
 0x6a6   :  { %v6161_v49 = vadd.f32 %v14501_v46, %v6073_v11  ;;  %v6241_v4 = vmax.f32 %v6160_v52, 0.0 }
 0x6a8   :  { %v6242_v17 = vmax.f32 %v6161_v49, 0.0 }
 0x6a9   :  { %v5964_v28 = vpop.f32.mrb[232].mxu0 }
 0x6aa   :  { %v9113_v2 = vpack.c.bf16 %v6242_v17, %v6241_v4  ;;  %v6074_v35 = vadd.f32 %v5964_v28, %v14483_v5  ;;  %v8986_v1 = vpop.f32.mrb[233].mxu0  ;;  %v9160_v59 = vpop.eup %9159 }
 0x6ab   :  { %v5967_v39 = vpop.f32.mrb[234].mxu0 }
 0x6ac   :  { %v6162_v37 = vadd.f32 %v14501_v46, %v6074_v35  ;;  %v6075_v45 = vadd.f32 %v5967_v39, %v14488_v43  ;;  %9114 = vmatpush1.bf16.msra.mxu1 %v9113_v2  ;;  %v8987_v50 = vpop.f32.mrb[235].mxu0  ;;  %v6554_v35 = vmul.f32 0.25, %v9160_v59 }
 0x6ad   :  { %9115 = vmatprep.subr.bf16.mxu1 %v9189_v15 }
 0x6ae   :  { %v6163_v3 = vadd.f32 %v14501_v46, %v6075_v45  ;;  %v6243_v34 = vmax.f32 %v6162_v37, 0.0  ;;  %v6555_v37 = vsel %vm6552_vm4, %v6554_v35, 1.0 }
 0x6b0   :  { %v6244_v27 = vmax.f32 %v6163_v3, 0.0 }
 0x6b1   :  { %v5972_v58 = vpop.f32.mrb[236].mxu0 }
 0x6b2   :  { %v9116_v62 = vpack.c.bf16 %v6244_v27, %v6243_v34  ;;  %v6076_v5 = vadd.f32 %v5972_v58, %v14495_v51  ;;  %v8990_v53 = vpop.f32.mrb[237].mxu0  ;;  %v6556_v27 = vmul.f32 %v6555_v37, %v14527_v24  ;;  %v6557_v58 = vmul.f32 %v6555_v37, %v14532_v0 }
 0x6b3   :  { %v5975_v38 = vpop.f32.mrb[238].mxu0  ;;  %v6560_v0 = vmul.f32 %v6555_v37, %v14570_v7  ;;  %v6565_v7 = vmul.f32 %v6555_v37, %v14616_v55  ;;  %v6569_v55 = vmul.f32 %v6555_v37, %v14659_v56 }
 0x6b4   :  { %v6164_v13 = vadd.f32 %v14501_v46, %v6076_v5  ;;  %v6077_v43 = vadd.f32 %v5975_v38, %v14505_v63  ;;  %9117 = vmatpush1.bf16.msra.mxu1 %v9116_v62  ;;  %v8991_v20 = vpop.f32.mrb[239].mxu0  ;;  %v9128_v12 = vpack.c.bf16 %v6557_v58, %v6556_v27  ;;  %v6558_v38 = vmul.f32 %v6555_v37, %v14544_v26 }
 0x6b5   :  { %9118 = vmatprep.subr.bf16.mxu1 %v9189_v15  ;;  %v6567_v20 = vmul.f32 %v6555_v37, %v14635_v31  ;;  %v6571_v31 = vmul.f32 %v6555_v37, %v14682_v36 }
 0x6b6   :  { %v6165_v30 = vadd.f32 %v14501_v46, %v6077_v43  ;;  %v6245_v61 = vmax.f32 %v6164_v13, 0.0  ;;  %v6559_v13 = vmul.f32 %v6555_v37, %v14559_v42  ;;  %v6563_v42 = vmul.f32 %v6555_v37, %v14597_v41 }
 0x6b7   :  { %v6564_v43 = vmul.f32 %v6555_v37, %v14608_v10  ;;  %v6568_v10 = vmul.f32 %v6555_v37, %v14646_v47 }
 0x6b8   :  { %v6246_v18 = vmax.f32 %v6165_v30, 0.0  ;;  %v9131_v24 = vpack.c.bf16 %v6559_v13, %v6558_v38 }
 0x6b9   :  { %v5980_v60 = vpop.f32.mrb[240].mxu0 }
 0x6ba   :  { %v9119_v40 = vpack.c.bf16 %v6246_v18, %v6245_v61  ;;  %v6078_v51 = vadd.f32 %v5980_v60, %v14510_v19  ;;  %v8994_v54 = vpop.f32.mrb[241].mxu0  ;;  %v9146_v18 = vpack.c.bf16 %v6569_v55, %v6568_v10 }
 0x6bb   :  { %v5983_v14 = vpop.f32.mrb[242].mxu0 }
 0x6bc   :  { %v6166_v16 = vadd.f32 %v14501_v46, %v6078_v51  ;;  %v6079_v52 = vadd.f32 %v5983_v14, %v14515_v8  ;;  %9120 = vmatpush1.bf16.msra.mxu1 %v9119_v40  ;;  %v8995_v63 = vpop.f32.mrb[243].mxu0 }
 0x6bd   :  { %9121 = vmatprep.subr.bf16.mxu1 %v9189_v15 }
 0x6be   :  { %v6167_v11 = vadd.f32 %v14501_v46, %v6079_v52  ;;  %v6247_v49 = vmax.f32 %v6166_v16, 0.0  ;;  %v7044_v52 = vld [vmem:[%s14770_s5] ss:$0 sm:$0xff] }
 0x6c0   :  { %v6248_v48 = vmax.f32 %v6167_v11, 0.0 }
 0x6c1   :  { %v5988_v4 = vpop.f32.mrb[244].mxu0 }
 0x6c2   :  { %v9122_v17 = vpack.c.bf16 %v6248_v48, %v6247_v49  ;;  %v6080_v28 = vadd.f32 %v5988_v4, %v14521_v23  ;;  %v8998_v19 = vpop.f32.mrb[245].mxu0 }
 0x6c3   :  { %v5991_v2 = vpop.f32.mrb[246].mxu0 }
 0x6c4   :  { %v6168_v1 = vadd.f32 %v14501_v46, %v6080_v28  ;;  %v6081_v8 = vadd.f32 %v5991_v2, %v14536_v22  ;;  %9123 = vmatpush1.bf16.msra.mxu1 %v9122_v17  ;;  %v8999_v25 = vpop.f32.mrb[247].mxu0 }
 0x6c5   :  { %9124 = vmatprep.subr.bf16.mxu1 %v9189_v15 }
 0x6c6   :  { %v6169_v39 = vadd.f32 %v14501_v46, %v6081_v8  ;;  %v6249_v45 = vmax.f32 %v6168_v1, 0.0 }
 0x6c8   :  { %v6250_v50 = vmax.f32 %v6169_v39, 0.0 }
 0x6c9   :  { %v5996_v3 = vpop.f32.mrb[248].mxu0 }
 0x6ca   :  { %v9125_v6 = vpack.c.bf16 %v6250_v50, %v6249_v45  ;;  %v6082_v23 = vadd.f32 %v5996_v3, %v14553_v21  ;;  %v9002_v34 = vpop.f32.mrb[249].mxu0  ;;  %v6562_v21 = vmul.f32 %v6555_v37, %v14589_v44 }
 0x6cb   :  { %v5999_v22 = vpop.f32.mrb[250].mxu0 }
 0x6cc   :  { %v6170_v62 = vadd.f32 %v14501_v46, %v6082_v23  ;;  %9126 = vmatpush1.bf16.msra.mxu1 %v9125_v6  ;;  %v9003_v5 = vpop.f32.mrb[251].mxu0  ;;  %v6561_v46 = vmul.f32 %v6555_v37, %v14578_v9  ;;  %v6566_v9 = vmul.f32 %v6555_v37, %v14627_v29  ;;  %v6570_v29 = vmul.f32 %v6555_v37, %v14673_v57 }
 0x6cd   :  { %6461 = vmatprep.subr.mxu1 %v14801_v33 }
 0x6ce   :  { %v6251_v53 = vmax.f32 %v6170_v62, 0.0  ;;  %v9134_v26 = vpack.c.bf16 %v6561_v46, %v6560_v0  ;;  %v9143_v44 = vpack.c.bf16 %v6567_v20, %v6566_v9  ;;  %v9149_v60 = vpack.c.bf16 %v6571_v31, %v6570_v29 }
 0x6d0   :  { %6462 = vmatpush1.msra.mxu1 %v6251_v53 }
 0x6d1   :  { %6494 = vmatmul.mubr.f32.vlgmr.msra.gmra.mrb[204].mxu1 %v14652_v32  ;;  %9127 = vmatprep.subr.bf16.mxu1 %v9189_v15  ;;  %v9137_v32 = vpack.c.bf16 %v6563_v42, %v6562_v21 }
 0x6d2   :  { %9129 = vmatpush3.bf16.msra.mxu1 %v9128_v12  ;;  %9036 = vmatprep.mubr.msk.f32.mxu1 %vm9187_vm2, %v14801_v33  ;;  %v9140_v33 = vpack.c.bf16 %v6565_v7, %v6564_v43 }
 0x6d3   :  { %9130 = vmatprep.subr.bf16.mxu1 %v9189_v15 }
 0x6d6   :  { %9132 = vmatpush3.bf16.msra.mxu1 %v9131_v24 }
 0x6d7   :  { %9133 = vmatprep.subr.bf16.mxu1 %v9189_v15 }
 0x6da   :  { %9135 = vmatpush3.bf16.msra.mxu1 %v9134_v26 }
 0x6db   :  { %9136 = vmatprep.subr.bf16.mxu1 %v9189_v15 }
 0x6de   :  { %9138 = vmatpush3.bf16.msra.mxu1 %v9137_v32 }
 0x6df   :  { %9139 = vmatprep.subr.bf16.mxu1 %v9189_v15 }
 0x6e2   :  { %9141 = vmatpush3.bf16.msra.mxu1 %v9140_v33 }
 0x6e3   :  { %9142 = vmatprep.subr.bf16.mxu1 %v9189_v15  ;;  %v7455_v41 = vpop.f32.mrb[200].mxu1 }
 0x6e4   :  { %v7456_v30 = vpop.f32.mrb[201].mxu1 }
 0x6e5   :  { %v7457_v61 = vadd.f32 %v7456_v30, %v7455_v41 }
 0x6e6   :  { %9144 = vmatpush3.bf16.msra.mxu1 %v9143_v44 }
 0x6e7   :  { %9145 = vmatprep.subr.bf16.mxu1 %v9189_v15 }
 0x6ea   :  { %9147 = vmatpush3.bf16.msra.mxu1 %v9146_v18 }
 0x6eb   :  { %9148 = vmatprep.subr.bf16.mxu1 %v9189_v15 }
 0x6ee   :  { %9150 = vmatpush3.bf16.msra.mxu1 %v9149_v60 }
 0x763   :  { %v7490_v40 = vpop.f32.mrb[202].mxu1 }
 0x764   :  { %v7491_v51 = vpop.f32.mrb[203].mxu1 }
 0x765   :  { %v7492_v54 = vadd.f32 %v7491_v51, %v7490_v40 }
 0x767   :  { %v6426_v14 = vadd.f32 %v7492_v54, %v7457_v61 }
 0x7a4   :  { %v6495_v47 = vpop.f32.mrb[204].mxu1 }
 0x7a5   :  { %v6496_v16 = vadd.f32 %v6495_v47, %v6426_v14  ;;  %v6497_v56 = vpop.f32.mrb[205].mxu1 }
 0x7a7   :  { %9037 = vmatmul.mubr.f32.vlgmr.msra.gmra.mrb[206].mxu1 %v6496_v16 }
 0x87a   :  { %v6645_v15 = vpop.f32.mrb[206].mxu1 }
 0x87b   :  { %v6646_v57 = vadd.f32 %v7044_v52, %v6645_v15  ;;  %v9038_v63 = vpop.f32.mrb[207].mxu1 }
 0x87d   :  { %6649 = vst [vmem:[#allocation2] sm:$0x3] %v6646_v57 }
 0x87e   :  { %9173 = shalt.err (!%p9170_p4)
}
 0x87f   :  { %s9174_s17 = scalar_lea.hbm %s14771_s6, 32 }
 0x880   :  { %p9175_p5 = scmp.ne.s32.totalorder %s14771_s6, %s9174_s17  ;;  %p9178_p6 = scmp.lt.u32.totalorder %s9174_s17, %s14771_s6 }
 0x882   :  { %p9180_p7 = pnand %p9178_p6, %p9175_p5 }
 0x884   :  { %9183 = shalt.err (!%p9180_p7)
}
 0x885   :  { %6659 = dma.vmem_to_hbm [thread:$0]  %s6657_s13, 32, %s14771_s6, [#allocation3]  }
 0x886   :  { %9184 = dma.done.wait [#allocation3], 32  }
 0x887   :  { %9185 = vsyncadd [#allocation3], 4294967264 }
 0x888   :  { %6663 = vsyncpa [#allocation3], 1 }

</bundles_post_ra>
